<compile_context>
chip_gen: v7x
topology: tpu7x:2x2x1
jax: 0.10.0
libtpu: 0.0.40
codegen_flags: <defaults>
</compile_context>

<pallas_src>
import jax
import jax.numpy as jnp
from jax import lax
from jax.experimental import pallas as pl
from jax.experimental.pallas import tpu as pltpu

_EPS = 1e-5
_SUB = 8                 # sublane width; left pad of the in-kernel pad scratch
_MIB = 1024 * 1024


# ----------------------------------------------------------------------------
# Tiling helpers
# ----------------------------------------------------------------------------
def _channel_tile(c, target=256):
    """Full channel dim when small, else an MXU/lane-friendly tile."""
    if c <= target:
        return c
    if c % target == 0:
        return target
    if c % 128 == 0:
        return 128
    return c             # single full-width tile (always a legal block)


def _batch_tile(n, how, target_m=512):
    """Images per grid step: fill the MXU M dim without blowing VMEM."""
    hi = max(1, min(n, target_m // max(how, 1)))
    for nb in range(hi, 0, -1):
        if n % nb == 0 and (nb == n or (nb * how) % _SUB == 0):
            return nb
    return n


def _space_to_depth(x, s):
    """(N, H, W, C) -> (N, s*s, H//s, W//s, C); plane p = (dh % s)*s + (dw % s)."""
    n, h, w, c = x.shape
    x = x.reshape(n, h // s, s, w // s, s, c)
    x = jnp.transpose(x, (0, 2, 4, 1, 3, 5))
    return x.reshape(n, s * s, h // s, w // s, c)


# ----------------------------------------------------------------------------
# Fused kernel:  out = relu?( conv(x, w) * scale + bias (+ residual) )
# ----------------------------------------------------------------------------
def _make_conv_kernel(*, taps_map, nb, ho, wo, h, w, pad, tk, inline_pad,
                      use_concat, use_acc, cin_steps, apply_relu, add_residual):
    m = nb * ho * wo
    taps = len(taps_map)

    def kernel(*refs):
        x_ref, w_ref, s_ref, b_ref = refs[:4]
        i = 4
        r_ref = None
        if add_residual:
            r_ref = refs[i]
            i += 1
        o_ref = refs[i]
        i += 1
        pad_ref = None
        if inline_pad:
            pad_ref = refs[i]
            i += 1
        acc_ref = refs[i] if use_acc else None

        k = pl.program_id(2)

        if inline_pad:
            # Zero borders + copy the unpadded block to a sublane-aligned
            # interior (column offset _SUB), so every tap is a plain slice.
            pad_ref[...] = jnp.zeros_like(pad_ref)
            pad_ref[:, pad:pad + h, _SUB:_SUB + w, :] = x_ref[...]

        def window(t):
            p, r, c = taps_map[t]
            if inline_pad:
                return pad_ref[:, r:r + ho, c:c + wo, :]
            return x_ref[:, p:p + 1, r:r + ho, c:c + wo, :]

        part = None
        if use_concat:
            pieces = [window(t).reshape(m, tk) for t in range(taps)]
            cols = pieces[0] if taps == 1 else jnp.concatenate(pieces, axis=-1)
            part = jnp.dot(cols, w_ref[0], preferred_element_type=jnp.float32)
            if use_acc:
                @pl.when(k == 0)
                def _assign():
                    acc_ref[...] = part

                @pl.when(k != 0)
                def _accum():
                    acc_ref[...] += part
        else:
            # Per-tap fallback for small / lane-unaligned channel tiles;
            # accumulate in place to bound live ranges.
            for t in range(taps):
                w_t = w_ref[0, t * tk:(t + 1) * tk, :]
                d = jnp.dot(window(t).reshape(m, tk), w_t,
                            preferred_element_type=jnp.float32)
                if t == 0:
                    @pl.when(k == 0)
                    def _assign():
                        acc_ref[...] = d

                    @pl.when(k != 0)
                    def _accum():
                        acc_ref[...] += d
                else:
                    acc_ref[...] += d

        def epilogue(acc):
            out = acc * s_ref[...] + b_ref[...]
            if add_residual:
                out = out + r_ref[...].astype(jnp.float32)
            if apply_relu:
                out = jnp.maximum(out, 0.0)
            return out.astype(o_ref.dtype)

        if use_acc:
            @pl.when(k == cin_steps - 1)
            def _write():
                o_ref[...] = epilogue(acc_ref[...])
        else:
            o_ref[...] = epilogue(part)

    return kernel


# ----------------------------------------------------------------------------
# Wrapper: conv + folded BN (+ residual) (+ ReLU) via one pallas_call
# ----------------------------------------------------------------------------
def conv_bn_act(x, w_oihw, scale, bias, *, stride=1, residual=None, relu=True,
                out_dtype=jnp.float32):
    """x: (N, H, W, Cin) NHWC.  w_oihw: (Cout, Cin, kh, kw).  Returns NHWC."""
    n, h, w, cin = x.shape
    cout, cin_w, kh, kw = w_oihw.shape
    assert cin_w == cin and kh == kw and kh in (1, 3)
    pad = (kh - 1) // 2
    ho = (h + 2 * pad - kh) // stride + 1
    wo = (w + 2 * pad - kw) // stride + 1
    taps = kh * kw

    tk = _channel_tile(cin)
    tn = _channel_tile(cout)
    cin_steps = cin // tk
    nb = _batch_tile(n, ho * wo)
    m = nb * ho * wo

    use_concat = (taps == 1) or (tk % 128 == 0)
    use_acc = (not use_concat) or (cin_steps > 1)
    inline_pad = (kh == 3 and stride == 1)

    xb = x.astype(jnp.bfloat16)

    # Weights -> (cin_steps, taps*tk, cout), tap-major within each cin step
    # (matches the im2col column order used in the kernel).
    wt = jnp.transpose(w_oihw, (2, 3, 1, 0)).reshape(taps, cin_steps, tk, cout)
    wt = jnp.transpose(wt, (1, 0, 2, 3)).reshape(cin_steps, taps * tk, cout)
    wt = wt.astype(jnp.bfloat16)

    scale2 = scale.reshape(1, cout).astype(jnp.float32)
    bias2 = bias.reshape(1, cout).astype(jnp.float32)

    scratch_shapes = []
    if inline_pad:
        x_in = xb
        x_block = (nb, h, w, tk)
        x_spec = pl.BlockSpec(x_block, lambda j, b, k: (b, 0, 0, k))
        taps_map = [(0, dh, _SUB - pad + dw)
                    for dh in range(kh) for dw in range(kw)]
        pad_shape = (nb, h + 2 * pad, w + 2 * _SUB, tk)
        scratch_shapes.append(pltpu.VMEM(pad_shape, jnp.bfloat16))
    elif kh == 1:
        xs = xb[:, ::stride, ::stride, :][:, :ho, :wo, :] if stride > 1 else xb
        x_in = xs.reshape(n, 1, ho, wo, cin)
        x_block = (nb, 1, ho, wo, tk)
        x_spec = pl.BlockSpec(x_block, lambda j, b, k: (b, 0, 0, 0, k))
        taps_map = [(0, 0, 0)]
        pad_shape = None
    else:
        # stride-2 3x3: wrapper pad + space-to-depth so taps are contiguous.
        s = stride
        rr, rc = (kh - 1) // s + ho, (kw - 1) // s + wo
        hp_t = max(s * rr, h + 2 * pad)
        hp_t += (-hp_t) % s
        wp_t = max(s * rc, w + 2 * pad)
        wp_t += (-wp_t) % s
        xp = jnp.pad(xb, ((0, 0), (pad, hp_t - h - pad),
                          (pad, wp_t - w - pad), (0, 0)))
        x_in = _space_to_depth(xp, s)
        ph, pw = x_in.shape[2], x_in.shape[3]
        x_block = (nb, s * s, ph, pw, tk)
        x_spec = pl.BlockSpec(x_block, lambda j, b, k: (b, 0, 0, 0, k))
        taps_map = [((dh % s) * s + (dw % s), dh // s, dw // s)
                    for dh in range(kh) for dw in range(kw)]
        pad_shape = None

    if use_acc:
        scratch_shapes.append(pltpu.VMEM((m, tn), jnp.float32))

    args = [x_in, wt, scale2, bias2]
    in_specs = [
        x_spec,
        pl.BlockSpec((1, taps * tk, tn), lambda j, b, k: (k, 0, j)),
        pl.BlockSpec((1, tn), lambda j, b, k: (0, j)),
        pl.BlockSpec((1, tn), lambda j, b, k: (0, j)),
    ]
    if residual is not None:
        args.append(residual.reshape(n * ho * wo, cout).astype(jnp.bfloat16))
        in_specs.append(pl.BlockSpec((m, tn), lambda j, b, k: (b, j)))

    kernel = _make_conv_kernel(
        taps_map=taps_map, nb=nb, ho=ho, wo=wo, h=h, w=w, pad=pad, tk=tk,
        inline_pad=inline_pad, use_concat=use_concat, use_acc=use_acc,
        cin_steps=cin_steps, apply_relu=relu,
        add_residual=residual is not None)

    # Explicit VMEM budget (double-buffered blocks + scratch), generous floor.
    itemsize_out = jnp.dtype(out_dtype).itemsize

    def _nb_bytes(shape, isz):
        t = isz
        for d in shape:
            t *= d
        return t

    need = (2 * _nb_bytes(x_block, 2) + 2 * _nb_bytes((taps * tk, tn), 2)
            + 4 * _nb_bytes((1, tn), 4) + 2 * _nb_bytes((m, tn), itemsize_out))
    if residual is not None:
        need += 2 * _nb_bytes((m, tn), 2)
    if inline_pad:
        need += _nb_bytes(pad_shape, 2)
    if use_acc:
        need += _nb_bytes((m, tn), 4)
    vmem_limit = int(min(max(2 * need, 16 * _MIB), 64 * _MIB))

    j_steps, b_steps = cout // tn, n // nb
    flops = int(2 * n * ho * wo * cout * cin * taps)
    bytes_accessed = int(
        x_in.size * 2 * j_steps
        + wt.size * 2 * (b_steps if cin_steps > 1 else 1)
        + (scale2.size + bias2.size) * 4
        + (0 if residual is None else n * ho * wo * cout * 2)
        + n * ho * wo * cout * itemsize_out)

    out = pl.pallas_call(
        kernel,
        grid=(cout // tn, n // nb, cin_steps),          # reduction axis last
        in_specs=in_specs,
        out_specs=pl.BlockSpec((m, tn), lambda j, b, k: (b, j)),
        out_shape=jax.ShapeDtypeStruct((n * ho * wo, cout), out_dtype),
        scratch_shapes=scratch_shapes,
        compiler_params=pltpu.CompilerParams(
            dimension_semantics=("parallel", "parallel", "arbitrary"),
            vmem_limit_bytes=vmem_limit),
        cost_estimate=pl.CostEstimate(flops=flops, transcendentals=0,
                                      bytes_accessed=bytes_accessed),
    )(*args)
    return out.reshape(n, ho, wo, cout)


# ----------------------------------------------------------------------------
# Parameters / BN folding (plain JAX glue)
# ----------------------------------------------------------------------------
def fold_bn(bn):
    scale = bn["gamma"] / jnp.sqrt(bn["var"] + _EPS)
    bias = bn["beta"] - bn["mean"] * scale
    return scale, bias


def init_basic_block_params(key, in_planes, planes, stride):
    keys = iter(jax.random.split(key, 24))

    def conv_w(cout, cin, k):
        s = (2.0 / (cin * k * k)) ** 0.5            # He init
        return s * jax.random.normal(next(keys), (cout, cin, k, k), jnp.float32)

    def bn_p(c):
        return dict(
            gamma=1.0 + 0.1 * jax.random.normal(next(keys), (c,), jnp.float32),
            beta=0.1 * jax.random.normal(next(keys), (c,), jnp.float32),
            mean=0.1 * jax.random.normal(next(keys), (c,), jnp.float32),
            var=jax.random.uniform(next(keys), (c,), jnp.float32, 0.5, 1.5),
        )

    p = dict(w1=conv_w(planes, in_planes, 3), bn1=bn_p(planes),
             w2=conv_w(planes, planes, 3), bn2=bn_p(planes))
    if stride != 1 or in_planes != planes:           # expansion == 1
        p["ws"] = conv_w(planes, in_planes, 1)
        p["bns"] = bn_p(planes)
    return p


# ----------------------------------------------------------------------------
# BasicBlock forward (all conv/BN/residual/ReLU hot paths in Pallas kernels)
# ----------------------------------------------------------------------------
def basic_block_forward(x_nchw, p, stride):
    x = jnp.transpose(x_nchw, (0, 2, 3, 1)).astype(jnp.float32)      # NHWC
    n, h, w, cin = x.shape
    planes = p["w1"].shape[0]

    # conv1 (3x3, stride, pad=1) + bn1 + relu  -> bf16 activation
    s1, b1 = fold_bn(p["bn1"])
    a1 = conv_bn_act(x, p["w1"], s1, b1, stride=stride, relu=True,
                     out_dtype=jnp.bfloat16)

    # shortcut: 1x1 conv (stride) + bn, or identity
    if "ws" in p:
        ss, bs = fold_bn(p["bns"])
        res = conv_bn_act(x, p["ws"], ss, bs, stride=stride, relu=False,
                          out_dtype=jnp.bfloat16)
    else:
        assert stride == 1 and cin == planes, "identity shortcut shape mismatch"
        res = x.astype(jnp.bfloat16)

    # conv2 (3x3, stride=1, pad=1) + bn2 + residual add + relu
    s2, b2 = fold_bn(p["bn2"])
    out = conv_bn_act(a1, p["w2"], s2, b2, stride=1, residual=res, relu=True,
                      out_dtype=jnp.float32)
    return jnp.transpose(out, (0, 3, 1, 2))                          # NCHW


# ----------------------------------------------------------------------------
# Numerics-matched pure-JAX reference (bf16 operands / activations, f32 accum)
# ----------------------------------------------------------------------------
def reference_forward(x, p, stride):
    bf = lambda a: a.astype(jnp.bfloat16)

    def conv(t, w, s, padd):
        return lax.conv_general_dilated(
            bf(t), bf(w), window_strides=(s, s),
            padding=[(padd, padd), (padd, padd)],
            dimension_numbers=("NCHW", "OIHW", "NCHW"),
            preferred_element_type=jnp.float32)

    def bn(t, b):
        sc = b["gamma"] / jnp.sqrt(b["var"] + _EPS)
        bi = b["beta"] - b["mean"] * sc
        return t * sc[None, :, None, None] + bi[None, :, None, None]

    a1 = jax.nn.relu(bn(conv(x, p["w1"], stride, 1), p["bn1"]))
    a1 = bf(a1).astype(jnp.float32)                  # bf16 inter-layer act
    out = bn(conv(a1, p["w2"], 1, 1), p["bn2"])
    if "ws" in p:
        sc = bf(bn(conv(x, p["ws"], stride, 0), p["bns"])).astype(jnp.float32)
    else:
        sc = bf(x).astype(jnp.float32)
    return jax.nn.relu(out + sc)


if __name__ == "__main__":
    root = jax.random.PRNGKey(0)
    kxa, kxb, kxd, kpa, kpb, kpc, kpd = jax.random.split(root, 7)

    # bf16 activation storage => allow a one-ulp-ish absolute tolerance.
    TOL = 5e-2

    def check(name, x, p, stride, planes, hw_out):
        n = x.shape[0]
        out = jax.block_until_ready(basic_block_forward(x, p, stride))
        ref = jax.block_until_ready(reference_forward(x, p, stride))
        assert out.shape == ref.shape == (n, planes, hw_out, hw_out), (name, out.shape)
        err = float(jnp.max(jnp.abs(out - ref)))
        assert err < TOL, (name, err)

    n, hw = 2, 16

    # A: projection shortcut (cin != planes), stride 1, tiny channels
    x_a = jax.random.normal(kxa, (n, 4, hw, hw), jnp.float32)
    p_a = init_basic_block_params(kpa, 4, 8, stride=1)
    check("A", x_a, p_a, 1, 8, hw)

    # B: identity shortcut, stride 1
    x_b = jax.random.normal(kxb, (n, 8, hw, hw), jnp.float32)
    p_b = init_basic_block_params(kpb, 8, 8, stride=1)
    check("B", x_b, p_b, 1, 8, hw)

    # C: stride-2 downsampling block (fully compiled space-to-depth tap path)
    p_c = init_basic_block_params(kpc, 4, 8, stride=2)
    check("C", x_a, p_c, 2, 8, hw // 2)

    # D: ResNet-width block (256 -> 512, stride 2): 128-aligned channel tiles,
    #    im2col single-dot path, multi-step Cin reduction + VMEM accumulator,
    #    and Cout tiling across the parallel grid axis.
    x_d = jax.random.normal(kxd, (n, 256, hw, hw), jnp.float32)
    p_d = init_basic_block_params(kpd, 256, 512, stride=2)
    check("D", x_d, p_d, 2, 512, hw // 2)

    print("KERNEL_OK")
</pallas_src>

<mosaic_0001>
module attributes {stable_mosaic.version = 11 : i64} {
  func.func @kernel(%arg0: i32, %arg1: i32, %arg2: i32, %arg3: memref<2x16x16x4xbf16, #tpu.memory_space<vmem>>, %arg4: memref<1x36x8xbf16, #tpu.memory_space<vmem>>, %arg5: memref<1x8xf32, #tpu.memory_space<vmem>>, %arg6: memref<1x8xf32, #tpu.memory_space<vmem>>, %arg7: memref<512x8xbf16, #tpu.memory_space<vmem>>, %arg8: memref<2x18x32x4xbf16, #tpu.memory_space<vmem>>, %arg9: memref<512x8xf32, #tpu.memory_space<vmem>>) attributes {dimension_semantics = [#tpu.dimension_semantics<parallel>, #tpu.dimension_semantics<parallel>, #tpu.dimension_semantics<arbitrary>], iteration_bounds = array<i64: 1, 1, 1>, scalar_prefetch = 0 : i64, scratch_operands = 2 : i64, tpu.core_type = #tpu.core_type<tc>, window_params = [{transform_indices = @transform_0, window_bounds = array<i64: 2, 16, 16, 4>}, {transform_indices = @transform_1, window_bounds = array<i64: 1, 36, 8>}, {transform_indices = @transform_2, window_bounds = array<i64: 1, 8>}, {transform_indices = @transform_3, window_bounds = array<i64: 1, 8>}, {transform_indices = @transform_4, window_bounds = array<i64: 512, 8>}]} {
    %cst = arith.constant 0.000000e+00 : bf16
    %0 = vector.broadcast %cst : bf16 to vector<2x18x32x4xbf16>
    %c0 = arith.constant 0 : index
    %c0_0 = arith.constant 0 : index
    %c0_1 = arith.constant 0 : index
    %c0_2 = arith.constant 0 : index
    %1 = vector.load %arg8[%c0, %c0_0, %c0_1, %c0_2] : memref<2x18x32x4xbf16, #tpu.memory_space<vmem>>, vector<2x18x32x4xbf16>
    tpu.vector_store %arg8[%c0, %c0_0, %c0_1, %c0_2], %0 {strides = array<i32>} : memref<2x18x32x4xbf16, #tpu.memory_space<vmem>>, vector<2x18x32x4xbf16>,
    %c0_3 = arith.constant 0 : index
    %c0_4 = arith.constant 0 : index
    %c0_5 = arith.constant 0 : index
    %c0_6 = arith.constant 0 : index
    %2 = vector.load %arg3[%c0_3, %c0_4, %c0_5, %c0_6] : memref<2x16x16x4xbf16, #tpu.memory_space<vmem>>, vector<2x16x16x4xbf16>
    %c0_7 = arith.constant 0 : index
    %c1 = arith.constant 1 : index
    %c8 = arith.constant 8 : index
    %c0_8 = arith.constant 0 : index
    %3 = vector.load %arg8[%c0_7, %c1, %c8, %c0_8] : memref<2x18x32x4xbf16, #tpu.memory_space<vmem>>, vector<2x16x16x4xbf16>
    tpu.vector_store %arg8[%c0_7, %c1, %c8, %c0_8], %2 {strides = array<i32>} : memref<2x18x32x4xbf16, #tpu.memory_space<vmem>>, vector<2x16x16x4xbf16>,
    %c0_9 = arith.constant 0 : index
    %c0_10 = arith.constant 0 : index
    %c0_11 = arith.constant 0 : index
    %4 = vector.load %arg4[%c0_9, %c0_10, %c0_11] : memref<1x36x8xbf16, #tpu.memory_space<vmem>>, vector<1x4x8xbf16>
    %5 = vector.shape_cast %4 : vector<1x4x8xbf16> to vector<4x8xbf16>
    %c0_12 = arith.constant 0 : index
    %c0_13 = arith.constant 0 : index
    %c7 = arith.constant 7 : index
    %c0_14 = arith.constant 0 : index
    %6 = vector.load %arg8[%c0_12, %c0_13, %c7, %c0_14] : memref<2x18x32x4xbf16, #tpu.memory_space<vmem>>, vector<2x16x16x4xbf16>
    %7 = vector.shape_cast %6 : vector<2x16x16x4xbf16> to vector<512x4xbf16>
    %cst_15 = arith.constant dense<0.000000e+00> : vector<512x8xf32>
    %8 = tpu.matmul %7, %5, %cst_15 {dimension_numbers = #tpu.dot_dimension_numbers<[1], [0], [0], [1], [0, 0, 1, 1], [], []>} : vector<512x4xbf16>, vector<4x8xbf16>, vector<512x8xf32> -> vector<512x8xf32>
    %c0_i32 = arith.constant 0 : i32
    %9 = arith.cmpi eq, %arg2, %c0_i32 : i32
    %10 = arith.extui %9 : i1 to i32
    %c0_i32_16 = arith.constant 0 : i32
    %11 = arith.cmpi ne, %10, %c0_i32_16 : i32
    scf.if %11 {
      %c0_108 = arith.constant 0 : index
      %c0_109 = arith.constant 0 : index
      %82 = vector.load %arg9[%c0_108, %c0_109] : memref<512x8xf32, #tpu.memory_space<vmem>>, vector<512x8xf32>
      tpu.vector_store %arg9[%c0_108, %c0_109], %8 {strides = array<i32>} : memref<512x8xf32, #tpu.memory_space<vmem>>, vector<512x8xf32>,
    } else {
    }
    %c0_i32_17 = arith.constant 0 : i32
    %12 = arith.cmpi ne, %arg2, %c0_i32_17 : i32
    %13 = arith.extui %12 : i1 to i32
    %c0_i32_18 = arith.constant 0 : i32
    %14 = arith.cmpi ne, %13, %c0_i32_18 : i32
    scf.if %14 {
      %c0_108 = arith.constant 0 : index
      %c0_109 = arith.constant 0 : index
      %82 = vector.load %arg9[%c0_108, %c0_109] : memref<512x8xf32, #tpu.memory_space<vmem>>, vector<512x8xf32>
      %83 = arith.addf %82, %8 : vector<512x8xf32>
      %c0_110 = arith.constant 0 : index
      %c0_111 = arith.constant 0 : index
      %84 = vector.load %arg9[%c0_110, %c0_111] : memref<512x8xf32, #tpu.memory_space<vmem>>, vector<512x8xf32>
      tpu.vector_store %arg9[%c0_110, %c0_111], %83 {strides = array<i32>} : memref<512x8xf32, #tpu.memory_space<vmem>>, vector<512x8xf32>,
    } else {
    }
    %c0_19 = arith.constant 0 : index
    %c4 = arith.constant 4 : index
    %c0_20 = arith.constant 0 : index
    %15 = vector.load %arg4[%c0_19, %c4, %c0_20] : memref<1x36x8xbf16, #tpu.memory_space<vmem>>, vector<1x4x8xbf16>
    %16 = vector.shape_cast %15 : vector<1x4x8xbf16> to vector<4x8xbf16>
    %c0_21 = arith.constant 0 : index
    %c0_22 = arith.constant 0 : index
    %c8_23 = arith.constant 8 : index
    %c0_24 = arith.constant 0 : index
    %17 = vector.load %arg8[%c0_21, %c0_22, %c8_23, %c0_24] : memref<2x18x32x4xbf16, #tpu.memory_space<vmem>>, vector<2x16x16x4xbf16>
    %18 = vector.shape_cast %17 : vector<2x16x16x4xbf16> to vector<512x4xbf16>
    %cst_25 = arith.constant dense<0.000000e+00> : vector<512x8xf32>
    %19 = tpu.matmul %18, %16, %cst_25 {dimension_numbers = #tpu.dot_dimension_numbers<[1], [0], [0], [1], [0, 0, 1, 1], [], []>} : vector<512x4xbf16>, vector<4x8xbf16>, vector<512x8xf32> -> vector<512x8xf32>
    %c0_26 = arith.constant 0 : index
    %c0_27 = arith.constant 0 : index
    %20 = vector.load %arg9[%c0_26, %c0_27] : memref<512x8xf32, #tpu.memory_space<vmem>>, vector<512x8xf32>
    %21 = arith.addf %20, %19 : vector<512x8xf32>
    %c0_28 = arith.constant 0 : index
    %c0_29 = arith.constant 0 : index
    %22 = vector.load %arg9[%c0_28, %c0_29] : memref<512x8xf32, #tpu.memory_space<vmem>>, vector<512x8xf32>
    tpu.vector_store %arg9[%c0_28, %c0_29], %21 {strides = array<i32>} : memref<512x8xf32, #tpu.memory_space<vmem>>, vector<512x8xf32>,
    %c0_30 = arith.constant 0 : index
    %c8_31 = arith.constant 8 : index
    %c0_32 = arith.constant 0 : index
    %23 = vector.load %arg4[%c0_30, %c8_31, %c0_32] : memref<1x36x8xbf16, #tpu.memory_space<vmem>>, vector<1x4x8xbf16>
    %24 = vector.shape_cast %23 : vector<1x4x8xbf16> to vector<4x8xbf16>
    %c0_33 = arith.constant 0 : index
    %c0_34 = arith.constant 0 : index
    %c9 = arith.constant 9 : index
    %c0_35 = arith.constant 0 : index
    %25 = vector.load %arg8[%c0_33, %c0_34, %c9, %c0_35] : memref<2x18x32x4xbf16, #tpu.memory_space<vmem>>, vector<2x16x16x4xbf16>
    %26 = vector.shape_cast %25 : vector<2x16x16x4xbf16> to vector<512x4xbf16>
    %cst_36 = arith.constant dense<0.000000e+00> : vector<512x8xf32>
    %27 = tpu.matmul %26, %24, %cst_36 {dimension_numbers = #tpu.dot_dimension_numbers<[1], [0], [0], [1], [0, 0, 1, 1], [], []>} : vector<512x4xbf16>, vector<4x8xbf16>, vector<512x8xf32> -> vector<512x8xf32>
    %c0_37 = arith.constant 0 : index
    %c0_38 = arith.constant 0 : index
    %28 = vector.load %arg9[%c0_37, %c0_38] : memref<512x8xf32, #tpu.memory_space<vmem>>, vector<512x8xf32>
    %29 = arith.addf %28, %27 : vector<512x8xf32>
    %c0_39 = arith.constant 0 : index
    %c0_40 = arith.constant 0 : index
    %30 = vector.load %arg9[%c0_39, %c0_40] : memref<512x8xf32, #tpu.memory_space<vmem>>, vector<512x8xf32>
    tpu.vector_store %arg9[%c0_39, %c0_40], %29 {strides = array<i32>} : memref<512x8xf32, #tpu.memory_space<vmem>>, vector<512x8xf32>,
    %c0_41 = arith.constant 0 : index
    %c12 = arith.constant 12 : index
    %c0_42 = arith.constant 0 : index
    %31 = vector.load %arg4[%c0_41, %c12, %c0_42] : memref<1x36x8xbf16, #tpu.memory_space<vmem>>, vector<1x4x8xbf16>
    %32 = vector.shape_cast %31 : vector<1x4x8xbf16> to vector<4x8xbf16>
    %c0_43 = arith.constant 0 : index
    %c1_44 = arith.constant 1 : index
    %c7_45 = arith.constant 7 : index
    %c0_46 = arith.constant 0 : index
    %33 = vector.load %arg8[%c0_43, %c1_44, %c7_45, %c0_46] : memref<2x18x32x4xbf16, #tpu.memory_space<vmem>>, vector<2x16x16x4xbf16>
    %34 = vector.shape_cast %33 : vector<2x16x16x4xbf16> to vector<512x4xbf16>
    %cst_47 = arith.constant dense<0.000000e+00> : vector<512x8xf32>
    %35 = tpu.matmul %34, %32, %cst_47 {dimension_numbers = #tpu.dot_dimension_numbers<[1], [0], [0], [1], [0, 0, 1, 1], [], []>} : vector<512x4xbf16>, vector<4x8xbf16>, vector<512x8xf32> -> vector<512x8xf32>
    %c0_48 = arith.constant 0 : index
    %c0_49 = arith.constant 0 : index
    %36 = vector.load %arg9[%c0_48, %c0_49] : memref<512x8xf32, #tpu.memory_space<vmem>>, vector<512x8xf32>
    %37 = arith.addf %36, %35 : vector<512x8xf32>
    %c0_50 = arith.constant 0 : index
    %c0_51 = arith.constant 0 : index
    %38 = vector.load %arg9[%c0_50, %c0_51] : memref<512x8xf32, #tpu.memory_space<vmem>>, vector<512x8xf32>
    tpu.vector_store %arg9[%c0_50, %c0_51], %37 {strides = array<i32>} : memref<512x8xf32, #tpu.memory_space<vmem>>, vector<512x8xf32>,
    %c0_52 = arith.constant 0 : index
    %c16 = arith.constant 16 : index
    %c0_53 = arith.constant 0 : index
    %39 = vector.load %arg4[%c0_52, %c16, %c0_53] : memref<1x36x8xbf16, #tpu.memory_space<vmem>>, vector<1x4x8xbf16>
    %40 = vector.shape_cast %39 : vector<1x4x8xbf16> to vector<4x8xbf16>
    %c0_54 = arith.constant 0 : index
    %c1_55 = arith.constant 1 : index
    %c8_56 = arith.constant 8 : index
    %c0_57 = arith.constant 0 : index
    %41 = vector.load %arg8[%c0_54, %c1_55, %c8_56, %c0_57] : memref<2x18x32x4xbf16, #tpu.memory_space<vmem>>, vector<2x16x16x4xbf16>
    %42 = vector.shape_cast %41 : vector<2x16x16x4xbf16> to vector<512x4xbf16>
    %cst_58 = arith.constant dense<0.000000e+00> : vector<512x8xf32>
    %43 = tpu.matmul %42, %40, %cst_58 {dimension_numbers = #tpu.dot_dimension_numbers<[1], [0], [0], [1], [0, 0, 1, 1], [], []>} : vector<512x4xbf16>, vector<4x8xbf16>, vector<512x8xf32> -> vector<512x8xf32>
    %c0_59 = arith.constant 0 : index
    %c0_60 = arith.constant 0 : index
    %44 = vector.load %arg9[%c0_59, %c0_60] : memref<512x8xf32, #tpu.memory_space<vmem>>, vector<512x8xf32>
    %45 = arith.addf %44, %43 : vector<512x8xf32>
    %c0_61 = arith.constant 0 : index
    %c0_62 = arith.constant 0 : index
    %46 = vector.load %arg9[%c0_61, %c0_62] : memref<512x8xf32, #tpu.memory_space<vmem>>, vector<512x8xf32>
    tpu.vector_store %arg9[%c0_61, %c0_62], %45 {strides = array<i32>} : memref<512x8xf32, #tpu.memory_space<vmem>>, vector<512x8xf32>,
    %c0_63 = arith.constant 0 : index
    %c20 = arith.constant 20 : index
    %c0_64 = arith.constant 0 : index
    %47 = vector.load %arg4[%c0_63, %c20, %c0_64] : memref<1x36x8xbf16, #tpu.memory_space<vmem>>, vector<1x4x8xbf16>
    %48 = vector.shape_cast %47 : vector<1x4x8xbf16> to vector<4x8xbf16>
    %c0_65 = arith.constant 0 : index
    %c1_66 = arith.constant 1 : index
    %c9_67 = arith.constant 9 : index
    %c0_68 = arith.constant 0 : index
    %49 = vector.load %arg8[%c0_65, %c1_66, %c9_67, %c0_68] : memref<2x18x32x4xbf16, #tpu.memory_space<vmem>>, vector<2x16x16x4xbf16>
    %50 = vector.shape_cast %49 : vector<2x16x16x4xbf16> to vector<512x4xbf16>
    %cst_69 = arith.constant dense<0.000000e+00> : vector<512x8xf32>
    %51 = tpu.matmul %50, %48, %cst_69 {dimension_numbers = #tpu.dot_dimension_numbers<[1], [0], [0], [1], [0, 0, 1, 1], [], []>} : vector<512x4xbf16>, vector<4x8xbf16>, vector<512x8xf32> -> vector<512x8xf32>
    %c0_70 = arith.constant 0 : index
    %c0_71 = arith.constant 0 : index
    %52 = vector.load %arg9[%c0_70, %c0_71] : memref<512x8xf32, #tpu.memory_space<vmem>>, vector<512x8xf32>
    %53 = arith.addf %52, %51 : vector<512x8xf32>
    %c0_72 = arith.constant 0 : index
    %c0_73 = arith.constant 0 : index
    %54 = vector.load %arg9[%c0_72, %c0_73] : memref<512x8xf32, #tpu.memory_space<vmem>>, vector<512x8xf32>
    tpu.vector_store %arg9[%c0_72, %c0_73], %53 {strides = array<i32>} : memref<512x8xf32, #tpu.memory_space<vmem>>, vector<512x8xf32>,
    %c0_74 = arith.constant 0 : index
    %c24 = arith.constant 24 : index
    %c0_75 = arith.constant 0 : index
    %55 = vector.load %arg4[%c0_74, %c24, %c0_75] : memref<1x36x8xbf16, #tpu.memory_space<vmem>>, vector<1x4x8xbf16>
    %56 = vector.shape_cast %55 : vector<1x4x8xbf16> to vector<4x8xbf16>
    %c0_76 = arith.constant 0 : index
    %c2 = arith.constant 2 : index
    %c7_77 = arith.constant 7 : index
    %c0_78 = arith.constant 0 : index
    %57 = vector.load %arg8[%c0_76, %c2, %c7_77, %c0_78] : memref<2x18x32x4xbf16, #tpu.memory_space<vmem>>, vector<2x16x16x4xbf16>
    %58 = vector.shape_cast %57 : vector<2x16x16x4xbf16> to vector<512x4xbf16>
    %cst_79 = arith.constant dense<0.000000e+00> : vector<512x8xf32>
    %59 = tpu.matmul %58, %56, %cst_79 {dimension_numbers = #tpu.dot_dimension_numbers<[1], [0], [0], [1], [0, 0, 1, 1], [], []>} : vector<512x4xbf16>, vector<4x8xbf16>, vector<512x8xf32> -> vector<512x8xf32>
    %c0_80 = arith.constant 0 : index
    %c0_81 = arith.constant 0 : index
    %60 = vector.load %arg9[%c0_80, %c0_81] : memref<512x8xf32, #tpu.memory_space<vmem>>, vector<512x8xf32>
    %61 = arith.addf %60, %59 : vector<512x8xf32>
    %c0_82 = arith.constant 0 : index
    %c0_83 = arith.constant 0 : index
    %62 = vector.load %arg9[%c0_82, %c0_83] : memref<512x8xf32, #tpu.memory_space<vmem>>, vector<512x8xf32>
    tpu.vector_store %arg9[%c0_82, %c0_83], %61 {strides = array<i32>} : memref<512x8xf32, #tpu.memory_space<vmem>>, vector<512x8xf32>,
    %c0_84 = arith.constant 0 : index
    %c28 = arith.constant 28 : index
    %c0_85 = arith.constant 0 : index
    %63 = vector.load %arg4[%c0_84, %c28, %c0_85] : memref<1x36x8xbf16, #tpu.memory_space<vmem>>, vector<1x4x8xbf16>
    %64 = vector.shape_cast %63 : vector<1x4x8xbf16> to vector<4x8xbf16>
    %c0_86 = arith.constant 0 : index
    %c2_87 = arith.constant 2 : index
    %c8_88 = arith.constant 8 : index
    %c0_89 = arith.constant 0 : index
    %65 = vector.load %arg8[%c0_86, %c2_87, %c8_88, %c0_89] : memref<2x18x32x4xbf16, #tpu.memory_space<vmem>>, vector<2x16x16x4xbf16>
    %66 = vector.shape_cast %65 : vector<2x16x16x4xbf16> to vector<512x4xbf16>
    %cst_90 = arith.constant dense<0.000000e+00> : vector<512x8xf32>
    %67 = tpu.matmul %66, %64, %cst_90 {dimension_numbers = #tpu.dot_dimension_numbers<[1], [0], [0], [1], [0, 0, 1, 1], [], []>} : vector<512x4xbf16>, vector<4x8xbf16>, vector<512x8xf32> -> vector<512x8xf32>
    %c0_91 = arith.constant 0 : index
    %c0_92 = arith.constant 0 : index
    %68 = vector.load %arg9[%c0_91, %c0_92] : memref<512x8xf32, #tpu.memory_space<vmem>>, vector<512x8xf32>
    %69 = arith.addf %68, %67 : vector<512x8xf32>
    %c0_93 = arith.constant 0 : index
    %c0_94 = arith.constant 0 : index
    %70 = vector.load %arg9[%c0_93, %c0_94] : memref<512x8xf32, #tpu.memory_space<vmem>>, vector<512x8xf32>
    tpu.vector_store %arg9[%c0_93, %c0_94], %69 {strides = array<i32>} : memref<512x8xf32, #tpu.memory_space<vmem>>, vector<512x8xf32>,
    %c0_95 = arith.constant 0 : index
    %c32 = arith.constant 32 : index
    %c0_96 = arith.constant 0 : index
    %71 = vector.load %arg4[%c0_95, %c32, %c0_96] : memref<1x36x8xbf16, #tpu.memory_space<vmem>>, vector<1x4x8xbf16>
    %72 = vector.shape_cast %71 : vector<1x4x8xbf16> to vector<4x8xbf16>
    %c0_97 = arith.constant 0 : index
    %c2_98 = arith.constant 2 : index
    %c9_99 = arith.constant 9 : index
    %c0_100 = arith.constant 0 : index
    %73 = vector.load %arg8[%c0_97, %c2_98, %c9_99, %c0_100] : memref<2x18x32x4xbf16, #tpu.memory_space<vmem>>, vector<2x16x16x4xbf16>
    %74 = vector.shape_cast %73 : vector<2x16x16x4xbf16> to vector<512x4xbf16>
    %cst_101 = arith.constant dense<0.000000e+00> : vector<512x8xf32>
    %75 = tpu.matmul %74, %72, %cst_101 {dimension_numbers = #tpu.dot_dimension_numbers<[1], [0], [0], [1], [0, 0, 1, 1], [], []>} : vector<512x4xbf16>, vector<4x8xbf16>, vector<512x8xf32> -> vector<512x8xf32>
    %c0_102 = arith.constant 0 : index
    %c0_103 = arith.constant 0 : index
    %76 = vector.load %arg9[%c0_102, %c0_103] : memref<512x8xf32, #tpu.memory_space<vmem>>, vector<512x8xf32>
    %77 = arith.addf %76, %75 : vector<512x8xf32>
    %c0_104 = arith.constant 0 : index
    %c0_105 = arith.constant 0 : index
    %78 = vector.load %arg9[%c0_104, %c0_105] : memref<512x8xf32, #tpu.memory_space<vmem>>, vector<512x8xf32>
    tpu.vector_store %arg9[%c0_104, %c0_105], %77 {strides = array<i32>} : memref<512x8xf32, #tpu.memory_space<vmem>>, vector<512x8xf32>,
    %c0_i32_106 = arith.constant 0 : i32
    %79 = arith.cmpi eq, %arg2, %c0_i32_106 : i32
    %80 = arith.extui %79 : i1 to i32
    %c0_i32_107 = arith.constant 0 : i32
    %81 = arith.cmpi ne, %80, %c0_i32_107 : i32
    scf.if %81 {
      %c0_108 = arith.constant 0 : index
      %c0_109 = arith.constant 0 : index
      %82 = vector.load %arg9[%c0_108, %c0_109] : memref<512x8xf32, #tpu.memory_space<vmem>>, vector<512x8xf32>
      %c0_110 = arith.constant 0 : index
      %c0_111 = arith.constant 0 : index
      %83 = vector.load %arg5[%c0_110, %c0_111] : memref<1x8xf32, #tpu.memory_space<vmem>>, vector<1x8xf32>
      %84 = vector.broadcast %83 : vector<1x8xf32> to vector<512x8xf32>
      %85 = arith.mulf %82, %84 : vector<512x8xf32>
      %c0_112 = arith.constant 0 : index
      %c0_113 = arith.constant 0 : index
      %86 = vector.load %arg6[%c0_112, %c0_113] : memref<1x8xf32, #tpu.memory_space<vmem>>, vector<1x8xf32>
      %87 = vector.broadcast %86 : vector<1x8xf32> to vector<512x8xf32>
      %88 = arith.addf %85, %87 : vector<512x8xf32>
      %cst_114 = arith.constant 0.000000e+00 : f32
      %89 = vector.broadcast %cst_114 : f32 to vector<512x8xf32>
      %90 = arith.maximumf %88, %89 : vector<512x8xf32>
      %91 = arith.truncf %90 : vector<512x8xf32> to vector<512x8xbf16>
      %c0_115 = arith.constant 0 : index
      %c0_116 = arith.constant 0 : index
      %92 = vector.load %arg7[%c0_115, %c0_116] : memref<512x8xbf16, #tpu.memory_space<vmem>>, vector<512x8xbf16>
      tpu.vector_store %arg7[%c0_115, %c0_116], %91 {strides = array<i32>} : memref<512x8xbf16, #tpu.memory_space<vmem>>, vector<512x8xbf16>,
    } else {
    }
    return
  }
  func.func @transform_0(%arg0: i32, %arg1: i32, %arg2: i32) -> (i32, i32, i32, i32) {
    %c0_i32 = arith.constant 0 : i32
    %c0_i32_0 = arith.constant 0 : i32
    %c0_i32_1 = arith.constant 0 : i32
    return %arg1, %c0_i32, %c0_i32_0, %arg2 : i32, i32, i32, i32
  }
  func.func @transform_1(%arg0: i32, %arg1: i32, %arg2: i32) -> (i32, i32, i32) {
    %c0_i32 = arith.constant 0 : i32
    %c0_i32_0 = arith.constant 0 : i32
    return %arg2, %c0_i32, %arg0 : i32, i32, i32
  }
  func.func @transform_2(%arg0: i32, %arg1: i32, %arg2: i32) -> (i32, i32) {
    %c0_i32 = arith.constant 0 : i32
    %c0_i32_0 = arith.constant 0 : i32
    return %c0_i32, %arg0 : i32, i32
  }
  func.func @transform_3(%arg0: i32, %arg1: i32, %arg2: i32) -> (i32, i32) {
    %c0_i32 = arith.constant 0 : i32
    %c0_i32_0 = arith.constant 0 : i32
    return %c0_i32, %arg0 : i32, i32
  }
  func.func @transform_4(%arg0: i32, %arg1: i32, %arg2: i32) -> (i32, i32) {
    %c0_i32 = arith.constant 0 : i32
    return %arg1, %arg0 : i32, i32
  }
}

</mosaic_0001>

<bundles_post_ra>
// kernel: tpu_custom_call.1
= control target key start
LH: loop header
LB: loop body
LE: loop exit
PB: predicated region body
PF: predicated region fallthrough
CT: control target
= control target key end

     0   :  { %vm1184_vm0 = vcmask 1041408   ;;  %vm18_vm1 = vcmask 31744   ;;  %v12181_v1 = vmov 0   ;;  %vm412_vm2 = vcmask 31748   ;;  %s15291_s1 = inlined_call_operand.vmem [shape: bf16[1,36,8], index: 1, kind: input, shape index: {}]   ;;  %s15292_s0 = inlined_call_operand.vmem [shape: bf16[2,16,16,4], index: 0, kind: input, shape index: {}]   ;;  %s15293_s2 = inlined_call_operand.vmem [shape: f32[1,8], index: 2, kind: input, shape index: {}]   ;;  %s15294_s3 = inlined_call_operand.vmem [shape: f32[1,8], index: 3, kind: input, shape index: {}]   ;;  %s15295_s4 = inlined_call_operand.vmem [shape: bf16[512,8], index: 4, kind: output, shape index: {}]  }
   0x1   :  { %v12210_v0 = vld [vmem:[%s15291_s1] sm:$0x3]  ;;  %55 = vst.msk [vmem:[#allocation2 + $0x120] sm:$0xff] %vm18_vm1, %v12181_v1  ;;  %56 = vst.msk [vmem:[#allocation2 + $0x128] sm:$0xff] %vm18_vm1, %v12181_v1  ;;  %v12113_v5 = vld [vmem:[%s15292_s0 + $0x84] ss:$0 sps:$4 sm:$0xff]  }
   0x2   :  { %19 = vst.msk [vmem:[#allocation2] sm:$0xff] %vm18_vm1, %v12181_v1  ;;  %20 = vst.msk [vmem:[#allocation2 + $0x8] sm:$0xff] %vm18_vm1, %v12181_v1  ;;  %12101 = vmatprep.subr.msk.bf16.mxu1 %vm1184_vm0, %v12210_v0  ;;  %v1186_v2 = vsel %vm1184_vm0, %v12210_v0, 0  ;;  %v12111_v3 = vld [vmem:[%s15291_s1] ss:$0 sps:$4 sm:$0xcc]   ;;  %12100 = vmatprep.subr.msk.bf16.mxu0 %vm1184_vm0, %v12210_v0 }
   0x3   :  { %21 = vst.msk [vmem:[#allocation2 + $0x10] sm:$0xff] %vm18_vm1, %v12181_v1  ;;  %22 = vst.msk [vmem:[#allocation2 + $0x18] sm:$0xff] %vm18_vm1, %v12181_v1  ;;  %12099 = vmatpush3.bf16.msra.mxu1 %v1186_v2  ;;  %v12112_v4 = vld [vmem:[%s15292_s0 + $0x80] ss:$0 sps:$4 sm:$0xff]   ;;  %vm414_vm3 = vcmask 27648   ;;  %11505 = vmatpush3.bf16.msra.mxu0 %v1186_v2  ;;  %v1972_v6 = vrot.slane %v12111_v3, 2 }
   0x4   :  { %23 = vst.msk [vmem:[#allocation2 + $0x20] sm:$0xff] %vm18_vm1, %v12181_v1  ;;  %24 = vst.msk [vmem:[#allocation2 + $0x28] sm:$0xff] %vm18_vm1, %v12181_v1  ;;  %vm543_vm4 = vsmask.f32 4352  ;;  %v12114_v7 = vld [vmem:[%s15292_s0] ss:$0 sps:$4 sm:$0xff]  }
   0x5   :  { %25 = vst.msk [vmem:[#allocation2 + $0x30] sm:$0xff] %vm18_vm1, %v12181_v1  ;;  %26 = vst.msk [vmem:[#allocation2 + $0x38] sm:$0xff] %vm18_vm1, %v12181_v1  ;;  %v12115_v8 = vld [vmem:[%s15292_s0 + $0x4] ss:$0 sps:$4 sm:$0xff]   ;;  %12102 = vmatprep.subr.msk.bf16.mxu1 %vm1184_vm0, %v1972_v6  ;;  %v12381_v9 = vsel %vm1184_vm0, %v1972_v6, 0  ;;  %vm1872_vm5 = vcmask 1043456  }
   0x6   :  { %27 = vst.msk [vmem:[#allocation2 + $0x40] sm:$0xff] %vm18_vm1, %v12181_v1  ;;  %28 = vst.msk [vmem:[#allocation2 + $0x48] sm:$0xff] %vm18_vm1, %v12181_v1  ;;  %v12116_v10 = vld [vmem:[%s15292_s0 + $0x88] ss:$0 sps:$4 sm:$0xff]   ;;  %v12117_v11 = vld [vmem:[%s15292_s0 + $0x8c] ss:$0 sps:$4 sm:$0xff]  }
   0x7   :  { %29 = vst.msk [vmem:[#allocation2 + $0x50] sm:$0xff] %vm18_vm1, %v12181_v1  ;;  %30 = vst.msk [vmem:[#allocation2 + $0x58] sm:$0xff] %vm18_vm1, %v12181_v1  ;;  %v12118_v24 = vld [vmem:[%s15292_s0 + $0x90] ss:$0 sps:$4 sm:$0xff]   ;;  %v12119_v29 = vld [vmem:[%s15292_s0 + $0x94] ss:$0 sps:$4 sm:$0xff]  }
   0x8   :  { %31 = vst.msk [vmem:[#allocation2 + $0x60] sm:$0xff] %vm18_vm1, %v12181_v1  ;;  %32 = vst.msk [vmem:[#allocation2 + $0x68] sm:$0xff] %vm18_vm1, %v12181_v1  ;;  %v511_v12 = vld [vmem:[#allocation2 + $0x120] sm:$0xf8]  ;;  %v512_v13 = vld [vmem:[#allocation2 + $0x128] sm:$0xf] }
   0x9   :  { %33 = vst.msk [vmem:[#allocation2 + $0x70] sm:$0xff] %vm18_vm1, %v12181_v1  ;;  %34 = vst.msk [vmem:[#allocation2 + $0x78] sm:$0xff] %vm18_vm1, %v12181_v1  ;;  %v479_v14 = vld [vmem:[#allocation2] sm:$0xf8]  ;;  %v817_v15 = vshrl.u32 %v511_v12, 16  ;;  %v820_v16 = vshll.u32 %v511_v12, 16 }
   0xa   :  { %35 = vst.msk [vmem:[#allocation2 + $0x80] sm:$0xff] %vm18_vm1, %v12181_v1  ;;  %36 = vst.msk [vmem:[#allocation2 + $0x88] sm:$0xff] %vm18_vm1, %v12181_v1  ;;  %v825_v17 = vshrl.u32 %v512_v13, 16  ;;  %v828_v18 = vshll.u32 %v512_v13, 16  ;;  %v480_v19 = vld [vmem:[#allocation2 + $0x8] sm:$0xf] }
   0xb   :  { %37 = vst.msk [vmem:[#allocation2 + $0x90] sm:$0xff] %vm18_vm1, %v12181_v1  ;;  %38 = vst.msk [vmem:[#allocation2 + $0x98] sm:$0xff] %vm18_vm1, %v12181_v1  ;;  %v545_v20 = vshrl.u32 %v479_v14, 16  ;;  %v548_v21 = vshll.u32 %v479_v14, 16  ;;  %v553_v22 = vshrl.u32 %v480_v19, 16  ;;  %v556_v23 = vshll.u32 %v480_v19, 16 }
   0xc   :  { %39 = vst.msk [vmem:[#allocation2 + $0xa0] sm:$0xff] %vm18_vm1, %v12181_v1  ;;  %40 = vst.msk [vmem:[#allocation2 + $0xa8] sm:$0xff] %vm18_vm1, %v12181_v1  ;;  %v819_v25 = vrot.slane %v817_v15, 3  ;;  %v822_v26 = vrot.slane %v820_v16, 4  ;;  %v827_v27 = vrot.slane %v825_v17, 3  ;;  %v830_v28 = vrot.slane %v828_v18, 4 }
   0xd   :  { %41 = vst.msk [vmem:[#allocation2 + $0xb0] sm:$0xff] %vm18_vm1, %v12181_v1  ;;  %42 = vst.msk [vmem:[#allocation2 + $0xb8] sm:$0xff] %vm18_vm1, %v12181_v1  ;;  %v547_v32 = vrot.slane %v545_v20, 3  ;;  %v550_v33 = vrot.slane %v548_v21, 4  ;;  %v2554_v38 = vld [vmem:[%s15291_s1 + $0x4] sm:$0x3] }
   0xe   :  { %43 = vst.msk [vmem:[#allocation2 + $0xc0] sm:$0xff] %vm18_vm1, %v12181_v1  ;;  %44 = vst.msk [vmem:[#allocation2 + $0xc8] sm:$0xff] %vm18_vm1, %v12181_v1  ;;  %v823_v34 = vor.u32 %v822_v26, %v819_v25  ;;  %v831_v35 = vor.u32 %v830_v28, %v827_v27  ;;  %v555_v42 = vrot.slane %v553_v22, 3  ;;  %12103 = vmatprep.subr.msk.bf16.mxu0 %vm1184_vm0, %v2554_v38  ;;  %v558_v47 = vrot.slane %v556_v23, 4  ;;  %v12120_v63 = vld [vmem:[%s15292_s0 + $0x8] ss:$0 sps:$4 sm:$0xff]  }
   0xf   :  { %45 = vst.msk [vmem:[#allocation2 + $0xd0] sm:$0xff] %vm18_vm1, %v12181_v1  ;;  %46 = vst.msk [vmem:[#allocation2 + $0xd8] sm:$0xff] %vm18_vm1, %v12181_v1  ;;  %v551_v41 = vor.u32 %v550_v33, %v547_v32  ;;  %v12123_v25 = vld [vmem:[%s15292_s0 + $0x14] ss:$0 sps:$4 sm:$0xff]   ;;  %v3261_v28 = vsel %vm1184_vm0, %v2554_v38, 0  ;;  %vm1481_vm7 = vcmask 64512  }
  0x10   :  { %47 = vst.msk [vmem:[#allocation2 + $0xe0] sm:$0xff] %vm18_vm1, %v12181_v1  ;;  %48 = vst.msk [vmem:[#allocation2 + $0xe8] sm:$0xff] %vm18_vm1, %v12181_v1  ;;  %v832_v44 = vsel %vm543_vm4, %v823_v34, %v831_v35  ;;  %v559_v55 = vor.u32 %v558_v47, %v555_v42  ;;  %v12126_v34 = vld [vmem:[%s15292_s0 + $0xa0] ss:$0 sps:$4 sm:$0xff]   ;;  %vm2619_vm6 = vsmask.f32 3328 }
  0x11   :  { %49 = vst.msk [vmem:[#allocation2 + $0xf0] sm:$0xff] %vm18_vm1, %v12181_v1  ;;  %50 = vst.msk [vmem:[#allocation2 + $0xf8] sm:$0xff] %vm18_vm1, %v12181_v1  ;;  %11538 = vmatprep.mubr.msk.bf16.mxu1 %vm18_vm1, %v832_v44  ;;  %vm10652_vm8 = vcmask 60416  }
  0x12   :  { %51 = vst.msk [vmem:[#allocation2 + $0x100] sm:$0xff] %vm18_vm1, %v12181_v1  ;;  %52 = vst.msk [vmem:[#allocation2 + $0x108] sm:$0xff] %vm18_vm1, %v12181_v1  ;;  %v560_v0 = vsel %vm543_vm4, %v551_v41, %v559_v55  ;;  %v12128_v41 = vld [vmem:[%s15292_s0 + $0x18] ss:$0 sps:$4 sm:$0xff]  }
  0x13   :  { %53 = vst.msk [vmem:[#allocation2 + $0x110] sm:$0xff] %vm18_vm1, %v12181_v1  ;;  %54 = vst.msk [vmem:[#allocation2 + $0x118] sm:$0xff] %vm18_vm1, %v12181_v1  ;;  %11506 = vmatprep.mubr.msk.bf16.mxu0 %vm18_vm1, %v560_v0 }
  0x14   :  { %57 = vst.msk [vmem:[#allocation2 + $0x130] sm:$0xff] %vm18_vm1, %v12181_v1  ;;  %58 = vst.msk [vmem:[#allocation2 + $0x138] sm:$0xff] %vm18_vm1, %v12181_v1 }
  0x15   :  { %59 = vst.msk [vmem:[#allocation2 + $0x140] sm:$0xff] %vm18_vm1, %v12181_v1  ;;  %60 = vst.msk [vmem:[#allocation2 + $0x148] sm:$0xff] %vm18_vm1, %v12181_v1 }
  0x16   :  { %61 = vst.msk [vmem:[#allocation2 + $0x150] sm:$0xff] %vm18_vm1, %v12181_v1  ;;  %62 = vst.msk [vmem:[#allocation2 + $0x158] sm:$0xff] %vm18_vm1, %v12181_v1 }
  0x17   :  { %63 = vst.msk [vmem:[#allocation2 + $0x160] sm:$0xff] %vm18_vm1, %v12181_v1  ;;  %64 = vst.msk [vmem:[#allocation2 + $0x168] sm:$0xff] %vm18_vm1, %v12181_v1 }
  0x18   :  { %65 = vst.msk [vmem:[#allocation2 + $0x170] sm:$0xff] %vm18_vm1, %v12181_v1  ;;  %66 = vst.msk [vmem:[#allocation2 + $0x178] sm:$0xff] %vm18_vm1, %v12181_v1 }
  0x19   :  { %67 = vst.msk [vmem:[#allocation2 + $0x180] sm:$0xff] %vm18_vm1, %v12181_v1  ;;  %68 = vst.msk [vmem:[#allocation2 + $0x188] sm:$0xff] %vm18_vm1, %v12181_v1 }
  0x1a   :  { %69 = vst.msk [vmem:[#allocation2 + $0x190] sm:$0xff] %vm18_vm1, %v12181_v1  ;;  %70 = vst.msk [vmem:[#allocation2 + $0x198] sm:$0xff] %vm18_vm1, %v12181_v1 }
  0x1b   :  { %71 = vst.msk [vmem:[#allocation2 + $0x1a0] sm:$0xff] %vm18_vm1, %v12181_v1  ;;  %72 = vst.msk [vmem:[#allocation2 + $0x1a8] sm:$0xff] %vm18_vm1, %v12181_v1 }
  0x1c   :  { %73 = vst.msk [vmem:[#allocation2 + $0x1b0] sm:$0xff] %vm18_vm1, %v12181_v1  ;;  %74 = vst.msk [vmem:[#allocation2 + $0x1b8] sm:$0xff] %vm18_vm1, %v12181_v1 }
  0x1d   :  { %75 = vst.msk [vmem:[#allocation2 + $0x1c0] sm:$0xff] %vm18_vm1, %v12181_v1  ;;  %76 = vst.msk [vmem:[#allocation2 + $0x1c8] sm:$0xff] %vm18_vm1, %v12181_v1 }
  0x1e   :  { %77 = vst.msk [vmem:[#allocation2 + $0x1d0] sm:$0xff] %vm18_vm1, %v12181_v1  ;;  %78 = vst.msk [vmem:[#allocation2 + $0x1d8] sm:$0xff] %vm18_vm1, %v12181_v1 }
  0x1f   :  { %79 = vst.msk [vmem:[#allocation2 + $0x1e0] sm:$0xff] %vm18_vm1, %v12181_v1  ;;  %80 = vst.msk [vmem:[#allocation2 + $0x1e8] sm:$0xff] %vm18_vm1, %v12181_v1 }
  0x20   :  { %81 = vst.msk [vmem:[#allocation2 + $0x1f0] sm:$0xff] %vm18_vm1, %v12181_v1  ;;  %82 = vst.msk [vmem:[#allocation2 + $0x1f8] sm:$0xff] %vm18_vm1, %v12181_v1 }
  0x21   :  { %83 = vst.msk [vmem:[#allocation2 + $0x200] sm:$0xff] %vm18_vm1, %v12181_v1  ;;  %84 = vst.msk [vmem:[#allocation2 + $0x208] sm:$0xff] %vm18_vm1, %v12181_v1 }
  0x22   :  { %85 = vst.msk [vmem:[#allocation2 + $0x210] sm:$0xff] %vm18_vm1, %v12181_v1  ;;  %86 = vst.msk [vmem:[#allocation2 + $0x218] sm:$0xff] %vm18_vm1, %v12181_v1 }
  0x23   :  { %87 = vst.msk [vmem:[#allocation2 + $0x220] sm:$0xff] %vm18_vm1, %v12181_v1  ;;  %88 = vst.msk [vmem:[#allocation2 + $0x228] sm:$0xff] %vm18_vm1, %v12181_v1 }
  0x24   :  { %89 = vst.msk [vmem:[#allocation2 + $0x230] sm:$0xff] %vm18_vm1, %v12181_v1  ;;  %90 = vst.msk [vmem:[#allocation2 + $0x238] sm:$0xff] %vm18_vm1, %v12181_v1 }
  0x25   :  { %446 = vst.msk [vmem:[#allocation2 + $0x130] sm:$0xf0] %vm412_vm2, %v12112_v4  ;;  %413 = vst.msk [vmem:[#allocation2 + $0x10] sm:$0xf0] %vm412_vm2, %v12114_v7 }
  0x26   :  { %447 = vst.msk [vmem:[#allocation2 + $0x138] sm:$0xf] %vm414_vm3, %v12113_v5  ;;  %415 = vst.msk [vmem:[#allocation2 + $0x18] sm:$0xf] %vm414_vm3, %v12115_v8 }
  0x27   :  { %448 = vst.msk [vmem:[#allocation2 + $0x140] sm:$0xf0] %vm412_vm2, %v12116_v10  ;;  %450 = vst.msk [vmem:[#allocation2 + $0x150] sm:$0xf0] %vm412_vm2, %v12118_v24  ;;  %v12122_v24 = vld [vmem:[%s15292_s0 + $0x10] ss:$0 sps:$4 sm:$0xff]  }
  0x28   :  { %449 = vst.msk [vmem:[#allocation2 + $0x148] sm:$0xf] %vm414_vm3, %v12117_v11  ;;  %451 = vst.msk [vmem:[#allocation2 + $0x158] sm:$0xf] %vm414_vm3, %v12119_v29  ;;  %v12121_v11 = vld [vmem:[%s15292_s0 + $0xc] ss:$0 sps:$4 sm:$0xff]  }
  0x29   :  { %416 = vst.msk [vmem:[#allocation2 + $0x20] sm:$0xf0] %vm412_vm2, %v12120_v63  ;;  %418 = vst.msk [vmem:[#allocation2 + $0x30] sm:$0xf0] %vm412_vm2, %v12122_v24 }
  0x2a   :  { %417 = vst.msk [vmem:[#allocation2 + $0x28] sm:$0xf] %vm414_vm3, %v12121_v11  ;;  %419 = vst.msk [vmem:[#allocation2 + $0x38] sm:$0xf] %vm414_vm3, %v12123_v25 }
  0x2b   :  { %454 = vst.msk [vmem:[#allocation2 + $0x170] sm:$0xf0] %vm412_vm2, %v12126_v34  ;;  %420 = vst.msk [vmem:[#allocation2 + $0x40] sm:$0xf0] %vm412_vm2, %v12128_v41 }
  0x2c   :  { %v513_v30 = vld [vmem:[#allocation2 + $0x130] sm:$0xf8] }
  0x2d   :  { %v514_v31 = vld [vmem:[#allocation2 + $0x138] sm:$0xf]  ;;  %v834_v36 = vshrl.u32 %v513_v30, 16  ;;  %v837_v37 = vshll.u32 %v513_v30, 16  ;;  %v481_v43 = vld [vmem:[#allocation2 + $0x10] sm:$0xf8] }
  0x2e   :  { %v842_v39 = vshrl.u32 %v514_v31, 16  ;;  %v845_v40 = vshll.u32 %v514_v31, 16  ;;  %v482_v48 = vld [vmem:[#allocation2 + $0x18] sm:$0xf]  ;;  %v562_v51 = vshrl.u32 %v481_v43, 16  ;;  %v565_v52 = vshll.u32 %v481_v43, 16 }
  0x2f   :  { %v836_v45 = vrot.slane %v834_v36, 3  ;;  %v839_v46 = vrot.slane %v837_v37, 4  ;;  %v515_v53 = vld [vmem:[#allocation2 + $0x140] sm:$0xf8]  ;;  %v570_v56 = vshrl.u32 %v482_v48, 16  ;;  %v573_v57 = vshll.u32 %v482_v48, 16 }
  0x30   :  { %v844_v49 = vrot.slane %v842_v39, 3  ;;  %v847_v50 = vrot.slane %v845_v40, 4  ;;  %v516_v58 = vld [vmem:[#allocation2 + $0x148] sm:$0xf]  ;;  %v564_v60 = vrot.slane %v562_v51, 3  ;;  %v567_v61 = vrot.slane %v565_v52, 4 }
  0x31   :  { %v840_v54 = vor.u32 %v839_v46, %v836_v45  ;;  %v851_v62 = vshrl.u32 %v515_v53, 16  ;;  %v572_v1 = vrot.slane %v570_v56, 3  ;;  %v575_v2 = vrot.slane %v573_v57, 4  ;;  %v517_v4 = vld [vmem:[#allocation2 + $0x150] sm:$0xf8] }
  0x32   :  { %v848_v59 = vor.u32 %v847_v50, %v844_v49  ;;  %v854_v3 = vshll.u32 %v515_v53, 16  ;;  %v568_v6 = vor.u32 %v567_v61, %v564_v60  ;;  %v859_v8 = vshrl.u32 %v516_v58, 16  ;;  %v518_v10 = vld [vmem:[#allocation2 + $0x158] sm:$0xf]  ;;  %v12125_v31 = vld [vmem:[%s15292_s0 + $0x9c] ss:$0 sps:$4 sm:$0xff]  }
  0x33   :  { %v853_v7 = vrot.slane %v851_v62, 3  ;;  %v576_v12 = vor.u32 %v575_v2, %v572_v1  ;;  %v862_v14 = vshll.u32 %v516_v58, 16  ;;  %v868_v15 = vshrl.u32 %v517_v4, 16  ;;  %v12124_v30 = vld [vmem:[%s15292_s0 + $0x98] ss:$0 sps:$4 sm:$0xff]  }
  0x34   :  { %v849_v5 = vsel %vm543_vm4, %v840_v54, %v848_v59  ;;  %v856_v13 = vrot.slane %v854_v3, 4  ;;  %v861_v16 = vrot.slane %v859_v8, 3  ;;  %v871_v17 = vshll.u32 %v517_v4, 16  ;;  %v483_v36 = vld [vmem:[#allocation2 + $0x20] sm:$0xf8] }
  0x35   :  { %11539 = vmatmul.mubr.msk.bf16.vlgmr.msra.gmra.mrb[0].mxu1 %vm18_vm1, %v849_v5  ;;  %v876_v18 = vshrl.u32 %v518_v10, 16  ;;  %v879_v19 = vshll.u32 %v518_v10, 16  ;;  %v577_v20 = vsel %vm543_vm4, %v568_v6, %v576_v12  ;;  %v864_v22 = vrot.slane %v862_v14, 4  ;;  %452 = vst.msk [vmem:[#allocation2 + $0x160] sm:$0xf0] %vm412_vm2, %v12124_v30 }
  0x36   :  { %11571 = vmatpush3.bf16.msra.mxu1 %v12381_v9  ;;  %v857_v21 = vor.u32 %v856_v13, %v853_v7  ;;  %v870_v23 = vrot.slane %v868_v15, 3  ;;  %11507 = vmatmul.mubr.msk.bf16.vlgmr.msra.gmra.mrb[0].mxu0 %vm18_vm1, %v577_v20  ;;  %v873_v9 = vrot.slane %v871_v17, 4  ;;  %453 = vst.msk [vmem:[#allocation2 + $0x168] sm:$0xf] %vm414_vm3, %v12125_v31  ;;  %v12127_v37 = vld [vmem:[%s15292_s0 + $0xa4] ss:$0 sps:$4 sm:$0xff]  }
  0x37   :  { %v878_v26 = vrot.slane %v876_v18, 3  ;;  %v881_v27 = vrot.slane %v879_v19, 4  ;;  %v865_v29 = vor.u32 %v864_v22, %v861_v16  ;;  %11637 = vmatpush3.bf16.msra.mxu0 %v3261_v28  ;;  %v579_v39 = vshrl.u32 %v483_v36, 16  ;;  %v484_v42 = vld [vmem:[#allocation2 + $0x28] sm:$0xf] }
  0x38   :  { %v874_v32 = vor.u32 %v873_v9, %v870_v23  ;;  %v582_v40 = vshll.u32 %v483_v36, 16  ;;  %455 = vst.msk [vmem:[#allocation2 + $0x178] sm:$0xf] %vm414_vm3, %v12127_v37  ;;  %v12129_v43 = vld [vmem:[%s15292_s0 + $0x1c] ss:$0 sps:$4 sm:$0xff]   ;;  %v587_v46 = vshrl.u32 %v484_v42, 16 }
  0x39   :  { %v882_v33 = vor.u32 %v881_v27, %v878_v26  ;;  %v866_v35 = vsel %vm543_vm4, %v857_v21, %v865_v29  ;;  %v581_v44 = vrot.slane %v579_v39, 3  ;;  %v590_v47 = vshll.u32 %v484_v42, 16  ;;  %421 = vst.msk [vmem:[#allocation2 + $0x48] sm:$0xf] %vm414_vm3, %v12129_v43  ;;  %v12130_v48 = vld [vmem:[%s15292_s0 + $0x20] ss:$0 sps:$4 sm:$0xff]  }
  0x3a   :  { %11542 = vmatprep.mubr.msk.bf16.mxu1 %vm18_vm1, %v866_v35  ;;  %v584_v45 = vrot.slane %v582_v40, 4  ;;  %v12131_v49 = vld [vmem:[%s15292_s0 + $0x24] ss:$0 sps:$4 sm:$0xff]   ;;  %v589_v51 = vrot.slane %v587_v46, 3  ;;  %v485_v53 = vld [vmem:[#allocation2 + $0x30] sm:$0xf8] }
  0x3b   :  { %v883_v38 = vsel %vm543_vm4, %v874_v32, %v882_v33  ;;  %v592_v52 = vrot.slane %v590_v47, 4  ;;  %v486_v54 = vld [vmem:[#allocation2 + $0x38] sm:$0xf]  ;;  %v596_v55 = vshrl.u32 %v485_v53, 16  ;;  %v599_v56 = vshll.u32 %v485_v53, 16 }
  0x3c   :  { %v585_v50 = vor.u32 %v584_v45, %v581_v44  ;;  %v604_v57 = vshrl.u32 %v486_v54, 16  ;;  %v607_v58 = vshll.u32 %v486_v54, 16  ;;  %422 = vst.msk [vmem:[#allocation2 + $0x50] sm:$0xf0] %vm412_vm2, %v12130_v48  ;;  %v519_v60 = vld [vmem:[#allocation2 + $0x160] sm:$0xf8] }
  0x3d   :  { %11543 = vmatmul.mubr.msk.bf16.gmra.mrb[4].mxu1 %vm18_vm1, %v883_v38  ;;  %423 = vst.msk [vmem:[#allocation2 + $0x58] sm:$0xf] %vm414_vm3, %v12131_v49  ;;  %v593_v59 = vor.u32 %v592_v52, %v589_v51  ;;  %v520_v61 = vld [vmem:[#allocation2 + $0x168] sm:$0xf]  ;;  %v598_v63 = vrot.slane %v596_v55, 3  ;;  %v601_v0 = vrot.slane %v599_v56, 4 }
  0x3e   :  { %v12132_v62 = vld [vmem:[%s15292_s0 + $0xa8] ss:$0 sps:$4 sm:$0xff]   ;;  %v606_v1 = vrot.slane %v604_v57, 3  ;;  %v609_v2 = vrot.slane %v607_v58, 4  ;;  %v521_v3 = vld [vmem:[#allocation2 + $0x170] sm:$0xf8] }
  0x3f   :  { %v594_v4 = vsel %vm543_vm4, %v585_v50, %v593_v59  ;;  %v885_v5 = vshrl.u32 %v519_v60, 16  ;;  %v888_v6 = vshll.u32 %v519_v60, 16  ;;  %v893_v7 = vshrl.u32 %v520_v61, 16  ;;  %v522_v8 = vld [vmem:[#allocation2 + $0x178] sm:$0xf] }
  0x40   :  { %456 = vst.msk [vmem:[#allocation2 + $0x180] sm:$0xf0] %vm412_vm2, %v12132_v62  ;;  %11510 = vmatprep.mubr.msk.bf16.mxu0 %vm18_vm1, %v594_v4  ;;  %v602_v10 = vor.u32 %v601_v0, %v598_v63  ;;  %v610_v11 = vor.u32 %v609_v2, %v606_v1  ;;  %v896_v12 = vshll.u32 %v520_v61, 16  ;;  %v902_v13 = vshrl.u32 %v521_v3, 16  ;;  %v487_v14 = vld [vmem:[#allocation2 + $0x40] sm:$0xf8] }
  0x41   :  { %v12133_v15 = vld [vmem:[%s15292_s0 + $0xac] ss:$0 sps:$4 sm:$0xff]   ;;  %v887_v16 = vrot.slane %v885_v5, 3  ;;  %v890_v17 = vrot.slane %v888_v6, 4  ;;  %v895_v18 = vrot.slane %v893_v7, 3  ;;  %v905_v19 = vshll.u32 %v521_v3, 16 }
  0x42   :  { %v488_v20 = vld [vmem:[#allocation2 + $0x48] sm:$0xf]  ;;  %v611_v21 = vsel %vm543_vm4, %v602_v10, %v610_v11  ;;  %v898_v22 = vrot.slane %v896_v12, 4  ;;  %v904_v23 = vrot.slane %v902_v13, 3  ;;  %v910_v24 = vshrl.u32 %v522_v8, 16 }
  0x43   :  { %457 = vst.msk [vmem:[#allocation2 + $0x188] sm:$0xf] %vm414_vm3, %v12133_v15  ;;  %11511 = vmatmul.mubr.msk.bf16.gmra.mrb[4].mxu0 %vm18_vm1, %v611_v21  ;;  %v891_v25 = vor.u32 %v890_v17, %v887_v16  ;;  %v907_v9 = vrot.slane %v905_v19, 4  ;;  %v913_v26 = vshll.u32 %v522_v8, 16  ;;  %v613_v27 = vshrl.u32 %v487_v14, 16 }
  0x44   :  { %v489_v28 = vld [vmem:[#allocation2 + $0x50] sm:$0xf8]  ;;  %v899_v29 = vor.u32 %v898_v22, %v895_v18  ;;  %v912_v30 = vrot.slane %v910_v24, 3  ;;  %v616_v31 = vshll.u32 %v487_v14, 16  ;;  %v621_v32 = vshrl.u32 %v488_v20, 16 }
  0x45   :  { %v490_v33 = vld [vmem:[#allocation2 + $0x58] sm:$0xf]  ;;  %v908_v34 = vor.u32 %v907_v9, %v904_v23  ;;  %v915_v35 = vrot.slane %v913_v26, 4  ;;  %v615_v36 = vrot.slane %v613_v27, 3  ;;  %v624_v37 = vshll.u32 %v488_v20, 16 }
  0x46   :  { %v900_v38 = vsel %vm543_vm4, %v891_v25, %v899_v29  ;;  %v618_v39 = vrot.slane %v616_v31, 4  ;;  %v623_v40 = vrot.slane %v621_v32, 3  ;;  %v630_v41 = vshrl.u32 %v489_v28, 16  ;;  %v12134_v47 = vld [vmem:[%s15292_s0 + $0xb0] ss:$0 sps:$4 sm:$0xff]  }
  0x47   :  { %v523_v42 = vld [vmem:[#allocation2 + $0x180] sm:$0xf8]  ;;  %11546 = vmatprep.mubr.msk.bf16.mxu1 %vm18_vm1, %v900_v38  ;;  %v916_v43 = vor.u32 %v915_v35, %v912_v30  ;;  %v626_v44 = vrot.slane %v624_v37, 4  ;;  %v633_v45 = vshll.u32 %v489_v28, 16  ;;  %v638_v46 = vshrl.u32 %v490_v33, 16 }
  0x48   :  { %v619_v48 = vor.u32 %v618_v39, %v615_v36  ;;  %v632_v49 = vrot.slane %v630_v41, 3  ;;  %v641_v50 = vshll.u32 %v490_v33, 16  ;;  %v919_v51 = vshrl.u32 %v523_v42, 16  ;;  %v12135_v52 = vld [vmem:[%s15292_s0 + $0xb4] ss:$0 sps:$4 sm:$0xff]  }
  0x49   :  { %v917_v53 = vsel %vm543_vm4, %v908_v34, %v916_v43  ;;  %v627_v54 = vor.u32 %v626_v44, %v623_v40  ;;  %v635_v55 = vrot.slane %v633_v45, 4  ;;  %v640_v56 = vrot.slane %v638_v46, 3  ;;  %458 = vst.msk [vmem:[#allocation2 + $0x190] sm:$0xf0] %vm412_vm2, %v12134_v47  ;;  %v12136_v1 = vld [vmem:[%s15292_s0 + $0x28] ss:$0 sps:$4 sm:$0xff]  }
  0x4a   :  { %v524_v57 = vld [vmem:[#allocation2 + $0x188] sm:$0xf]  ;;  %11547 = vmatmul.mubr.msk.bf16.gmra.mrb[8].mxu1 %vm18_vm1, %v917_v53  ;;  %v643_v58 = vrot.slane %v641_v50, 4  ;;  %v921_v59 = vrot.slane %v919_v51, 3  ;;  %v922_v60 = vshll.u32 %v523_v42, 16 }
  0x4b   :  { %v927_v61 = vshrl.u32 %v524_v57, 16  ;;  %459 = vst.msk [vmem:[#allocation2 + $0x198] sm:$0xf] %vm414_vm3, %v12135_v52  ;;  %v628_v62 = vsel %vm543_vm4, %v619_v48, %v627_v54  ;;  %v636_v63 = vor.u32 %v635_v55, %v632_v49  ;;  %v930_v0 = vshll.u32 %v524_v57, 16  ;;  %v12137_v2 = vld [vmem:[%s15292_s0 + $0x2c] ss:$0 sps:$4 sm:$0xff]  }
  0x4c   :  { %11514 = vmatprep.mubr.msk.bf16.mxu0 %vm18_vm1, %v628_v62  ;;  %v644_v3 = vor.u32 %v643_v58, %v640_v56  ;;  %v924_v4 = vrot.slane %v922_v60, 4  ;;  %424 = vst.msk [vmem:[#allocation2 + $0x60] sm:$0xf0] %vm412_vm2, %v12136_v1  ;;  %v12138_v7 = vld [vmem:[%s15292_s0 + $0x30] ss:$0 sps:$4 sm:$0xff]  }
  0x4d   :  { %v929_v5 = vrot.slane %v927_v61, 3  ;;  %v932_v6 = vrot.slane %v930_v0, 4  ;;  %425 = vst.msk [vmem:[#allocation2 + $0x68] sm:$0xf] %vm414_vm3, %v12137_v2  ;;  %v12139_v8 = vld [vmem:[%s15292_s0 + $0x34] ss:$0 sps:$4 sm:$0xff]  }
  0x4e   :  { %v645_v10 = vsel %vm543_vm4, %v636_v63, %v644_v3  ;;  %v925_v11 = vor.u32 %v924_v4, %v921_v59  ;;  %v12140_v12 = vld [vmem:[%s15292_s0 + $0xb8] ss:$0 sps:$4 sm:$0xff]   ;;  %426 = vst.msk [vmem:[#allocation2 + $0x70] sm:$0xf0] %vm412_vm2, %v12138_v7  ;;  %v12141_v14 = vld [vmem:[%s15292_s0 + $0xbc] ss:$0 sps:$4 sm:$0xff]  }
  0x4f   :  { %11515 = vmatmul.mubr.msk.bf16.gmra.mrb[8].mxu0 %vm18_vm1, %v645_v10  ;;  %v933_v13 = vor.u32 %v932_v6, %v929_v5  ;;  %427 = vst.msk [vmem:[#allocation2 + $0x78] sm:$0xf] %vm414_vm3, %v12139_v8  ;;  %v12142_v16 = vld [vmem:[%s15292_s0 + $0xc0] ss:$0 sps:$4 sm:$0xff]   ;;  %v12143_v17 = vld [vmem:[%s15292_s0 + $0xc4] ss:$0 sps:$4 sm:$0xff]  }
  0x50   :  { %v525_v15 = vld [vmem:[#allocation2 + $0x190] sm:$0xf8]  ;;  %460 = vst.msk [vmem:[#allocation2 + $0x1a0] sm:$0xf0] %vm412_vm2, %v12140_v12  ;;  %462 = vst.msk [vmem:[#allocation2 + $0x1b0] sm:$0xf0] %vm412_vm2, %v12142_v16 }
  0x51   :  { %v934_v18 = vsel %vm543_vm4, %v925_v11, %v933_v13  ;;  %v936_v20 = vshrl.u32 %v525_v15, 16  ;;  %v939_v21 = vshll.u32 %v525_v15, 16  ;;  %461 = vst.msk [vmem:[#allocation2 + $0x1a8] sm:$0xf] %vm414_vm3, %v12141_v14  ;;  %463 = vst.msk [vmem:[#allocation2 + $0x1b8] sm:$0xf] %vm414_vm3, %v12143_v17 }
  0x52   :  { %v526_v19 = vld [vmem:[#allocation2 + $0x198] sm:$0xf]  ;;  %11550 = vmatprep.mubr.msk.bf16.mxu1 %vm18_vm1, %v934_v18  ;;  %v12145_v26 = vld [vmem:[%s15292_s0 + $0x3c] ss:$0 sps:$4 sm:$0xff]   ;;  %v12146_v5 = vld [vmem:[%s15292_s0 + $0x40] ss:$0 sps:$4 sm:$0xff]  }
  0x53   :  { %v944_v22 = vshrl.u32 %v526_v19, 16  ;;  %v947_v23 = vshll.u32 %v526_v19, 16  ;;  %v12144_v24 = vld [vmem:[%s15292_s0 + $0x38] ss:$0 sps:$4 sm:$0xff]   ;;  %v938_v25 = vrot.slane %v936_v20, 3  ;;  %v941_v9 = vrot.slane %v939_v21, 4 }
  0x54   :  { %v491_v29 = vld [vmem:[#allocation2 + $0x60] sm:$0xf8]  ;;  %v492_v30 = vld [vmem:[#allocation2 + $0x68] sm:$0xf]  ;;  %428 = vst.msk [vmem:[#allocation2 + $0x80] sm:$0xf0] %vm412_vm2, %v12144_v24 }
  0x55   :  { %v946_v27 = vrot.slane %v944_v22, 3  ;;  %v949_v28 = vrot.slane %v947_v23, 4  ;;  %v942_v31 = vor.u32 %v941_v9, %v938_v25  ;;  %v647_v32 = vshrl.u32 %v491_v29, 16  ;;  %429 = vst.msk [vmem:[#allocation2 + $0x88] sm:$0xf] %vm414_vm3, %v12145_v26 }
  0x56   :  { %v650_v33 = vshll.u32 %v491_v29, 16  ;;  %v655_v34 = vshrl.u32 %v492_v30, 16  ;;  %v658_v36 = vshll.u32 %v492_v30, 16  ;;  %v493_v37 = vld [vmem:[#allocation2 + $0x70] sm:$0xf8] }
  0x57   :  { %v950_v35 = vor.u32 %v949_v28, %v946_v27  ;;  %v494_v38 = vld [vmem:[#allocation2 + $0x78] sm:$0xf]  ;;  %v649_v39 = vrot.slane %v647_v32, 3  ;;  %v664_v42 = vshrl.u32 %v493_v37, 16  ;;  %v527_v43 = vld [vmem:[#allocation2 + $0x1a0] sm:$0xf8] }
  0x58   :  { %v652_v40 = vrot.slane %v650_v33, 4  ;;  %v657_v41 = vrot.slane %v655_v34, 3  ;;  %v660_v45 = vrot.slane %v658_v36, 4  ;;  %v667_v46 = vshll.u32 %v493_v37, 16  ;;  %v528_v48 = vld [vmem:[#allocation2 + $0x1a8] sm:$0xf] }
  0x59   :  { %v951_v44 = vsel %vm543_vm4, %v942_v31, %v950_v35  ;;  %v672_v47 = vshrl.u32 %v494_v38, 16  ;;  %v666_v50 = vrot.slane %v664_v42, 3  ;;  %v675_v51 = vshll.u32 %v494_v38, 16  ;;  %v529_v53 = vld [vmem:[#allocation2 + $0x1b0] sm:$0xf8] }
  0x5a   :  { %11551 = vmatmul.mubr.msk.bf16.gmra.mrb[12].mxu1 %vm18_vm1, %v951_v44  ;;  %v653_v49 = vor.u32 %v652_v40, %v649_v39  ;;  %v953_v52 = vshrl.u32 %v527_v43, 16  ;;  %v661_v54 = vor.u32 %v660_v45, %v657_v41  ;;  %v669_v55 = vrot.slane %v667_v46, 4  ;;  %v530_v58 = vld [vmem:[#allocation2 + $0x1b8] sm:$0xf]  ;;  %v12147_v11 = vld [vmem:[%s15292_s0 + $0x44] ss:$0 sps:$4 sm:$0xff]  }
  0x5b   :  { %v674_v56 = vrot.slane %v672_v47, 3  ;;  %v956_v57 = vshll.u32 %v527_v43, 16  ;;  %v677_v59 = vrot.slane %v675_v51, 4  ;;  %v961_v61 = vshrl.u32 %v528_v48, 16  ;;  %v495_v63 = vld [vmem:[#allocation2 + $0x80] sm:$0xf8] }
  0x5c   :  { %v955_v60 = vrot.slane %v953_v52, 3  ;;  %v964_v62 = vshll.u32 %v528_v48, 16  ;;  %v662_v0 = vsel %vm543_vm4, %v653_v49, %v661_v54  ;;  %v670_v1 = vor.u32 %v669_v55, %v666_v50  ;;  %v496_v4 = vld [vmem:[#allocation2 + $0x88] sm:$0xf]  ;;  %430 = vst.msk [vmem:[#allocation2 + $0x90] sm:$0xf0] %vm412_vm2, %v12146_v5 }
  0x5d   :  { %v958_v2 = vrot.slane %v956_v57, 4  ;;  %v970_v3 = vshrl.u32 %v529_v53, 16  ;;  %11518 = vmatprep.mubr.msk.bf16.mxu0 %vm18_vm1, %v662_v0  ;;  %v678_v6 = vor.u32 %v677_v59, %v674_v56  ;;  %v963_v7 = vrot.slane %v961_v61, 3  ;;  %431 = vst.msk [vmem:[#allocation2 + $0x98] sm:$0xf] %vm414_vm3, %v12147_v11 }
  0x5e   :  { %v966_v8 = vrot.slane %v964_v62, 4  ;;  %v973_v10 = vshll.u32 %v529_v53, 16  ;;  %v978_v14 = vshrl.u32 %v530_v58, 16  ;;  %v981_v15 = vshll.u32 %v530_v58, 16  ;;  %v12148_v20 = vld [vmem:[%s15292_s0 + $0xc8] ss:$0 sps:$4 sm:$0xff]  }
  0x5f   :  { %v959_v12 = vor.u32 %v958_v2, %v955_v60  ;;  %v972_v13 = vrot.slane %v970_v3, 3  ;;  %v679_v16 = vsel %vm543_vm4, %v670_v1, %v678_v6  ;;  %v681_v19 = vshrl.u32 %v495_v63, 16  ;;  %v12149_v25 = vld [vmem:[%s15292_s0 + $0xcc] ss:$0 sps:$4 sm:$0xff]   ;;  %464 = vst.msk [vmem:[#allocation2 + $0x1c0] sm:$0xf0] %vm412_vm2, %v12148_v20 }
  0x60   :  { %v967_v17 = vor.u32 %v966_v8, %v963_v7  ;;  %v975_v18 = vrot.slane %v973_v10, 4  ;;  %11519 = vmatmul.mubr.msk.bf16.gmra.mrb[12].mxu0 %vm18_vm1, %v679_v16  ;;  %v980_v21 = vrot.slane %v978_v14, 3  ;;  %v983_v22 = vrot.slane %v981_v15, 4  ;;  %465 = vst.msk [vmem:[#allocation2 + $0x1c8] sm:$0xf] %vm414_vm3, %v12149_v25 }
  0x61   :  { %v684_v23 = vshll.u32 %v495_v63, 16  ;;  %v689_v24 = vshrl.u32 %v496_v4, 16  ;;  %v683_v27 = vrot.slane %v681_v19, 3  ;;  %v692_v28 = vshll.u32 %v496_v4, 16  ;;  %v12150_v32 = vld [vmem:[%s15292_s0 + $0xd0] ss:$0 sps:$4 sm:$0xff]  }
  0x62   :  { %v968_v9 = vsel %vm543_vm4, %v959_v12, %v967_v17  ;;  %v976_v26 = vor.u32 %v975_v18, %v972_v13  ;;  %v984_v29 = vor.u32 %v983_v22, %v980_v21  ;;  %v12151_v33 = vld [vmem:[%s15292_s0 + $0xd4] ss:$0 sps:$4 sm:$0xff]   ;;  %466 = vst.msk [vmem:[#allocation2 + $0x1d0] sm:$0xf0] %vm412_vm2, %v12150_v32  ;;  %v12152_v37 = vld [vmem:[%s15292_s0 + $0x48] ss:$0 sps:$4 sm:$0xff]  }
  0x63   :  { %11554 = vmatprep.mubr.msk.bf16.mxu1 %vm18_vm1, %v968_v9  ;;  %v686_v30 = vrot.slane %v684_v23, 4  ;;  %v691_v31 = vrot.slane %v689_v24, 3  ;;  %v694_v34 = vrot.slane %v692_v28, 4  ;;  %467 = vst.msk [vmem:[#allocation2 + $0x1d8] sm:$0xf] %vm414_vm3, %v12151_v33 }
  0x64   :  { %v985_v35 = vsel %vm543_vm4, %v976_v26, %v984_v29  ;;  %v12153_v38 = vld [vmem:[%s15292_s0 + $0x4c] ss:$0 sps:$4 sm:$0xff]   ;;  %v497_v40 = vld [vmem:[#allocation2 + $0x90] sm:$0xf8]  ;;  %v12154_v41 = vld [vmem:[%s15292_s0 + $0x50] ss:$0 sps:$4 sm:$0xff]  }
  0x65   :  { %v687_v36 = vor.u32 %v686_v30, %v683_v27  ;;  %11555 = vmatmul.mubr.msk.bf16.gmra.mrb[16].mxu1 %vm18_vm1, %v985_v35  ;;  %v695_v39 = vor.u32 %v694_v34, %v691_v31  ;;  %v498_v42 = vld [vmem:[#allocation2 + $0x98] sm:$0xf]  ;;  %v698_v43 = vshrl.u32 %v497_v40, 16  ;;  %v701_v44 = vshll.u32 %v497_v40, 16  ;;  %432 = vst.msk [vmem:[#allocation2 + $0xa0] sm:$0xf0] %vm412_vm2, %v12152_v37 }
  0x66   :  { %433 = vst.msk [vmem:[#allocation2 + $0xa8] sm:$0xf] %vm414_vm3, %v12153_v38  ;;  %v12155_v45 = vld [vmem:[%s15292_s0 + $0x54] ss:$0 sps:$4 sm:$0xff]   ;;  %v706_v47 = vshrl.u32 %v498_v42, 16  ;;  %v709_v48 = vshll.u32 %v498_v42, 16 }
  0x67   :  { %v696_v46 = vsel %vm543_vm4, %v687_v36, %v695_v39  ;;  %434 = vst.msk [vmem:[#allocation2 + $0xb0] sm:$0xf0] %vm412_vm2, %v12154_v41  ;;  %v700_v49 = vrot.slane %v698_v43, 3  ;;  %v703_v50 = vrot.slane %v701_v44, 4  ;;  %v531_v51 = vld [vmem:[#allocation2 + $0x1c0] sm:$0xf8] }
  0x68   :  { %11522 = vmatprep.mubr.msk.bf16.mxu0 %vm18_vm1, %v696_v46  ;;  %435 = vst.msk [vmem:[#allocation2 + $0xb8] sm:$0xf] %vm414_vm3, %v12155_v45  ;;  %v12156_v52 = vld [vmem:[%s15292_s0 + $0xd8] ss:$0 sps:$4 sm:$0xff]   ;;  %v708_v53 = vrot.slane %v706_v47, 3  ;;  %v711_v54 = vrot.slane %v709_v48, 4 }
  0x69   :  { %v532_v55 = vld [vmem:[#allocation2 + $0x1c8] sm:$0xf]  ;;  %v987_v56 = vshrl.u32 %v531_v51, 16  ;;  %v990_v57 = vshll.u32 %v531_v51, 16  ;;  %v704_v58 = vor.u32 %v703_v50, %v700_v49  ;;  %v12157_v61 = vld [vmem:[%s15292_s0 + $0xdc] ss:$0 sps:$4 sm:$0xff]  }
  0x6a   :  { %v995_v59 = vshrl.u32 %v532_v55, 16  ;;  %v998_v60 = vshll.u32 %v532_v55, 16  ;;  %468 = vst.msk [vmem:[#allocation2 + $0x1e0] sm:$0xf0] %vm412_vm2, %v12156_v52  ;;  %v712_v62 = vor.u32 %v711_v54, %v708_v53  ;;  %v533_v1 = vld [vmem:[#allocation2 + $0x1d0] sm:$0xf8] }
  0x6b   :  { %v989_v63 = vrot.slane %v987_v56, 3  ;;  %v992_v0 = vrot.slane %v990_v57, 4  ;;  %v534_v2 = vld [vmem:[#allocation2 + $0x1d8] sm:$0xf]  ;;  %v1004_v5 = vshrl.u32 %v533_v1, 16  ;;  %v1007_v6 = vshll.u32 %v533_v1, 16 }
  0x6c   :  { %v997_v3 = vrot.slane %v995_v59, 3  ;;  %v1000_v4 = vrot.slane %v998_v60, 4  ;;  %469 = vst.msk [vmem:[#allocation2 + $0x1e8] sm:$0xf] %vm414_vm3, %v12157_v61  ;;  %v713_v7 = vsel %vm543_vm4, %v704_v58, %v712_v62  ;;  %v1012_v10 = vshrl.u32 %v534_v2, 16 }
  0x6d   :  { %v993_v8 = vor.u32 %v992_v0, %v989_v63  ;;  %v1015_v11 = vshll.u32 %v534_v2, 16  ;;  %v499_v12 = vld [vmem:[#allocation2 + $0xa0] sm:$0xf8]  ;;  %v500_v13 = vld [vmem:[#allocation2 + $0xa8] sm:$0xf]  ;;  %11523 = vmatmul.mubr.msk.bf16.gmra.mrb[16].mxu0 %vm18_vm1, %v713_v7  ;;  %v1006_v15 = vrot.slane %v1004_v5, 3 }
  0x6e   :  { %v1001_v14 = vor.u32 %v1000_v4, %v997_v3  ;;  %v1009_v16 = vrot.slane %v1007_v6, 4  ;;  %v715_v17 = vshrl.u32 %v499_v12, 16  ;;  %v501_v18 = vld [vmem:[#allocation2 + $0xb0] sm:$0xf8]  ;;  %v1014_v19 = vrot.slane %v1012_v10, 3 }
  0x6f   :  { %v1017_v20 = vrot.slane %v1015_v11, 4  ;;  %v718_v21 = vshll.u32 %v499_v12, 16  ;;  %v723_v22 = vshrl.u32 %v500_v13, 16  ;;  %v502_v23 = vld [vmem:[#allocation2 + $0xb8] sm:$0xf]  ;;  %v726_v26 = vshll.u32 %v500_v13, 16 }
  0x70   :  { %v1002_v24 = vsel %vm543_vm4, %v993_v8, %v1001_v14  ;;  %v1010_v25 = vor.u32 %v1009_v16, %v1006_v15  ;;  %v717_v9 = vrot.slane %v715_v17, 3  ;;  %v12158_v27 = vld [vmem:[%s15292_s0 + $0xe0] ss:$0 sps:$4 sm:$0xff]   ;;  %v12159_v28 = vld [vmem:[%s15292_s0 + $0xe4] ss:$0 sps:$4 sm:$0xff]   ;;  %v732_v32 = vshrl.u32 %v501_v18, 16 }
  0x71   :  { %11558 = vmatprep.mubr.msk.bf16.mxu1 %vm18_vm1, %v1002_v24  ;;  %v1018_v29 = vor.u32 %v1017_v20, %v1014_v19  ;;  %v720_v30 = vrot.slane %v718_v21, 4  ;;  %v725_v31 = vrot.slane %v723_v22, 3  ;;  %v535_v33 = vld [vmem:[#allocation2 + $0x1e0] sm:$0xf8]  ;;  %v728_v34 = vrot.slane %v726_v26, 4 }
  0x72   :  { %v735_v35 = vshll.u32 %v501_v18, 16  ;;  %v740_v36 = vshrl.u32 %v502_v23, 16  ;;  %v743_v37 = vshll.u32 %v502_v23, 16  ;;  %470 = vst.msk [vmem:[#allocation2 + $0x1f0] sm:$0xf0] %vm412_vm2, %v12158_v27  ;;  %v734_v40 = vrot.slane %v732_v32, 3 }
  0x73   :  { %471 = vst.msk [vmem:[#allocation2 + $0x1f8] sm:$0xf] %vm414_vm3, %v12159_v28  ;;  %v1019_v38 = vsel %vm543_vm4, %v1010_v25, %v1018_v29  ;;  %v721_v39 = vor.u32 %v720_v30, %v717_v9  ;;  %v536_v41 = vld [vmem:[#allocation2 + $0x1e8] sm:$0xf]  ;;  %v1021_v42 = vshrl.u32 %v535_v33, 16  ;;  %v729_v43 = vor.u32 %v728_v34, %v725_v31 }
  0x74   :  { %11559 = vmatmul.mubr.msk.bf16.gmra.mrb[20].mxu1 %vm18_vm1, %v1019_v38  ;;  %v737_v44 = vrot.slane %v735_v35, 4  ;;  %v742_v45 = vrot.slane %v740_v36, 3  ;;  %v745_v46 = vrot.slane %v743_v37, 4  ;;  %v12160_v47 = vld [vmem:[%s15292_s0 + $0x58] ss:$0 sps:$4 sm:$0xff]   ;;  %v1024_v49 = vshll.u32 %v535_v33, 16 }
  0x75   :  { %v1023_v48 = vrot.slane %v1021_v42, 3  ;;  %v1029_v50 = vshrl.u32 %v536_v41, 16  ;;  %v1032_v51 = vshll.u32 %v536_v41, 16  ;;  %v12161_v52 = vld [vmem:[%s15292_s0 + $0x5c] ss:$0 sps:$4 sm:$0xff]   ;;  %v730_v53 = vsel %vm543_vm4, %v721_v39, %v729_v43 }
  0x76   :  { %v738_v54 = vor.u32 %v737_v44, %v734_v40  ;;  %v746_v55 = vor.u32 %v745_v46, %v742_v45  ;;  %436 = vst.msk [vmem:[#allocation2 + $0xc0] sm:$0xf0] %vm412_vm2, %v12160_v47  ;;  %v12162_v56 = vld [vmem:[%s15292_s0 + $0x60] ss:$0 sps:$4 sm:$0xff]   ;;  %11526 = vmatprep.mubr.msk.bf16.mxu0 %vm18_vm1, %v730_v53  ;;  %v1026_v57 = vrot.slane %v1024_v49, 4 }
  0x77   :  { %v1031_v58 = vrot.slane %v1029_v50, 3  ;;  %v1034_v59 = vrot.slane %v1032_v51, 4  ;;  %437 = vst.msk [vmem:[#allocation2 + $0xc8] sm:$0xf] %vm414_vm3, %v12161_v52  ;;  %v12163_v60 = vld [vmem:[%s15292_s0 + $0x64] ss:$0 sps:$4 sm:$0xff]  }
  0x78   :  { %v747_v61 = vsel %vm543_vm4, %v738_v54, %v746_v55  ;;  %438 = vst.msk [vmem:[#allocation2 + $0xd0] sm:$0xf0] %vm412_vm2, %v12162_v56  ;;  %v12164_v62 = vld [vmem:[%s15292_s0 + $0xe8] ss:$0 sps:$4 sm:$0xff]   ;;  %v1027_v63 = vor.u32 %v1026_v57, %v1023_v48  ;;  %v12165_v3 = vld [vmem:[%s15292_s0 + $0xec] ss:$0 sps:$4 sm:$0xff]  }
  0x79   :  { %11527 = vmatmul.mubr.msk.bf16.gmra.mrb[20].mxu0 %vm18_vm1, %v747_v61  ;;  %v1035_v0 = vor.u32 %v1034_v59, %v1031_v58  ;;  %v537_v1 = vld [vmem:[#allocation2 + $0x1f0] sm:$0xf8]  ;;  %439 = vst.msk [vmem:[#allocation2 + $0xd8] sm:$0xf] %vm414_vm3, %v12163_v60  ;;  %473 = vst.msk [vmem:[#allocation2 + $0x208] sm:$0xf] %vm414_vm3, %v12165_v3 }
  0x7a   :  { %v538_v2 = vld [vmem:[#allocation2 + $0x1f8] sm:$0xf]  ;;  %v1038_v4 = vshrl.u32 %v537_v1, 16  ;;  %v1041_v5 = vshll.u32 %v537_v1, 16  ;;  %472 = vst.msk [vmem:[#allocation2 + $0x200] sm:$0xf0] %vm412_vm2, %v12164_v62 }
  0x7b   :  { %v1046_v6 = vshrl.u32 %v538_v2, 16  ;;  %v1049_v7 = vshll.u32 %v538_v2, 16  ;;  %v1036_v8 = vsel %vm543_vm4, %v1027_v63, %v1035_v0  ;;  %v12166_v10 = vld [vmem:[%s15292_s0 + $0xf0] ss:$0 sps:$4 sm:$0xff]   ;;  %v12167_v11 = vld [vmem:[%s15292_s0 + $0xf4] ss:$0 sps:$4 sm:$0xff]  }
  0x7c   :  { %11562 = vmatprep.mubr.msk.bf16.mxu1 %vm18_vm1, %v1036_v8  ;;  %v1040_v12 = vrot.slane %v1038_v4, 3  ;;  %v1043_v13 = vrot.slane %v1041_v5, 4  ;;  %474 = vst.msk [vmem:[#allocation2 + $0x210] sm:$0xf0] %vm412_vm2, %v12166_v10  ;;  %v12168_v17 = vld [vmem:[%s15292_s0 + $0x68] ss:$0 sps:$4 sm:$0xff]  }
  0x7d   :  { %v1048_v14 = vrot.slane %v1046_v6, 3  ;;  %v1051_v15 = vrot.slane %v1049_v7, 4  ;;  %v503_v16 = vld [vmem:[#allocation2 + $0xc0] sm:$0xf8]  ;;  %475 = vst.msk [vmem:[#allocation2 + $0x218] sm:$0xf] %vm414_vm3, %v12167_v11 }
  0x7e   :  { %v1044_v18 = vor.u32 %v1043_v13, %v1040_v12  ;;  %v504_v20 = vld [vmem:[#allocation2 + $0xc8] sm:$0xf]  ;;  %v749_v21 = vshrl.u32 %v503_v16, 16  ;;  %v752_v22 = vshll.u32 %v503_v16, 16  ;;  %v12169_v23 = vld [vmem:[%s15292_s0 + $0x6c] ss:$0 sps:$4 sm:$0xff]  }
  0x7f   :  { %v1052_v19 = vor.u32 %v1051_v15, %v1048_v14  ;;  %v757_v24 = vshrl.u32 %v504_v20, 16  ;;  %v760_v25 = vshll.u32 %v504_v20, 16  ;;  %v505_v9 = vld [vmem:[#allocation2 + $0xd0] sm:$0xf8]  ;;  %440 = vst.msk [vmem:[#allocation2 + $0xe0] sm:$0xf0] %vm412_vm2, %v12168_v17 }
  0x80   :  { %v751_v27 = vrot.slane %v749_v21, 3  ;;  %v754_v28 = vrot.slane %v752_v22, 4  ;;  %v506_v29 = vld [vmem:[#allocation2 + $0xd8] sm:$0xf]  ;;  %v766_v30 = vshrl.u32 %v505_v9, 16  ;;  %v769_v33 = vshll.u32 %v505_v9, 16 }
  0x81   :  { %v1053_v26 = vsel %vm543_vm4, %v1044_v18, %v1052_v19  ;;  %441 = vst.msk [vmem:[#allocation2 + $0xe8] sm:$0xf] %vm414_vm3, %v12169_v23  ;;  %v759_v31 = vrot.slane %v757_v24, 3  ;;  %v762_v32 = vrot.slane %v760_v25, 4  ;;  %v774_v34 = vshrl.u32 %v506_v29, 16 }
  0x82   :  { %11563 = vmatmul.mubr.msk.bf16.gmra.mrb[24].mxu1 %vm18_vm1, %v1053_v26  ;;  %v539_v35 = vld [vmem:[#allocation2 + $0x200] sm:$0xf8]  ;;  %v755_v36 = vor.u32 %v754_v28, %v751_v27  ;;  %v768_v37 = vrot.slane %v766_v30, 3  ;;  %v777_v38 = vshll.u32 %v506_v29, 16  ;;  %v540_v39 = vld [vmem:[#allocation2 + $0x208] sm:$0xf] }
  0x83   :  { %v1055_v40 = vshrl.u32 %v539_v35, 16  ;;  %v763_v41 = vor.u32 %v762_v32, %v759_v31  ;;  %v771_v42 = vrot.slane %v769_v33, 4  ;;  %v776_v43 = vrot.slane %v774_v34, 3  ;;  %v541_v49 = vld [vmem:[#allocation2 + $0x210] sm:$0xf8] }
  0x84   :  { %v1058_v44 = vshll.u32 %v539_v35, 16  ;;  %v779_v45 = vrot.slane %v777_v38, 4  ;;  %v1063_v47 = vshrl.u32 %v540_v39, 16  ;;  %v1066_v48 = vshll.u32 %v540_v39, 16  ;;  %v542_v53 = vld [vmem:[#allocation2 + $0x218] sm:$0xf] }
  0x85   :  { %v1057_v46 = vrot.slane %v1055_v40, 3  ;;  %v764_v50 = vsel %vm543_vm4, %v755_v36, %v763_v41  ;;  %v772_v51 = vor.u32 %v771_v42, %v768_v37  ;;  %v1072_v54 = vshrl.u32 %v541_v49, 16  ;;  %v12170_v55 = vld [vmem:[%s15292_s0 + $0x70] ss:$0 sps:$4 sm:$0xff]   ;;  %v12171_v6 = vld [vmem:[%s15292_s0 + $0x74] ss:$0 sps:$4 sm:$0xff]  }
  0x86   :  { %v1060_v52 = vrot.slane %v1058_v44, 4  ;;  %11530 = vmatprep.mubr.msk.bf16.mxu0 %vm18_vm1, %v764_v50  ;;  %v780_v56 = vor.u32 %v779_v45, %v776_v43  ;;  %v1065_v57 = vrot.slane %v1063_v47, 3  ;;  %v1068_v58 = vrot.slane %v1066_v48, 4  ;;  %v507_v60 = vld [vmem:[#allocation2 + $0xe0] sm:$0xf8] }
  0x87   :  { %v1075_v59 = vshll.u32 %v541_v49, 16  ;;  %v1074_v62 = vrot.slane %v1072_v54, 3  ;;  %v1080_v63 = vshrl.u32 %v542_v53, 16  ;;  %v1083_v0 = vshll.u32 %v542_v53, 16  ;;  %442 = vst.msk [vmem:[#allocation2 + $0xf0] sm:$0xf0] %vm412_vm2, %v12170_v55 }
  0x88   :  { %v1061_v61 = vor.u32 %v1060_v52, %v1057_v46  ;;  %v508_v1 = vld [vmem:[#allocation2 + $0xe8] sm:$0xf]  ;;  %v781_v2 = vsel %vm543_vm4, %v772_v51, %v780_v56  ;;  %v1069_v3 = vor.u32 %v1068_v58, %v1065_v57  ;;  %v783_v5 = vshrl.u32 %v507_v60, 16  ;;  %v1744_v7 = vld [vmem:[#allocation2] sm:$0xf0] }
  0x89   :  { %v1077_v4 = vrot.slane %v1075_v59, 4  ;;  %11531 = vmatmul.mubr.msk.bf16.gmra.mrb[24].mxu0 %vm18_vm1, %v781_v2  ;;  %v1082_v8 = vrot.slane %v1080_v63, 3  ;;  %v1085_v10 = vrot.slane %v1083_v0, 4  ;;  %v786_v11 = vshll.u32 %v507_v60, 16  ;;  %v1745_v13 = vld [vmem:[#allocation2 + $0x8] sm:$0xf] }
  0x8a   :  { %v791_v12 = vshrl.u32 %v508_v1, 16  ;;  %v1070_v14 = vsel %vm543_vm4, %v1061_v61, %v1069_v3  ;;  %v785_v16 = vrot.slane %v783_v5, 3  ;;  %v794_v17 = vshll.u32 %v508_v1, 16  ;;  %443 = vst.msk [vmem:[#allocation2 + $0xf8] sm:$0xf] %vm414_vm3, %v12171_v6 }
  0x8b   :  { %v1078_v15 = vor.u32 %v1077_v4, %v1074_v62  ;;  %v1746_v18 = vld [vmem:[#allocation2 + $0x10] sm:$0xf0]  ;;  %11566 = vmatprep.mubr.msk.bf16.mxu1 %vm18_vm1, %v1070_v14  ;;  %v1086_v19 = vor.u32 %v1085_v10, %v1082_v8  ;;  %v788_v20 = vrot.slane %v786_v11, 4  ;;  %v1873_v22 = vrot.slane %v1744_v7, 4  ;;  %v1747_v9 = vld [vmem:[#allocation2 + $0x18] sm:$0xf] }
  0x8c   :  { %v793_v21 = vrot.slane %v791_v12, 3  ;;  %v12172_v23 = vld [vmem:[%s15291_s1 + $0x4] ss:$0 sps:$4 sm:$0xcc]   ;;  %v796_v24 = vrot.slane %v794_v17, 4  ;;  %v1874_v25 = vrot.slane %v1745_v13, 4 }
  0x8d   :  { %v1876_v26 = vrot.slane %v1746_v18, 4  ;;  %v1087_v27 = vsel %vm543_vm4, %v1078_v15, %v1086_v19  ;;  %v789_v28 = vor.u32 %v788_v20, %v785_v16  ;;  %v4356_v29 = vrot.slane %v12172_v23, 2  ;;  %v2555_v31 = vld [vmem:[#allocation2] sm:$0xf0]  ;;  %v2556_v32 = vld [vmem:[#allocation2 + $0x8] sm:$0x1f] }
  0x8e   :  { %v1877_v30 = vrot.slane %v1747_v9, 4  ;;  %11567 = vmatmul.mubr.msk.bf16.gmra.mrb[28].mxu1 %vm18_vm1, %v1087_v27  ;;  %v797_v33 = vor.u32 %v796_v24, %v793_v21  ;;  %v509_v34 = vld [vmem:[#allocation2 + $0xf0] sm:$0xf8]  ;;  %v1875_v35 = vsel %vm1872_vm5, %v1873_v22, %v1874_v25  ;;  %v2621_v36 = vshrl.u32 %v2555_v31, 16  ;;  %v1748_v41 = vld [vmem:[#allocation2 + $0x20] sm:$0xf0] }
  0x8f   :  { %v800_v37 = vshrl.u32 %v509_v34, 16  ;;  %v803_v38 = vshll.u32 %v509_v34, 16  ;;  %11572 = vmatprep.mubr.msk.bf16.mxu1 %vm18_vm1, %v1875_v35  ;;  %12104 = vmatprep.subr.msk.bf16.mxu1 %vm1184_vm0, %v4356_v29  ;;  %v4454_v40 = vsel %vm1184_vm0, %v4356_v29, 0  ;;  %v2624_v44 = vshll.u32 %v2555_v31, 16  ;;  %v1749_v46 = vld [vmem:[#allocation2 + $0x28] sm:$0xf] }
  0x90   :  { %v1878_v39 = vsel %vm1872_vm5, %v1876_v26, %v1877_v30  ;;  %v798_v42 = vsel %vm543_vm4, %v789_v28, %v797_v33  ;;  %v2623_v43 = vrot.slane %v2621_v36, 4  ;;  %v2629_v45 = vshrl.u32 %v2556_v32, 16  ;;  %v2557_v56 = vld [vmem:[#allocation2 + $0x10] sm:$0xf0]  ;;  %v2558_v60 = vld [vmem:[#allocation2 + $0x18] sm:$0x1f] }
  0x91   :  { %11534 = vmatprep.mubr.msk.bf16.mxu0 %vm18_vm1, %v798_v42  ;;  %v510_v47 = vld [vmem:[#allocation2 + $0xf8] sm:$0xf]  ;;  %v802_v48 = vrot.slane %v800_v37, 3  ;;  %v805_v49 = vrot.slane %v803_v38, 4  ;;  %v2632_v50 = vshll.u32 %v2556_v32, 16  ;;  %v1879_v51 = vrot.slane %v1748_v41, 4 }
  0x92   :  { %v808_v52 = vshrl.u32 %v510_v47, 16  ;;  %v811_v53 = vshll.u32 %v510_v47, 16  ;;  %v2626_v54 = vrot.slane %v2624_v44, 5  ;;  %v2631_v55 = vrot.slane %v2629_v45, 4  ;;  %v1750_v2 = vld [vmem:[#allocation2 + $0x30] sm:$0xf0] }
  0x93   :  { %v806_v57 = vor.u32 %v805_v49, %v802_v48  ;;  %v2634_v58 = vrot.slane %v2632_v50, 5  ;;  %v1880_v59 = vrot.slane %v1749_v46, 4  ;;  %v2638_v61 = vshrl.u32 %v2557_v56, 16  ;;  %v1751_v7 = vld [vmem:[#allocation2 + $0x38] sm:$0xf] }
  0x94   :  { %v810_v62 = vrot.slane %v808_v52, 3  ;;  %v813_v63 = vrot.slane %v811_v53, 4  ;;  %v2627_v0 = vor.u32 %v2626_v54, %v2623_v43  ;;  %v2641_v1 = vshll.u32 %v2557_v56, 16  ;;  %v4937_v8 = vld [vmem:[%s15291_s1 + $0x8] sm:$0x3] }
  0x95   :  { %v2635_v3 = vor.u32 %v2634_v58, %v2631_v55  ;;  %v1881_v4 = vsel %vm1872_vm5, %v1879_v51, %v1880_v59  ;;  %v2640_v5 = vrot.slane %v2638_v61, 4  ;;  %v2646_v6 = vshrl.u32 %v2558_v60, 16  ;;  %12105 = vmatprep.subr.msk.bf16.mxu0 %vm1184_vm0, %v4937_v8  ;;  %v2559_v14 = vld [vmem:[#allocation2 + $0x20] sm:$0xf0]  ;;  %v2560_v19 = vld [vmem:[#allocation2 + $0x28] sm:$0x1f] }
  0x96   :  { %v814_v10 = vor.u32 %v813_v63, %v810_v62  ;;  %11573 = vmatmul.mubr.msk.bf16.vlgmr.msra.gmra.mrb[32].mxu1 %vm18_vm1, %v1878_v39  ;;  %v2643_v11 = vrot.slane %v2641_v1, 5  ;;  %v2649_v12 = vshll.u32 %v2558_v60, 16  ;;  %v1882_v13 = vrot.slane %v1750_v2, 4  ;;  %v1752_v24 = vld [vmem:[#allocation2 + $0x40] sm:$0xf0] }
  0x97   :  { %11703 = vmatpush3.bf16.msra.mxu1 %v4454_v40  ;;  %v2636_v15 = vsel %vm2619_vm6, %v2627_v0, %v2635_v3  ;;  %11576 = vmatprep.mubr.msk.bf16.mxu1 %vm18_vm1, %v1881_v4  ;;  %v2648_v16 = vrot.slane %v2646_v6, 4  ;;  %v1883_v17 = vrot.slane %v1751_v7, 4  ;;  %v5259_v18 = vsel %vm1184_vm0, %v4937_v8, 0  ;;  %v1753_v25 = vld [vmem:[#allocation2 + $0x48] sm:$0xf] }
  0x98   :  { %v815_v20 = vsel %vm543_vm4, %v806_v57, %v814_v10  ;;  %v2644_v21 = vor.u32 %v2643_v11, %v2640_v5  ;;  %v2651_v22 = vrot.slane %v2649_v12, 5  ;;  %v2655_v23 = vshrl.u32 %v2559_v14, 16  ;;  %v2561_v29 = vld [vmem:[#allocation2 + $0x30] sm:$0xf0]  ;;  %v2562_v34 = vld [vmem:[#allocation2 + $0x38] sm:$0x1f] }
  0x99   :  { %11535 = vmatmul.mubr.msk.bf16.gmra.mrb[28].mxu0 %vm18_vm1, %v815_v20  ;;  %v1884_v9 = vsel %vm1872_vm5, %v1882_v13, %v1883_v17  ;;  %v2658_v26 = vshll.u32 %v2559_v14, 16  ;;  %v2663_v27 = vshrl.u32 %v2560_v19, 16  ;;  %v2666_v28 = vshll.u32 %v2560_v19, 16  ;;  %v1754_v39 = vld [vmem:[#allocation2 + $0x50] sm:$0xf0] }
  0x9a   :  { %11638 = vmatprep.mubr.msk.bf16.mxu0 %vm18_vm1, %v2636_v15  ;;  %v2652_v30 = vor.u32 %v2651_v22, %v2648_v16  ;;  %v2657_v31 = vrot.slane %v2655_v23, 4  ;;  %v1885_v32 = vrot.slane %v1752_v24, 4  ;;  %v1886_v33 = vrot.slane %v1753_v25, 4  ;;  %v1755_v44 = vld [vmem:[#allocation2 + $0x58] sm:$0xf] }
  0x9b   :  { %v2660_v35 = vrot.slane %v2658_v26, 5  ;;  %v2665_v36 = vrot.slane %v2663_v27, 4  ;;  %v2668_v37 = vrot.slane %v2666_v28, 5  ;;  %v2672_v38 = vshrl.u32 %v2561_v29, 16  ;;  %v2563_v45 = vld [vmem:[#allocation2 + $0x40] sm:$0xf0] }
  0x9c   :  { %v2653_v40 = vsel %vm2619_vm6, %v2644_v21, %v2652_v30  ;;  %v1887_v41 = vsel %vm1872_vm5, %v1885_v32, %v1886_v33  ;;  %v2675_v42 = vshll.u32 %v2561_v29, 16  ;;  %v2680_v43 = vshrl.u32 %v2562_v34, 16  ;;  %v2564_v50 = vld [vmem:[#allocation2 + $0x48] sm:$0x1f]  ;;  %v1756_v51 = vld [vmem:[#allocation2 + $0x60] sm:$0xf0] }
  0x9d   :  { %v2661_v46 = vor.u32 %v2660_v35, %v2657_v31  ;;  %v2669_v47 = vor.u32 %v2668_v37, %v2665_v36  ;;  %v2674_v48 = vrot.slane %v2672_v38, 4  ;;  %v2683_v49 = vshll.u32 %v2562_v34, 16  ;;  %v1757_v56 = vld [vmem:[#allocation2 + $0x68] sm:$0xf]  ;;  %v2565_v61 = vld [vmem:[#allocation2 + $0x50] sm:$0xf0] }
  0x9e   :  { %11577 = vmatmul.mubr.msk.bf16.gmra.mrb[36].mxu1 %vm18_vm1, %v1884_v9  ;;  %v2677_v52 = vrot.slane %v2675_v42, 5  ;;  %v2682_v53 = vrot.slane %v2680_v43, 4  ;;  %v1888_v54 = vrot.slane %v1754_v39, 4  ;;  %v1889_v55 = vrot.slane %v1755_v44, 4  ;;  %v2566_v2 = vld [vmem:[#allocation2 + $0x58] sm:$0x1f] }
  0x9f   :  { %v2670_v57 = vsel %vm2619_vm6, %v2661_v46, %v2669_v47  ;;  %11580 = vmatprep.mubr.msk.bf16.mxu1 %vm18_vm1, %v1887_v41  ;;  %v2685_v58 = vrot.slane %v2683_v49, 5  ;;  %v2689_v59 = vshrl.u32 %v2563_v45, 16  ;;  %v2692_v60 = vshll.u32 %v2563_v45, 16  ;;  %v1758_v7 = vld [vmem:[#allocation2 + $0x70] sm:$0xf0] }
  0xa0   :  { %v2678_v62 = vor.u32 %v2677_v52, %v2674_v48  ;;  %v1890_v63 = vsel %vm1872_vm5, %v1888_v54, %v1889_v55  ;;  %v2697_v0 = vshrl.u32 %v2564_v50, 16  ;;  %v2700_v1 = vshll.u32 %v2564_v50, 16  ;;  %v1759_v13 = vld [vmem:[#allocation2 + $0x78] sm:$0xf]  ;;  %v2567_v19 = vld [vmem:[#allocation2 + $0x60] sm:$0xf0] }
  0xa1   :  { %11639 = vmatmul.mubr.msk.bf16.vlgmr.msra.gmra.mrb[32].mxu0 %vm18_vm1, %v2653_v40  ;;  %v2686_v3 = vor.u32 %v2685_v58, %v2682_v53  ;;  %v2691_v4 = vrot.slane %v2689_v59, 4  ;;  %v2694_v5 = vrot.slane %v2692_v60, 5  ;;  %v1891_v6 = vrot.slane %v1756_v51, 4  ;;  %v2568_v24 = vld [vmem:[#allocation2 + $0x68] sm:$0x1f] }
  0xa2   :  { %11769 = vmatpush3.bf16.msra.mxu0 %v5259_v18  ;;  %11642 = vmatprep.mubr.msk.bf16.mxu0 %vm18_vm1, %v2670_v57  ;;  %v2699_v8 = vrot.slane %v2697_v0, 4  ;;  %v2702_v10 = vrot.slane %v2700_v1, 5  ;;  %v1892_v11 = vrot.slane %v1757_v56, 4  ;;  %v2706_v12 = vshrl.u32 %v2565_v61, 16  ;;  %v1760_v18 = vld [vmem:[#allocation2 + $0x80] sm:$0xf0] }
  0xa3   :  { %v2687_v14 = vsel %vm2619_vm6, %v2678_v62, %v2686_v3  ;;  %v2695_v15 = vor.u32 %v2694_v5, %v2691_v4  ;;  %v2709_v16 = vshll.u32 %v2565_v61, 16  ;;  %v2714_v17 = vshrl.u32 %v2566_v2, 16  ;;  %v1761_v28 = vld [vmem:[#allocation2 + $0x88] sm:$0xf]  ;;  %v2569_v33 = vld [vmem:[#allocation2 + $0x70] sm:$0xf0] }
  0xa4   :  { %v2703_v20 = vor.u32 %v2702_v10, %v2699_v8  ;;  %v1893_v21 = vsel %vm1872_vm5, %v1891_v6, %v1892_v11  ;;  %v2708_v22 = vrot.slane %v2706_v12, 4  ;;  %v2717_v23 = vshll.u32 %v2566_v2, 16  ;;  %v2570_v38 = vld [vmem:[#allocation2 + $0x78] sm:$0x1f]  ;;  %v1762_v43 = vld [vmem:[#allocation2 + $0x90] sm:$0xf0] }
  0xa5   :  { %v2711_v25 = vrot.slane %v2709_v16, 5  ;;  %v2716_v9 = vrot.slane %v2714_v17, 4  ;;  %v1894_v26 = vrot.slane %v1758_v7, 4  ;;  %v1895_v27 = vrot.slane %v1759_v13, 4  ;;  %v1763_v48 = vld [vmem:[#allocation2 + $0x98] sm:$0xf] }
  0xa6   :  { %11581 = vmatmul.mubr.msk.bf16.gmra.mrb[40].mxu1 %vm18_vm1, %v1890_v63  ;;  %v2704_v29 = vsel %vm2619_vm6, %v2695_v15, %v2703_v20  ;;  %v2719_v30 = vrot.slane %v2717_v23, 5  ;;  %v2723_v31 = vshrl.u32 %v2567_v19, 16  ;;  %v2726_v32 = vshll.u32 %v2567_v19, 16  ;;  %v2571_v53 = vld [vmem:[#allocation2 + $0x80] sm:$0xf0] }
  0xa7   :  { %11584 = vmatprep.mubr.msk.bf16.mxu1 %vm18_vm1, %v1893_v21  ;;  %v2712_v34 = vor.u32 %v2711_v25, %v2708_v22  ;;  %v1896_v35 = vsel %vm1872_vm5, %v1894_v26, %v1895_v27  ;;  %v2731_v36 = vshrl.u32 %v2568_v24, 16  ;;  %v2734_v37 = vshll.u32 %v2568_v24, 16  ;;  %v2572_v58 = vld [vmem:[#allocation2 + $0x88] sm:$0x1f]  ;;  %v1764_v59 = vld [vmem:[#allocation2 + $0xa0] sm:$0xf0] }
  0xa8   :  { %v2720_v39 = vor.u32 %v2719_v30, %v2716_v9  ;;  %v2725_v40 = vrot.slane %v2723_v31, 4  ;;  %v2728_v41 = vrot.slane %v2726_v32, 5  ;;  %v1897_v42 = vrot.slane %v1760_v18, 4  ;;  %v1765_v0 = vld [vmem:[#allocation2 + $0xa8] sm:$0xf] }
  0xa9   :  { %11643 = vmatmul.mubr.msk.bf16.gmra.mrb[36].mxu0 %vm18_vm1, %v2687_v14  ;;  %v2733_v44 = vrot.slane %v2731_v36, 4  ;;  %v2736_v45 = vrot.slane %v2734_v37, 5  ;;  %v1898_v46 = vrot.slane %v1761_v28, 4  ;;  %v2740_v47 = vshrl.u32 %v2569_v33, 16  ;;  %v2573_v5 = vld [vmem:[#allocation2 + $0x90] sm:$0xf0] }
  0xaa   :  { %11646 = vmatprep.mubr.msk.bf16.mxu0 %vm18_vm1, %v2704_v29  ;;  %v2721_v49 = vsel %vm2619_vm6, %v2712_v34, %v2720_v39  ;;  %v2729_v50 = vor.u32 %v2728_v41, %v2725_v40  ;;  %v2743_v51 = vshll.u32 %v2569_v33, 16  ;;  %v2748_v52 = vshrl.u32 %v2570_v38, 16  ;;  %v2574_v11 = vld [vmem:[#allocation2 + $0x98] sm:$0x1f]  ;;  %v1766_v16 = vld [vmem:[#allocation2 + $0xb0] sm:$0xf0] }
  0xab   :  { %v2737_v54 = vor.u32 %v2736_v45, %v2733_v44  ;;  %v1899_v55 = vsel %vm1872_vm5, %v1897_v42, %v1898_v46  ;;  %v2742_v56 = vrot.slane %v2740_v47, 4  ;;  %v2751_v57 = vshll.u32 %v2570_v38, 16  ;;  %v1767_v22 = vld [vmem:[#allocation2 + $0xb8] sm:$0xf]  ;;  %v2575_v9 = vld [vmem:[#allocation2 + $0xa0] sm:$0xf0] }
  0xac   :  { %v2745_v60 = vrot.slane %v2743_v51, 5  ;;  %v2750_v61 = vrot.slane %v2748_v52, 4  ;;  %v1900_v62 = vrot.slane %v1762_v43, 4  ;;  %v1901_v63 = vrot.slane %v1763_v48, 4  ;;  %v2576_v30 = vld [vmem:[#allocation2 + $0xa8] sm:$0x1f] }
  0xad   :  { %v2738_v1 = vsel %vm2619_vm6, %v2729_v50, %v2737_v54  ;;  %v2753_v2 = vrot.slane %v2751_v57, 5  ;;  %v2757_v3 = vshrl.u32 %v2571_v53, 16  ;;  %v2760_v4 = vshll.u32 %v2571_v53, 16  ;;  %v1768_v31 = vld [vmem:[#allocation2 + $0xc0] sm:$0xf0] }
  0xae   :  { %11585 = vmatmul.mubr.msk.bf16.gmra.mrb[44].mxu1 %vm18_vm1, %v1896_v35  ;;  %v2746_v6 = vor.u32 %v2745_v60, %v2742_v56  ;;  %v1902_v7 = vsel %vm1872_vm5, %v1900_v62, %v1901_v63  ;;  %v2765_v8 = vshrl.u32 %v2572_v58, 16  ;;  %v2768_v10 = vshll.u32 %v2572_v58, 16  ;;  %v1769_v36 = vld [vmem:[#allocation2 + $0xc8] sm:$0xf]  ;;  %v2577_v41 = vld [vmem:[#allocation2 + $0xb0] sm:$0xf0] }
  0xaf   :  { %11588 = vmatprep.mubr.msk.bf16.mxu1 %vm18_vm1, %v1899_v55  ;;  %v2754_v12 = vor.u32 %v2753_v2, %v2750_v61  ;;  %v2759_v13 = vrot.slane %v2757_v3, 4  ;;  %v2762_v14 = vrot.slane %v2760_v4, 5  ;;  %v1903_v15 = vrot.slane %v1764_v59, 4  ;;  %v2578_v46 = vld [vmem:[#allocation2 + $0xb8] sm:$0x1f] }
  0xb0   :  { %v2767_v17 = vrot.slane %v2765_v8, 4  ;;  %v2770_v19 = vrot.slane %v2768_v10, 5  ;;  %v1904_v20 = vrot.slane %v1765_v0, 4  ;;  %v2774_v21 = vshrl.u32 %v2573_v5, 16  ;;  %v1770_v51 = vld [vmem:[#allocation2 + $0xd0] sm:$0xf0] }
  0xb1   :  { %11647 = vmatmul.mubr.msk.bf16.gmra.mrb[40].mxu0 %vm18_vm1, %v2721_v49  ;;  %v2755_v23 = vsel %vm2619_vm6, %v2746_v6, %v2754_v12  ;;  %v2763_v24 = vor.u32 %v2762_v14, %v2759_v13  ;;  %v2777_v18 = vshll.u32 %v2573_v5, 16  ;;  %v2782_v25 = vshrl.u32 %v2574_v11, 16  ;;  %v1771_v56 = vld [vmem:[#allocation2 + $0xd8] sm:$0xf]  ;;  %v2579_v61 = vld [vmem:[#allocation2 + $0xc0] sm:$0xf0] }
  0xb2   :  { %11650 = vmatprep.mubr.msk.bf16.mxu0 %vm18_vm1, %v2738_v1  ;;  %v2771_v26 = vor.u32 %v2770_v19, %v2767_v17  ;;  %v1905_v27 = vsel %vm1872_vm5, %v1903_v15, %v1904_v20  ;;  %v2776_v28 = vrot.slane %v2774_v21, 4  ;;  %v2785_v29 = vshll.u32 %v2574_v11, 16  ;;  %v2580_v2 = vld [vmem:[#allocation2 + $0xc8] sm:$0x1f]  ;;  %v1772_v3 = vld [vmem:[#allocation2 + $0xe0] sm:$0xf0] }
  0xb3   :  { %v2779_v32 = vrot.slane %v2777_v18, 5  ;;  %v2784_v33 = vrot.slane %v2782_v25, 4  ;;  %v1906_v34 = vrot.slane %v1766_v16, 4  ;;  %v1907_v35 = vrot.slane %v1767_v22, 4  ;;  %v1773_v8 = vld [vmem:[#allocation2 + $0xe8] sm:$0xf] }
  0xb4   :  { %v2772_v37 = vsel %vm2619_vm6, %v2763_v24, %v2771_v26  ;;  %v2787_v38 = vrot.slane %v2785_v29, 5  ;;  %v2791_v39 = vshrl.u32 %v2575_v9, 16  ;;  %v2794_v40 = vshll.u32 %v2575_v9, 16  ;;  %v2581_v14 = vld [vmem:[#allocation2 + $0xd0] sm:$0xf0] }
  0xb5   :  { %v2780_v42 = vor.u32 %v2779_v32, %v2776_v28  ;;  %v1908_v43 = vsel %vm1872_vm5, %v1906_v34, %v1907_v35  ;;  %v2799_v44 = vshrl.u32 %v2576_v30, 16  ;;  %v2802_v45 = vshll.u32 %v2576_v30, 16  ;;  %v2582_v20 = vld [vmem:[#allocation2 + $0xd8] sm:$0x1f]  ;;  %v1774_v18 = vld [vmem:[#allocation2 + $0xf0] sm:$0xf0] }
  0xb6   :  { %11589 = vmatmul.mubr.msk.bf16.gmra.mrb[48].mxu1 %vm18_vm1, %v1902_v7  ;;  %v2788_v47 = vor.u32 %v2787_v38, %v2784_v33  ;;  %v2793_v48 = vrot.slane %v2791_v39, 4  ;;  %v2796_v49 = vrot.slane %v2794_v40, 5  ;;  %v1909_v50 = vrot.slane %v1768_v31, 4  ;;  %v1775_v28 = vld [vmem:[#allocation2 + $0xf8] sm:$0xf] }
  0xb7   :  { %11592 = vmatprep.mubr.msk.bf16.mxu1 %vm18_vm1, %v1905_v27  ;;  %v2801_v52 = vrot.slane %v2799_v44, 4  ;;  %v2804_v53 = vrot.slane %v2802_v45, 5  ;;  %v1910_v54 = vrot.slane %v1769_v36, 4  ;;  %v2808_v55 = vshrl.u32 %v2577_v41, 16  ;;  %v2583_v33 = vld [vmem:[#allocation2 + $0xe0] sm:$0xf0] }
  0xb8   :  { %v2789_v57 = vsel %vm2619_vm6, %v2780_v42, %v2788_v47  ;;  %v2797_v58 = vor.u32 %v2796_v49, %v2793_v48  ;;  %v2811_v59 = vshll.u32 %v2577_v41, 16  ;;  %v2816_v60 = vshrl.u32 %v2578_v46, 16  ;;  %v2584_v38 = vld [vmem:[#allocation2 + $0xe8] sm:$0x1f]  ;;  %v1776_v39 = vld [vmem:[#allocation2 + $0x120] sm:$0xf0] }
  0xb9   :  { %11651 = vmatmul.mubr.msk.bf16.gmra.mrb[44].mxu0 %vm18_vm1, %v2755_v23  ;;  %v2805_v62 = vor.u32 %v2804_v53, %v2801_v52  ;;  %v1911_v63 = vsel %vm1872_vm5, %v1909_v50, %v1910_v54  ;;  %v2810_v0 = vrot.slane %v2808_v55, 4  ;;  %v2819_v1 = vshll.u32 %v2578_v46, 16  ;;  %v1777_v44 = vld [vmem:[#allocation2 + $0x128] sm:$0xf]  ;;  %v2585_v49 = vld [vmem:[#allocation2 + $0xf0] sm:$0xf0] }
  0xba   :  { %11654 = vmatprep.mubr.msk.bf16.mxu0 %vm18_vm1, %v2772_v37  ;;  %v2813_v4 = vrot.slane %v2811_v59, 5  ;;  %v2818_v5 = vrot.slane %v2816_v60, 4  ;;  %v1912_v6 = vrot.slane %v1770_v51, 4  ;;  %v1913_v7 = vrot.slane %v1771_v56, 4  ;;  %v2586_v54 = vld [vmem:[#allocation2 + $0xf8] sm:$0x1f] }
  0xbb   :  { %v2806_v10 = vsel %vm2619_vm6, %v2797_v58, %v2805_v62  ;;  %v2821_v11 = vrot.slane %v2819_v1, 5  ;;  %v2825_v12 = vshrl.u32 %v2579_v61, 16  ;;  %v2828_v13 = vshll.u32 %v2579_v61, 16  ;;  %v1778_v59 = vld [vmem:[#allocation2 + $0x130] sm:$0xf0] }
  0xbc   :  { %v2814_v15 = vor.u32 %v2813_v4, %v2810_v0  ;;  %v1914_v16 = vsel %vm1872_vm5, %v1912_v6, %v1913_v7  ;;  %v2833_v17 = vshrl.u32 %v2580_v2, 16  ;;  %v2836_v19 = vshll.u32 %v2580_v2, 16  ;;  %v1779_v0 = vld [vmem:[#allocation2 + $0x138] sm:$0xf] }
  0xbd   :  { %v2822_v21 = vor.u32 %v2821_v11, %v2818_v5  ;;  %v2827_v22 = vrot.slane %v2825_v12, 4  ;;  %v2830_v23 = vrot.slane %v2828_v13, 5  ;;  %v1915_v24 = vrot.slane %v1772_v3, 4  ;;  %v2587_v5 = vld [vmem:[#allocation2 + $0x120] sm:$0xf0] }
  0xbe   :  { %11593 = vmatmul.mubr.msk.bf16.gmra.mrb[52].mxu1 %vm18_vm1, %v1908_v43  ;;  %v2835_v25 = vrot.slane %v2833_v17, 4  ;;  %v2838_v9 = vrot.slane %v2836_v19, 5  ;;  %v1916_v26 = vrot.slane %v1773_v8, 4  ;;  %v2842_v27 = vshrl.u32 %v2581_v14, 16  ;;  %v2588_v11 = vld [vmem:[#allocation2 + $0x128] sm:$0x1f] }
  0xbf   :  { %11596 = vmatprep.mubr.msk.bf16.mxu1 %vm18_vm1, %v1911_v63  ;;  %v2823_v29 = vsel %vm2619_vm6, %v2814_v15, %v2822_v21  ;;  %v2831_v30 = vor.u32 %v2830_v23, %v2827_v22  ;;  %v2845_v31 = vshll.u32 %v2581_v14, 16  ;;  %v2850_v32 = vshrl.u32 %v2582_v20, 16  ;;  %v1780_v12 = vld [vmem:[#allocation2 + $0x140] sm:$0xf0]  ;;  %v2589_v23 = vld [vmem:[#allocation2 + $0x130] sm:$0xf0] }
  0xc0   :  { %v2839_v34 = vor.u32 %v2838_v9, %v2835_v25  ;;  %v1917_v35 = vsel %vm1872_vm5, %v1915_v24, %v1916_v26  ;;  %v2844_v36 = vrot.slane %v2842_v27, 4  ;;  %v2853_v37 = vshll.u32 %v2582_v20, 16  ;;  %v2590_v26 = vld [vmem:[#allocation2 + $0x138] sm:$0x1f] }
  0xc1   :  { %11655 = vmatmul.mubr.msk.bf16.gmra.mrb[48].mxu0 %vm18_vm1, %v2789_v57  ;;  %v2847_v40 = vrot.slane %v2845_v31, 5  ;;  %v2852_v41 = vrot.slane %v2850_v32, 4  ;;  %v1918_v42 = vrot.slane %v1774_v18, 4  ;;  %v1919_v43 = vrot.slane %v1775_v28, 4 }
  0xc2   :  { %11658 = vmatprep.mubr.msk.bf16.mxu0 %vm18_vm1, %v2806_v10  ;;  %v2840_v45 = vsel %vm2619_vm6, %v2831_v30, %v2839_v34  ;;  %v2855_v46 = vrot.slane %v2853_v37, 5  ;;  %v2859_v47 = vshrl.u32 %v2583_v33, 16  ;;  %v2862_v48 = vshll.u32 %v2583_v33, 16 }
  0xc3   :  { %v2848_v50 = vor.u32 %v2847_v40, %v2844_v36  ;;  %v1920_v51 = vsel %vm1872_vm5, %v1918_v42, %v1919_v43  ;;  %v2867_v52 = vshrl.u32 %v2584_v38, 16  ;;  %v2870_v53 = vshll.u32 %v2584_v38, 16  ;;  %v1783_v36 = vld [vmem:[#allocation2 + $0x158] sm:$0xf] }
  0xc4   :  { %v2856_v55 = vor.u32 %v2855_v46, %v2852_v41  ;;  %v2861_v56 = vrot.slane %v2859_v47, 4  ;;  %v2864_v57 = vrot.slane %v2862_v48, 5  ;;  %v1921_v58 = vrot.slane %v1776_v39, 4  ;;  %v2591_v41 = vld [vmem:[#allocation2 + $0x140] sm:$0xf0] }
  0xc5   :  { %v2869_v60 = vrot.slane %v2867_v52, 4  ;;  %v2872_v61 = vrot.slane %v2870_v53, 5  ;;  %v1922_v62 = vrot.slane %v1777_v44, 4  ;;  %v2876_v63 = vshrl.u32 %v2585_v49, 16  ;;  %v2592_v46 = vld [vmem:[#allocation2 + $0x148] sm:$0x1f] }
  0xc6   :  { %11597 = vmatmul.mubr.msk.bf16.gmra.mrb[56].mxu1 %vm18_vm1, %v1914_v16  ;;  %v2857_v1 = vsel %vm2619_vm6, %v2848_v50, %v2856_v55  ;;  %v2865_v2 = vor.u32 %v2864_v57, %v2861_v56  ;;  %v2879_v3 = vshll.u32 %v2585_v49, 16  ;;  %v2884_v4 = vshrl.u32 %v2586_v54, 16  ;;  %v1781_v16 = vld [vmem:[#allocation2 + $0x148] sm:$0xf]  ;;  %v1784_v47 = vld [vmem:[#allocation2 + $0x160] sm:$0xf0] }
  0xc7   :  { %11600 = vmatprep.mubr.msk.bf16.mxu1 %vm18_vm1, %v1917_v35  ;;  %v2873_v6 = vor.u32 %v2872_v61, %v2869_v60  ;;  %v1923_v7 = vsel %vm1872_vm5, %v1921_v58, %v1922_v62  ;;  %v2878_v8 = vrot.slane %v2876_v63, 4  ;;  %v2887_v10 = vshll.u32 %v2586_v54, 16  ;;  %v1785_v53 = vld [vmem:[#allocation2 + $0x168] sm:$0xf]  ;;  %v2594_v62 = vld [vmem:[#allocation2 + $0x158] sm:$0x1f] }
  0xc8   :  { %v2881_v13 = vrot.slane %v2879_v3, 5  ;;  %v2886_v14 = vrot.slane %v2884_v4, 4  ;;  %v1924_v15 = vrot.slane %v1778_v59, 4  ;;  %v1925_v17 = vrot.slane %v1779_v0, 4  ;;  %v1786_v4 = vld [vmem:[#allocation2 + $0x170] sm:$0xf0] }
  0xc9   :  { %11659 = vmatmul.mubr.msk.bf16.gmra.mrb[52].mxu0 %vm18_vm1, %v2823_v29  ;;  %v2874_v19 = vsel %vm2619_vm6, %v2865_v2, %v2873_v6  ;;  %v2889_v20 = vrot.slane %v2887_v10, 5  ;;  %v2893_v21 = vshrl.u32 %v2587_v5, 16  ;;  %v2896_v22 = vshll.u32 %v2587_v5, 16  ;;  %v1782_v29 = vld [vmem:[#allocation2 + $0x150] sm:$0xf0] }
  0xca   :  { %11662 = vmatprep.mubr.msk.bf16.mxu0 %vm18_vm1, %v2840_v45  ;;  %v2882_v24 = vor.u32 %v2881_v13, %v2878_v8  ;;  %v12750_v18 = vsel %vm1872_vm5, %v1924_v15, %v1925_v17  ;;  %v2901_v25 = vshrl.u32 %v2588_v11, 16  ;;  %v2904_v9 = vshll.u32 %v2588_v11, 16  ;;  %v1787_v10 = vld [vmem:[#allocation2 + $0x178] sm:$0xf] }
  0xcb   :  { %v2890_v27 = vor.u32 %v2889_v20, %v2886_v14  ;;  %v2895_v28 = vrot.slane %v2893_v21, 4  ;;  %v2898_v30 = vrot.slane %v2896_v22, 5  ;;  %v1927_v31 = vrot.slane %v1780_v12, 4  ;;  %v2595_v14 = vld [vmem:[#allocation2 + $0x160] sm:$0xf0] }
  0xcc   :  { %v2903_v32 = vrot.slane %v2901_v25, 4  ;;  %v2906_v33 = vrot.slane %v2904_v9, 5  ;;  %v1928_v34 = vrot.slane %v1781_v16, 4  ;;  %v2910_v35 = vshrl.u32 %v2589_v23, 16  ;;  %v2596_v20 = vld [vmem:[#allocation2 + $0x168] sm:$0x1f] }
  0xcd   :  { %v12753_v37 = vsel %vm2619_vm6, %v2882_v24, %v2890_v27  ;;  %v2899_v38 = vor.u32 %v2898_v30, %v2895_v28  ;;  %v2913_v39 = vshll.u32 %v2589_v23, 16  ;;  %v2918_v40 = vshrl.u32 %v2590_v26, 16  ;;  %v1788_v21 = vld [vmem:[#allocation2 + $0x180] sm:$0xf0]  ;;  %v1789_v9 = vld [vmem:[#allocation2 + $0x188] sm:$0xf] }
  0xce   :  { %11601 = vmatmul.mubr.msk.bf16.gmra.mrb[60].mxu1 %vm18_vm1, %v1920_v51  ;;  %v2907_v42 = vor.u32 %v2906_v33, %v2903_v32  ;;  %v1929_v43 = vsel %vm1872_vm5, %v1927_v31, %v1928_v34  ;;  %v2912_v44 = vrot.slane %v2910_v35, 4  ;;  %v2921_v45 = vshll.u32 %v2590_v26, 16  ;;  %v2593_v51 = vld [vmem:[#allocation2 + $0x150] sm:$0xf0] }
  0xcf   :  { %11604 = vmatprep.mubr.msk.bf16.mxu1 %vm18_vm1, %v1923_v7  ;;  %v2915_v48 = vrot.slane %v2913_v39, 5  ;;  %v2920_v49 = vrot.slane %v2918_v40, 4  ;;  %v1930_v50 = vrot.slane %v1782_v29, 4  ;;  %v1931_v52 = vrot.slane %v1783_v36, 4  ;;  %v2597_v31 = vld [vmem:[#allocation2 + $0x170] sm:$0xf0] }
  0xd0   :  { %v2908_v54 = vsel %vm2619_vm6, %v2899_v38, %v2907_v42  ;;  %v2923_v55 = vrot.slane %v2921_v45, 5  ;;  %v2927_v56 = vshrl.u32 %v2591_v41, 16  ;;  %v2930_v57 = vshll.u32 %v2591_v41, 16  ;;  %v1790_v40 = vld [vmem:[#allocation2 + $0x190] sm:$0xf0] }
  0xd1   :  { %11663 = vmatmul.mubr.msk.bf16.gmra.mrb[56].mxu0 %vm18_vm1, %v2857_v1  ;;  %v2916_v58 = vor.u32 %v2915_v48, %v2912_v44  ;;  %v12761_v59 = vsel %vm1872_vm5, %v1930_v50, %v1931_v52  ;;  %v2935_v60 = vshrl.u32 %v2592_v46, 16  ;;  %v2938_v61 = vshll.u32 %v2592_v46, 16  ;;  %v1791_v45 = vld [vmem:[#allocation2 + $0x198] sm:$0xf]  ;;  %v2599_v50 = vld [vmem:[#allocation2 + $0x180] sm:$0xf0] }
  0xd2   :  { %11666 = vmatprep.mubr.msk.bf16.mxu0 %vm18_vm1, %v2874_v19  ;;  %v2924_v63 = vor.u32 %v2923_v55, %v2920_v49  ;;  %v2929_v0 = vrot.slane %v2927_v56, 4  ;;  %v2932_v2 = vrot.slane %v2930_v57, 5  ;;  %v1933_v3 = vrot.slane %v1784_v47, 4  ;;  %v2600_v56 = vld [vmem:[#allocation2 + $0x188] sm:$0x1f] }
  0xd3   :  { %v2937_v5 = vrot.slane %v2935_v60, 4  ;;  %v2940_v6 = vrot.slane %v2938_v61, 5  ;;  %v1934_v7 = vrot.slane %v1785_v53, 4  ;;  %v2944_v8 = vshrl.u32 %v2593_v51, 16  ;;  %v1792_v57 = vld [vmem:[#allocation2 + $0x1a0] sm:$0xf0] }
  0xd4   :  { %v12765_v1 = vsel %vm2619_vm6, %v2916_v58, %v2924_v63  ;;  %v2933_v11 = vor.u32 %v2932_v2, %v2929_v0  ;;  %v2947_v12 = vshll.u32 %v2593_v51, 16  ;;  %v2952_v13 = vshrl.u32 %v2594_v62, 16  ;;  %v1793_v61 = vld [vmem:[#allocation2 + $0x1a8] sm:$0xf] }
  0xd5   :  { %v2941_v15 = vor.u32 %v2940_v6, %v2937_v5  ;;  %v1935_v17 = vsel %vm1872_vm5, %v1933_v3, %v1934_v7  ;;  %v2946_v16 = vrot.slane %v2944_v8, 4  ;;  %v2955_v19 = vshll.u32 %v2594_v62, 16  ;;  %v2601_v3 = vld [vmem:[#allocation2 + $0x190] sm:$0xf0]  ;;  %v2602_v8 = vld [vmem:[#allocation2 + $0x198] sm:$0x1f] }
  0xd6   :  { %11605 = vmatmul.mubr.msk.bf16.gmra.mrb[64].mxu1 %vm18_vm1, %v12750_v18  ;;  %v2949_v22 = vrot.slane %v2947_v12, 5  ;;  %v2954_v23 = vrot.slane %v2952_v13, 4  ;;  %v1936_v24 = vrot.slane %v1786_v4, 4  ;;  %v1937_v25 = vrot.slane %v1787_v10, 4  ;;  %v2598_v18 = vld [vmem:[#allocation2 + $0x178] sm:$0x1f] }
  0xd7   :  { %11608 = vmatprep.mubr.msk.bf16.mxu1 %vm18_vm1, %v1929_v43  ;;  %v2942_v26 = vsel %vm2619_vm6, %v2933_v11, %v2941_v15  ;;  %v2957_v27 = vrot.slane %v2955_v19, 5  ;;  %v2961_v28 = vshrl.u32 %v2595_v14, 16  ;;  %v2964_v30 = vshll.u32 %v2595_v14, 16  ;;  %v1794_v13 = vld [vmem:[#allocation2 + $0x1b0] sm:$0xf0] }
  0xd8   :  { %v2950_v29 = vor.u32 %v2949_v22, %v2946_v16  ;;  %v12773_v32 = vsel %vm1872_vm5, %v1936_v24, %v1937_v25  ;;  %v2969_v33 = vshrl.u32 %v2596_v20, 16  ;;  %v2972_v34 = vshll.u32 %v2596_v20, 16  ;;  %v2603_v24 = vld [vmem:[#allocation2 + $0x1a0] sm:$0xf0] }
  0xd9   :  { %11667 = vmatmul.mubr.msk.bf16.gmra.mrb[60].mxu0 %vm18_vm1, %v12753_v37  ;;  %v2958_v35 = vor.u32 %v2957_v27, %v2954_v23  ;;  %v2963_v36 = vrot.slane %v2961_v28, 4  ;;  %v2966_v38 = vrot.slane %v2964_v30, 5  ;;  %v1939_v39 = vrot.slane %v1788_v21, 4  ;;  %v2604_v28 = vld [vmem:[#allocation2 + $0x1a8] sm:$0x1f] }
  0xda   :  { %11670 = vmatprep.mubr.msk.bf16.mxu0 %vm18_vm1, %v2908_v54  ;;  %v2971_v41 = vrot.slane %v2969_v33, 4  ;;  %v2974_v42 = vrot.slane %v2972_v34, 5  ;;  %v1940_v43 = vrot.slane %v1789_v9, 4  ;;  %v2978_v44 = vshrl.u32 %v2597_v31, 16  ;;  %v1796_v30 = vld [vmem:[#allocation2 + $0x1c0] sm:$0xf0] }
  0xdb   :  { %v12779_v46 = vsel %vm2619_vm6, %v2950_v29, %v2958_v35  ;;  %v2967_v47 = vor.u32 %v2966_v38, %v2963_v36  ;;  %v2981_v48 = vshll.u32 %v2597_v31, 16  ;;  %v2986_v49 = vshrl.u32 %v2598_v18, 16 }
  0xdc   :  { %v2975_v37 = vor.u32 %v2974_v42, %v2971_v41  ;;  %v1941_v52 = vsel %vm1872_vm5, %v1939_v39, %v1940_v43  ;;  %v2980_v53 = vrot.slane %v2978_v44, 4  ;;  %v2989_v55 = vshll.u32 %v2598_v18, 16  ;;  %v2605_v39 = vld [vmem:[#allocation2 + $0x1b0] sm:$0xf0]  ;;  %v2606_v44 = vld [vmem:[#allocation2 + $0x1b8] sm:$0x1f] }
  0xdd   :  { %v2983_v54 = vrot.slane %v2981_v48, 5  ;;  %v2988_v51 = vrot.slane %v2986_v49, 4  ;;  %v1942_v58 = vrot.slane %v1790_v40, 4  ;;  %v1943_v60 = vrot.slane %v1791_v45, 4 }
  0xde   :  { %11609 = vmatmul.mubr.msk.bf16.gmra.mrb[68].mxu1 %vm18_vm1, %v12761_v59  ;;  %v12785_v62 = vsel %vm2619_vm6, %v2967_v47, %v2975_v37  ;;  %v2991_v63 = vrot.slane %v2989_v55, 5  ;;  %v2995_v0 = vshrl.u32 %v2599_v50, 16  ;;  %v2998_v2 = vshll.u32 %v2599_v50, 16  ;;  %v1798_v50 = vld [vmem:[#allocation2 + $0x1d0] sm:$0xf0] }
  0xdf   :  { %11612 = vmatprep.mubr.msk.bf16.mxu1 %vm18_vm1, %v1935_v17  ;;  %v2984_v4 = vor.u32 %v2983_v54, %v2980_v53  ;;  %v12789_v5 = vsel %vm1872_vm5, %v1942_v58, %v1943_v60  ;;  %v3003_v6 = vshrl.u32 %v2600_v56, 16  ;;  %v3006_v7 = vshll.u32 %v2600_v56, 16  ;;  %v1795_v17 = vld [vmem:[#allocation2 + $0x1b8] sm:$0xf] }
  0xe0   :  { %v2992_v10 = vor.u32 %v2991_v63, %v2988_v51  ;;  %v2997_v11 = vrot.slane %v2995_v0, 4  ;;  %v3000_v12 = vrot.slane %v2998_v2, 5  ;;  %v1945_v59 = vrot.slane %v1792_v57, 4  ;;  %v1799_v57 = vld [vmem:[#allocation2 + $0x1d8] sm:$0xf] }
  0xe1   :  { %11671 = vmatmul.mubr.msk.bf16.gmra.mrb[64].mxu0 %vm18_vm1, %v12765_v1  ;;  %v3005_v14 = vrot.slane %v3003_v6, 4  ;;  %v3008_v15 = vrot.slane %v3006_v7, 5  ;;  %v1946_v16 = vrot.slane %v1793_v61, 4  ;;  %v3012_v19 = vshrl.u32 %v2601_v3, 16  ;;  %v2608_v2 = vld [vmem:[#allocation2 + $0x1c8] sm:$0x1f] }
  0xe2   :  { %11674 = vmatprep.mubr.msk.bf16.mxu0 %vm18_vm1, %v2942_v26  ;;  %v12795_v20 = vsel %vm2619_vm6, %v2984_v4, %v2992_v10  ;;  %v3001_v21 = vor.u32 %v3000_v12, %v2997_v11  ;;  %v3015_v22 = vshll.u32 %v2601_v3, 16  ;;  %v3020_v23 = vshrl.u32 %v2602_v8, 16  ;;  %v1797_v26 = vld [vmem:[#allocation2 + $0x1c8] sm:$0xf]  ;;  %v1800_v3 = vld [vmem:[#allocation2 + $0x1e0] sm:$0xf0] }
  0xe3   :  { %v3009_v25 = vor.u32 %v3008_v15, %v3005_v14  ;;  %v12798_v9 = vsel %vm1872_vm5, %v1945_v59, %v1946_v16  ;;  %v3014_v27 = vrot.slane %v3012_v19, 4  ;;  %v3023_v1 = vshll.u32 %v2602_v8, 16  ;;  %v1801_v8 = vld [vmem:[#allocation2 + $0x1e8] sm:$0xf]  ;;  %v2610_v19 = vld [vmem:[#allocation2 + $0x1d8] sm:$0x1f] }
  0xe4   :  { %v3017_v31 = vrot.slane %v3015_v22, 5  ;;  %v3022_v29 = vrot.slane %v3020_v23, 4  ;;  %v1948_v33 = vrot.slane %v1794_v13, 4  ;;  %v1949_v34 = vrot.slane %v1795_v17, 4 }
  0xe5   :  { %v12801_v18 = vsel %vm2619_vm6, %v3001_v21, %v3009_v25  ;;  %v3025_v35 = vrot.slane %v3023_v1, 5  ;;  %v3029_v36 = vshrl.u32 %v2603_v24, 16  ;;  %v3032_v38 = vshll.u32 %v2603_v24, 16  ;;  %v1802_v24 = vld [vmem:[#allocation2 + $0x1f0] sm:$0xf0] }
  0xe6   :  { %11613 = vmatmul.mubr.msk.bf16.gmra.mrb[72].mxu1 %vm18_vm1, %v12773_v32  ;;  %v3018_v40 = vor.u32 %v3017_v31, %v3014_v27  ;;  %v12806_v41 = vsel %vm1872_vm5, %v1948_v33, %v1949_v34  ;;  %v3037_v42 = vshrl.u32 %v2604_v28, 16  ;;  %v3040_v43 = vshll.u32 %v2604_v28, 16 }
  0xe7   :  { %11616 = vmatprep.mubr.msk.bf16.mxu1 %vm18_vm1, %v1941_v52  ;;  %v3026_v45 = vor.u32 %v3025_v35, %v3022_v29  ;;  %v3031_v47 = vrot.slane %v3029_v36, 4  ;;  %v3034_v48 = vrot.slane %v3032_v38, 5  ;;  %v1951_v49 = vrot.slane %v1796_v30, 4  ;;  %v2607_v52 = vld [vmem:[#allocation2 + $0x1c0] sm:$0xf0] }
  0xe8   :  { %v3039_v37 = vrot.slane %v3037_v42, 4  ;;  %v3042_v53 = vrot.slane %v3040_v43, 5  ;;  %v1952_v55 = vrot.slane %v1797_v26, 4  ;;  %v3046_v56 = vshrl.u32 %v2605_v39, 16  ;;  %v1803_v30 = vld [vmem:[#allocation2 + $0x1f8] sm:$0xf] }
  0xe9   :  { %11675 = vmatmul.mubr.msk.bf16.gmra.mrb[68].mxu0 %vm18_vm1, %v12779_v46  ;;  %v12812_v32 = vsel %vm2619_vm6, %v3018_v40, %v3026_v45  ;;  %v3035_v54 = vor.u32 %v3034_v48, %v3031_v47  ;;  %v3049_v51 = vshll.u32 %v2605_v39, 16  ;;  %v3054_v58 = vshrl.u32 %v2606_v44, 16  ;;  %v2612_v26 = vld [vmem:[#allocation2 + $0x1e8] sm:$0x1f]  ;;  %v1804_v39 = vld [vmem:[#allocation2 + $0x200] sm:$0xf0] }
  0xea   :  { %11678 = vmatprep.mubr.msk.bf16.mxu0 %vm18_vm1, %v12785_v62  ;;  %v3043_v60 = vor.u32 %v3042_v53, %v3039_v37  ;;  %v12817_v61 = vsel %vm1872_vm5, %v1951_v49, %v1952_v55  ;;  %v3048_v63 = vrot.slane %v3046_v56, 4  ;;  %v3057_v0 = vshll.u32 %v2606_v44, 16  ;;  %v2609_v62 = vld [vmem:[#allocation2 + $0x1d0] sm:$0xf0]  ;;  %v1805_v40 = vld [vmem:[#allocation2 + $0x208] sm:$0xf] }
  0xeb   :  { %v3051_v4 = vrot.slane %v3049_v51, 5  ;;  %v3056_v46 = vrot.slane %v3054_v58, 4  ;;  %v1954_v6 = vrot.slane %v1798_v50, 4  ;;  %v1955_v7 = vrot.slane %v1799_v57, 4  ;;  %v12842_v47 = vld [vmem:[%s15291_s1 + $0xc] sm:$0x3] }
  0xec   :  { %v12820_v10 = vsel %vm2619_vm6, %v3035_v54, %v3043_v60  ;;  %v3059_v11 = vrot.slane %v3057_v0, 5  ;;  %v3063_v12 = vshrl.u32 %v2607_v52, 16  ;;  %v3066_v59 = vshll.u32 %v2607_v52, 16  ;;  %v2613_v37 = vld [vmem:[#allocation2 + $0x1f0] sm:$0xf0]  ;;  %12107 = vmatprep.subr.msk.bf16.mxu0 %vm1184_vm0, %v12842_v47 }
  0xed   :  { %v3052_v13 = vor.u32 %v3051_v4, %v3048_v63  ;;  %v12823_v14 = vsel %vm1872_vm5, %v1954_v6, %v1955_v7  ;;  %v3071_v15 = vshrl.u32 %v2608_v2, 16  ;;  %v3074_v16 = vshll.u32 %v2608_v2, 16  ;;  %v2614_v57 = vld [vmem:[#allocation2 + $0x1f8] sm:$0x1f]  ;;  %v1806_v60 = vld [vmem:[#allocation2 + $0x210] sm:$0xf0] }
  0xee   :  { %11617 = vmatmul.mubr.msk.bf16.gmra.mrb[76].mxu1 %vm18_vm1, %v12789_v5  ;;  %v3060_v17 = vor.u32 %v3059_v11, %v3056_v46  ;;  %v3065_v21 = vrot.slane %v3063_v12, 4  ;;  %v3068_v22 = vrot.slane %v3066_v59, 5  ;;  %v1957_v23 = vrot.slane %v1800_v3, 4  ;;  %v2611_v5 = vld [vmem:[#allocation2 + $0x1e0] sm:$0xf0] }
  0xef   :  { %11620 = vmatprep.mubr.msk.bf16.mxu1 %vm18_vm1, %v12798_v9  ;;  %v3073_v25 = vrot.slane %v3071_v15, 4  ;;  %v3076_v27 = vrot.slane %v3074_v16, 5  ;;  %v1958_v1 = vrot.slane %v1801_v8, 4  ;;  %v3080_v28 = vshrl.u32 %v2609_v62, 16  ;;  %v1807_v4 = vld [vmem:[#allocation2 + $0x218] sm:$0xf] }
  0xf0   :  { %v12830_v31 = vsel %vm2619_vm6, %v3052_v13, %v3060_v17  ;;  %v3069_v29 = vor.u32 %v3068_v22, %v3065_v21  ;;  %v3083_v33 = vshll.u32 %v2609_v62, 16  ;;  %v3088_v34 = vshrl.u32 %v2610_v19, 16  ;;  %v2615_v11 = vld [vmem:[#allocation2 + $0x200] sm:$0xf0]  ;;  %v2616_v13 = vld [vmem:[#allocation2 + $0x208] sm:$0x1f] }
  0xf1   :  { %11679 = vmatmul.mubr.msk.bf16.gmra.mrb[72].mxu0 %vm18_vm1, %v12795_v20  ;;  %v3077_v35 = vor.u32 %v3076_v27, %v3073_v25  ;;  %v12835_v36 = vsel %vm1872_vm5, %v1957_v23, %v1958_v1  ;;  %v3082_v9 = vrot.slane %v3080_v28, 4  ;;  %v3091_v38 = vshll.u32 %v2610_v19, 16  ;;  %v2617_v17 = vld [vmem:[#allocation2 + $0x210] sm:$0xf0]  ;;  %v2618_v25 = vld [vmem:[#allocation2 + $0x218] sm:$0x1f] }
  0xf2   :  { %11682 = vmatprep.mubr.msk.bf16.mxu0 %vm18_vm1, %v12801_v18  ;;  %v3085_v42 = vrot.slane %v3083_v33, 5  ;;  %v3090_v43 = vrot.slane %v3088_v34, 4  ;;  %v1960_v44 = vrot.slane %v1802_v24, 4  ;;  %v1961_v45 = vrot.slane %v1803_v30, 4  ;;  %v3745_v30 = vld [vmem:[#allocation2 + $0x10] sm:$0xf8] }
  0xf3   :  { %v12845_v20 = vsel %vm2619_vm6, %v3069_v29, %v3077_v35  ;;  %v3093_v48 = vrot.slane %v3091_v38, 5  ;;  %v3097_v49 = vshrl.u32 %v2611_v5, 16  ;;  %v3100_v50 = vshll.u32 %v2611_v5, 16 }
  0xf4   :  { %v3086_v18 = vor.u32 %v3085_v42, %v3082_v9  ;;  %v12850_v53 = vsel %vm1872_vm5, %v1960_v44, %v1961_v45  ;;  %v3105_v55 = vshrl.u32 %v2612_v26, 16  ;;  %v3108_v56 = vshll.u32 %v2612_v26, 16 }
  0xf5   :  { %v3094_v54 = vor.u32 %v3093_v48, %v3090_v43  ;;  %v3099_v51 = vrot.slane %v3097_v49, 4  ;;  %v3102_v58 = vrot.slane %v3100_v50, 5  ;;  %v1963_v52 = vrot.slane %v1804_v39, 4  ;;  %v3746_v39 = vld [vmem:[#allocation2 + $0x18] sm:$0xf] }
  0xf6   :  { %11621 = vmatmul.mubr.msk.bf16.gmra.mrb[80].mxu1 %vm18_vm1, %v12806_v41  ;;  %v3107_v63 = vrot.slane %v3105_v55, 4  ;;  %v3110_v0 = vrot.slane %v3108_v56, 5  ;;  %v1964_v2 = vrot.slane %v1805_v40, 4  ;;  %v3114_v3 = vshrl.u32 %v2613_v37, 16 }
  0xf7   :  { %11624 = vmatprep.mubr.msk.bf16.mxu1 %vm18_vm1, %v12817_v61  ;;  %v12857_v46 = vsel %vm2619_vm6, %v3086_v18, %v3094_v54  ;;  %v3103_v6 = vor.u32 %v3102_v58, %v3099_v51  ;;  %v3117_v7 = vshll.u32 %v2613_v37, 16  ;;  %v3122_v8 = vshrl.u32 %v2614_v57, 16  ;;  %v3747_v37 = vld [vmem:[#allocation2 + $0x20] sm:$0xf8]  ;;  %v3748_v54 = vld [vmem:[#allocation2 + $0x28] sm:$0xf] }
  0xf8   :  { %v3111_v12 = vor.u32 %v3110_v0, %v3107_v63  ;;  %v12860_v59 = vsel %vm1872_vm5, %v1963_v52, %v1964_v2  ;;  %v3116_v41 = vrot.slane %v3114_v3, 4  ;;  %v3125_v62 = vshll.u32 %v2614_v57, 16  ;;  %v3749_v63 = vld [vmem:[#allocation2 + $0x30] sm:$0xf8] }
  0xf9   :  { %11683 = vmatmul.mubr.msk.bf16.gmra.mrb[76].mxu0 %vm18_vm1, %v12812_v32  ;;  %v3119_v15 = vrot.slane %v3117_v7, 5  ;;  %v3124_v16 = vrot.slane %v3122_v8, 4  ;;  %v1966_v61 = vrot.slane %v1806_v60, 4  ;;  %v1967_v19 = vrot.slane %v1807_v4, 4  ;;  %v4939_v60 = vld [vmem:[#allocation2 + $0x18] sm:$0xf] }
  0xfa   :  { %11686 = vmatprep.mubr.msk.bf16.mxu0 %vm18_vm1, %v12820_v10  ;;  %v12867_v21 = vsel %vm2619_vm6, %v3103_v6, %v3111_v12  ;;  %v3127_v22 = vrot.slane %v3125_v62, 5  ;;  %v3131_v23 = vshrl.u32 %v2615_v11, 16  ;;  %v3134_v24 = vshll.u32 %v2615_v11, 16  ;;  %v12173_v10 = vld [vmem:[%s15291_s1 + $0x8] ss:$0 sps:$4 sm:$0xcc]  }
  0xfb   :  { %v3120_v27 = vor.u32 %v3119_v15, %v3116_v41  ;;  %v12870_v1 = vsel %vm1872_vm5, %v1966_v61, %v1967_v19  ;;  %v3139_v32 = vshrl.u32 %v2616_v13, 16  ;;  %v3142_v28 = vshll.u32 %v2616_v13, 16  ;;  %v3750_v6 = vld [vmem:[#allocation2 + $0x38] sm:$0xf]  ;;  %v4940_v15 = vld [vmem:[#allocation2 + $0x20] sm:$0xf0] }
  0xfc   :  { %v3128_v29 = vor.u32 %v3127_v22, %v3124_v16  ;;  %v3133_v33 = vrot.slane %v3131_v23, 4  ;;  %v3136_v34 = vrot.slane %v3134_v24, 5  ;;  %v3148_v5 = vshrl.u32 %v2617_v17, 16  ;;  %v4941_v16 = vld [vmem:[#allocation2 + $0x28] sm:$0xf] }
  0xfd   :  { %v3141_v26 = vrot.slane %v3139_v32, 4  ;;  %v3144_v35 = vrot.slane %v3142_v28, 5  ;;  %v3151_v9 = vshll.u32 %v2617_v17, 16  ;;  %v3156_v38 = vshrl.u32 %v2618_v25, 16  ;;  %v3751_v24 = vld [vmem:[#allocation2 + $0x40] sm:$0xf8] }
  0xfe   :  { %11625 = vmatmul.mubr.msk.bf16.gmra.mrb[84].mxu1 %vm18_vm1, %v12823_v14  ;;  %v12878_v40 = vsel %vm2619_vm6, %v3120_v27, %v3128_v29  ;;  %v3137_v42 = vor.u32 %v3136_v34, %v3133_v33  ;;  %v3150_v43 = vrot.slane %v3148_v5, 4  ;;  %v3159_v44 = vshll.u32 %v2618_v25, 16 }
  0xff   :  { %11628 = vmatprep.mubr.msk.bf16.mxu1 %vm18_vm1, %v12835_v36  ;;  %v3145_v45 = vor.u32 %v3144_v35, %v3141_v26  ;;  %v3153_v48 = vrot.slane %v3151_v9, 5  ;;  %v3158_v49 = vrot.slane %v3156_v38, 4  ;;  %v3810_v50 = vshrl.u32 %v3745_v30, 16  ;;  %v4938_v36 = vld [vmem:[#allocation2 + $0x10] sm:$0xf0] }
 0x100   :  { %v3161_v18 = vrot.slane %v3159_v44, 5  ;;  %v3813_v55 = vshll.u32 %v3745_v30, 16  ;;  %v3818_v56 = vshrl.u32 %v3746_v39, 16  ;;  %v3821_v57 = vshll.u32 %v3746_v39, 16  ;;  %v3752_v35 = vld [vmem:[#allocation2 + $0x48] sm:$0xf] }
 0x101   :  { %11687 = vmatmul.mubr.msk.bf16.gmra.mrb[80].mxu0 %vm18_vm1, %v12830_v31  ;;  %v12885_v14 = vsel %vm2619_vm6, %v3137_v42, %v3145_v45  ;;  %v3154_v51 = vor.u32 %v3153_v48, %v3150_v43  ;;  %v3812_v58 = vrot.slane %v3810_v50, 3  ;;  %v6354_v52 = vrot.slane %v12173_v10, 2  ;;  %v4942_v43 = vld [vmem:[#allocation2 + $0x30] sm:$0xf0]  ;;  %v4943_v44 = vld [vmem:[#allocation2 + $0x38] sm:$0xf] }
 0x102   :  { %11690 = vmatprep.mubr.msk.bf16.mxu0 %vm18_vm1, %v12845_v20  ;;  %v3162_v0 = vor.u32 %v3161_v18, %v3158_v49  ;;  %v3815_v2 = vrot.slane %v3813_v55, 4  ;;  %v3820_v3 = vrot.slane %v3818_v56, 3  ;;  %v3823_v4 = vrot.slane %v3821_v57, 4 }
 0x103   :  { %12106 = vmatprep.subr.msk.bf16.mxu1 %vm1184_vm0, %v6354_v52  ;;  %v3827_v31 = vshrl.u32 %v3747_v37, 16  ;;  %v3830_v7 = vshll.u32 %v3747_v37, 16  ;;  %v3835_v8 = vshrl.u32 %v3748_v54, 16  ;;  %v3838_v11 = vshll.u32 %v3748_v54, 16  ;;  %v3753_v37 = vld [vmem:[#allocation2 + $0x50] sm:$0xf8] }
 0x104   :  { %v12893_v41 = vsel %vm2619_vm6, %v3154_v51, %v3162_v0  ;;  %v3816_v62 = vor.u32 %v3815_v2, %v3812_v58  ;;  %v3824_v13 = vor.u32 %v3823_v4, %v3820_v3  ;;  %v12896_v20 = vsel %vm1184_vm0, %v6354_v52, 0  ;;  %v3754_v51 = vld [vmem:[#allocation2 + $0x58] sm:$0xf]  ;;  %v4945_v4 = vld [vmem:[#allocation2 + $0x48] sm:$0xf] }
 0x105   :  { %v3829_v19 = vrot.slane %v3827_v31, 3  ;;  %v3832_v17 = vrot.slane %v3830_v7, 4  ;;  %v3837_v22 = vrot.slane %v3835_v8, 3  ;;  %v3840_v23 = vrot.slane %v3838_v11, 4 }
 0x106   :  { %11629 = vmatmul.mubr.msk.bf16.gmra.mrb[88].mxu1 %vm18_vm1, %v12850_v53  ;;  %v3825_v27 = vsel %vm543_vm4, %v3816_v62, %v3824_v13  ;;  %v5066_v32 = vrot.slane %v4938_v36, 4  ;;  %v5067_v28 = vrot.slane %v4939_v60, 4  ;;  %v3844_v30 = vshrl.u32 %v3749_v63, 16  ;;  %v4944_v60 = vld [vmem:[#allocation2 + $0x40] sm:$0xf0] }
 0x107   :  { %11632 = vmatprep.mubr.msk.bf16.mxu1 %vm18_vm1, %v12860_v59  ;;  %v3833_v34 = vor.u32 %v3832_v17, %v3829_v19  ;;  %v3841_v5 = vor.u32 %v3840_v23, %v3837_v22  ;;  %v3847_v10 = vshll.u32 %v3749_v63, 16  ;;  %v3852_v26 = vshrl.u32 %v3750_v6, 16  ;;  %v3755_v19 = vld [vmem:[#allocation2 + $0x60] sm:$0xf8] }
 0x108   :  { %v12890_v12 = vpop.f32.mrb[0].mxu1  ;;  %v12914_v53 = vsel %vm1872_vm5, %v5066_v32, %v5067_v28  ;;  %v3846_v38 = vrot.slane %v3844_v30, 3  ;;  %v3855_v39 = vshll.u32 %v3750_v6, 16  ;;  %v5069_v42 = vrot.slane %v4940_v15, 4  ;;  %v3756_v28 = vld [vmem:[#allocation2 + $0x68] sm:$0xf] }
 0x109   :  { %v12898_v61 = vpop.f32.mrb[1].mxu1  ;;  %v12907_v33 = vpop.f32.mrb[0].mxu0  ;;  %11691 = vmatmul.mubr.msk.bf16.gmra.mrb[84].mxu0 %vm18_vm1, %v12857_v46  ;;  %v12921_v59 = vsel %vm543_vm4, %v3833_v34, %v3841_v5  ;;  %v3849_v48 = vrot.slane %v3847_v10, 4  ;;  %v3854_v49 = vrot.slane %v3852_v26, 3  ;;  %v5070_v50 = vrot.slane %v4941_v16, 4  ;;  %1516 = vst.msk [vmem:[#allocation3 + $0x110] sm:$0xff] %vm1481_vm7, %v12890_v12 }
 0x10a   :  { %v12900_v25 = vpop.f32.mrb[2].mxu1  ;;  %v12911_v9 = vpop.f32.mrb[1].mxu0  ;;  %11694 = vmatprep.mubr.msk.bf16.mxu0 %vm18_vm1, %v12867_v21  ;;  %v3857_v55 = vrot.slane %v3855_v39, 4  ;;  %v3861_v56 = vshrl.u32 %v3751_v24, 16  ;;  %v3864_v57 = vshll.u32 %v3751_v24, 16  ;;  %v3869_v54 = vshrl.u32 %v3752_v35, 16 }
 0x10b   :  { %v12905_v29 = vpop.f32.mrb[3].mxu1  ;;  %v12916_v45 = vpop.f32.mrb[2].mxu0  ;;  %v3850_v58 = vor.u32 %v3849_v48, %v3846_v38  ;;  %v12928_v46 = vsel %vm1872_vm5, %v5069_v42, %v5070_v50  ;;  %v3872_v52 = vshll.u32 %v3752_v35, 16  ;;  %v12932_v36 = vsel %vm1184_vm0, %v12842_v47, 0  ;;  %v4946_v30 = vld [vmem:[#allocation2 + $0x50] sm:$0xf0] }
 0x10c   :  { %v12923_v18 = vpop.f32.mrb[3].mxu0  ;;  %v3858_v0 = vor.u32 %v3857_v55, %v3854_v49  ;;  %v3863_v2 = vrot.slane %v3861_v56, 3  ;;  %v3866_v3 = vrot.slane %v3864_v57, 4  ;;  %v3871_v21 = vrot.slane %v3869_v54, 3  ;;  %v4947_v26 = vld [vmem:[#allocation2 + $0x58] sm:$0xf] }
 0x10d   :  { %v3874_v31 = vrot.slane %v3872_v52, 4  ;;  %v5072_v7 = vrot.slane %v4942_v43, 4  ;;  %v5073_v8 = vrot.slane %v4943_v44, 4  ;;  %v3878_v11 = vshrl.u32 %v3753_v37, 16  ;;  %v3757_v42 = vld [vmem:[#allocation2 + $0x70] sm:$0xf8] }
 0x10e   :  { %11633 = vmatmul.mubr.msk.bf16.gmra.mrb[92].mxu1 %vm18_vm1, %v12870_v1  ;;  %v12937_v13 = vsel %vm543_vm4, %v3850_v58, %v3858_v0  ;;  %v3867_v47 = vor.u32 %v3866_v3, %v3863_v2  ;;  %v3881_v15 = vshll.u32 %v3753_v37, 16  ;;  %v3886_v16 = vshrl.u32 %v3754_v51, 16  ;;  %v3758_v50 = vld [vmem:[#allocation2 + $0x78] sm:$0xf]  ;;  %v4948_v37 = vld [vmem:[#allocation2 + $0x60] sm:$0xf0] }
 0x10f   :  { %11704 = vmatprep.mubr.msk.bf16.mxu1 %vm18_vm1, %v3825_v27  ;;  %v3875_v22 = vor.u32 %v3874_v31, %v3871_v21  ;;  %v12941_v23 = vsel %vm1872_vm5, %v5072_v7, %v5073_v8  ;;  %v3880_v24 = vrot.slane %v3878_v11, 3  ;;  %v3889_v32 = vshll.u32 %v3754_v51, 16  ;;  %v4949_v57 = vld [vmem:[#allocation2 + $0x68] sm:$0xf]  ;;  %1514 = vst.msk [vmem:[#allocation3 + $0x100] sm:$0xff] %vm1481_vm7, %v12898_v61  ;;  %1517 = vst.msk [vmem:[#allocation3 + $0x118] sm:$0xff] %vm1481_vm7, %v12900_v25 }
 0x110   :  { %v11544_v63 = vpop.f32.mrb[4].mxu1  ;;  %v3883_v34 = vrot.slane %v3881_v15, 4  ;;  %v3888_v1 = vrot.slane %v3886_v16, 3  ;;  %v5075_v5 = vrot.slane %v4944_v60, 4  ;;  %v5076_v10 = vrot.slane %v4945_v4, 4  ;;  %1515 = vst.msk [vmem:[#allocation3 + $0x108] sm:$0xff] %vm1481_vm7, %v12905_v29 }
 0x111   :  { %v1366_v6 = vpop.f32.mrb[5].mxu1  ;;  %11695 = vmatmul.mubr.msk.bf16.gmra.mrb[88].mxu0 %vm18_vm1, %v12878_v40  ;;  %v12946_v35 = vsel %vm543_vm4, %v3867_v47, %v3875_v22  ;;  %v3891_v27 = vrot.slane %v3889_v32, 4  ;;  %v3895_v38 = vshrl.u32 %v3755_v19, 16  ;;  %v3898_v39 = vshll.u32 %v3755_v19, 16  ;;  %v3759_v52 = vld [vmem:[#allocation2 + $0x80] sm:$0xf8] }
 0x112   :  { %v11545_v62 = vpop.f32.mrb[6].mxu1  ;;  %11698 = vmatprep.mubr.msk.bf16.mxu0 %vm18_vm1, %v12885_v14  ;;  %v3884_v43 = vor.u32 %v3883_v34, %v3880_v24  ;;  %v12951_v44 = vsel %vm1872_vm5, %v5075_v5, %v5076_v10  ;;  %v3903_v48 = vshrl.u32 %v3756_v28, 16  ;;  %v3906_v49 = vshll.u32 %v3756_v28, 16  ;;  %1484 = vst.msk [vmem:[#allocation3 + $0x10] sm:$0xff] %vm1481_vm7, %v12907_v33  ;;  %1482 = vst.msk [vmem:[#allocation3] sm:$0xff] %vm1481_vm7, %v12911_v9 }
 0x113   :  { %v1369_v17 = vpop.f32.mrb[7].mxu1  ;;  %v3892_v55 = vor.u32 %v3891_v27, %v3888_v1  ;;  %v3897_v40 = vrot.slane %v3895_v38, 3  ;;  %v3900_v56 = vrot.slane %v3898_v39, 4  ;;  %v5078_v14 = vrot.slane %v4946_v30, 4  ;;  %1520 = vst.msk [vmem:[#allocation3 + $0x130] sm:$0xff] %vm1481_vm7, %v11544_v63  ;;  %1485 = vst.msk [vmem:[#allocation3 + $0x18] sm:$0xff] %vm1481_vm7, %v12916_v45 }
 0x114   :  { %v3905_v54 = vrot.slane %v3903_v48, 3  ;;  %v3908_v51 = vrot.slane %v3906_v49, 4  ;;  %v5079_v58 = vrot.slane %v4947_v26, 4  ;;  %1518 = vst.msk [vmem:[#allocation3 + $0x120] sm:$0xff] %vm1481_vm7, %v1366_v6  ;;  %1483 = vst.msk [vmem:[#allocation3 + $0x8] sm:$0xff] %vm1481_vm7, %v12923_v18  ;;  %v3912_v25 = vshrl.u32 %v3757_v42, 16 }
 0x115   :  { %1521 = vst.msk [vmem:[#allocation3 + $0x138] sm:$0xff] %vm1481_vm7, %v11545_v62  ;;  %1519 = vst.msk [vmem:[#allocation3 + $0x128] sm:$0xff] %vm1481_vm7, %v1369_v17  ;;  %v12974_v12 = vsel %vm543_vm4, %v3884_v43, %v3892_v55  ;;  %v3901_v61 = vor.u32 %v3900_v56, %v3897_v40  ;;  %v3915_v29 = vshll.u32 %v3757_v42, 16  ;;  %v3760_v33 = vld [vmem:[#allocation2 + $0x88] sm:$0xf]  ;;  %v3920_v18 = vshrl.u32 %v3758_v50, 16 }
 0x116   :  { %v4950_v9 = vld [vmem:[#allocation2 + $0x70] sm:$0xf0]  ;;  %11705 = vmatmul.mubr.msk.bf16.vlgmr.msra.gmra.mrb[96].mxu1 %vm18_vm1, %v12921_v59  ;;  %v3909_v45 = vor.u32 %v3908_v51, %v3905_v54  ;;  %v12979_v60 = vsel %vm1872_vm5, %v5078_v14, %v5079_v58  ;;  %v3923_v63 = vshll.u32 %v3758_v50, 16  ;;  %v4951_v0 = vld [vmem:[#allocation2 + $0x78] sm:$0xf]  ;;  %v11512_v3 = vpop.f32.mrb[4].mxu0 }
 0x117   :  { %v3761_v2 = vld [vmem:[#allocation2 + $0x90] sm:$0xf8]  ;;  %11835 = vmatpush3.bf16.msra.mxu1 %v12896_v20  ;;  %11708 = vmatprep.mubr.msk.bf16.mxu1 %vm18_vm1, %v12937_v13  ;;  %v3914_v21 = vrot.slane %v3912_v25, 3  ;;  %v3917_v4 = vrot.slane %v3915_v29, 4  ;;  %v5081_v6 = vrot.slane %v4948_v37, 4  ;;  %v5082_v31 = vrot.slane %v4949_v57, 4 }
 0x118   :  { %1488 = vst.msk [vmem:[#allocation3 + $0x30] sm:$0xff] %vm1481_vm7, %v11512_v3  ;;  %v1238_v59 = vpop.f32.mrb[5].mxu0  ;;  %v12986_v7 = vsel %vm543_vm4, %v3901_v61, %v3909_v45  ;;  %v3922_v8 = vrot.slane %v3920_v18, 3  ;;  %v3925_v11 = vrot.slane %v3923_v63, 4  ;;  %v3929_v62 = vshrl.u32 %v3759_v52, 16 }
 0x119   :  { %v3762_v47 = vld [vmem:[#allocation2 + $0x98] sm:$0xf]  ;;  %1486 = vst.msk [vmem:[#allocation3 + $0x20] sm:$0xff] %vm1481_vm7, %v1238_v59  ;;  %v11513_v20 = vpop.f32.mrb[6].mxu0  ;;  %11699 = vmatmul.mubr.msk.bf16.gmra.mrb[92].mxu0 %vm18_vm1, %v12893_v41  ;;  %v3918_v13 = vor.u32 %v3917_v4, %v3914_v21  ;;  %v12992_v15 = vsel %vm1872_vm5, %v5081_v6, %v5082_v31  ;;  %v3932_v16 = vshll.u32 %v3759_v52, 16  ;;  %v3937_v19 = vshrl.u32 %v3760_v33, 16 }
 0x11a   :  { %v4952_v17 = vld [vmem:[#allocation2 + $0x80] sm:$0xf0]  ;;  %1489 = vst.msk [vmem:[#allocation3 + $0x38] sm:$0xff] %vm1481_vm7, %v11513_v20  ;;  %v1241_v22 = vpop.f32.mrb[7].mxu0  ;;  %11770 = vmatprep.mubr.msk.bf16.mxu0 %vm18_vm1, %v12914_v53  ;;  %v3926_v24 = vor.u32 %v3925_v11, %v3922_v8  ;;  %v3931_v32 = vrot.slane %v3929_v62, 3  ;;  %v3940_v28 = vshll.u32 %v3760_v33, 16 }
 0x11b   :  { %v5084_v30 = vrot.slane %v4950_v9, 4  ;;  %v4953_v34 = vld [vmem:[#allocation2 + $0x88] sm:$0xf]  ;;  %v3763_v1 = vld [vmem:[#allocation2 + $0xa0] sm:$0xf8]  ;;  %1487 = vst.msk [vmem:[#allocation3 + $0x28] sm:$0xff] %vm1481_vm7, %v1241_v22 }
 0x11c   :  { %v3934_v41 = vrot.slane %v3932_v16, 4  ;;  %v3939_v5 = vrot.slane %v3937_v19, 3  ;;  %v5085_v10 = vrot.slane %v4951_v0, 4  ;;  %v3946_v26 = vshrl.u32 %v3761_v2, 16  ;;  %v3764_v27 = vld [vmem:[#allocation2 + $0xa8] sm:$0xf] }
 0x11d   :  { %v12999_v38 = vsel %vm543_vm4, %v3918_v13, %v3926_v24  ;;  %v3942_v39 = vrot.slane %v3940_v28, 4  ;;  %v3949_v42 = vshll.u32 %v3761_v2, 16  ;;  %v3954_v43 = vshrl.u32 %v3762_v47, 16  ;;  %v11548_v37 = vpop.f32.mrb[8].mxu1  ;;  %v4954_v55 = vld [vmem:[#allocation2 + $0x90] sm:$0xf0] }
 0x11e   :  { %v3935_v53 = vor.u32 %v3934_v41, %v3931_v32  ;;  %v13002_v48 = vsel %vm1872_vm5, %v5084_v30, %v5085_v10  ;;  %v3948_v49 = vrot.slane %v3946_v26, 3  ;;  %v3957_v50 = vshll.u32 %v3762_v47, 16  ;;  %v4955_v40 = vld [vmem:[#allocation2 + $0x98] sm:$0xf]  ;;  %11709 = vmatmul.mubr.msk.bf16.gmra.mrb[100].mxu1 %vm18_vm1, %v12946_v35  ;;  %1524 = vst.msk [vmem:[#allocation3 + $0x150] sm:$0xff] %vm1481_vm7, %v11548_v37  ;;  %v1382_v14 = vpop.f32.mrb[9].mxu1 }
 0x11f   :  { %v3943_v56 = vor.u32 %v3942_v39, %v3939_v5  ;;  %v3951_v57 = vrot.slane %v3949_v42, 4  ;;  %v3956_v54 = vrot.slane %v3954_v43, 3  ;;  %v5087_v51 = vrot.slane %v4952_v17, 4  ;;  %v3765_v58 = vld [vmem:[#allocation2 + $0xb0] sm:$0xf8]  ;;  %11712 = vmatprep.mubr.msk.bf16.mxu1 %vm18_vm1, %v12974_v12  ;;  %1522 = vst.msk [vmem:[#allocation3 + $0x140] sm:$0xff] %vm1481_vm7, %v1382_v14 }
 0x120   :  { %v12174_v52 = vld [vmem:[%s15292_s0 + $0x78] ss:$0 sps:$4 sm:$0xff]   ;;  %v3959_v61 = vrot.slane %v3957_v50, 4  ;;  %v5088_v25 = vrot.slane %v4953_v34, 4  ;;  %v3963_v29 = vshrl.u32 %v3763_v1, 16  ;;  %v3966_v33 = vshll.u32 %v3763_v1, 16 }
 0x121   :  { %v11549_v35 = vpop.f32.mrb[10].mxu1  ;;  %v3766_v9 = vld [vmem:[#allocation2 + $0xb8] sm:$0xf]  ;;  %v13014_v45 = vsel %vm543_vm4, %v3935_v53, %v3943_v56  ;;  %v3952_v18 = vor.u32 %v3951_v57, %v3948_v49  ;;  %v3971_v63 = vshrl.u32 %v3764_v27, 16  ;;  %v3974_v0 = vshll.u32 %v3764_v27, 16  ;;  %11771 = vmatmul.mubr.msk.bf16.vlgmr.msra.gmra.mrb[96].mxu0 %vm18_vm1, %v12928_v46 }
 0x122   :  { %1525 = vst.msk [vmem:[#allocation3 + $0x158] sm:$0xff] %vm1481_vm7, %v11549_v35  ;;  %v1385_v2 = vpop.f32.mrb[11].mxu1  ;;  %v4956_v3 = vld [vmem:[#allocation2 + $0xa0] sm:$0xf0]  ;;  %v12175_v12 = vld [vmem:[%s15292_s0 + $0x7c] ss:$0 sps:$4 sm:$0xff]   ;;  %v3960_v21 = vor.u32 %v3959_v61, %v3956_v54  ;;  %v13024_v4 = vsel %vm1872_vm5, %v5087_v51, %v5088_v25  ;;  %11901 = vmatpush3.bf16.msra.mxu0 %v12932_v36  ;;  %11774 = vmatprep.mubr.msk.bf16.mxu0 %vm18_vm1, %v12941_v23 }
 0x123   :  { %444 = vst.msk [vmem:[#allocation2 + $0x100] sm:$0xf0] %vm412_vm2, %v12174_v52  ;;  %v3965_v6 = vrot.slane %v3963_v29, 3  ;;  %v3968_v31 = vrot.slane %v3966_v33, 4  ;;  %v4957_v59 = vld [vmem:[#allocation2 + $0xa8] sm:$0xf] }
 0x124   :  { %1523 = vst.msk [vmem:[#allocation3 + $0x148] sm:$0xff] %vm1481_vm7, %v1385_v2  ;;  %v3767_v8 = vld [vmem:[#allocation2 + $0xc0] sm:$0xf8]  ;;  %v3973_v11 = vrot.slane %v3971_v63, 3  ;;  %v3976_v62 = vrot.slane %v3974_v0, 4  ;;  %v5090_v47 = vrot.slane %v4954_v55, 4  ;;  %v13032_v16 = vsel %vm543_vm4, %v3952_v18, %v3960_v21 }
 0x125   :  { %v5091_v20 = vrot.slane %v4955_v40, 4  ;;  %v3768_v46 = vld [vmem:[#allocation2 + $0xc8] sm:$0xf]  ;;  %v11516_v13 = vpop.f32.mrb[8].mxu0  ;;  %445 = vst.msk [vmem:[#allocation2 + $0x108] sm:$0xf] %vm414_vm3, %v12175_v12  ;;  %v3969_v19 = vor.u32 %v3968_v31, %v3965_v6 }
 0x126   :  { %v3980_v17 = vshrl.u32 %v3765_v58, 16  ;;  %v3983_v22 = vshll.u32 %v3765_v58, 16  ;;  %1492 = vst.msk [vmem:[#allocation3 + $0x50] sm:$0xff] %vm1481_vm7, %v11516_v13  ;;  %v1254_v36 = vpop.f32.mrb[9].mxu0  ;;  %v4958_v24 = vld [vmem:[#allocation2 + $0xb0] sm:$0xf0]  ;;  %v3977_v32 = vor.u32 %v3976_v62, %v3973_v11  ;;  %11713 = vmatmul.mubr.msk.bf16.gmra.mrb[104].mxu1 %vm18_vm1, %v12986_v7 }
 0x127   :  { %v13036_v23 = vsel %vm1872_vm5, %v5090_v47, %v5091_v20  ;;  %v3988_v28 = vshrl.u32 %v3766_v9, 16  ;;  %v3991_v30 = vshll.u32 %v3766_v9, 16  ;;  %1490 = vst.msk [vmem:[#allocation3 + $0x40] sm:$0xff] %vm1481_vm7, %v1254_v36  ;;  %v11517_v34 = vpop.f32.mrb[10].mxu0  ;;  %v4959_v1 = vld [vmem:[#allocation2 + $0xb8] sm:$0xf]  ;;  %11716 = vmatprep.mubr.msk.bf16.mxu1 %vm18_vm1, %v12999_v38 }
 0x128   :  { %v3982_v41 = vrot.slane %v3980_v17, 3  ;;  %v3985_v5 = vrot.slane %v3983_v22, 4  ;;  %v5093_v10 = vrot.slane %v4956_v3, 4  ;;  %v5094_v26 = vrot.slane %v4957_v59, 4  ;;  %1493 = vst.msk [vmem:[#allocation3 + $0x58] sm:$0xff] %vm1481_vm7, %v11517_v34  ;;  %v1257_v27 = vpop.f32.mrb[11].mxu0 }
 0x129   :  { %v13043_v39 = vsel %vm543_vm4, %v3969_v19, %v3977_v32  ;;  %v3990_v42 = vrot.slane %v3988_v28, 3  ;;  %v3993_v43 = vrot.slane %v3991_v30, 4  ;;  %v3997_v53 = vshrl.u32 %v3767_v8, 16  ;;  %1491 = vst.msk [vmem:[#allocation3 + $0x48] sm:$0xff] %vm1481_vm7, %v1257_v27  ;;  %v3769_v49 = vld [vmem:[#allocation2 + $0xd0] sm:$0xf8]  ;;  %11775 = vmatmul.mubr.msk.bf16.gmra.mrb[100].mxu0 %vm18_vm1, %v12951_v44 }
 0x12a   :  { %v3986_v50 = vor.u32 %v3985_v5, %v3982_v41  ;;  %v13049_v37 = vsel %vm1872_vm5, %v5093_v10, %v5094_v26  ;;  %v4000_v55 = vshll.u32 %v3767_v8, 16  ;;  %v4005_v40 = vshrl.u32 %v3768_v46, 16  ;;  %v3770_v56 = vld [vmem:[#allocation2 + $0xd8] sm:$0xf]  ;;  %v4960_v7 = vld [vmem:[#allocation2 + $0xc0] sm:$0xf0]  ;;  %11778 = vmatprep.mubr.msk.bf16.mxu0 %vm18_vm1, %v12979_v60 }
 0x12b   :  { %v3994_v57 = vor.u32 %v3993_v43, %v3990_v42  ;;  %v3999_v54 = vrot.slane %v3997_v53, 3  ;;  %v4008_v51 = vshll.u32 %v3768_v46, 16  ;;  %v5096_v14 = vrot.slane %v4958_v24, 4  ;;  %v4961_v58 = vld [vmem:[#allocation2 + $0xc8] sm:$0xf] }
 0x12c   :  { %v4002_v52 = vrot.slane %v4000_v55, 4  ;;  %v4007_v61 = vrot.slane %v4005_v40, 3  ;;  %v5097_v25 = vrot.slane %v4959_v1, 4  ;;  %v4014_v38 = vshrl.u32 %v3769_v49, 16  ;;  %v3771_v29 = vld [vmem:[#allocation2 + $0xe0] sm:$0xf8] }
 0x12d   :  { %v13056_v33 = vsel %vm543_vm4, %v3986_v50, %v3994_v57  ;;  %v4010_v35 = vrot.slane %v4008_v51, 4  ;;  %v4017_v9 = vshll.u32 %v3769_v49, 16  ;;  %v4022_v18 = vshrl.u32 %v3770_v56, 16  ;;  %v3772_v63 = vld [vmem:[#allocation2 + $0xe8] sm:$0xf]  ;;  %v11552_v31 = vpop.f32.mrb[12].mxu1 }
 0x12e   :  { %v4003_v0 = vor.u32 %v4002_v52, %v3999_v54  ;;  %v13059_v2 = vsel %vm1872_vm5, %v5096_v14, %v5097_v25  ;;  %v4016_v44 = vrot.slane %v4014_v38, 3  ;;  %v4025_v3 = vshll.u32 %v3770_v56, 16  ;;  %v4962_v12 = vld [vmem:[#allocation2 + $0xd0] sm:$0xf0]  ;;  %v4963_v21 = vld [vmem:[#allocation2 + $0xd8] sm:$0xf]  ;;  %11717 = vmatmul.mubr.msk.bf16.gmra.mrb[108].mxu1 %vm18_vm1, %v13014_v45 }
 0x12f   :  { %v4011_v6 = vor.u32 %v4010_v35, %v4007_v61  ;;  %v4019_v59 = vrot.slane %v4017_v9, 4  ;;  %v4024_v8 = vrot.slane %v4022_v18, 3  ;;  %v5099_v60 = vrot.slane %v4960_v7, 4  ;;  %v3773_v11 = vld [vmem:[#allocation2 + $0xf0] sm:$0xf8]  ;;  %1528 = vst.msk [vmem:[#allocation3 + $0x170] sm:$0xff] %vm1481_vm7, %v11552_v31  ;;  %11720 = vmatprep.mubr.msk.bf16.mxu1 %vm18_vm1, %v13032_v16 }
 0x130   :  { %v1398_v62 = vpop.f32.mrb[13].mxu1  ;;  %v4027_v47 = vrot.slane %v4025_v3, 4  ;;  %v5100_v20 = vrot.slane %v4961_v58, 4  ;;  %v4031_v46 = vshrl.u32 %v3771_v29, 16  ;;  %v4034_v13 = vshll.u32 %v3771_v29, 16 }
 0x131   :  { %v13065_v19 = vsel %vm543_vm4, %v4003_v0, %v4011_v6  ;;  %1526 = vst.msk [vmem:[#allocation3 + $0x160] sm:$0xff] %vm1481_vm7, %v1398_v62  ;;  %v11553_v17 = vpop.f32.mrb[14].mxu1  ;;  %v4020_v22 = vor.u32 %v4019_v59, %v4016_v44  ;;  %v4039_v36 = vshrl.u32 %v3772_v63, 16  ;;  %v4042_v24 = vshll.u32 %v3772_v63, 16  ;;  %v3774_v32 = vld [vmem:[#allocation2 + $0xf8] sm:$0xf]  ;;  %11779 = vmatmul.mubr.msk.bf16.gmra.mrb[104].mxu0 %vm18_vm1, %v12992_v15 }
 0x132   :  { %1529 = vst.msk [vmem:[#allocation3 + $0x178] sm:$0xff] %vm1481_vm7, %v11553_v17  ;;  %v1401_v28 = vpop.f32.mrb[15].mxu1  ;;  %v4028_v30 = vor.u32 %v4027_v47, %v4024_v8  ;;  %v13072_v34 = vsel %vm1872_vm5, %v5099_v60, %v5100_v20  ;;  %v4033_v45 = vrot.slane %v4031_v46, 3  ;;  %v4036_v1 = vrot.slane %v4034_v13, 4  ;;  %v4964_v41 = vld [vmem:[#allocation2 + $0xe0] sm:$0xf0]  ;;  %11782 = vmatprep.mubr.msk.bf16.mxu0 %vm18_vm1, %v13002_v48 }
 0x133   :  { %1527 = vst.msk [vmem:[#allocation3 + $0x168] sm:$0xff] %vm1481_vm7, %v1401_v28  ;;  %v4041_v5 = vrot.slane %v4039_v36, 3  ;;  %v4044_v10 = vrot.slane %v4042_v24, 4  ;;  %v5102_v26 = vrot.slane %v4962_v12, 4  ;;  %v5103_v27 = vrot.slane %v4963_v21, 4  ;;  %v11520_v15 = vpop.f32.mrb[12].mxu0 }
 0x134   :  { %v4965_v42 = vld [vmem:[#allocation2 + $0xe8] sm:$0xf]  ;;  %v13078_v16 = vsel %vm543_vm4, %v4020_v22, %v4028_v30  ;;  %v4037_v43 = vor.u32 %v4036_v1, %v4033_v45  ;;  %v4048_v53 = vshrl.u32 %v3773_v11, 16  ;;  %v4051_v49 = vshll.u32 %v3773_v11, 16  ;;  %v3775_v50 = vld [vmem:[#allocation2 + $0x100] sm:$0xf8] }
 0x135   :  { %v4966_v55 = vld [vmem:[#allocation2 + $0xf0] sm:$0xf0]  ;;  %v4045_v40 = vor.u32 %v4044_v10, %v4041_v5  ;;  %v13083_v56 = vsel %vm1872_vm5, %v5102_v26, %v5103_v27  ;;  %v4056_v7 = vshrl.u32 %v3774_v32, 16  ;;  %v4059_v57 = vshll.u32 %v3774_v32, 16  ;;  %v3776_v54 = vld [vmem:[#allocation2 + $0x108] sm:$0xf] }
 0x136   :  { %v4967_v51 = vld [vmem:[#allocation2 + $0xf8] sm:$0xf]  ;;  %v4050_v14 = vrot.slane %v4048_v53, 3  ;;  %v4053_v58 = vrot.slane %v4051_v49, 4  ;;  %v5105_v52 = vrot.slane %v4964_v41, 4  ;;  %v5106_v61 = vrot.slane %v4965_v42, 4  ;;  %11721 = vmatmul.mubr.msk.bf16.gmra.mrb[112].mxu1 %vm18_vm1, %v13043_v39 }
 0x137   :  { %v13086_v25 = vsel %vm543_vm4, %v4037_v43, %v4045_v40  ;;  %1496 = vst.msk [vmem:[#allocation3 + $0x70] sm:$0xff] %vm1481_vm7, %v11520_v15  ;;  %v1270_v38 = vpop.f32.mrb[13].mxu0  ;;  %v4058_v48 = vrot.slane %v4056_v7, 3  ;;  %v4061_v29 = vrot.slane %v4059_v57, 4  ;;  %v4065_v35 = vshrl.u32 %v3775_v50, 16  ;;  %11724 = vmatprep.mubr.msk.bf16.mxu1 %vm18_vm1, %v13056_v33 }
 0x138   :  { %v3777_v9 = vld [vmem:[#allocation2 + $0x130] sm:$0xf8]  ;;  %1494 = vst.msk [vmem:[#allocation3 + $0x60] sm:$0xff] %vm1481_vm7, %v1270_v38  ;;  %v11521_v18 = vpop.f32.mrb[14].mxu0  ;;  %v4054_v63 = vor.u32 %v4053_v58, %v4050_v14  ;;  %v13091_v0 = vsel %vm1872_vm5, %v5105_v52, %v5106_v61  ;;  %v4068_v44 = vshll.u32 %v3775_v50, 16  ;;  %v4073_v3 = vshrl.u32 %v3776_v54, 16 }
 0x139   :  { %v3778_v12 = vld [vmem:[#allocation2 + $0x138] sm:$0xf]  ;;  %1497 = vst.msk [vmem:[#allocation3 + $0x78] sm:$0xff] %vm1481_vm7, %v11521_v18  ;;  %v1273_v21 = vpop.f32.mrb[15].mxu0  ;;  %v4062_v6 = vor.u32 %v4061_v29, %v4058_v48  ;;  %v4067_v31 = vrot.slane %v4065_v35, 3  ;;  %v4076_v59 = vshll.u32 %v3776_v54, 16  ;;  %11783 = vmatmul.mubr.msk.bf16.gmra.mrb[108].mxu0 %vm18_vm1, %v13024_v4 }
 0x13a   :  { %v5108_v8 = vrot.slane %v4966_v55, 4  ;;  %v4968_v60 = vld [vmem:[#allocation2 + $0x100] sm:$0xf0]  ;;  %1495 = vst.msk [vmem:[#allocation3 + $0x68] sm:$0xff] %vm1481_vm7, %v1273_v21  ;;  %v4070_v62 = vrot.slane %v4068_v44, 4  ;;  %v4075_v47 = vrot.slane %v4073_v3, 3  ;;  %11786 = vmatprep.mubr.msk.bf16.mxu0 %vm18_vm1, %v13036_v23 }
 0x13b   :  { %v3779_v11 = vld [vmem:[#allocation2 + $0x140] sm:$0xf8]  ;;  %v5109_v20 = vrot.slane %v4967_v51, 4  ;;  %v4082_v46 = vshrl.u32 %v3777_v9, 16  ;;  %v3780_v13 = vld [vmem:[#allocation2 + $0x148] sm:$0xf]  ;;  %v13100_v17 = vsel %vm543_vm4, %v4054_v63, %v4062_v6 }
 0x13c   :  { %v11556_v39 = vpop.f32.mrb[16].mxu1  ;;  %v4078_v22 = vrot.slane %v4076_v59, 4  ;;  %v4085_v36 = vshll.u32 %v3777_v9, 16  ;;  %v4090_v24 = vshrl.u32 %v3778_v12, 16  ;;  %v4969_v32 = vld [vmem:[#allocation2 + $0x108] sm:$0xf]  ;;  %v4071_v28 = vor.u32 %v4070_v62, %v4067_v31 }
 0x13d   :  { %1532 = vst.msk [vmem:[#allocation3 + $0x190] sm:$0xff] %vm1481_vm7, %v11556_v39  ;;  %v1414_v33 = vpop.f32.mrb[17].mxu1  ;;  %v13106_v30 = vsel %vm1872_vm5, %v5108_v8, %v5109_v20  ;;  %v4084_v45 = vrot.slane %v4082_v46, 3  ;;  %v4093_v1 = vshll.u32 %v3778_v12, 16  ;;  %v4970_v41 = vld [vmem:[#allocation2 + $0x130] sm:$0xf0] }
 0x13e   :  { %1530 = vst.msk [vmem:[#allocation3 + $0x180] sm:$0xff] %vm1481_vm7, %v1414_v33  ;;  %v11557_v5 = vpop.f32.mrb[18].mxu1  ;;  %v4079_v10 = vor.u32 %v4078_v22, %v4075_v47  ;;  %v4087_v26 = vrot.slane %v4085_v36, 4  ;;  %v4092_v27 = vrot.slane %v4090_v24, 3  ;;  %v5111_v4 = vrot.slane %v4968_v60, 4  ;;  %11725 = vmatmul.mubr.msk.bf16.gmra.mrb[116].mxu1 %vm18_vm1, %v13065_v19 }
 0x13f   :  { %v4971_v42 = vld [vmem:[#allocation2 + $0x138] sm:$0xf]  ;;  %1533 = vst.msk [vmem:[#allocation3 + $0x198] sm:$0xff] %vm1481_vm7, %v11557_v5  ;;  %v1417_v43 = vpop.f32.mrb[19].mxu1  ;;  %v4095_v53 = vrot.slane %v4093_v1, 4  ;;  %v5112_v49 = vrot.slane %v4969_v32, 4  ;;  %11728 = vmatprep.mubr.msk.bf16.mxu1 %vm18_vm1, %v13078_v16 }
 0x140   :  { %v4099_v50 = vshrl.u32 %v3779_v11, 16  ;;  %v4102_v55 = vshll.u32 %v3779_v11, 16  ;;  %1531 = vst.msk [vmem:[#allocation3 + $0x188] sm:$0xff] %vm1481_vm7, %v1417_v43  ;;  %v13114_v40 = vsel %vm543_vm4, %v4071_v28, %v4079_v10  ;;  %v4088_v23 = vor.u32 %v4087_v26, %v4084_v45  ;;  %v3781_v54 = vld [vmem:[#allocation2 + $0x150] sm:$0xf8]  ;;  %v11524_v16 = vpop.f32.mrb[16].mxu0 }
 0x141   :  { %v4107_v7 = vshrl.u32 %v3780_v13, 16  ;;  %v4110_v57 = vshll.u32 %v3780_v13, 16  ;;  %v3782_v51 = vld [vmem:[#allocation2 + $0x158] sm:$0xf]  ;;  %v4096_v15 = vor.u32 %v4095_v53, %v4092_v27  ;;  %v13117_v14 = vsel %vm1872_vm5, %v5111_v4, %v5112_v49  ;;  %v4972_v61 = vld [vmem:[#allocation2 + $0x140] sm:$0xf0]  ;;  %11787 = vmatmul.mubr.msk.bf16.gmra.mrb[112].mxu0 %vm18_vm1, %v13049_v37 }
 0x142   :  { %v4101_v58 = vrot.slane %v4099_v50, 3  ;;  %v4104_v52 = vrot.slane %v4102_v55, 4  ;;  %v4973_v38 = vld [vmem:[#allocation2 + $0x148] sm:$0xf]  ;;  %v5114_v35 = vrot.slane %v4970_v41, 4  ;;  %v5115_v9 = vrot.slane %v4971_v42, 4  ;;  %11790 = vmatprep.mubr.msk.bf16.mxu0 %vm18_vm1, %v13059_v2 }
 0x143   :  { %v4109_v48 = vrot.slane %v4107_v7, 3  ;;  %v4112_v29 = vrot.slane %v4110_v57, 4  ;;  %v3783_v18 = vld [vmem:[#allocation2 + $0x160] sm:$0xf8]  ;;  %v13124_v63 = vsel %vm543_vm4, %v4088_v23, %v4096_v15  ;;  %v4116_v3 = vshrl.u32 %v3781_v54, 16  ;;  %1500 = vst.msk [vmem:[#allocation3 + $0x90] sm:$0xff] %vm1481_vm7, %v11524_v16 }
 0x144   :  { %v4105_v44 = vor.u32 %v4104_v52, %v4101_v58  ;;  %v4119_v12 = vshll.u32 %v3781_v54, 16  ;;  %v3784_v21 = vld [vmem:[#allocation2 + $0x168] sm:$0xf]  ;;  %v4974_v6 = vld [vmem:[#allocation2 + $0x150] sm:$0xf0]  ;;  %v13127_v59 = vsel %vm1872_vm5, %v5114_v35, %v5115_v9  ;;  %v4124_v19 = vshrl.u32 %v3782_v51, 16 }
 0x145   :  { %v4113_v31 = vor.u32 %v4112_v29, %v4109_v48  ;;  %v4127_v8 = vshll.u32 %v3782_v51, 16  ;;  %v4975_v60 = vld [vmem:[#allocation2 + $0x158] sm:$0xf]  ;;  %v3785_v11 = vld [vmem:[#allocation2 + $0x170] sm:$0xf8]  ;;  %v4118_v62 = vrot.slane %v4116_v3, 3 }
 0x146   :  { %v4121_v47 = vrot.slane %v4119_v12, 4  ;;  %v5117_v20 = vrot.slane %v4972_v61, 4  ;;  %v5118_v46 = vrot.slane %v4973_v38, 4  ;;  %v1286_v13 = vpop.f32.mrb[17].mxu0  ;;  %v4126_v22 = vrot.slane %v4124_v19, 3  ;;  %11729 = vmatmul.mubr.msk.bf16.gmra.mrb[120].mxu1 %vm18_vm1, %v13086_v25 }
 0x147   :  { %v13135_v39 = vsel %vm543_vm4, %v4105_v44, %v4113_v31  ;;  %v4129_v36 = vrot.slane %v4127_v8, 4  ;;  %v4133_v24 = vshrl.u32 %v3783_v18, 16  ;;  %v3786_v32 = vld [vmem:[#allocation2 + $0x178] sm:$0xf]  ;;  %1498 = vst.msk [vmem:[#allocation3 + $0x80] sm:$0xff] %vm1481_vm7, %v1286_v13  ;;  %v11525_v37 = vpop.f32.mrb[18].mxu0  ;;  %11732 = vmatprep.mubr.msk.bf16.mxu1 %vm18_vm1, %v13100_v17 }
 0x148   :  { %v4122_v33 = vor.u32 %v4121_v47, %v4118_v62  ;;  %v13139_v28 = vsel %vm1872_vm5, %v5117_v20, %v5118_v46  ;;  %v4136_v45 = vshll.u32 %v3783_v18, 16  ;;  %v4141_v1 = vshrl.u32 %v3784_v21, 16  ;;  %v4976_v2 = vld [vmem:[#allocation2 + $0x160] sm:$0xf0]  ;;  %1501 = vst.msk [vmem:[#allocation3 + $0x98] sm:$0xff] %vm1481_vm7, %v11525_v37  ;;  %v1289_v41 = vpop.f32.mrb[19].mxu0 }
 0x149   :  { %v4130_v5 = vor.u32 %v4129_v36, %v4126_v22  ;;  %v4135_v10 = vrot.slane %v4133_v24, 3  ;;  %v4144_v26 = vshll.u32 %v3784_v21, 16  ;;  %v5120_v27 = vrot.slane %v4974_v6, 4  ;;  %v4977_v4 = vld [vmem:[#allocation2 + $0x168] sm:$0xf]  ;;  %1499 = vst.msk [vmem:[#allocation3 + $0x88] sm:$0xff] %vm1481_vm7, %v1289_v41  ;;  %11791 = vmatmul.mubr.msk.bf16.gmra.mrb[116].mxu0 %vm18_vm1, %v13072_v34 }
 0x14a   :  { %v4138_v42 = vrot.slane %v4136_v45, 4  ;;  %v4143_v43 = vrot.slane %v4141_v1, 3  ;;  %v5121_v53 = vrot.slane %v4975_v60, 4  ;;  %v4150_v49 = vshrl.u32 %v3785_v11, 16  ;;  %v3787_v50 = vld [vmem:[#allocation2 + $0x180] sm:$0xf8]  ;;  %11794 = vmatprep.mubr.msk.bf16.mxu0 %vm18_vm1, %v13083_v56 }
 0x14b   :  { %v13146_v55 = vsel %vm543_vm4, %v4122_v33, %v4130_v5  ;;  %v4146_v23 = vrot.slane %v4144_v26, 4  ;;  %v4153_v7 = vshll.u32 %v3785_v11, 16  ;;  %v4158_v57 = vshrl.u32 %v3786_v32, 16  ;;  %v3788_v54 = vld [vmem:[#allocation2 + $0x188] sm:$0xf]  ;;  %v11560_v51 = vpop.f32.mrb[20].mxu1 }
 0x14c   :  { %v4139_v15 = vor.u32 %v4138_v42, %v4135_v10  ;;  %v13151_v58 = vsel %vm1872_vm5, %v5120_v27, %v5121_v53  ;;  %v4152_v52 = vrot.slane %v4150_v49, 3  ;;  %v4161_v61 = vshll.u32 %v3786_v32, 16  ;;  %v4978_v38 = vld [vmem:[#allocation2 + $0x170] sm:$0xf0]  ;;  %v4979_v48 = vld [vmem:[#allocation2 + $0x178] sm:$0xf] }
 0x14d   :  { %1536 = vst.msk [vmem:[#allocation3 + $0x1b0] sm:$0xff] %vm1481_vm7, %v11560_v51  ;;  %v1430_v25 = vpop.f32.mrb[21].mxu1  ;;  %v4147_v29 = vor.u32 %v4146_v23, %v4143_v43  ;;  %v4155_v35 = vrot.slane %v4153_v7, 4  ;;  %v4160_v9 = vrot.slane %v4158_v57, 3  ;;  %v5123_v18 = vrot.slane %v4976_v2, 4  ;;  %v11528_v22 = vpop.f32.mrb[20].mxu0 }
 0x14e   :  { %v3789_v44 = vld [vmem:[#allocation2 + $0x190] sm:$0xf8]  ;;  %1534 = vst.msk [vmem:[#allocation3 + $0x1a0] sm:$0xff] %vm1481_vm7, %v1430_v25  ;;  %v11561_v17 = vpop.f32.mrb[22].mxu1  ;;  %v4163_v3 = vrot.slane %v4161_v61, 4  ;;  %v5124_v12 = vrot.slane %v4977_v4, 4  ;;  %11733 = vmatmul.mubr.msk.bf16.gmra.mrb[124].mxu1 %vm18_vm1, %v13114_v40 }
 0x14f   :  { %v4167_v21 = vshrl.u32 %v3787_v50, 16  ;;  %v4170_v6 = vshll.u32 %v3787_v50, 16  ;;  %v3790_v31 = vld [vmem:[#allocation2 + $0x198] sm:$0xf]  ;;  %1537 = vst.msk [vmem:[#allocation3 + $0x1b8] sm:$0xff] %vm1481_vm7, %v11561_v17  ;;  %v1433_v19 = vpop.f32.mrb[23].mxu1  ;;  %v13161_v8 = vsel %vm543_vm4, %v4139_v15, %v4147_v29  ;;  %v4156_v60 = vor.u32 %v4155_v35, %v4152_v52  ;;  %11736 = vmatprep.mubr.msk.bf16.mxu1 %vm18_vm1, %v13124_v63 }
 0x150   :  { %v4175_v11 = vshrl.u32 %v3788_v54, 16  ;;  %v4178_v34 = vshll.u32 %v3788_v54, 16  ;;  %v4980_v16 = vld [vmem:[#allocation2 + $0x180] sm:$0xf0]  ;;  %1535 = vst.msk [vmem:[#allocation3 + $0x1a8] sm:$0xff] %vm1481_vm7, %v1433_v19  ;;  %v4164_v62 = vor.u32 %v4163_v3, %v4160_v9  ;;  %v13165_v47 = vsel %vm1872_vm5, %v5123_v18, %v5124_v12  ;;  %1504 = vst.msk [vmem:[#allocation3 + $0xb0] sm:$0xff] %vm1481_vm7, %v11528_v22 }
 0x151   :  { %v4169_v20 = vrot.slane %v4167_v21, 3  ;;  %v4172_v46 = vrot.slane %v4170_v6, 4  ;;  %v4981_v13 = vld [vmem:[#allocation2 + $0x188] sm:$0xf]  ;;  %v3791_v56 = vld [vmem:[#allocation2 + $0x1a0] sm:$0xf8]  ;;  %11795 = vmatmul.mubr.msk.bf16.gmra.mrb[120].mxu0 %vm18_vm1, %v13091_v0 }
 0x152   :  { %v4177_v36 = vrot.slane %v4175_v11, 3  ;;  %v4180_v24 = vrot.slane %v4178_v34, 4  ;;  %v5126_v32 = vrot.slane %v4978_v38, 4  ;;  %v5127_v37 = vrot.slane %v4979_v48, 4  ;;  %v3792_v33 = vld [vmem:[#allocation2 + $0x1a8] sm:$0xf]  ;;  %11798 = vmatprep.mubr.msk.bf16.mxu0 %vm18_vm1, %v13106_v30 }
 0x153   :  { %v1302_v45 = vpop.f32.mrb[21].mxu0  ;;  %v13169_v1 = vsel %vm543_vm4, %v4156_v60, %v4164_v62  ;;  %v4173_v2 = vor.u32 %v4172_v46, %v4169_v20  ;;  %v4184_v41 = vshrl.u32 %v3789_v44, 16  ;;  %v4187_v5 = vshll.u32 %v3789_v44, 16  ;;  %v4982_v10 = vld [vmem:[#allocation2 + $0x190] sm:$0xf0] }
 0x154   :  { %1502 = vst.msk [vmem:[#allocation3 + $0xa0] sm:$0xff] %vm1481_vm7, %v1302_v45  ;;  %v11529_v26 = vpop.f32.mrb[22].mxu0  ;;  %v4181_v27 = vor.u32 %v4180_v24, %v4177_v36  ;;  %v13175_v4 = vsel %vm1872_vm5, %v5126_v32, %v5127_v37  ;;  %v4192_v42 = vshrl.u32 %v3790_v31, 16  ;;  %v4195_v43 = vshll.u32 %v3790_v31, 16  ;;  %v4983_v53 = vld [vmem:[#allocation2 + $0x198] sm:$0xf] }
 0x155   :  { %1505 = vst.msk [vmem:[#allocation3 + $0xb8] sm:$0xff] %vm1481_vm7, %v11529_v26  ;;  %v1305_v49 = vpop.f32.mrb[23].mxu0  ;;  %v4186_v50 = vrot.slane %v4184_v41, 3  ;;  %v4189_v23 = vrot.slane %v4187_v5, 4  ;;  %v5129_v7 = vrot.slane %v4980_v16, 4  ;;  %v5130_v40 = vrot.slane %v4981_v13, 4 }
 0x156   :  { %1503 = vst.msk [vmem:[#allocation3 + $0xa8] sm:$0xff] %vm1481_vm7, %v1305_v49  ;;  %v13182_v57 = vsel %vm543_vm4, %v4173_v2, %v4181_v27  ;;  %v4194_v54 = vrot.slane %v4192_v42, 3  ;;  %v4197_v51 = vrot.slane %v4195_v43, 4  ;;  %v4201_v15 = vshrl.u32 %v3791_v56, 16  ;;  %v3793_v52 = vld [vmem:[#allocation2 + $0x1b0] sm:$0xf8]  ;;  %11737 = vmatmul.mubr.msk.bf16.gmra.mrb[128].mxu1 %vm18_vm1, %v13135_v39 }
 0x157   :  { %v4190_v63 = vor.u32 %v4189_v23, %v4186_v50  ;;  %v13187_v61 = vsel %vm1872_vm5, %v5129_v7, %v5130_v40  ;;  %v4204_v38 = vshll.u32 %v3791_v56, 16  ;;  %v4209_v48 = vshrl.u32 %v3792_v33, 16  ;;  %v3794_v25 = vld [vmem:[#allocation2 + $0x1b8] sm:$0xf]  ;;  %v4984_v29 = vld [vmem:[#allocation2 + $0x1a0] sm:$0xf0]  ;;  %11740 = vmatprep.mubr.msk.bf16.mxu1 %vm18_vm1, %v13146_v55 }
 0x158   :  { %v4198_v35 = vor.u32 %v4197_v51, %v4194_v54  ;;  %v4203_v9 = vrot.slane %v4201_v15, 3  ;;  %v4212_v18 = vshll.u32 %v3792_v33, 16  ;;  %v5132_v44 = vrot.slane %v4982_v10, 4  ;;  %v4985_v17 = vld [vmem:[#allocation2 + $0x1a8] sm:$0xf]  ;;  %v11564_v31 = vpop.f32.mrb[24].mxu1 }
 0x159   :  { %v4206_v3 = vrot.slane %v4204_v38, 4  ;;  %v4211_v12 = vrot.slane %v4209_v48, 3  ;;  %v5133_v21 = vrot.slane %v4983_v53, 4  ;;  %v4218_v0 = vshrl.u32 %v3793_v52, 16  ;;  %v3795_v6 = vld [vmem:[#allocation2 + $0x1c0] sm:$0xf8]  ;;  %11799 = vmatmul.mubr.msk.bf16.gmra.mrb[124].mxu0 %vm18_vm1, %v13117_v14 }
 0x15a   :  { %v13192_v19 = vsel %vm543_vm4, %v4190_v63, %v4198_v35  ;;  %v4214_v60 = vrot.slane %v4212_v18, 4  ;;  %v4221_v11 = vshll.u32 %v3793_v52, 16  ;;  %v4226_v34 = vshrl.u32 %v3794_v25, 16  ;;  %v3796_v16 = vld [vmem:[#allocation2 + $0x1c8] sm:$0xf]  ;;  %1540 = vst.msk [vmem:[#allocation3 + $0x1d0] sm:$0xff] %vm1481_vm7, %v11564_v31  ;;  %11802 = vmatprep.mubr.msk.bf16.mxu0 %vm18_vm1, %v13127_v59 }
 0x15b   :  { %v1446_v30 = vpop.f32.mrb[25].mxu1  ;;  %v4207_v62 = vor.u32 %v4206_v3, %v4203_v9  ;;  %v13196_v20 = vsel %vm1872_vm5, %v5132_v44, %v5133_v21  ;;  %v4220_v46 = vrot.slane %v4218_v0, 3  ;;  %v4229_v13 = vshll.u32 %v3794_v25, 16  ;;  %v4986_v56 = vld [vmem:[#allocation2 + $0x1b0] sm:$0xf0] }
 0x15c   :  { %1538 = vst.msk [vmem:[#allocation3 + $0x1c0] sm:$0xff] %vm1481_vm7, %v1446_v30  ;;  %v11565_v22 = vpop.f32.mrb[26].mxu1  ;;  %v4215_v36 = vor.u32 %v4214_v60, %v4211_v12  ;;  %v4223_v24 = vrot.slane %v4221_v11, 4  ;;  %v4228_v32 = vrot.slane %v4226_v34, 3  ;;  %v5135_v37 = vrot.slane %v4984_v29, 4  ;;  %v11532_v9 = vpop.f32.mrb[24].mxu0 }
 0x15d   :  { %v4987_v33 = vld [vmem:[#allocation2 + $0x1b8] sm:$0xf]  ;;  %1541 = vst.msk [vmem:[#allocation3 + $0x1d8] sm:$0xff] %vm1481_vm7, %v11565_v22  ;;  %v1449_v45 = vpop.f32.mrb[27].mxu1  ;;  %v4231_v2 = vrot.slane %v4229_v13, 4  ;;  %v5136_v41 = vrot.slane %v4985_v17, 4 }
 0x15e   :  { %v4235_v5 = vshrl.u32 %v3795_v6, 16  ;;  %v4238_v10 = vshll.u32 %v3795_v6, 16  ;;  %1539 = vst.msk [vmem:[#allocation3 + $0x1c8] sm:$0xff] %vm1481_vm7, %v1449_v45  ;;  %v13206_v39 = vsel %vm543_vm4, %v4207_v62, %v4215_v36  ;;  %v4224_v26 = vor.u32 %v4223_v24, %v4220_v46  ;;  %v3797_v43 = vld [vmem:[#allocation2 + $0x1d0] sm:$0xf8]  ;;  %1508 = vst.msk [vmem:[#allocation3 + $0xd0] sm:$0xff] %vm1481_vm7, %v11532_v9  ;;  %11741 = vmatmul.mubr.msk.bf16.gmra.mrb[132].mxu1 %vm18_vm1, %v13161_v8 }
 0x15f   :  { %v4243_v27 = vshrl.u32 %v3796_v16, 16  ;;  %v4246_v42 = vshll.u32 %v3796_v16, 16  ;;  %v3798_v53 = vld [vmem:[#allocation2 + $0x1d8] sm:$0xf]  ;;  %v4232_v49 = vor.u32 %v4231_v2, %v4228_v32  ;;  %v13211_v55 = vsel %vm1872_vm5, %v5135_v37, %v5136_v41  ;;  %v4988_v7 = vld [vmem:[#allocation2 + $0x1c0] sm:$0xf0]  ;;  %11744 = vmatprep.mubr.msk.bf16.mxu1 %vm18_vm1, %v13169_v1 }
 0x160   :  { %v4237_v50 = vrot.slane %v4235_v5, 3  ;;  %v4240_v23 = vrot.slane %v4238_v10, 4  ;;  %v4989_v40 = vld [vmem:[#allocation2 + $0x1c8] sm:$0xf]  ;;  %v5138_v15 = vrot.slane %v4986_v56, 4  ;;  %v5139_v52 = vrot.slane %v4987_v33, 4 }
 0x161   :  { %v4245_v54 = vrot.slane %v4243_v27, 3  ;;  %v4248_v51 = vrot.slane %v4246_v42, 4  ;;  %v3799_v63 = vld [vmem:[#allocation2 + $0x1e0] sm:$0xf8]  ;;  %v13216_v38 = vsel %vm543_vm4, %v4224_v26, %v4232_v49  ;;  %v4252_v48 = vshrl.u32 %v3797_v43, 16  ;;  %v1318_v21 = vpop.f32.mrb[25].mxu0  ;;  %11803 = vmatmul.mubr.msk.bf16.gmra.mrb[128].mxu0 %vm18_vm1, %v13139_v28 }
 0x162   :  { %v4241_v14 = vor.u32 %v4240_v23, %v4237_v50  ;;  %v4255_v25 = vshll.u32 %v3797_v43, 16  ;;  %v3800_v29 = vld [vmem:[#allocation2 + $0x1e8] sm:$0xf]  ;;  %v4990_v35 = vld [vmem:[#allocation2 + $0x1d0] sm:$0xf0]  ;;  %v13219_v44 = vsel %vm1872_vm5, %v5138_v15, %v5139_v52  ;;  %v4260_v17 = vshrl.u32 %v3798_v53, 16  ;;  %11806 = vmatprep.mubr.msk.bf16.mxu0 %vm18_vm1, %v13151_v58 }
 0x163   :  { %v4249_v18 = vor.u32 %v4248_v51, %v4245_v54  ;;  %v4263_v59 = vshll.u32 %v3798_v53, 16  ;;  %v4991_v3 = vld [vmem:[#allocation2 + $0x1d8] sm:$0xf]  ;;  %v3801_v12 = vld [vmem:[#allocation2 + $0x1f0] sm:$0xf8]  ;;  %v4254_v0 = vrot.slane %v4252_v48, 3 }
 0x164   :  { %v4257_v6 = vrot.slane %v4255_v25, 4  ;;  %v5141_v31 = vrot.slane %v4988_v7, 4  ;;  %v5142_v60 = vrot.slane %v4989_v40, 4  ;;  %v3802_v11 = vld [vmem:[#allocation2 + $0x1f8] sm:$0xf]  ;;  %1506 = vst.msk [vmem:[#allocation3 + $0xc0] sm:$0xff] %vm1481_vm7, %v1318_v21 }
 0x165   :  { %v11533_v34 = vpop.f32.mrb[26].mxu0  ;;  %v13226_v16 = vsel %vm543_vm4, %v4241_v14, %v4249_v18  ;;  %v4262_v30 = vrot.slane %v4260_v17, 3  ;;  %v4265_v62 = vrot.slane %v4263_v59, 4  ;;  %v4269_v46 = vshrl.u32 %v3799_v63, 16  ;;  %v4992_v24 = vld [vmem:[#allocation2 + $0x1e0] sm:$0xf0] }
 0x166   :  { %1509 = vst.msk [vmem:[#allocation3 + $0xd8] sm:$0xff] %vm1481_vm7, %v11533_v34  ;;  %v1321_v13 = vpop.f32.mrb[27].mxu0  ;;  %v4258_v56 = vor.u32 %v4257_v6, %v4254_v0  ;;  %v13232_v22 = vsel %vm1872_vm5, %v5141_v31, %v5142_v60  ;;  %v4272_v8 = vshll.u32 %v3799_v63, 16  ;;  %v4277_v36 = vshrl.u32 %v3800_v29, 16  ;;  %v4993_v2 = vld [vmem:[#allocation2 + $0x1e8] sm:$0xf]  ;;  %11745 = vmatmul.mubr.msk.bf16.gmra.mrb[136].mxu1 %vm18_vm1, %v13182_v57 }
 0x167   :  { %1507 = vst.msk [vmem:[#allocation3 + $0xc8] sm:$0xff] %vm1481_vm7, %v1321_v13  ;;  %v4266_v32 = vor.u32 %v4265_v62, %v4262_v30  ;;  %v4271_v37 = vrot.slane %v4269_v46, 3  ;;  %v4280_v33 = vshll.u32 %v3800_v29, 16  ;;  %v5144_v45 = vrot.slane %v4990_v35, 4  ;;  %v3803_v41 = vld [vmem:[#allocation2 + $0x200] sm:$0xf8]  ;;  %11748 = vmatprep.mubr.msk.bf16.mxu1 %vm18_vm1, %v13192_v19 }
 0x168   :  { %v12176_v5 = vld [vmem:[%s15292_s0 + $0xf8] ss:$0 sps:$4 sm:$0xff]   ;;  %v11568_v1 = vpop.f32.mrb[28].mxu1  ;;  %v4274_v10 = vrot.slane %v4272_v8, 4  ;;  %v4279_v26 = vrot.slane %v4277_v36, 3  ;;  %v5145_v27 = vrot.slane %v4991_v3, 4 }
 0x169   :  { %v4286_v42 = vshrl.u32 %v3801_v12, 16  ;;  %1544 = vst.msk [vmem:[#allocation3 + $0x1f0] sm:$0xff] %vm1481_vm7, %v11568_v1  ;;  %v1462_v43 = vpop.f32.mrb[29].mxu1  ;;  %v13244_v53 = vsel %vm543_vm4, %v4258_v56, %v4266_v32  ;;  %v4282_v49 = vrot.slane %v4280_v33, 4  ;;  %v4289_v50 = vshll.u32 %v3801_v12, 16  ;;  %v2363_v31 = vld [vmem:[#allocation3 + $0x10] sm:$0xff]  ;;  %11807 = vmatmul.mubr.msk.bf16.gmra.mrb[132].mxu0 %vm18_vm1, %v13165_v47 }
 0x16a   :  { %v4294_v23 = vshrl.u32 %v3802_v11, 16  ;;  %v12177_v28 = vld [vmem:[%s15292_s0 + $0xfc] ss:$0 sps:$4 sm:$0xff]   ;;  %476 = vst.msk [vmem:[#allocation2 + $0x220] sm:$0xf0] %vm412_vm2, %v12176_v5  ;;  %v11569_v7 = vpop.f32.mrb[30].mxu1  ;;  %v4275_v40 = vor.u32 %v4274_v10, %v4271_v37  ;;  %v13252_v54 = vsel %vm1872_vm5, %v5144_v45, %v5145_v27  ;;  %11810 = vmatprep.mubr.msk.bf16.mxu0 %vm18_vm1, %v13175_v4 }
 0x16b   :  { %1542 = vst.msk [vmem:[#allocation3 + $0x1e0] sm:$0xff] %vm1481_vm7, %v1462_v43  ;;  %v4288_v58 = vrot.slane %v4286_v42, 3  ;;  %v4297_v51 = vshll.u32 %v3802_v11, 16  ;;  %v3804_v15 = vld [vmem:[#allocation2 + $0x208] sm:$0xf]  ;;  %1545 = vst.msk [vmem:[#allocation3 + $0x1f8] sm:$0xff] %vm1481_vm7, %v11569_v7  ;;  %v4283_v63 = vor.u32 %v4282_v49, %v4279_v26 }
 0x16c   :  { %v1465_v52 = vpop.f32.mrb[31].mxu1  ;;  %v4291_v14 = vrot.slane %v4289_v50, 4  ;;  %v4296_v48 = vrot.slane %v4294_v23, 3  ;;  %v5147_v25 = vrot.slane %v4992_v24, 4  ;;  %v4994_v29 = vld [vmem:[#allocation2 + $0x1f0] sm:$0xf0] }
 0x16d   :  { %477 = vst.msk [vmem:[#allocation2 + $0x228] sm:$0xf] %vm414_vm3, %v12177_v28  ;;  %v4299_v35 = vrot.slane %v4297_v51, 4  ;;  %v5148_v9 = vrot.slane %v4993_v2, 4  ;;  %v4303_v18 = vshrl.u32 %v3803_v41, 16  ;;  %v4306_v17 = vshll.u32 %v3803_v41, 16 }
 0x16e   :  { %1543 = vst.msk [vmem:[#allocation3 + $0x1e8] sm:$0xff] %vm1481_vm7, %v1465_v52  ;;  %v4995_v59 = vld [vmem:[#allocation2 + $0x1f8] sm:$0xf]  ;;  %v13260_v3 = vsel %vm543_vm4, %v4275_v40, %v4283_v63  ;;  %v4292_v12 = vor.u32 %v4291_v14, %v4288_v58  ;;  %v4311_v21 = vshrl.u32 %v3804_v15, 16  ;;  %v4314_v0 = vshll.u32 %v3804_v15, 16  ;;  %v2361_v46 = vld [vmem:[#allocation3] sm:$0xff]  ;;  %11749 = vmatmul.mubr.msk.bf16.gmra.mrb[140].mxu1 %vm18_vm1, %v13206_v39 }
 0x16f   :  { %v3805_v6 = vld [vmem:[#allocation2 + $0x210] sm:$0xf8]  ;;  %v4300_v60 = vor.u32 %v4299_v35, %v4296_v48  ;;  %v13265_v11 = vsel %vm1872_vm5, %v5147_v25, %v5148_v9  ;;  %v4305_v34 = vrot.slane %v4303_v18, 3  ;;  %v4308_v30 = vrot.slane %v4306_v17, 4  ;;  %v3806_v62 = vld [vmem:[#allocation2 + $0x218] sm:$0xf]  ;;  %11752 = vmatprep.mubr.msk.bf16.mxu1 %vm18_vm1, %v13216_v38 }
 0x170   :  { %v4313_v57 = vrot.slane %v4311_v21, 3  ;;  %v4316_v13 = vrot.slane %v4314_v0, 4  ;;  %v5150_v56 = vrot.slane %v4994_v29, 4  ;;  %v5151_v8 = vrot.slane %v4995_v59, 4  ;;  %v4996_v36 = vld [vmem:[#allocation2 + $0x200] sm:$0xf0] }
 0x171   :  { %v11574_v24 = vpop.f32.mrb[32].mxu1  ;;  %v2364_v32 = vld [vmem:[#allocation3 + $0x18] sm:$0xff]  ;;  %v13270_v19 = vsel %vm543_vm4, %v4292_v12, %v4300_v60  ;;  %v4309_v37 = vor.u32 %v4308_v30, %v4305_v34  ;;  %v4320_v33 = vshrl.u32 %v3805_v6, 16  ;;  %v4323_v45 = vshll.u32 %v3805_v6, 16  ;;  %v4997_v2 = vld [vmem:[#allocation2 + $0x208] sm:$0xf]  ;;  %11811 = vmatmul.mubr.msk.bf16.gmra.mrb[136].mxu0 %vm18_vm1, %v13187_v61 }
 0x172   :  { %v2427_v41 = vadd.f32 %v11574_v24, %v2363_v31  ;;  %v2106_v5 = vpop.f32.mrb[33].mxu1  ;;  %v2362_v1 = vld [vmem:[#allocation3 + $0x8] sm:$0xff]  ;;  %v4317_v10 = vor.u32 %v4316_v13, %v4313_v57  ;;  %v13275_v26 = vsel %vm1872_vm5, %v5150_v56, %v5151_v8  ;;  %v4328_v47 = vshrl.u32 %v3806_v62, 16  ;;  %v3807_v27 = vld [vmem:[#allocation2 + $0x220] sm:$0xf8]  ;;  %v11536_v58 = vpop.f32.mrb[28].mxu0  ;;  %11814 = vmatprep.mubr.msk.bf16.mxu0 %vm18_vm1, %v13196_v20 }
 0x173   :  { %v4998_v42 = vld [vmem:[#allocation2 + $0x210] sm:$0xf0]  ;;  %v4999_v43 = vld [vmem:[#allocation2 + $0x218] sm:$0xf]  ;;  %v2425_v49 = vadd.f32 %v2361_v46, %v2106_v5  ;;  %v11575_v50 = vpop.f32.mrb[34].mxu1  ;;  %v4322_v23 = vrot.slane %v4320_v33, 3 }
 0x174   :  { %v4325_v28 = vrot.slane %v4323_v45, 4  ;;  %v4331_v7 = vshll.u32 %v3806_v62, 16  ;;  %v3808_v40 = vld [vmem:[#allocation2 + $0x228] sm:$0xf]  ;;  %2492 = vst.msk [vmem:[#allocation3 + $0x10] sm:$0xff] %vm1481_vm7, %v2427_v41  ;;  %v2428_v51 = vadd.f32 %v11575_v50, %v2364_v32  ;;  %v2109_v15 = vpop.f32.mrb[35].mxu1  ;;  %v13279_v4 = vsel %vm543_vm4, %v4309_v37, %v4317_v10 }
 0x175   :  { %v4330_v52 = vrot.slane %v4328_v47, 3  ;;  %v5153_v63 = vrot.slane %v4996_v36, 4  ;;  %v5000_v14 = vld [vmem:[#allocation2 + $0x220] sm:$0xf0]  ;;  %1512 = vst.msk [vmem:[#allocation3 + $0xf0] sm:$0xff] %vm1481_vm7, %v11536_v58  ;;  %v1334_v48 = vpop.f32.mrb[29].mxu0  ;;  %v2426_v25 = vadd.f32 %v2362_v1, %v2109_v15 }
 0x176   :  { %2490 = vst.msk [vmem:[#allocation3] sm:$0xff] %vm1481_vm7, %v2425_v49  ;;  %v4326_v29 = vor.u32 %v4325_v28, %v4322_v23  ;;  %v4333_v35 = vrot.slane %v4331_v7, 4  ;;  %v5154_v9 = vrot.slane %v4997_v2, 4  ;;  %v5001_v18 = vld [vmem:[#allocation2 + $0x228] sm:$0xf]  ;;  %1510 = vst.msk [vmem:[#allocation3 + $0xe0] sm:$0xff] %vm1481_vm7, %v1334_v48  ;;  %11753 = vmatmul.mubr.msk.bf16.gmra.mrb[144].mxu1 %vm18_vm1, %v13226_v16 }
 0x177   :  { %v11537_v17 = vpop.f32.mrb[30].mxu0  ;;  %2493 = vst.msk [vmem:[#allocation3 + $0x18] sm:$0xff] %vm1481_vm7, %v2428_v51  ;;  %v4337_v59 = vshrl.u32 %v3807_v27, 16  ;;  %v4340_v12 = vshll.u32 %v3807_v27, 16  ;;  %v4345_v21 = vshrl.u32 %v3808_v40, 16  ;;  %v4348_v0 = vshll.u32 %v3808_v40, 16  ;;  %11756 = vmatprep.mubr.msk.bf16.mxu1 %vm18_vm1, %v13244_v53 }
 0x178   :  { %1513 = vst.msk [vmem:[#allocation3 + $0xf8] sm:$0xff] %vm1481_vm7, %v11537_v17  ;;  %v1337_v6 = vpop.f32.mrb[31].mxu0  ;;  %2491 = vst.msk [vmem:[#allocation3 + $0x8] sm:$0xff] %vm1481_vm7, %v2426_v25  ;;  %v2367_v31 = vld [vmem:[#allocation3 + $0x30] sm:$0xff]  ;;  %v4334_v60 = vor.u32 %v4333_v35, %v4330_v52  ;;  %v13292_v34 = vsel %vm1872_vm5, %v5153_v63, %v5154_v9  ;;  %v5156_v30 = vrot.slane %v4998_v42, 4  ;;  %v5157_v62 = vrot.slane %v4999_v43, 4 }
 0x179   :  { %v5743_v39 = vld [vmem:[#allocation2 + $0x10] sm:$0xf0]  ;;  %1511 = vst.msk [vmem:[#allocation3 + $0xe8] sm:$0xff] %vm1481_vm7, %v1337_v6  ;;  %v4339_v46 = vrot.slane %v4337_v59, 3  ;;  %v4342_v57 = vrot.slane %v4340_v12, 4  ;;  %v4347_v13 = vrot.slane %v4345_v21, 3  ;;  %11815 = vmatmul.mubr.msk.bf16.gmra.mrb[140].mxu0 %vm18_vm1, %v13211_v55 }
 0x17a   :  { %v4350_v56 = vrot.slane %v4348_v0, 4  ;;  %v5744_v8 = vld [vmem:[#allocation2 + $0x18] sm:$0x1f]  ;;  %v11578_v36 = vpop.f32.mrb[36].mxu1  ;;  %v13298_v38 = vsel %vm543_vm4, %v4326_v29, %v4334_v60  ;;  %v13301_v24 = vsel %vm1872_vm5, %v5156_v30, %v5157_v62  ;;  %v5159_v32 = vrot.slane %v5000_v14, 4  ;;  %v2365_v41 = vld [vmem:[#allocation3 + $0x20] sm:$0xff]  ;;  %11818 = vmatprep.mubr.msk.bf16.mxu0 %vm18_vm1, %v13219_v44 }
 0x17b   :  { %v5160_v37 = vrot.slane %v5001_v18, 4  ;;  %v13306_v33 = vld [vmem:[%s15291_s1 + $0xc] ss:$0 sps:$4 sm:$0xcc]   ;;  %v2431_v45 = vadd.f32 %v11578_v36, %v2367_v31  ;;  %v2122_v2 = vpop.f32.mrb[37].mxu1  ;;  %v2368_v5 = vld [vmem:[#allocation3 + $0x38] sm:$0xff]  ;;  %v4343_v61 = vor.u32 %v4342_v57, %v4339_v46 }
 0x17c   :  { %v4351_v1 = vor.u32 %v4350_v56, %v4347_v13  ;;  %v5808_v10 = vshrl.u32 %v5743_v39, 16  ;;  %v5745_v47 = vld [vmem:[#allocation2 + $0x20] sm:$0xf0]  ;;  %v3554_v27 = vld [vmem:[#allocation3 + $0x10] sm:$0xff]  ;;  %v2429_v42 = vadd.f32 %v2365_v41, %v2122_v2  ;;  %v11579_v43 = vpop.f32.mrb[38].mxu1  ;;  %v5811_v50 = vshll.u32 %v5743_v39, 16 }
 0x17d   :  { %v13311_v49 = vsel %vm1872_vm5, %v5159_v32, %v5160_v37  ;;  %v5816_v23 = vshrl.u32 %v5744_v8, 16  ;;  %v5746_v28 = vld [vmem:[#allocation2 + $0x28] sm:$0x1f]  ;;  %v11640_v7 = vpop.f32.mrb[32].mxu0  ;;  %2496 = vst.msk [vmem:[#allocation3 + $0x30] sm:$0xff] %vm1481_vm7, %v2431_v45  ;;  %v3552_v40 = vld [vmem:[#allocation3] sm:$0xff]  ;;  %v2432_v58 = vadd.f32 %v11579_v43, %v2368_v5 }
 0x17e   :  { %v2125_v51 = vpop.f32.mrb[39].mxu1  ;;  %v2366_v20 = vld [vmem:[#allocation3 + $0x28] sm:$0xff]  ;;  %v13315_v15 = vsel %vm543_vm4, %v4343_v61, %v4351_v1  ;;  %v5810_v52 = vrot.slane %v5808_v10, 4  ;;  %v5819_v63 = vshll.u32 %v5744_v8, 16  ;;  %v3618_v14 = vadd.f32 %v11640_v7, %v3554_v27  ;;  %v3297_v48 = vpop.f32.mrb[33].mxu0  ;;  %2494 = vst.msk [vmem:[#allocation3 + $0x20] sm:$0xff] %vm1481_vm7, %v2429_v42  ;;  %11757 = vmatmul.mubr.msk.bf16.gmra.mrb[148].mxu1 %vm18_vm1, %v13260_v3 }
 0x17f   :  { %v3555_v25 = vld [vmem:[#allocation3 + $0x18] sm:$0xff]  ;;  %v2430_v29 = vadd.f32 %v2366_v20, %v2125_v51  ;;  %v5813_v35 = vrot.slane %v5811_v50, 5  ;;  %v5818_v9 = vrot.slane %v5816_v23, 4  ;;  %v6937_v18 = vld [vmem:[#allocation2 + $0x20] sm:$0xf8]  ;;  %v3616_v17 = vadd.f32 %v3552_v40, %v3297_v48  ;;  %v11641_v59 = vpop.f32.mrb[34].mxu0  ;;  %11760 = vmatprep.mubr.msk.bf16.mxu1 %vm18_vm1, %v13270_v19 }
 0x180   :  { %2497 = vst.msk [vmem:[#allocation3 + $0x38] sm:$0xff] %vm1481_vm7, %v2432_v58  ;;  %v3553_v12 = vld [vmem:[#allocation3 + $0x8] sm:$0xff]  ;;  %v5821_v21 = vrot.slane %v5819_v63, 5  ;;  %v8353_v0 = vrot.slane %v13306_v33, 2  ;;  %v5825_v6 = vshrl.u32 %v5745_v47, 16  ;;  %3682 = vst.msk [vmem:[#allocation3 + $0x10] sm:$0xff] %vm1481_vm7, %v3618_v14  ;;  %v3619_v31 = vadd.f32 %v11641_v59, %v3555_v25 }
 0x181   :  { %v3300_v60 = vpop.f32.mrb[35].mxu0  ;;  %2495 = vst.msk [vmem:[#allocation3 + $0x28] sm:$0xff] %vm1481_vm7, %v2430_v29  ;;  %v2371_v30 = vld [vmem:[#allocation3 + $0x50] sm:$0xff]  ;;  %v5814_v62 = vor.u32 %v5813_v35, %v5810_v52  ;;  %v5828_v39 = vshll.u32 %v5745_v47, 16  ;;  %v5833_v46 = vshrl.u32 %v5746_v28, 16  ;;  %3680 = vst.msk [vmem:[#allocation3] sm:$0xff] %vm1481_vm7, %v3616_v17  ;;  %11819 = vmatmul.mubr.msk.bf16.gmra.mrb[144].mxu0 %vm18_vm1, %v13232_v22 }
 0x182   :  { %v3617_v16 = vadd.f32 %v3553_v12, %v3300_v60  ;;  %v5822_v57 = vor.u32 %v5821_v21, %v5818_v9  ;;  %12108 = vmatprep.subr.msk.bf16.mxu1 %vm1184_vm0, %v8353_v0  ;;  %v5827_v13 = vrot.slane %v5825_v6, 4  ;;  %v5836_v56 = vshll.u32 %v5746_v28, 16  ;;  %v6938_v8 = vld [vmem:[#allocation2 + $0x28] sm:$0xf]  ;;  %v13331_v36 = vld [vmem:[%s15291_s1 + $0x10] sm:$0x3]  ;;  %11822 = vmatprep.mubr.msk.bf16.mxu0 %vm18_vm1, %v13252_v54 }
 0x183   :  { %3683 = vst.msk [vmem:[#allocation3 + $0x18] sm:$0xff] %vm1481_vm7, %v3619_v31  ;;  %v11582_v53 = vpop.f32.mrb[40].mxu1  ;;  %v2369_v32 = vld [vmem:[#allocation3 + $0x40] sm:$0xff]  ;;  %v5830_v37 = vrot.slane %v5828_v39, 5  ;;  %v5835_v33 = vrot.slane %v5833_v46, 4  ;;  %v13337_v45 = vsel %vm1184_vm0, %v8353_v0, 0  ;;  %12109 = vmatprep.subr.msk.bf16.mxu0 %vm1184_vm0, %v13331_v36 }
 0x184   :  { %v7002_v2 = vshrl.u32 %v6937_v18, 16  ;;  %3681 = vst.msk [vmem:[#allocation3 + $0x8] sm:$0xff] %vm1481_vm7, %v3617_v16  ;;  %v2435_v41 = vadd.f32 %v11582_v53, %v2371_v30  ;;  %v2138_v5 = vpop.f32.mrb[41].mxu1  ;;  %v2372_v61 = vld [vmem:[#allocation3 + $0x58] sm:$0xff]  ;;  %v13345_v55 = vsel %vm2619_vm6, %v5814_v62, %v5822_v57  ;;  %v5838_v1 = vrot.slane %v5836_v56, 5  ;;  %v3558_v27 = vld [vmem:[#allocation3 + $0x30] sm:$0xff] }
 0x185   :  { %v7005_v10 = vshll.u32 %v6937_v18, 16  ;;  %v5747_v47 = vld [vmem:[#allocation2 + $0x30] sm:$0xf0]  ;;  %v2433_v42 = vadd.f32 %v2369_v32, %v2138_v5  ;;  %v11583_v43 = vpop.f32.mrb[42].mxu1  ;;  %v5831_v50 = vor.u32 %v5830_v37, %v5827_v13  ;;  %v7010_v28 = vshrl.u32 %v6938_v8, 16  ;;  %v11644_v40 = vpop.f32.mrb[36].mxu0 }
 0x186   :  { %v7004_v23 = vrot.slane %v7002_v2, 3  ;;  %v5748_v7 = vld [vmem:[#allocation2 + $0x38] sm:$0x1f]  ;;  %2500 = vst.msk [vmem:[#allocation3 + $0x50] sm:$0xff] %vm1481_vm7, %v2435_v41  ;;  %v3556_v58 = vld [vmem:[#allocation3 + $0x20] sm:$0xff]  ;;  %v2436_v51 = vadd.f32 %v11583_v43, %v2372_v61  ;;  %v2141_v20 = vpop.f32.mrb[43].mxu1  ;;  %v5839_v52 = vor.u32 %v5838_v1, %v5835_v33  ;;  %v3622_v48 = vadd.f32 %v11644_v40, %v3558_v27  ;;  %11761 = vmatmul.mubr.msk.bf16.gmra.mrb[152].mxu1 %vm18_vm1, %v13279_v4 }
 0x187   :  { %v2370_v44 = vld [vmem:[#allocation3 + $0x48] sm:$0xff]  ;;  %v7007_v63 = vrot.slane %v7005_v10, 4  ;;  %v7013_v14 = vshll.u32 %v6938_v8, 16  ;;  %v3313_v25 = vpop.f32.mrb[37].mxu0  ;;  %2498 = vst.msk [vmem:[#allocation3 + $0x40] sm:$0xff] %vm1481_vm7, %v2433_v42  ;;  %v3559_v29 = vld [vmem:[#allocation3 + $0x38] sm:$0xff]  ;;  %11764 = vmatprep.mubr.msk.bf16.mxu1 %vm18_vm1, %v13298_v38 }
 0x188   :  { %v2434_v35 = vadd.f32 %v2370_v44, %v2141_v20  ;;  %v7012_v9 = vrot.slane %v7010_v28, 3  ;;  %v5842_v18 = vshrl.u32 %v5747_v47, 16  ;;  %v6939_v17 = vld [vmem:[#allocation2 + $0x30] sm:$0xf8]  ;;  %v3620_v59 = vadd.f32 %v3556_v58, %v3313_v25  ;;  %v11645_v12 = vpop.f32.mrb[38].mxu0  ;;  %2501 = vst.msk [vmem:[#allocation3 + $0x58] sm:$0xff] %vm1481_vm7, %v2436_v51 }
 0x189   :  { %v3557_v21 = vld [vmem:[#allocation3 + $0x28] sm:$0xff]  ;;  %v13353_v0 = vsel %vm2619_vm6, %v5831_v50, %v5839_v52  ;;  %v7008_v6 = vor.u32 %v7007_v63, %v7004_v23  ;;  %v7015_v31 = vrot.slane %v7013_v14, 4  ;;  %v13355_v60 = vld [vmem:[#allocation2 + $0x38] sm:$0xf]  ;;  %3686 = vst.msk [vmem:[#allocation3 + $0x30] sm:$0xff] %vm1481_vm7, %v3622_v48  ;;  %v3623_v30 = vadd.f32 %v11645_v12, %v3559_v29  ;;  %v3316_v62 = vpop.f32.mrb[39].mxu0  ;;  %11823 = vmatmul.mubr.msk.bf16.gmra.mrb[148].mxu0 %vm18_vm1, %v13265_v11 }
 0x18a   :  { %2499 = vst.msk [vmem:[#allocation3 + $0x48] sm:$0xff] %vm1481_vm7, %v2434_v35  ;;  %v5844_v39 = vrot.slane %v5842_v18, 4  ;;  %v5845_v46 = vshll.u32 %v5747_v47, 16  ;;  %v5850_v16 = vshrl.u32 %v5748_v7, 16  ;;  %3684 = vst.msk [vmem:[#allocation3 + $0x20] sm:$0xff] %vm1481_vm7, %v3620_v59  ;;  %v3621_v3 = vadd.f32 %v3557_v21, %v3316_v62  ;;  %v11586_v53 = vpop.f32.mrb[44].mxu1  ;;  %11826 = vmatprep.mubr.msk.bf16.mxu0 %vm18_vm1, %v13275_v26 }
 0x18b   :  { %v7016_v57 = vor.u32 %v7015_v31, %v7012_v9  ;;  %v5853_v13 = vshll.u32 %v5748_v7, 16  ;;  %v7019_v56 = vshrl.u32 %v6939_v17, 16  ;;  %v5749_v8 = vld [vmem:[#allocation2 + $0x40] sm:$0xf0]  ;;  %3687 = vst.msk [vmem:[#allocation3 + $0x38] sm:$0xff] %vm1481_vm7, %v3623_v30  ;;  %v2375_v32 = vld [vmem:[#allocation3 + $0x70] sm:$0xff] }
 0x18c   :  { %v5847_v37 = vrot.slane %v5845_v46, 5  ;;  %v5852_v33 = vrot.slane %v5850_v16, 4  ;;  %v7022_v19 = vshll.u32 %v6939_v17, 16  ;;  %v7027_v2 = vshrl.u32 %v13355_v60, 16  ;;  %3685 = vst.msk [vmem:[#allocation3 + $0x28] sm:$0xff] %vm1481_vm7, %v3621_v3  ;;  %v2154_v5 = vpop.f32.mrb[45].mxu1 }
 0x18d   :  { %v2439_v41 = vadd.f32 %v11586_v53, %v2375_v32  ;;  %v2373_v61 = vld [vmem:[#allocation3 + $0x60] sm:$0xff]  ;;  %v2376_v1 = vld [vmem:[#allocation3 + $0x78] sm:$0xff]  ;;  %v13370_v10 = vsel %vm543_vm4, %v7008_v6, %v7016_v57  ;;  %v5855_v22 = vrot.slane %v5853_v13, 5  ;;  %v13372_v47 = vrot.slane %v7019_v56, 3  ;;  %v3562_v27 = vld [vmem:[#allocation3 + $0x50] sm:$0xff]  ;;  %v11587_v43 = vpop.f32.mrb[46].mxu1 }
 0x18e   :  { %v2437_v42 = vadd.f32 %v2373_v61, %v2154_v5  ;;  %v5848_v50 = vor.u32 %v5847_v37, %v5844_v39  ;;  %v7024_v23 = vrot.slane %v7022_v19, 4  ;;  %v7029_v28 = vrot.slane %v7027_v2, 3  ;;  %v5750_v7 = vld [vmem:[#allocation2 + $0x48] sm:$0x1f]  ;;  %v11648_v40 = vpop.f32.mrb[40].mxu0  ;;  %v3560_v58 = vld [vmem:[#allocation3 + $0x40] sm:$0xff]  ;;  %11765 = vmatmul.mubr.msk.bf16.gmra.mrb[156].mxu1 %vm18_vm1, %v13315_v15 }
 0x18f   :  { %2504 = vst.msk [vmem:[#allocation3 + $0x70] sm:$0xff] %vm1481_vm7, %v2439_v41  ;;  %v2440_v51 = vadd.f32 %v11587_v43, %v2376_v1  ;;  %v2157_v20 = vpop.f32.mrb[47].mxu1  ;;  %v2374_v54 = vld [vmem:[#allocation3 + $0x68] sm:$0xff]  ;;  %v5856_v44 = vor.u32 %v5855_v22, %v5852_v33  ;;  %v7030_v52 = vshll.u32 %v13355_v60, 16  ;;  %v5859_v63 = vshrl.u32 %v5749_v8, 16  ;;  %v3329_v48 = vpop.f32.mrb[41].mxu0  ;;  %11836 = vmatprep.mubr.msk.bf16.mxu1 %vm18_vm1, %v13345_v55 }
 0x190   :  { %v3626_v14 = vadd.f32 %v11648_v40, %v3562_v27  ;;  %2502 = vst.msk [vmem:[#allocation3 + $0x60] sm:$0xff] %vm1481_vm7, %v2437_v42  ;;  %v3563_v25 = vld [vmem:[#allocation3 + $0x58] sm:$0xff]  ;;  %v2438_v29 = vadd.f32 %v2374_v54, %v2157_v20  ;;  %v7025_v35 = vor.u32 %v7024_v23, %v13372_v47  ;;  %v5862_v9 = vshll.u32 %v5749_v8, 16  ;;  %v6941_v18 = vld [vmem:[#allocation2 + $0x40] sm:$0xf8]  ;;  %v11649_v59 = vpop.f32.mrb[42].mxu0 }
 0x191   :  { %v3624_v17 = vadd.f32 %v3560_v58, %v3329_v48  ;;  %2505 = vst.msk [vmem:[#allocation3 + $0x78] sm:$0xff] %vm1481_vm7, %v2440_v51  ;;  %v3561_v12 = vld [vmem:[#allocation3 + $0x48] sm:$0xff]  ;;  %v13382_v21 = vsel %vm2619_vm6, %v5848_v50, %v5856_v44  ;;  %v7032_v6 = vrot.slane %v7030_v52, 4  ;;  %v5861_v31 = vrot.slane %v5859_v63, 4  ;;  %v3332_v30 = vpop.f32.mrb[43].mxu0  ;;  %v2379_v3 = vld [vmem:[#allocation3 + $0x90] sm:$0xff]  ;;  %11827 = vmatmul.mubr.msk.bf16.gmra.mrb[152].mxu0 %vm18_vm1, %v13292_v34 }
 0x192   :  { %3690 = vst.msk [vmem:[#allocation3 + $0x50] sm:$0xff] %vm1481_vm7, %v3626_v14  ;;  %v3627_v60 = vadd.f32 %v11649_v59, %v3563_v25  ;;  %2503 = vst.msk [vmem:[#allocation3 + $0x68] sm:$0xff] %vm1481_vm7, %v2438_v29  ;;  %v5864_v62 = vrot.slane %v5862_v9, 5  ;;  %v5867_v39 = vshrl.u32 %v5750_v7, 16  ;;  %v5870_v46 = vshll.u32 %v5750_v7, 16  ;;  %v2377_v57 = vld [vmem:[#allocation3 + $0x80] sm:$0xff]  ;;  %11830 = vmatprep.mubr.msk.bf16.mxu0 %vm18_vm1, %v13301_v24 }
 0x193   :  { %v6942_v16 = vld [vmem:[#allocation2 + $0x48] sm:$0xf]  ;;  %3688 = vst.msk [vmem:[#allocation3 + $0x40] sm:$0xff] %vm1481_vm7, %v3624_v17  ;;  %v3625_v4 = vadd.f32 %v3561_v12, %v3332_v30  ;;  %v7033_v13 = vor.u32 %v7032_v6, %v7029_v28  ;;  %v13391_v56 = vsel %vm1184_vm0, %v13331_v36, 0  ;;  %v7036_v8 = vshrl.u32 %v6941_v18, 16  ;;  %v11590_v38 = vpop.f32.mrb[48].mxu1 }
 0x194   :  { %3691 = vst.msk [vmem:[#allocation3 + $0x58] sm:$0xff] %vm1481_vm7, %v3627_v60  ;;  %v2380_v53 = vld [vmem:[#allocation3 + $0x98] sm:$0xff]  ;;  %v5865_v32 = vor.u32 %v5864_v62, %v5861_v31  ;;  %v5869_v37 = vrot.slane %v5867_v39, 4  ;;  %v5872_v33 = vrot.slane %v5870_v46, 5  ;;  %v7039_v19 = vshll.u32 %v6941_v18, 16  ;;  %v2170_v5 = vpop.f32.mrb[49].mxu1 }
 0x195   :  { %v5751_v2 = vld [vmem:[#allocation2 + $0x50] sm:$0xf0]  ;;  %3689 = vst.msk [vmem:[#allocation3 + $0x48] sm:$0xff] %vm1481_vm7, %v3625_v4  ;;  %v2443_v41 = vadd.f32 %v11590_v38, %v2379_v3  ;;  %v2378_v61 = vld [vmem:[#allocation3 + $0x88] sm:$0xff]  ;;  %v13400_v36 = vsel %vm543_vm4, %v7025_v35, %v7033_v13  ;;  %v13402_v1 = vrot.slane %v7036_v8, 3  ;;  %v7044_v11 = vshrl.u32 %v6942_v16, 16 }
 0x196   :  { %v5752_v22 = vld [vmem:[#allocation2 + $0x58] sm:$0x1f]  ;;  %v3566_v47 = vld [vmem:[#allocation3 + $0x70] sm:$0xff]  ;;  %v2441_v27 = vadd.f32 %v2377_v57, %v2170_v5  ;;  %v11591_v42 = vpop.f32.mrb[50].mxu1  ;;  %v5873_v43 = vor.u32 %v5872_v33, %v5869_v37  ;;  %v7041_v50 = vrot.slane %v7039_v19, 4  ;;  %v7047_v23 = vshll.u32 %v6942_v16, 16  ;;  %11837 = vmatmul.mubr.msk.bf16.vlgmr.msra.gmra.mrb[160].mxu1 %vm18_vm1, %v13353_v0 }
 0x197   :  { %v6943_v28 = vld [vmem:[#allocation2 + $0x50] sm:$0xf8]  ;;  %v11652_v7 = vpop.f32.mrb[44].mxu0  ;;  %2508 = vst.msk [vmem:[#allocation3 + $0x90] sm:$0xff] %vm1481_vm7, %v2443_v41  ;;  %v3564_v40 = vld [vmem:[#allocation3 + $0x60] sm:$0xff]  ;;  %v2444_v58 = vadd.f32 %v11591_v42, %v2380_v53  ;;  %v2173_v26 = vpop.f32.mrb[51].mxu1  ;;  %11967 = vmatpush3.bf16.msra.mxu1 %v13337_v45  ;;  %11840 = vmatprep.mubr.msk.bf16.mxu1 %vm18_vm1, %v13382_v21 }
 0x198   :  { %v7046_v51 = vrot.slane %v7044_v11, 3  ;;  %v5876_v20 = vshrl.u32 %v5751_v2, 16  ;;  %v5879_v54 = vshll.u32 %v5751_v2, 16  ;;  %v3630_v44 = vadd.f32 %v11652_v7, %v3566_v47  ;;  %v3345_v52 = vpop.f32.mrb[45].mxu0  ;;  %2506 = vst.msk [vmem:[#allocation3 + $0x80] sm:$0xff] %vm1481_vm7, %v2441_v27  ;;  %v3567_v63 = vld [vmem:[#allocation3 + $0x78] sm:$0xff] }
 0x199   :  { %v2442_v14 = vadd.f32 %v2378_v61, %v2173_v26  ;;  %v13407_v48 = vsel %vm2619_vm6, %v5865_v32, %v5873_v43  ;;  %v7042_v25 = vor.u32 %v7041_v50, %v13402_v1  ;;  %v6944_v29 = vld [vmem:[#allocation2 + $0x58] sm:$0xf]  ;;  %v3628_v35 = vadd.f32 %v3564_v40, %v3345_v52  ;;  %v11653_v9 = vpop.f32.mrb[46].mxu0  ;;  %2509 = vst.msk [vmem:[#allocation3 + $0x98] sm:$0xff] %vm1481_vm7, %v2444_v58  ;;  %v3565_v18 = vld [vmem:[#allocation3 + $0x68] sm:$0xff]  ;;  %v2383_v46 = vld [vmem:[#allocation3 + $0xb0] sm:$0xff] }
 0x19a   :  { %v7049_v17 = vrot.slane %v7047_v23, 4  ;;  %v5878_v59 = vrot.slane %v5876_v20, 4  ;;  %v5881_v12 = vrot.slane %v5879_v54, 5  ;;  %3694 = vst.msk [vmem:[#allocation3 + $0x70] sm:$0xff] %vm1481_vm7, %v3630_v44  ;;  %v3631_v6 = vadd.f32 %v11653_v9, %v3567_v63  ;;  %v3348_v31 = vpop.f32.mrb[47].mxu0  ;;  %v11594_v57 = vpop.f32.mrb[52].mxu1  ;;  %11831 = vmatmul.mubr.msk.bf16.gmra.mrb[156].mxu0 %vm18_vm1, %v13311_v49 }
 0x19b   :  { %2507 = vst.msk [vmem:[#allocation3 + $0x88] sm:$0xff] %vm1481_vm7, %v2442_v14  ;;  %v5884_v60 = vshrl.u32 %v5752_v22, 16  ;;  %v5887_v30 = vshll.u32 %v5752_v22, 16  ;;  %v7053_v62 = vshrl.u32 %v6943_v28, 16  ;;  %3692 = vst.msk [vmem:[#allocation3 + $0x60] sm:$0xff] %vm1481_vm7, %v3628_v35  ;;  %v3629_v39 = vadd.f32 %v3565_v18, %v3348_v31  ;;  %v2381_v13 = vld [vmem:[#allocation3 + $0xa0] sm:$0xff]  ;;  %11902 = vmatprep.mubr.msk.bf16.mxu0 %vm18_vm1, %v13370_v10 }
 0x19c   :  { %v7050_v15 = vor.u32 %v7049_v17, %v7046_v51  ;;  %v5882_v16 = vor.u32 %v5881_v12, %v5878_v59  ;;  %v7056_v4 = vshll.u32 %v6943_v28, 16  ;;  %v5753_v3 = vld [vmem:[#allocation2 + $0x60] sm:$0xf0]  ;;  %3695 = vst.msk [vmem:[#allocation3 + $0x78] sm:$0xff] %vm1481_vm7, %v3631_v6  ;;  %v7061_v53 = vshrl.u32 %v6944_v29, 16  ;;  %v2186_v37 = vpop.f32.mrb[53].mxu1 }
 0x19d   :  { %v5886_v8 = vrot.slane %v5884_v60, 4  ;;  %v5889_v55 = vrot.slane %v5887_v30, 5  ;;  %v7055_v38 = vrot.slane %v7053_v62, 3  ;;  %3693 = vst.msk [vmem:[#allocation3 + $0x68] sm:$0xff] %vm1481_vm7, %v3629_v39  ;;  %v2447_v32 = vadd.f32 %v11594_v57, %v2383_v46  ;;  %v2384_v33 = vld [vmem:[#allocation3 + $0xb8] sm:$0xff]  ;;  %v11595_v1 = vpop.f32.mrb[54].mxu1 }
 0x19e   :  { %v13425_v19 = vsel %vm543_vm4, %v7042_v25, %v7050_v15  ;;  %v7058_v2 = vrot.slane %v7056_v4, 4  ;;  %v7064_v41 = vshll.u32 %v6944_v29, 16  ;;  %v5754_v34 = vld [vmem:[#allocation2 + $0x68] sm:$0x1f]  ;;  %v3570_v5 = vld [vmem:[#allocation3 + $0x90] sm:$0xff]  ;;  %v2445_v61 = vadd.f32 %v2381_v13, %v2186_v37  ;;  %v11656_v42 = vpop.f32.mrb[48].mxu0  ;;  %11841 = vmatmul.mubr.msk.bf16.gmra.mrb[164].mxu1 %vm18_vm1, %v13407_v48 }
 0x19f   :  { %v5890_v11 = vor.u32 %v5889_v55, %v5886_v8  ;;  %v7063_v22 = vrot.slane %v7061_v53, 3  ;;  %v5893_v47 = vshrl.u32 %v5753_v3, 16  ;;  %v6945_v27 = vld [vmem:[#allocation2 + $0x60] sm:$0xf8]  ;;  %2512 = vst.msk [vmem:[#allocation3 + $0xb0] sm:$0xff] %vm1481_vm7, %v2447_v32  ;;  %v2448_v50 = vadd.f32 %v11595_v1, %v2384_v33  ;;  %v2189_v23 = vpop.f32.mrb[55].mxu1 }
 0x1a0   :  { %v3568_v43 = vld [vmem:[#allocation3 + $0x80] sm:$0xff]  ;;  %v2382_v24 = vld [vmem:[#allocation3 + $0xa8] sm:$0xff]  ;;  %v7059_v28 = vor.u32 %v7058_v2, %v7055_v38  ;;  %v7066_v7 = vrot.slane %v7064_v41, 4  ;;  %v5896_v40 = vshll.u32 %v5753_v3, 16  ;;  %v3634_v58 = vadd.f32 %v11656_v42, %v3570_v5  ;;  %v3361_v26 = vpop.f32.mrb[49].mxu0  ;;  %2510 = vst.msk [vmem:[#allocation3 + $0xa0] sm:$0xff] %vm1481_vm7, %v2445_v61 }
 0x1a1   :  { %v3571_v51 = vld [vmem:[#allocation3 + $0x98] sm:$0xff]  ;;  %v2446_v20 = vadd.f32 %v2382_v24, %v2189_v23  ;;  %v13430_v54 = vsel %vm2619_vm6, %v5882_v16, %v5890_v11  ;;  %v13432_v44 = vrot.slane %v5893_v47, 4  ;;  %v3632_v52 = vadd.f32 %v3568_v43, %v3361_v26  ;;  %v11657_v63 = vpop.f32.mrb[50].mxu0  ;;  %2513 = vst.msk [vmem:[#allocation3 + $0xb8] sm:$0xff] %vm1481_vm7, %v2448_v50  ;;  %v6946_v9 = vld [vmem:[#allocation2 + $0x68] sm:$0xf] }
 0x1a2   :  { %v3569_v14 = vld [vmem:[#allocation3 + $0x88] sm:$0xff]  ;;  %v7067_v25 = vor.u32 %v7066_v7, %v7063_v22  ;;  %v5898_v29 = vrot.slane %v5896_v40, 5  ;;  %v5901_v35 = vshrl.u32 %v5754_v34, 16  ;;  %3698 = vst.msk [vmem:[#allocation3 + $0x90] sm:$0xff] %vm1481_vm7, %v3634_v58  ;;  %v3635_v18 = vadd.f32 %v11657_v63, %v3571_v51  ;;  %v3364_v17 = vpop.f32.mrb[51].mxu0  ;;  %v2387_v60 = vld [vmem:[#allocation3 + $0xd0] sm:$0xff]  ;;  %11844 = vmatprep.mubr.msk.bf16.mxu1 %vm18_vm1, %v13430_v54  ;;  %11903 = vmatmul.mubr.msk.bf16.vlgmr.msra.gmra.mrb[160].mxu0 %vm18_vm1, %v13400_v36 }
 0x1a3   :  { %2511 = vst.msk [vmem:[#allocation3 + $0xa8] sm:$0xff] %vm1481_vm7, %v2446_v20  ;;  %v5904_v59 = vshll.u32 %v5754_v34, 16  ;;  %v7070_v12 = vshrl.u32 %v6945_v27, 16  ;;  %v7073_v6 = vshll.u32 %v6945_v27, 16  ;;  %v5755_v31 = vld [vmem:[#allocation2 + $0x70] sm:$0xf0]  ;;  %v3633_v0 = vadd.f32 %v3569_v14, %v3364_v17  ;;  %12033 = vmatpush3.bf16.msra.mxu0 %v13391_v56  ;;  %11906 = vmatprep.mubr.msk.bf16.mxu0 %vm18_vm1, %v13425_v19 }
 0x1a4   :  { %3696 = vst.msk [vmem:[#allocation3 + $0x80] sm:$0xff] %vm1481_vm7, %v3632_v52  ;;  %v2385_v30 = vld [vmem:[#allocation3 + $0xc0] sm:$0xff]  ;;  %v13444_v62 = vsel %vm543_vm4, %v7059_v28, %v7067_v25  ;;  %v5899_v39 = vor.u32 %v5898_v29, %v13432_v44  ;;  %v5903_v46 = vrot.slane %v5901_v35, 4  ;;  %3699 = vst.msk [vmem:[#allocation3 + $0x98] sm:$0xff] %vm1481_vm7, %v3635_v18  ;;  %v11598_v45 = vpop.f32.mrb[56].mxu1  ;;  %v2388_v21 = vld [vmem:[#allocation3 + $0xd8] sm:$0xff] }
 0x1a5   :  { %v5906_v15 = vrot.slane %v5904_v59, 5  ;;  %v7072_v16 = vrot.slane %v7070_v12, 3  ;;  %v7075_v4 = vrot.slane %v7073_v6, 4  ;;  %v7078_v3 = vshrl.u32 %v6946_v9, 16  ;;  %3697 = vst.msk [vmem:[#allocation3 + $0x88] sm:$0xff] %vm1481_vm7, %v3633_v0  ;;  %v2202_v13 = vpop.f32.mrb[57].mxu1 }
 0x1a6   :  { %v2451_v57 = vadd.f32 %v11598_v45, %v2387_v60  ;;  %v7081_v8 = vshll.u32 %v6946_v9, 16  ;;  %v5756_v55 = vld [vmem:[#allocation2 + $0x78] sm:$0x1f]  ;;  %v5910_v38 = vshrl.u32 %v5755_v31, 16  ;;  %v5913_v53 = vshll.u32 %v5755_v31, 16  ;;  %v3574_v32 = vld [vmem:[#allocation3 + $0xb0] sm:$0xff] }
 0x1a7   :  { %v2449_v37 = vadd.f32 %v2385_v30, %v2202_v13  ;;  %v11599_v49 = vpop.f32.mrb[58].mxu1  ;;  %v2386_v33 = vld [vmem:[#allocation3 + $0xc8] sm:$0xff]  ;;  %v5907_v2 = vor.u32 %v5906_v15, %v5903_v46  ;;  %v7076_v41 = vor.u32 %v7075_v4, %v7072_v16  ;;  %v7080_v34 = vrot.slane %v7078_v3, 3  ;;  %v6947_v5 = vld [vmem:[#allocation2 + $0x70] sm:$0xf8]  ;;  %v11660_v61 = vpop.f32.mrb[52].mxu0 }
 0x1a8   :  { %2516 = vst.msk [vmem:[#allocation3 + $0xd0] sm:$0xff] %vm1481_vm7, %v2451_v57  ;;  %v3572_v1 = vld [vmem:[#allocation3 + $0xa0] sm:$0xff]  ;;  %v2452_v11 = vadd.f32 %v11599_v49, %v2388_v21  ;;  %v2205_v22 = vpop.f32.mrb[59].mxu1  ;;  %v7083_v47 = vrot.slane %v7081_v8, 4  ;;  %v13454_v10 = vrot.slane %v5910_v38, 4  ;;  %v13456_v27 = vrot.slane %v5913_v53, 5 }
 0x1a9   :  { %v3638_v42 = vadd.f32 %v11660_v61, %v3574_v32  ;;  %v3377_v43 = vpop.f32.mrb[53].mxu0  ;;  %2514 = vst.msk [vmem:[#allocation3 + $0xc0] sm:$0xff] %vm1481_vm7, %v2449_v37  ;;  %v3575_v50 = vld [vmem:[#allocation3 + $0xb8] sm:$0xff]  ;;  %v2450_v23 = vadd.f32 %v2386_v33, %v2205_v22  ;;  %v13460_v24 = vsel %vm2619_vm6, %v5899_v39, %v5907_v2  ;;  %v5918_v28 = vshrl.u32 %v5756_v55, 16  ;;  %v5757_v52 = vld [vmem:[#allocation2 + $0x80] sm:$0xf0] }
 0x1aa   :  { %v6948_v7 = vld [vmem:[#allocation2 + $0x78] sm:$0xf]  ;;  %v3636_v40 = vadd.f32 %v3572_v1, %v3377_v43  ;;  %v11661_v58 = vpop.f32.mrb[54].mxu0  ;;  %2517 = vst.msk [vmem:[#allocation3 + $0xd8] sm:$0xff] %vm1481_vm7, %v2452_v11  ;;  %v3573_v26 = vld [vmem:[#allocation3 + $0xa8] sm:$0xff]  ;;  %v7084_v51 = vor.u32 %v7083_v47, %v7080_v34  ;;  %v5916_v20 = vor.u32 %v13456_v27, %v13454_v10  ;;  %v5921_v44 = vshll.u32 %v5756_v55, 16  ;;  %11845 = vmatmul.mubr.msk.bf16.gmra.mrb[168].mxu1 %vm18_vm1, %v13460_v24 }
 0x1ab   :  { %3702 = vst.msk [vmem:[#allocation3 + $0xb0] sm:$0xff] %vm1481_vm7, %v3638_v42  ;;  %v3639_v63 = vadd.f32 %v11661_v58, %v3575_v50  ;;  %v3380_v14 = vpop.f32.mrb[55].mxu0  ;;  %2515 = vst.msk [vmem:[#allocation3 + $0xc8] sm:$0xff] %vm1481_vm7, %v2450_v23  ;;  %v5920_v25 = vrot.slane %v5918_v28, 4  ;;  %v7087_v29 = vshrl.u32 %v6947_v5, 16  ;;  %v7090_v35 = vshll.u32 %v6947_v5, 16  ;;  %11907 = vmatmul.mubr.msk.bf16.gmra.mrb[164].mxu0 %vm18_vm1, %v13444_v62 }
 0x1ac   :  { %3700 = vst.msk [vmem:[#allocation3 + $0xa0] sm:$0xff] %vm1481_vm7, %v3636_v40  ;;  %v3637_v48 = vadd.f32 %v3573_v26, %v3380_v14  ;;  %v13473_v9 = vsel %vm543_vm4, %v7076_v41, %v7084_v51  ;;  %v5923_v18 = vrot.slane %v5921_v44, 5  ;;  %v7095_v17 = vshrl.u32 %v6948_v7, 16  ;;  %v5758_v59 = vld [vmem:[#allocation2 + $0x88] sm:$0x1f]  ;;  %v11602_v12 = vpop.f32.mrb[60].mxu1 }
 0x1ad   :  { %3703 = vst.msk [vmem:[#allocation3 + $0xb8] sm:$0xff] %vm1481_vm7, %v3639_v63  ;;  %v2391_v6 = vld [vmem:[#allocation3 + $0xf0] sm:$0xff]  ;;  %v7089_v54 = vrot.slane %v7087_v29, 3  ;;  %v7092_v31 = vrot.slane %v7090_v35, 4  ;;  %v7098_v0 = vshll.u32 %v6948_v7, 16  ;;  %v5927_v60 = vshrl.u32 %v5757_v52, 16  ;;  %11910 = vmatprep.mubr.msk.bf16.mxu0 %vm18_vm1, %v13473_v9 }
 0x1ae   :  { %3701 = vst.msk [vmem:[#allocation3 + $0xa8] sm:$0xff] %vm1481_vm7, %v3637_v48  ;;  %v2455_v30 = vadd.f32 %v11602_v12, %v2391_v6  ;;  %v2218_v39 = vpop.f32.mrb[61].mxu1  ;;  %v2389_v46 = vld [vmem:[#allocation3 + $0xe0] sm:$0xff]  ;;  %v2392_v45 = vld [vmem:[#allocation3 + $0xf8] sm:$0xff]  ;;  %v5924_v21 = vor.u32 %v5923_v18, %v5920_v25  ;;  %v7097_v15 = vrot.slane %v7095_v17, 3  ;;  %v5930_v36 = vshll.u32 %v5757_v52, 16 }
 0x1af   :  { %v3578_v16 = vld [vmem:[#allocation3 + $0xd0] sm:$0xff]  ;;  %v2453_v4 = vadd.f32 %v2389_v46, %v2218_v39  ;;  %v11603_v3 = vpop.f32.mrb[62].mxu1  ;;  %v7093_v57 = vor.u32 %v7092_v31, %v7089_v54  ;;  %v7100_v13 = vrot.slane %v7098_v0, 4  ;;  %v13482_v8 = vrot.slane %v5927_v60, 4  ;;  %v6949_v55 = vld [vmem:[#allocation2 + $0x80] sm:$0xf8] }
 0x1b0   :  { %v11664_v38 = vpop.f32.mrb[56].mxu0  ;;  %2520 = vst.msk [vmem:[#allocation3 + $0xf0] sm:$0xff] %vm1481_vm7, %v2455_v30  ;;  %v3576_v56 = vld [vmem:[#allocation3 + $0xc0] sm:$0xff]  ;;  %v2456_v53 = vadd.f32 %v11603_v3, %v2392_v45  ;;  %v2221_v32 = vpop.f32.mrb[63].mxu1  ;;  %v2390_v37 = vld [vmem:[#allocation3 + $0xe8] sm:$0xff]  ;;  %v5925_v19 = vsel %vm2619_vm6, %v5916_v20, %v5924_v21  ;;  %v5932_v49 = vrot.slane %v5930_v36, 5 }
 0x1b1   :  { %v5935_v33 = vshrl.u32 %v5758_v59, 16  ;;  %v3642_v2 = vadd.f32 %v11664_v38, %v3578_v16  ;;  %v3393_v41 = vpop.f32.mrb[57].mxu0  ;;  %2518 = vst.msk [vmem:[#allocation3 + $0xe0] sm:$0xff] %vm1481_vm7, %v2453_v4  ;;  %v3579_v34 = vld [vmem:[#allocation3 + $0xd8] sm:$0xff]  ;;  %v2454_v5 = vadd.f32 %v2390_v37, %v2221_v32  ;;  %v7101_v61 = vor.u32 %v7100_v13, %v7097_v15  ;;  %v6950_v11 = vld [vmem:[#allocation2 + $0x88] sm:$0xf]  ;;  %11848 = vmatprep.mubr.msk.bf16.mxu1 %vm18_vm1, %v5925_v19 }
 0x1b2   :  { %v5938_v1 = vshll.u32 %v5758_v59, 16  ;;  %v3640_v22 = vadd.f32 %v3576_v56, %v3393_v41  ;;  %v11665_v47 = vpop.f32.mrb[58].mxu0  ;;  %2521 = vst.msk [vmem:[#allocation3 + $0xf8] sm:$0xff] %vm1481_vm7, %v2456_v53  ;;  %v3577_v10 = vld [vmem:[#allocation3 + $0xc8] sm:$0xff]  ;;  %v5933_v27 = vor.u32 %v5932_v49, %v13482_v8  ;;  %v7104_v43 = vshrl.u32 %v6949_v55, 16  ;;  %v11606_v52 = vpop.f32.mrb[64].mxu1 }
 0x1b3   :  { %v5937_v42 = vrot.slane %v5935_v33, 4  ;;  %v5759_v50 = vld [vmem:[#allocation2 + $0x90] sm:$0xf0]  ;;  %3706 = vst.msk [vmem:[#allocation3 + $0xd0] sm:$0xff] %vm1481_vm7, %v3642_v2  ;;  %v3643_v23 = vadd.f32 %v11665_v47, %v3579_v34  ;;  %v3396_v28 = vpop.f32.mrb[59].mxu0  ;;  %2519 = vst.msk [vmem:[#allocation3 + $0xe8] sm:$0xff] %vm1481_vm7, %v2454_v5  ;;  %v13495_v7 = vsel %vm543_vm4, %v7093_v57, %v7101_v61 }
 0x1b4   :  { %v5940_v40 = vrot.slane %v5938_v1, 5  ;;  %v7107_v58 = vshll.u32 %v6949_v55, 16  ;;  %v5760_v26 = vld [vmem:[#allocation2 + $0x98] sm:$0x1f]  ;;  %3704 = vst.msk [vmem:[#allocation3 + $0xc0] sm:$0xff] %vm1481_vm7, %v3640_v22  ;;  %v3641_v24 = vadd.f32 %v3577_v10, %v3396_v28  ;;  %v7106_v51 = vrot.slane %v7104_v43, 3  ;;  %11911 = vmatmul.mubr.msk.bf16.gmra.mrb[168].mxu0 %vm18_vm1, %v13495_v7 }
 0x1b5   :  { %v7112_v20 = vshrl.u32 %v6950_v11, 16  ;;  %v7115_v44 = vshll.u32 %v6950_v11, 16  ;;  %3707 = vst.msk [vmem:[#allocation3 + $0xd8] sm:$0xff] %vm1481_vm7, %v3643_v23  ;;  %v2395_v63 = vld [vmem:[#allocation3 + $0x110] sm:$0xff]  ;;  %v2393_v14 = vld [vmem:[#allocation3 + $0x100] sm:$0xff]  ;;  %v5944_v35 = vshrl.u32 %v5759_v50, 16 }
 0x1b6   :  { %v5941_v25 = vor.u32 %v5940_v40, %v5937_v42  ;;  %v7109_v29 = vrot.slane %v7107_v58, 4  ;;  %v5947_v48 = vshll.u32 %v5759_v50, 16  ;;  %3705 = vst.msk [vmem:[#allocation3 + $0xc8] sm:$0xff] %vm1481_vm7, %v3641_v24  ;;  %v2459_v18 = vadd.f32 %v11606_v52, %v2395_v63  ;;  %v2234_v17 = vpop.f32.mrb[65].mxu1  ;;  %v6951_v54 = vld [vmem:[#allocation2 + $0x90] sm:$0xf8] }
 0x1b7   :  { %v7114_v59 = vrot.slane %v7112_v20, 3  ;;  %v7117_v12 = vrot.slane %v7115_v44, 4  ;;  %v5952_v6 = vshrl.u32 %v5760_v26, 16  ;;  %v3582_v31 = vld [vmem:[#allocation3 + $0xf0] sm:$0xff]  ;;  %v2457_v62 = vadd.f32 %v2393_v14, %v2234_v17  ;;  %v11607_v0 = vpop.f32.mrb[66].mxu1  ;;  %v2396_v60 = vld [vmem:[#allocation3 + $0x118] sm:$0xff] }
 0x1b8   :  { %v5942_v30 = vsel %vm2619_vm6, %v5933_v27, %v5941_v25  ;;  %v7110_v39 = vor.u32 %v7109_v29, %v7106_v51  ;;  %v13505_v46 = vrot.slane %v5944_v35, 4  ;;  %v6952_v45 = vld [vmem:[#allocation2 + $0x98] sm:$0xf]  ;;  %v11668_v21 = vpop.f32.mrb[60].mxu0  ;;  %2524 = vst.msk [vmem:[#allocation3 + $0x110] sm:$0xff] %vm1481_vm7, %v2459_v18  ;;  %v3580_v15 = vld [vmem:[#allocation3 + $0xe0] sm:$0xff]  ;;  %v2460_v36 = vadd.f32 %v11607_v0, %v2396_v60 }
 0x1b9   :  { %v2237_v9 = vpop.f32.mrb[67].mxu1  ;;  %v2394_v16 = vld [vmem:[#allocation3 + $0x108] sm:$0xff]  ;;  %v7118_v4 = vor.u32 %v7117_v12, %v7114_v59  ;;  %v5949_v3 = vrot.slane %v5947_v48, 5  ;;  %v5954_v57 = vrot.slane %v5952_v6, 4  ;;  %v3646_v13 = vadd.f32 %v11668_v21, %v3582_v31  ;;  %v3409_v8 = vpop.f32.mrb[61].mxu0  ;;  %2522 = vst.msk [vmem:[#allocation3 + $0x100] sm:$0xff] %vm1481_vm7, %v2457_v62  ;;  %11849 = vmatmul.mubr.msk.bf16.gmra.mrb[172].mxu1 %vm18_vm1, %v5942_v30 }
 0x1ba   :  { %v3583_v55 = vld [vmem:[#allocation3 + $0xf8] sm:$0xff]  ;;  %v2458_v38 = vadd.f32 %v2394_v16, %v2237_v9  ;;  %v5955_v56 = vshll.u32 %v5760_v26, 16  ;;  %v7121_v53 = vshrl.u32 %v6951_v54, 16  ;;  %v5761_v32 = vld [vmem:[#allocation2 + $0xa0] sm:$0xf0]  ;;  %v3644_v37 = vadd.f32 %v3580_v15, %v3409_v8  ;;  %v11669_v19 = vpop.f32.mrb[62].mxu0 }
 0x1bb   :  { %2525 = vst.msk [vmem:[#allocation3 + $0x118] sm:$0xff] %vm1481_vm7, %v2460_v36  ;;  %v3581_v49 = vld [vmem:[#allocation3 + $0xe8] sm:$0xff]  ;;  %v7119_v33 = vsel %vm543_vm4, %v7110_v39, %v7118_v4  ;;  %v5950_v2 = vor.u32 %v5949_v3, %v13505_v46  ;;  %v7124_v41 = vshll.u32 %v6951_v54, 16  ;;  %3710 = vst.msk [vmem:[#allocation3 + $0xf0] sm:$0xff] %vm1481_vm7, %v3646_v13  ;;  %v3647_v5 = vadd.f32 %v11669_v19, %v3583_v55  ;;  %v3412_v61 = vpop.f32.mrb[63].mxu0  ;;  %v2399_v10 = vld [vmem:[#allocation3 + $0x130] sm:$0xff] }
 0x1bc   :  { %v5762_v34 = vld [vmem:[#allocation2 + $0xa8] sm:$0x1f]  ;;  %2523 = vst.msk [vmem:[#allocation3 + $0x108] sm:$0xff] %vm1481_vm7, %v2458_v38  ;;  %v5957_v1 = vrot.slane %v5955_v56, 5  ;;  %v7123_v11 = vrot.slane %v7121_v53, 3  ;;  %v7129_v22 = vshrl.u32 %v6952_v45, 16  ;;  %v3645_v47 = vadd.f32 %v3581_v49, %v3412_v61  ;;  %11914 = vmatprep.mubr.msk.bf16.mxu0 %vm18_vm1, %v7119_v33 }
 0x1bd   :  { %3708 = vst.msk [vmem:[#allocation3 + $0xe0] sm:$0xff] %vm1481_vm7, %v3644_v37  ;;  %v7126_v27 = vrot.slane %v7124_v41, 4  ;;  %v7132_v42 = vshll.u32 %v6952_v45, 16  ;;  %v5961_v43 = vshrl.u32 %v5761_v32, 16  ;;  %3711 = vst.msk [vmem:[#allocation3 + $0xf8] sm:$0xff] %vm1481_vm7, %v3647_v5  ;;  %v11610_v50 = vpop.f32.mrb[68].mxu1 }
 0x1be   :  { %v5958_v23 = vor.u32 %v5957_v1, %v5954_v57  ;;  %v7131_v28 = vrot.slane %v7129_v22, 3  ;;  %v5964_v40 = vshll.u32 %v5761_v32, 16  ;;  %v5969_v58 = vshrl.u32 %v5762_v34, 16  ;;  %v6953_v26 = vld [vmem:[#allocation2 + $0xa0] sm:$0xf8]  ;;  %3709 = vst.msk [vmem:[#allocation3 + $0xe8] sm:$0xff] %vm1481_vm7, %v3645_v47 }
 0x1bf   :  { %v2463_v24 = vadd.f32 %v11610_v50, %v2399_v10  ;;  %v2250_v51 = vpop.f32.mrb[69].mxu1  ;;  %v2397_v20 = vld [vmem:[#allocation3 + $0x120] sm:$0xff]  ;;  %v2400_v44 = vld [vmem:[#allocation3 + $0x138] sm:$0xff]  ;;  %v7127_v52 = vor.u32 %v7126_v27, %v7123_v11  ;;  %v7134_v63 = vrot.slane %v7132_v42, 4  ;;  %v5963_v14 = vrot.slane %v5961_v43, 4  ;;  %v3586_v25 = vld [vmem:[#allocation3 + $0x110] sm:$0xff] }
 0x1c0   :  { %v2461_v29 = vadd.f32 %v2397_v20, %v2250_v51  ;;  %v11611_v7 = vpop.f32.mrb[70].mxu1  ;;  %v5959_v35 = vsel %vm2619_vm6, %v5950_v2, %v5958_v23  ;;  %v5966_v48 = vrot.slane %v5964_v40, 5  ;;  %v5971_v18 = vrot.slane %v5969_v58, 4  ;;  %v6954_v17 = vld [vmem:[#allocation2 + $0xa8] sm:$0xf]  ;;  %v11672_v59 = vpop.f32.mrb[64].mxu0 }
 0x1c1   :  { %2528 = vst.msk [vmem:[#allocation3 + $0x130] sm:$0xff] %vm1481_vm7, %v2463_v24  ;;  %v3584_v12 = vld [vmem:[#allocation3 + $0x100] sm:$0xff]  ;;  %v2464_v6 = vadd.f32 %v11611_v7, %v2400_v44  ;;  %v2253_v54 = vpop.f32.mrb[71].mxu1  ;;  %v2398_v31 = vld [vmem:[#allocation3 + $0x128] sm:$0xff]  ;;  %11852 = vmatprep.mubr.msk.bf16.mxu1 %vm18_vm1, %v5959_v35  ;;  %v7135_v62 = vor.u32 %v7134_v63, %v7131_v28  ;;  %v5972_v0 = vshll.u32 %v5762_v34, 16  ;;  %v7138_v60 = vshrl.u32 %v6953_v26, 16 }
 0x1c2   :  { %v3650_v30 = vadd.f32 %v11672_v59, %v3586_v25  ;;  %v3425_v39 = vpop.f32.mrb[65].mxu0  ;;  %2526 = vst.msk [vmem:[#allocation3 + $0x120] sm:$0xff] %vm1481_vm7, %v2461_v29  ;;  %v3587_v46 = vld [vmem:[#allocation3 + $0x118] sm:$0xff]  ;;  %v2462_v45 = vadd.f32 %v2398_v31, %v2253_v54  ;;  %v5967_v21 = vor.u32 %v5966_v48, %v5963_v14  ;;  %v7141_v15 = vshll.u32 %v6953_v26, 16  ;;  %v5763_v36 = vld [vmem:[#allocation2 + $0xb0] sm:$0xf0] }
 0x1c3   :  { %v3648_v9 = vadd.f32 %v3584_v12, %v3425_v39  ;;  %v11673_v16 = vpop.f32.mrb[66].mxu0  ;;  %2529 = vst.msk [vmem:[#allocation3 + $0x138] sm:$0xff] %vm1481_vm7, %v2464_v6  ;;  %v3585_v4 = vld [vmem:[#allocation3 + $0x108] sm:$0xff]  ;;  %v7136_v3 = vsel %vm543_vm4, %v7127_v52, %v7135_v62  ;;  %v5974_v57 = vrot.slane %v5972_v0, 5  ;;  %v7140_v13 = vrot.slane %v7138_v60, 3  ;;  %v2403_v49 = vld [vmem:[#allocation3 + $0x150] sm:$0xff] }
 0x1c4   :  { %v5764_v8 = vld [vmem:[#allocation2 + $0xb8] sm:$0x1f]  ;;  %3714 = vst.msk [vmem:[#allocation3 + $0x110] sm:$0xff] %vm1481_vm7, %v3650_v30  ;;  %v3651_v55 = vadd.f32 %v11673_v16, %v3587_v46  ;;  %v3428_v38 = vpop.f32.mrb[67].mxu0  ;;  %2527 = vst.msk [vmem:[#allocation3 + $0x128] sm:$0xff] %vm1481_vm7, %v2462_v45  ;;  %v7143_v56 = vrot.slane %v7141_v15, 4  ;;  %11915 = vmatmul.mubr.msk.bf16.gmra.mrb[172].mxu0 %vm18_vm1, %v7136_v3 }
 0x1c5   :  { %v7146_v53 = vshrl.u32 %v6954_v17, 16  ;;  %v7149_v32 = vshll.u32 %v6954_v17, 16  ;;  %3712 = vst.msk [vmem:[#allocation3 + $0x100] sm:$0xff] %vm1481_vm7, %v3648_v9  ;;  %v3649_v37 = vadd.f32 %v3585_v4, %v3428_v38  ;;  %v5975_v19 = vor.u32 %v5974_v57, %v5971_v18  ;;  %v2401_v33 = vld [vmem:[#allocation3 + $0x140] sm:$0xff]  ;;  %v11614_v34 = vpop.f32.mrb[72].mxu1  ;;  %v2404_v42 = vld [vmem:[#allocation3 + $0x158] sm:$0xff] }
 0x1c6   :  { %v5978_v2 = vshrl.u32 %v5763_v36, 16  ;;  %v5981_v41 = vshll.u32 %v5763_v36, 16  ;;  %3715 = vst.msk [vmem:[#allocation3 + $0x118] sm:$0xff] %vm1481_vm7, %v3651_v55  ;;  %v7144_v5 = vor.u32 %v7143_v56, %v7140_v13  ;;  %v5986_v11 = vshrl.u32 %v5764_v8, 16  ;;  %v6955_v22 = vld [vmem:[#allocation2 + $0xb0] sm:$0xf8] }
 0x1c7   :  { %v7148_v61 = vrot.slane %v7146_v53, 3  ;;  %v7151_v1 = vrot.slane %v7149_v32, 4  ;;  %3713 = vst.msk [vmem:[#allocation3 + $0x108] sm:$0xff] %vm1481_vm7, %v3649_v37  ;;  %v5976_v47 = vsel %vm2619_vm6, %v5967_v21, %v5975_v19  ;;  %v2467_v10 = vadd.f32 %v11614_v34, %v2403_v49  ;;  %v2266_v27 = vpop.f32.mrb[73].mxu1  ;;  %v6956_v23 = vld [vmem:[#allocation2 + $0xb8] sm:$0xf] }
 0x1c8   :  { %v5980_v43 = vrot.slane %v5978_v2, 4  ;;  %v5983_v50 = vrot.slane %v5981_v41, 5  ;;  %11853 = vmatmul.mubr.msk.bf16.gmra.mrb[176].mxu1 %vm18_vm1, %v5976_v47  ;;  %v3590_v28 = vld [vmem:[#allocation3 + $0x130] sm:$0xff]  ;;  %v2465_v40 = vadd.f32 %v2401_v33, %v2266_v27  ;;  %v11615_v58 = vpop.f32.mrb[74].mxu1  ;;  %v5988_v24 = vrot.slane %v5986_v11, 4  ;;  %v11676_v44 = vpop.f32.mrb[68].mxu0 }
 0x1c9   :  { %v7152_v26 = vor.u32 %v7151_v1, %v7148_v61  ;;  %v5989_v51 = vshll.u32 %v5764_v8, 16  ;;  %v5765_v20 = vld [vmem:[#allocation2 + $0xc0] sm:$0xf0]  ;;  %2532 = vst.msk [vmem:[#allocation3 + $0x150] sm:$0xff] %vm1481_vm7, %v2467_v10  ;;  %v2468_v63 = vadd.f32 %v11615_v58, %v2404_v42  ;;  %v2269_v14 = vpop.f32.mrb[75].mxu1  ;;  %v2402_v25 = vld [vmem:[#allocation3 + $0x148] sm:$0xff]  ;;  %v3654_v48 = vadd.f32 %v11676_v44, %v3590_v28 }
 0x1ca   :  { %v3588_v52 = vld [vmem:[#allocation3 + $0x120] sm:$0xff]  ;;  %v5984_v29 = vor.u32 %v5983_v50, %v5980_v43  ;;  %v7155_v7 = vshrl.u32 %v6955_v22, 16  ;;  %v7158_v35 = vshll.u32 %v6955_v22, 16  ;;  %v3441_v18 = vpop.f32.mrb[69].mxu0  ;;  %2530 = vst.msk [vmem:[#allocation3 + $0x140] sm:$0xff] %vm1481_vm7, %v2465_v40  ;;  %v3591_v17 = vld [vmem:[#allocation3 + $0x138] sm:$0xff]  ;;  %v2466_v59 = vadd.f32 %v2402_v25, %v2269_v14 }
 0x1cb   :  { %v7153_v12 = vsel %vm543_vm4, %v7144_v5, %v7152_v26  ;;  %v5991_v6 = vrot.slane %v5989_v51, 5  ;;  %v5766_v54 = vld [vmem:[#allocation2 + $0xc8] sm:$0x1f]  ;;  %v3652_v31 = vadd.f32 %v3588_v52, %v3441_v18  ;;  %v11677_v62 = vpop.f32.mrb[70].mxu0  ;;  %2533 = vst.msk [vmem:[#allocation3 + $0x158] sm:$0xff] %vm1481_vm7, %v2468_v63  ;;  %v7163_v39 = vshrl.u32 %v6956_v23, 16 }
 0x1cc   :  { %v3589_v0 = vld [vmem:[#allocation3 + $0x128] sm:$0xff]  ;;  %11918 = vmatprep.mubr.msk.bf16.mxu0 %vm18_vm1, %v7153_v12  ;;  %v7157_v60 = vrot.slane %v7155_v7, 3  ;;  %v7160_v30 = vrot.slane %v7158_v35, 4  ;;  %3718 = vst.msk [vmem:[#allocation3 + $0x130] sm:$0xff] %vm1481_vm7, %v3654_v48  ;;  %v3655_v46 = vadd.f32 %v11677_v62, %v3591_v17  ;;  %v3444_v45 = vpop.f32.mrb[71].mxu0  ;;  %2531 = vst.msk [vmem:[#allocation3 + $0x148] sm:$0xff] %vm1481_vm7, %v2466_v59 }
 0x1cd   :  { %v5992_v21 = vor.u32 %v5991_v6, %v5988_v24  ;;  %v7166_v15 = vshll.u32 %v6956_v23, 16  ;;  %v5995_v36 = vshrl.u32 %v5765_v20, 16  ;;  %v6957_v9 = vld [vmem:[#allocation2 + $0xc0] sm:$0xf8]  ;;  %3716 = vst.msk [vmem:[#allocation3 + $0x120] sm:$0xff] %vm1481_vm7, %v3652_v31  ;;  %v3653_v16 = vadd.f32 %v3589_v0, %v3444_v45  ;;  %v2407_v13 = vld [vmem:[#allocation3 + $0x170] sm:$0xff] }
 0x1ce   :  { %v7161_v4 = vor.u32 %v7160_v30, %v7157_v60  ;;  %v7165_v3 = vrot.slane %v7163_v39, 3  ;;  %v5998_v57 = vshll.u32 %v5765_v20, 16  ;;  %3719 = vst.msk [vmem:[#allocation3 + $0x138] sm:$0xff] %vm1481_vm7, %v3655_v46  ;;  %v6003_v56 = vshrl.u32 %v5766_v54, 16  ;;  %v11618_v53 = vpop.f32.mrb[76].mxu1  ;;  %v2405_v32 = vld [vmem:[#allocation3 + $0x160] sm:$0xff] }
 0x1cf   :  { %v5993_v8 = vsel %vm2619_vm6, %v5984_v29, %v5992_v21  ;;  %v7168_v55 = vrot.slane %v7166_v15, 4  ;;  %v5997_v38 = vrot.slane %v5995_v36, 4  ;;  %v2408_v37 = vld [vmem:[#allocation3 + $0x178] sm:$0xff]  ;;  %3717 = vst.msk [vmem:[#allocation3 + $0x128] sm:$0xff] %vm1481_vm7, %v3653_v16  ;;  %v6006_v49 = vshll.u32 %v5766_v54, 16  ;;  %v2282_v2 = vpop.f32.mrb[77].mxu1 }
 0x1d0   :  { %11856 = vmatprep.mubr.msk.bf16.mxu1 %vm18_vm1, %v5993_v8  ;;  %v6000_v19 = vrot.slane %v5998_v57, 5  ;;  %v2471_v33 = vadd.f32 %v11618_v53, %v2407_v13  ;;  %v6958_v41 = vld [vmem:[#allocation2 + $0xc8] sm:$0xf]  ;;  %v7172_v34 = vshrl.u32 %v6957_v9, 16  ;;  %v6005_v61 = vrot.slane %v6003_v56, 4  ;;  %v3594_v1 = vld [vmem:[#allocation3 + $0x150] sm:$0xff] }
 0x1d1   :  { %v7169_v5 = vor.u32 %v7168_v55, %v7165_v3  ;;  %v2469_v11 = vadd.f32 %v2405_v32, %v2282_v2  ;;  %v11619_v22 = vpop.f32.mrb[78].mxu1  ;;  %v7175_v47 = vshll.u32 %v6957_v9, 16  ;;  %v5767_v10 = vld [vmem:[#allocation2 + $0xd0] sm:$0xf0]  ;;  %v6008_v42 = vrot.slane %v6006_v49, 5  ;;  %v11680_v43 = vpop.f32.mrb[72].mxu0 }
 0x1d2   :  { %v6001_v27 = vor.u32 %v6000_v19, %v5997_v38  ;;  %2536 = vst.msk [vmem:[#allocation3 + $0x170] sm:$0xff] %vm1481_vm7, %v2471_v33  ;;  %v3592_v50 = vld [vmem:[#allocation3 + $0x140] sm:$0xff]  ;;  %v2472_v23 = vadd.f32 %v11619_v22, %v2408_v37  ;;  %v2285_v28 = vpop.f32.mrb[79].mxu1  ;;  %v2406_v40 = vld [vmem:[#allocation3 + $0x168] sm:$0xff]  ;;  %v7174_v58 = vrot.slane %v7172_v34, 3  ;;  %v3658_v24 = vadd.f32 %v11680_v43, %v3594_v1  ;;  %v3457_v51 = vpop.f32.mrb[73].mxu0 }
 0x1d3   :  { %v7170_v26 = vsel %vm543_vm4, %v7161_v4, %v7169_v5  ;;  %2534 = vst.msk [vmem:[#allocation3 + $0x160] sm:$0xff] %vm1481_vm7, %v2469_v11  ;;  %v3595_v20 = vld [vmem:[#allocation3 + $0x158] sm:$0xff]  ;;  %v2470_v44 = vadd.f32 %v2406_v40, %v2285_v28  ;;  %v7177_v52 = vrot.slane %v7175_v47, 4  ;;  %v6009_v14 = vor.u32 %v6008_v42, %v6005_v61  ;;  %v11681_v29 = vpop.f32.mrb[74].mxu0  ;;  %v3593_v7 = vld [vmem:[#allocation3 + $0x148] sm:$0xff]  ;;  %v11622_v36 = vpop.f32.mrb[80].mxu1 }
 0x1d4   :  { %v5768_v63 = vld [vmem:[#allocation2 + $0xd8] sm:$0x1f]  ;;  %11919 = vmatmul.mubr.msk.bf16.gmra.mrb[176].mxu0 %vm18_vm1, %v7170_v26  ;;  %v3656_v25 = vadd.f32 %v3592_v50, %v3457_v51  ;;  %2537 = vst.msk [vmem:[#allocation3 + $0x178] sm:$0xff] %vm1481_vm7, %v2472_v23  ;;  %v7180_v35 = vshrl.u32 %v6958_v41, 16  ;;  %v7183_v48 = vshll.u32 %v6958_v41, 16  ;;  %3722 = vst.msk [vmem:[#allocation3 + $0x150] sm:$0xff] %vm1481_vm7, %v3658_v24  ;;  %v3659_v17 = vadd.f32 %v11681_v29, %v3595_v20 }
 0x1d5   :  { %v6959_v18 = vld [vmem:[#allocation2 + $0xd0] sm:$0xf8]  ;;  %v3460_v59 = vpop.f32.mrb[75].mxu0  ;;  %2535 = vst.msk [vmem:[#allocation3 + $0x168] sm:$0xff] %vm1481_vm7, %v2470_v44  ;;  %v7178_v12 = vor.u32 %v7177_v52, %v7174_v58  ;;  %v6012_v6 = vshrl.u32 %v5767_v10, 16  ;;  %v6015_v54 = vshll.u32 %v5767_v10, 16  ;;  %v6010_v62 = vsel %vm2619_vm6, %v6001_v27, %v6009_v14 }
 0x1d6   :  { %v6960_v31 = vld [vmem:[#allocation2 + $0xd8] sm:$0xf]  ;;  %3720 = vst.msk [vmem:[#allocation3 + $0x140] sm:$0xff] %vm1481_vm7, %v3656_v25  ;;  %v3657_v0 = vadd.f32 %v3593_v7, %v3460_v59  ;;  %v7182_v60 = vrot.slane %v7180_v35, 3  ;;  %v7185_v30 = vrot.slane %v7183_v48, 4  ;;  %11857 = vmatmul.mubr.msk.bf16.gmra.mrb[180].mxu1 %vm18_vm1, %v6010_v62  ;;  %3723 = vst.msk [vmem:[#allocation3 + $0x158] sm:$0xff] %vm1481_vm7, %v3659_v17 }
 0x1d7   :  { %v5769_v39 = vld [vmem:[#allocation2 + $0xe0] sm:$0xf0]  ;;  %v6014_v46 = vrot.slane %v6012_v6, 4  ;;  %v6017_v45 = vrot.slane %v6015_v54, 5  ;;  %v6020_v21 = vshrl.u32 %v5768_v63, 16  ;;  %v6023_v15 = vshll.u32 %v5768_v63, 16 }
 0x1d8   :  { %3721 = vst.msk [vmem:[#allocation3 + $0x148] sm:$0xff] %vm1481_vm7, %v3657_v0  ;;  %v7186_v9 = vor.u32 %v7185_v30, %v7182_v60  ;;  %v7189_v16 = vshrl.u32 %v6959_v18, 16  ;;  %v7192_v4 = vshll.u32 %v6959_v18, 16  ;;  %v7197_v3 = vshrl.u32 %v6960_v31, 16  ;;  %v5770_v57 = vld [vmem:[#allocation2 + $0xe8] sm:$0x1f] }
 0x1d9   :  { %v2298_v13 = vpop.f32.mrb[81].mxu1  ;;  %v6018_v8 = vor.u32 %v6017_v45, %v6014_v46  ;;  %v6022_v55 = vrot.slane %v6020_v21, 4  ;;  %v6025_v38 = vrot.slane %v6023_v15, 5  ;;  %v7200_v56 = vshll.u32 %v6960_v31, 16  ;;  %v3598_v53 = vld [vmem:[#allocation3 + $0x170] sm:$0xff]  ;;  %v11684_v2 = vpop.f32.mrb[76].mxu0 }
 0x1da   :  { %v11623_v32 = vpop.f32.mrb[82].mxu1  ;;  %v7187_v37 = vsel %vm543_vm4, %v7178_v12, %v7186_v9  ;;  %v7191_v19 = vrot.slane %v7189_v16, 3  ;;  %v7194_v49 = vrot.slane %v7192_v4, 4  ;;  %v7199_v33 = vrot.slane %v7197_v3, 3  ;;  %v3473_v11 = vpop.f32.mrb[77].mxu0  ;;  %v3596_v22 = vld [vmem:[#allocation3 + $0x160] sm:$0xff] }
 0x1db   :  { %v2301_v41 = vpop.f32.mrb[83].mxu1  ;;  %11922 = vmatprep.mubr.msk.bf16.mxu0 %vm18_vm1, %v7187_v37  ;;  %v6026_v34 = vor.u32 %v6025_v38, %v6022_v55  ;;  %v7202_v5 = vrot.slane %v7200_v56, 4  ;;  %v6029_v61 = vshrl.u32 %v5769_v39, 16  ;;  %v6032_v1 = vshll.u32 %v5769_v39, 16  ;;  %v2411_v43 = vld [vmem:[#allocation3 + $0x190] sm:$0xff]  ;;  %v11685_v50 = vpop.f32.mrb[78].mxu0 }
 0x1dc   :  { %v7195_v47 = vor.u32 %v7194_v49, %v7191_v19  ;;  %v6037_v10 = vshrl.u32 %v5770_v57, 16  ;;  %v6040_v27 = vshll.u32 %v5770_v57, 16  ;;  %v3662_v42 = vadd.f32 %v11684_v2, %v3598_v53  ;;  %v3599_v23 = vld [vmem:[#allocation3 + $0x178] sm:$0xff]  ;;  %v2409_v24 = vld [vmem:[#allocation3 + $0x180] sm:$0xff]  ;;  %v3476_v20 = vpop.f32.mrb[79].mxu0  ;;  %v3597_v44 = vld [vmem:[#allocation3 + $0x168] sm:$0xff] }
 0x1dd   :  { %v6027_v28 = vsel %vm2619_vm6, %v6018_v8, %v6026_v34  ;;  %v7203_v40 = vor.u32 %v7202_v5, %v7199_v33  ;;  %v6031_v58 = vrot.slane %v6029_v61, 4  ;;  %v6034_v26 = vrot.slane %v6032_v1, 5  ;;  %v2412_v51 = vld [vmem:[#allocation3 + $0x198] sm:$0xff]  ;;  %v6961_v29 = vld [vmem:[#allocation2 + $0xe0] sm:$0xf8]  ;;  %v2410_v59 = vld [vmem:[#allocation3 + $0x188] sm:$0xff] }
 0x1de   :  { %11860 = vmatprep.mubr.msk.bf16.mxu1 %vm18_vm1, %v6027_v28  ;;  %v6039_v52 = vrot.slane %v6037_v10, 4  ;;  %v6042_v63 = vrot.slane %v6040_v27, 5  ;;  %3726 = vst.msk [vmem:[#allocation3 + $0x170] sm:$0xff] %vm1481_vm7, %v3662_v42  ;;  %v2475_v14 = vadd.f32 %v11622_v36, %v2411_v43  ;;  %v3660_v25 = vadd.f32 %v3596_v22, %v3473_v11  ;;  %v6962_v7 = vld [vmem:[#allocation2 + $0xe8] sm:$0xf]  ;;  %v13565_v54 = vpop.f32.mrb[84].mxu1 }
 0x1df   :  { %v7204_v35 = vsel %vm543_vm4, %v7195_v47, %v7203_v40  ;;  %v6035_v48 = vor.u32 %v6034_v26, %v6031_v58  ;;  %v2473_v18 = vadd.f32 %v2409_v24, %v2298_v13  ;;  %v3663_v17 = vadd.f32 %v11685_v50, %v3599_v23  ;;  %v5771_v12 = vld [vmem:[#allocation2 + $0xf0] sm:$0xf0]  ;;  %v5772_v6 = vld [vmem:[#allocation2 + $0xf8] sm:$0x1f]  ;;  %v13570_v39 = vpop.f32.mrb[85].mxu1  ;;  %v11688_v8 = vpop.f32.mrb[80].mxu0 }
 0x1e0   :  { %11923 = vmatmul.mubr.msk.bf16.gmra.mrb[180].mxu0 %vm18_vm1, %v7204_v35  ;;  %v6043_v31 = vor.u32 %v6042_v63, %v6039_v52  ;;  %2540 = vst.msk [vmem:[#allocation3 + $0x190] sm:$0xff] %vm1481_vm7, %v2475_v14  ;;  %3724 = vst.msk [vmem:[#allocation3 + $0x160] sm:$0xff] %vm1481_vm7, %v3660_v25  ;;  %v2476_v62 = vadd.f32 %v11623_v32, %v2412_v51  ;;  %v3661_v0 = vadd.f32 %v3597_v44, %v3476_v20  ;;  %v6963_v30 = vld [vmem:[#allocation2 + $0xf0] sm:$0xf8]  ;;  %v6964_v36 = vld [vmem:[#allocation2 + $0xf8] sm:$0xf] }
 0x1e1   :  { %v2474_v60 = vadd.f32 %v2410_v59, %v2301_v41  ;;  %2538 = vst.msk [vmem:[#allocation3 + $0x180] sm:$0xff] %vm1481_vm7, %v2473_v18  ;;  %3727 = vst.msk [vmem:[#allocation3 + $0x178] sm:$0xff] %vm1481_vm7, %v3663_v17  ;;  %v7206_v46 = vshrl.u32 %v6961_v29, 16  ;;  %v7209_v45 = vshll.u32 %v6961_v29, 16  ;;  %v7214_v21 = vshrl.u32 %v6962_v7, 16  ;;  %v13574_v9 = vpop.f32.mrb[86].mxu1 }
 0x1e2   :  { %v7217_v15 = vshll.u32 %v6962_v7, 16  ;;  %v6044_v16 = vsel %vm2619_vm6, %v6035_v48, %v6043_v31  ;;  %2541 = vst.msk [vmem:[#allocation3 + $0x198] sm:$0xff] %vm1481_vm7, %v2476_v62  ;;  %3725 = vst.msk [vmem:[#allocation3 + $0x168] sm:$0xff] %vm1481_vm7, %v3661_v0  ;;  %v6046_v4 = vshrl.u32 %v5771_v12, 16  ;;  %v6049_v3 = vshll.u32 %v5771_v12, 16  ;;  %v13580_v55 = vpop.f32.mrb[87].mxu1 }
 0x1e3   :  { %2539 = vst.msk [vmem:[#allocation3 + $0x188] sm:$0xff] %vm1481_vm7, %v2474_v60  ;;  %v6054_v57 = vshrl.u32 %v5772_v6, 16  ;;  %v5773_v13 = vld [vmem:[#allocation2 + $0x100] sm:$0xf0]  ;;  %11861 = vmatmul.mubr.msk.bf16.gmra.mrb[184].mxu1 %vm18_vm1, %v6044_v16  ;;  %v7208_v38 = vrot.slane %v7206_v46, 3  ;;  %v7211_v56 = vrot.slane %v7209_v45, 4 }
 0x1e4   :  { %v7216_v53 = vrot.slane %v7214_v21, 3  ;;  %v7219_v32 = vrot.slane %v7217_v15, 4  ;;  %v3489_v37 = vpop.f32.mrb[81].mxu0  ;;  %v6048_v19 = vrot.slane %v6046_v4, 4  ;;  %v6051_v49 = vrot.slane %v6049_v3, 5  ;;  %v13584_v58 = vpop.f32.mrb[88].mxu1 }
 0x1e5   :  { %v6056_v33 = vrot.slane %v6054_v57, 4  ;;  %v6057_v2 = vshll.u32 %v5772_v6, 16  ;;  %v11689_v41 = vpop.f32.mrb[82].mxu0  ;;  %v7212_v34 = vor.u32 %v7211_v56, %v7208_v38  ;;  %v7223_v61 = vshrl.u32 %v6963_v30, 16  ;;  %v5774_v42 = vld [vmem:[#allocation2 + $0x108] sm:$0x1f] }
 0x1e6   :  { %v7220_v5 = vor.u32 %v7219_v32, %v7216_v53  ;;  %v7226_v1 = vshll.u32 %v6963_v30, 16  ;;  %v3492_v11 = vpop.f32.mrb[83].mxu0  ;;  %v6052_v22 = vor.u32 %v6051_v49, %v6048_v19  ;;  %v7231_v10 = vshrl.u32 %v6964_v36, 16  ;;  %v2415_v44 = vld [vmem:[#allocation3 + $0x1b0] sm:$0xff]  ;;  %v13587_v63 = vpop.f32.mrb[89].mxu1  ;;  %v2413_v35 = vld [vmem:[#allocation3 + $0x1a0] sm:$0xff] }
 0x1e7   :  { %v6059_v47 = vrot.slane %v6057_v2, 5  ;;  %v7234_v27 = vshll.u32 %v6964_v36, 16  ;;  %v7225_v50 = vrot.slane %v7223_v61, 3  ;;  %v6063_v28 = vshrl.u32 %v5773_v13, 16  ;;  %v3602_v40 = vld [vmem:[#allocation3 + $0x190] sm:$0xff]  ;;  %v13589_v18 = vpop.f32.mrb[90].mxu1 }
 0x1e8   :  { %v7221_v43 = vsel %vm543_vm4, %v7212_v34, %v7220_v5  ;;  %v7228_v23 = vrot.slane %v7226_v1, 4  ;;  %v7233_v24 = vrot.slane %v7231_v10, 3  ;;  %v6066_v20 = vshll.u32 %v5773_v13, 16  ;;  %v3600_v52 = vld [vmem:[#allocation3 + $0x180] sm:$0xff]  ;;  %v13592_v0 = vpop.f32.mrb[84].mxu0  ;;  %v13594_v60 = vpop.f32.mrb[91].mxu1 }
 0x1e9   :  { %11926 = vmatprep.mubr.msk.bf16.mxu0 %vm18_vm1, %v7221_v43  ;;  %v6060_v26 = vor.u32 %v6059_v47, %v6056_v33  ;;  %v7236_v51 = vrot.slane %v7234_v27, 4  ;;  %v6065_v25 = vrot.slane %v6063_v28, 4  ;;  %v6071_v29 = vshrl.u32 %v5774_v42, 16  ;;  %v3603_v48 = vld [vmem:[#allocation3 + $0x198] sm:$0xff]  ;;  %v6965_v62 = vld [vmem:[#allocation2 + $0x100] sm:$0xf8] }
 0x1ea   :  { %v7229_v14 = vor.u32 %v7228_v23, %v7225_v50  ;;  %v6074_v7 = vshll.u32 %v5774_v42, 16  ;;  %v6068_v12 = vrot.slane %v6066_v20, 5  ;;  %v3666_v6 = vadd.f32 %v11688_v8, %v3602_v40  ;;  %v3601_v31 = vld [vmem:[#allocation3 + $0x188] sm:$0xff]  ;;  %v2416_v15 = vld [vmem:[#allocation3 + $0x1b8] sm:$0xff]  ;;  %v13598_v16 = vpop.f32.mrb[85].mxu0 }
 0x1eb   :  { %v6061_v17 = vsel %vm2619_vm6, %v6052_v22, %v6060_v26  ;;  %v7237_v59 = vor.u32 %v7236_v51, %v7233_v24  ;;  %v6073_v30 = vrot.slane %v6071_v29, 4  ;;  %v2479_v45 = vadd.f32 %v13565_v54, %v2415_v44  ;;  %v6966_v36 = vld [vmem:[#allocation2 + $0x108] sm:$0xf]  ;;  %v5775_v38 = vld [vmem:[#allocation2 + $0x130] sm:$0xf0]  ;;  %v13603_v53 = vpop.f32.mrb[86].mxu0 }
 0x1ec   :  { %11864 = vmatprep.mubr.msk.bf16.mxu1 %vm18_vm1, %v6061_v17  ;;  %v6076_v46 = vrot.slane %v6074_v7, 5  ;;  %v3664_v21 = vadd.f32 %v3600_v52, %v3489_v37  ;;  %v6069_v3 = vor.u32 %v6068_v12, %v6065_v25  ;;  %3730 = vst.msk [vmem:[#allocation3 + $0x190] sm:$0xff] %vm1481_vm7, %v3666_v6  ;;  %v2477_v57 = vadd.f32 %v2413_v35, %v13570_v39  ;;  %v2414_v8 = vld [vmem:[#allocation3 + $0x1a8] sm:$0xff]  ;;  %v5776_v56 = vld [vmem:[#allocation2 + $0x138] sm:$0x1f]  ;;  %v13610_v39 = vpop.f32.mrb[87].mxu0 }
 0x1ed   :  { %v7238_v4 = vsel %vm543_vm4, %v7229_v14, %v7237_v59  ;;  %v3667_v13 = vadd.f32 %v11689_v41, %v3603_v48  ;;  %2544 = vst.msk [vmem:[#allocation3 + $0x1b0] sm:$0xff] %vm1481_vm7, %v2479_v45  ;;  %v2480_v32 = vadd.f32 %v13574_v9, %v2416_v15  ;;  %v3665_v37 = vadd.f32 %v3601_v31, %v3492_v11  ;;  %v6967_v49 = vld [vmem:[#allocation2 + $0x110] sm:$0xf8]  ;;  %v6968_v5 = vld [vmem:[#allocation2 + $0x118] sm:$0xf]  ;;  %v13618_v22 = vpop.f32.mrb[92].mxu1 }
 0x1ee   :  { %11927 = vmatmul.mubr.msk.bf16.gmra.mrb[184].mxu0 %vm18_vm1, %v7238_v4  ;;  %v6077_v54 = vor.u32 %v6076_v46, %v6073_v30  ;;  %3728 = vst.msk [vmem:[#allocation3 + $0x180] sm:$0xff] %vm1481_vm7, %v3664_v21  ;;  %v2478_v19 = vadd.f32 %v2414_v8, %v13580_v55  ;;  %2542 = vst.msk [vmem:[#allocation3 + $0x1a0] sm:$0xff] %vm1481_vm7, %v2477_v57  ;;  %v7240_v33 = vshrl.u32 %v6965_v62, 16  ;;  %v7243_v2 = vshll.u32 %v6965_v62, 16  ;;  %v5777_v11 = vld [vmem:[#allocation2 + $0x140] sm:$0xf0] }
 0x1ef   :  { %3731 = vst.msk [vmem:[#allocation3 + $0x198] sm:$0xff] %vm1481_vm7, %v3667_v13  ;;  %v7248_v41 = vshrl.u32 %v6966_v36, 16  ;;  %v7251_v34 = vshll.u32 %v6966_v36, 16  ;;  %2545 = vst.msk [vmem:[#allocation3 + $0x1b8] sm:$0xff] %vm1481_vm7, %v2480_v32  ;;  %v6080_v9 = vshrl.u32 %v5775_v38, 16  ;;  %v6083_v55 = vshll.u32 %v5775_v38, 16 }
 0x1f0   :  { %v6078_v61 = vsel %vm2619_vm6, %v6069_v3, %v6077_v54  ;;  %3729 = vst.msk [vmem:[#allocation3 + $0x188] sm:$0xff] %vm1481_vm7, %v3665_v37  ;;  %2543 = vst.msk [vmem:[#allocation3 + $0x1a8] sm:$0xff] %vm1481_vm7, %v2478_v19  ;;  %v6088_v1 = vshrl.u32 %v5776_v56, 16  ;;  %v7242_v47 = vrot.slane %v7240_v33, 3  ;;  %v7245_v10 = vrot.slane %v7243_v2, 4  ;;  %v13621_v43 = vpop.f32.mrb[93].mxu1 }
 0x1f1   :  { %11865 = vmatmul.mubr.msk.bf16.gmra.mrb[188].mxu1 %vm18_vm1, %v6078_v61  ;;  %v7250_v27 = vrot.slane %v7248_v41, 3  ;;  %v7253_v42 = vrot.slane %v7251_v34, 4  ;;  %v6082_v50 = vrot.slane %v6080_v9, 4  ;;  %v6085_v23 = vrot.slane %v6083_v55, 5  ;;  %v13623_v26 = vpop.f32.mrb[94].mxu1  ;;  %v13625_v52 = vpop.f32.mrb[88].mxu0 }
 0x1f2   :  { %v6090_v28 = vrot.slane %v6088_v1, 4  ;;  %v6091_v40 = vshll.u32 %v5776_v56, 16  ;;  %v7246_v24 = vor.u32 %v7245_v10, %v7242_v47  ;;  %v7257_v20 = vshrl.u32 %v6967_v49, 16  ;;  %v13627_v14 = vpop.f32.mrb[95].mxu1  ;;  %v5778_v48 = vld [vmem:[#allocation2 + $0x148] sm:$0x1f] }
 0x1f3   :  { %v7254_v51 = vor.u32 %v7253_v42, %v7250_v27  ;;  %v7260_v44 = vshll.u32 %v6967_v49, 16  ;;  %v6086_v25 = vor.u32 %v6085_v23, %v6082_v50  ;;  %v7265_v7 = vshrl.u32 %v6968_v5, 16  ;;  %v13629_v17 = vpop.f32.mrb[89].mxu0  ;;  %v2419_v38 = vld [vmem:[#allocation3 + $0x1d0] sm:$0xff]  ;;  %v2417_v49 = vld [vmem:[#allocation3 + $0x1c0] sm:$0xff]  ;;  %v13639_v41 = vpop.f32.mrb[96].mxu1 }
 0x1f4   :  { %v6093_v29 = vrot.slane %v6091_v40, 5  ;;  %v7268_v35 = vshll.u32 %v6968_v5, 16  ;;  %v7259_v12 = vrot.slane %v7257_v20, 3  ;;  %v6097_v31 = vshrl.u32 %v5777_v11, 16  ;;  %v3606_v62 = vld [vmem:[#allocation3 + $0x1b0] sm:$0xff]  ;;  %v13632_v30 = vpop.f32.mrb[90].mxu0 }
 0x1f5   :  { %v7255_v59 = vsel %vm543_vm4, %v7246_v24, %v7254_v51  ;;  %v7262_v6 = vrot.slane %v7260_v44, 4  ;;  %v7267_v45 = vrot.slane %v7265_v7, 3  ;;  %v6100_v15 = vshll.u32 %v5777_v11, 16  ;;  %v3604_v36 = vld [vmem:[#allocation3 + $0x1a0] sm:$0xff]  ;;  %v13635_v4 = vpop.f32.mrb[91].mxu0  ;;  %v2420_v55 = vld [vmem:[#allocation3 + $0x1d8] sm:$0xff] }
 0x1f6   :  { %11930 = vmatprep.mubr.msk.bf16.mxu0 %vm18_vm1, %v7255_v59  ;;  %v6094_v46 = vor.u32 %v6093_v29, %v6090_v28  ;;  %v7270_v21 = vrot.slane %v7268_v35, 4  ;;  %v6099_v57 = vrot.slane %v6097_v31, 4  ;;  %v6105_v13 = vshrl.u32 %v5778_v48, 16  ;;  %v3607_v56 = vld [vmem:[#allocation3 + $0x1b8] sm:$0xff]  ;;  %v6969_v2 = vld [vmem:[#allocation2 + $0x140] sm:$0xf8] }
 0x1f7   :  { %v7263_v3 = vor.u32 %v7262_v6, %v7259_v12  ;;  %v6108_v8 = vshll.u32 %v5778_v48, 16  ;;  %v6102_v37 = vrot.slane %v6100_v15, 5  ;;  %v3670_v19 = vadd.f32 %v13592_v0, %v3606_v62  ;;  %v3605_v33 = vld [vmem:[#allocation3 + $0x1a8] sm:$0xff]  ;;  %v13644_v11 = vpop.f32.mrb[97].mxu1  ;;  %v5779_v50 = vld [vmem:[#allocation2 + $0x150] sm:$0xf0] }
 0x1f8   :  { %v6095_v54 = vsel %vm2619_vm6, %v6086_v25, %v6094_v46  ;;  %v7271_v32 = vor.u32 %v7270_v21, %v7267_v45  ;;  %v6107_v34 = vrot.slane %v6105_v13, 4  ;;  %v2483_v61 = vadd.f32 %v13584_v58, %v2419_v38  ;;  %v6970_v1 = vld [vmem:[#allocation2 + $0x148] sm:$0xf]  ;;  %v5780_v23 = vld [vmem:[#allocation2 + $0x158] sm:$0x1f]  ;;  %v13650_v28 = vpop.f32.mrb[98].mxu1 }
 0x1f9   :  { %11868 = vmatprep.mubr.msk.bf16.mxu1 %vm18_vm1, %v6095_v54  ;;  %v6110_v5 = vrot.slane %v6108_v8, 5  ;;  %v3668_v9 = vadd.f32 %v3604_v36, %v13598_v16  ;;  %v6103_v0 = vor.u32 %v6102_v37, %v6099_v57  ;;  %3734 = vst.msk [vmem:[#allocation3 + $0x1b0] sm:$0xff] %vm1481_vm7, %v3670_v19  ;;  %v2481_v10 = vadd.f32 %v2417_v49, %v13587_v63  ;;  %v2418_v42 = vld [vmem:[#allocation3 + $0x1c8] sm:$0xff]  ;;  %v6971_v24 = vld [vmem:[#allocation2 + $0x150] sm:$0xf8]  ;;  %v13660_v51 = vpop.f32.mrb[99].mxu1 }
 0x1fa   :  { %v7272_v47 = vsel %vm543_vm4, %v7263_v3, %v7271_v32  ;;  %v3671_v27 = vadd.f32 %v13603_v53, %v3607_v56  ;;  %2548 = vst.msk [vmem:[#allocation3 + $0x1d0] sm:$0xff] %vm1481_vm7, %v2483_v61  ;;  %v2484_v16 = vadd.f32 %v13589_v18, %v2420_v55  ;;  %v3669_v40 = vadd.f32 %v3605_v33, %v13610_v39  ;;  %v13658_v53 = vpop.f32.mrb[92].mxu0  ;;  %v6972_v48 = vld [vmem:[#allocation2 + $0x158] sm:$0xf]  ;;  %v5781_v3 = vld [vmem:[#allocation2 + $0x160] sm:$0xf0] }
 0x1fb   :  { %11931 = vmatmul.mubr.msk.bf16.gmra.mrb[188].mxu0 %vm18_vm1, %v7272_v47  ;;  %v6111_v58 = vor.u32 %v6110_v5, %v6107_v34  ;;  %3732 = vst.msk [vmem:[#allocation3 + $0x1a0] sm:$0xff] %vm1481_vm7, %v3668_v9  ;;  %v2482_v63 = vadd.f32 %v2418_v42, %v13594_v60  ;;  %2546 = vst.msk [vmem:[#allocation3 + $0x1c0] sm:$0xff] %vm1481_vm7, %v2481_v10  ;;  %v7274_v20 = vshrl.u32 %v6969_v2, 16  ;;  %v7277_v44 = vshll.u32 %v6969_v2, 16  ;;  %v13664_v7 = vpop.f32.mrb[93].mxu0  ;;  %v13675_v56 = vpop.f32.mrb[100].mxu1 }
 0x1fc   :  { %3735 = vst.msk [vmem:[#allocation3 + $0x1b8] sm:$0xff] %vm1481_vm7, %v3671_v27  ;;  %v7282_v25 = vshrl.u32 %v6970_v1, 16  ;;  %v7285_v29 = vshll.u32 %v6970_v1, 16  ;;  %2549 = vst.msk [vmem:[#allocation3 + $0x1d8] sm:$0xff] %vm1481_vm7, %v2484_v16  ;;  %v6114_v60 = vshrl.u32 %v5779_v50, 16  ;;  %v6117_v39 = vshll.u32 %v5779_v50, 16 }
 0x1fd   :  { %v6112_v18 = vsel %vm2619_vm6, %v6103_v0, %v6111_v58  ;;  %3733 = vst.msk [vmem:[#allocation3 + $0x1a8] sm:$0xff] %vm1481_vm7, %v3669_v40  ;;  %2547 = vst.msk [vmem:[#allocation3 + $0x1c8] sm:$0xff] %vm1481_vm7, %v2482_v63  ;;  %v6122_v35 = vshrl.u32 %v5780_v23, 16  ;;  %v13670_v59 = vpop.f32.mrb[94].mxu0  ;;  %v7276_v12 = vrot.slane %v7274_v20, 3  ;;  %v7279_v6 = vrot.slane %v7277_v44, 4 }
 0x1fe   :  { %11869 = vmatmul.mubr.msk.bf16.gmra.mrb[192].mxu1 %vm18_vm1, %v6112_v18  ;;  %v7284_v31 = vrot.slane %v7282_v25, 3  ;;  %v7287_v62 = vrot.slane %v7285_v29, 4  ;;  %v13673_v46 = vpop.f32.mrb[95].mxu0  ;;  %v6116_v45 = vrot.slane %v6114_v60, 4  ;;  %v6119_v21 = vrot.slane %v6117_v39, 5  ;;  %v13677_v33 = vpop.f32.mrb[101].mxu1 }
 0x1ff   :  { %v6124_v15 = vrot.slane %v6122_v35, 4  ;;  %v6125_v36 = vshll.u32 %v5780_v23, 16  ;;  %v7280_v57 = vor.u32 %v7279_v6, %v7276_v12  ;;  %v7291_v8 = vshrl.u32 %v6971_v24, 16  ;;  %v5782_v49 = vld [vmem:[#allocation2 + $0x168] sm:$0x1f]  ;;  %v13680_v55 = vpop.f32.mrb[102].mxu1 }
 0x200   :  { %v7288_v13 = vor.u32 %v7287_v62, %v7284_v31  ;;  %v7294_v38 = vshll.u32 %v6971_v24, 16  ;;  %v6120_v54 = vor.u32 %v6119_v21, %v6116_v45  ;;  %v7299_v37 = vshrl.u32 %v6972_v48, 16  ;;  %v13683_v42 = vpop.f32.mrb[96].mxu0  ;;  %v13685_v50 = vpop.f32.mrb[103].mxu1  ;;  %v2423_v63 = vld [vmem:[#allocation3 + $0x1f0] sm:$0xff]  ;;  %v2421_v60 = vld [vmem:[#allocation3 + $0x1e0] sm:$0xff] }
 0x201   :  { %v6127_v32 = vrot.slane %v6125_v36, 5  ;;  %v7302_v19 = vshll.u32 %v6972_v48, 16  ;;  %v7293_v34 = vrot.slane %v7291_v8, 3  ;;  %v6131_v61 = vshrl.u32 %v5781_v3, 16  ;;  %v3610_v9 = vld [vmem:[#allocation3 + $0x1d0] sm:$0xff]  ;;  %v13687_v20 = vpop.f32.mrb[97].mxu0 }
 0x202   :  { %v7289_v2 = vsel %vm543_vm4, %v7280_v57, %v7288_v13  ;;  %v7296_v5 = vrot.slane %v7294_v38, 4  ;;  %v7301_v47 = vrot.slane %v7299_v37, 3  ;;  %v6134_v10 = vshll.u32 %v5781_v3, 16  ;;  %v3608_v27 = vld [vmem:[#allocation3 + $0x1c0] sm:$0xff]  ;;  %v13691_v48 = vpop.f32.mrb[98].mxu0  ;;  %v2424_v45 = vld [vmem:[#allocation3 + $0x1f8] sm:$0xff] }
 0x203   :  { %11934 = vmatprep.mubr.msk.bf16.mxu0 %vm18_vm1, %v7289_v2  ;;  %v6128_v1 = vor.u32 %v6127_v32, %v6124_v15  ;;  %v7304_v0 = vrot.slane %v7302_v19, 4  ;;  %v6133_v58 = vrot.slane %v6131_v61, 4  ;;  %v6139_v16 = vshrl.u32 %v5782_v49, 16  ;;  %v3611_v24 = vld [vmem:[#allocation3 + $0x1d8] sm:$0xff]  ;;  %v6973_v35 = vld [vmem:[#allocation2 + $0x160] sm:$0xf8] }
 0x204   :  { %v7297_v23 = vor.u32 %v7296_v5, %v7293_v34  ;;  %v6142_v40 = vshll.u32 %v5782_v49, 16  ;;  %v6136_v29 = vrot.slane %v6134_v10, 5  ;;  %v3674_v18 = vadd.f32 %v13625_v52, %v3610_v9  ;;  %v3609_v39 = vld [vmem:[#allocation3 + $0x1c8] sm:$0xff]  ;;  %v13696_v15 = vpop.f32.mrb[99].mxu0  ;;  %v5783_v8 = vld [vmem:[#allocation2 + $0x170] sm:$0xf0] }
 0x205   :  { %v6129_v44 = vsel %vm2619_vm6, %v6120_v54, %v6128_v1  ;;  %v7305_v25 = vor.u32 %v7304_v0, %v7301_v47  ;;  %v6141_v12 = vrot.slane %v6139_v16, 4  ;;  %v2487_v31 = vadd.f32 %v13618_v22, %v2423_v63  ;;  %v6974_v21 = vld [vmem:[#allocation2 + $0x168] sm:$0xf]  ;;  %v5784_v38 = vld [vmem:[#allocation2 + $0x178] sm:$0x1f] }
 0x206   :  { %11872 = vmatprep.mubr.msk.bf16.mxu1 %vm18_vm1, %v6129_v44  ;;  %v6144_v6 = vrot.slane %v6142_v40, 5  ;;  %v3672_v62 = vadd.f32 %v3608_v27, %v13629_v17  ;;  %v6137_v52 = vor.u32 %v6136_v29, %v6133_v58  ;;  %3738 = vst.msk [vmem:[#allocation3 + $0x1d0] sm:$0xff] %vm1481_vm7, %v3674_v18  ;;  %v2485_v3 = vadd.f32 %v2421_v60, %v13621_v43  ;;  %v2422_v13 = vld [vmem:[#allocation3 + $0x1e8] sm:$0xff]  ;;  %v6975_v37 = vld [vmem:[#allocation2 + $0x170] sm:$0xf8]  ;;  %v13708_v43 = vpop.f32.mrb[104].mxu1 }
 0x207   :  { %v7306_v36 = vsel %vm543_vm4, %v7297_v23, %v7305_v25  ;;  %v3675_v57 = vadd.f32 %v13632_v30, %v3611_v24  ;;  %2552 = vst.msk [vmem:[#allocation3 + $0x1f0] sm:$0xff] %vm1481_vm7, %v2487_v31  ;;  %v2488_v17 = vadd.f32 %v13623_v26, %v2424_v45  ;;  %v3673_v54 = vadd.f32 %v3609_v39, %v13635_v4  ;;  %v6976_v34 = vld [vmem:[#allocation2 + $0x178] sm:$0xf]  ;;  %v13712_v5 = vpop.f32.mrb[105].mxu1  ;;  %v5785_v9 = vld [vmem:[#allocation2 + $0x180] sm:$0xf0] }
 0x208   :  { %11935 = vmatmul.mubr.msk.bf16.gmra.mrb[192].mxu0 %vm18_vm1, %v7306_v36  ;;  %v6145_v22 = vor.u32 %v6144_v6, %v6141_v12  ;;  %3736 = vst.msk [vmem:[#allocation3 + $0x1c0] sm:$0xff] %vm1481_vm7, %v3672_v62  ;;  %v2486_v32 = vadd.f32 %v2422_v13, %v13627_v14  ;;  %2550 = vst.msk [vmem:[#allocation3 + $0x1e0] sm:$0xff] %vm1481_vm7, %v2485_v3  ;;  %v7308_v30 = vshrl.u32 %v6973_v35, 16  ;;  %v7311_v19 = vshll.u32 %v6973_v35, 16  ;;  %v13718_v1 = vpop.f32.mrb[106].mxu1  ;;  %v13721_v23 = vpop.f32.mrb[100].mxu0 }
 0x209   :  { %3739 = vst.msk [vmem:[#allocation3 + $0x1d8] sm:$0xff] %vm1481_vm7, %v3675_v57  ;;  %v7316_v49 = vshrl.u32 %v6974_v21, 16  ;;  %v7319_v2 = vshll.u32 %v6974_v21, 16  ;;  %2553 = vst.msk [vmem:[#allocation3 + $0x1f8] sm:$0xff] %vm1481_vm7, %v2488_v17  ;;  %v6148_v14 = vshrl.u32 %v5783_v8, 16  ;;  %v6151_v4 = vshll.u32 %v5783_v8, 16 }
 0x20a   :  { %v6146_v26 = vsel %vm2619_vm6, %v6137_v52, %v6145_v22  ;;  %3737 = vst.msk [vmem:[#allocation3 + $0x1c8] sm:$0xff] %vm1481_vm7, %v3673_v54  ;;  %2551 = vst.msk [vmem:[#allocation3 + $0x1e8] sm:$0xff] %vm1481_vm7, %v2486_v32  ;;  %v6156_v61 = vshrl.u32 %v5784_v38, 16  ;;  %v7310_v47 = vrot.slane %v7308_v30, 3  ;;  %v7313_v0 = vrot.slane %v7311_v19, 4  ;;  %v13723_v58 = vpop.f32.mrb[107].mxu1 }
 0x20b   :  { %11873 = vmatmul.mubr.msk.bf16.gmra.mrb[196].mxu1 %vm18_vm1, %v6146_v26  ;;  %v7318_v10 = vrot.slane %v7316_v49, 3  ;;  %v7321_v27 = vrot.slane %v7319_v2, 4  ;;  %v6150_v16 = vrot.slane %v6148_v14, 4  ;;  %v6153_v40 = vrot.slane %v6151_v4, 5  ;;  %v13725_v44 = vpop.f32.mrb[101].mxu0  ;;  %v4747_v54 = vld [vmem:[#allocation3 + $0x10] sm:$0xff] }
 0x20c   :  { %v6158_v63 = vrot.slane %v6156_v61, 4  ;;  %v6159_v24 = vshll.u32 %v5784_v38, 16  ;;  %v7314_v25 = vor.u32 %v7313_v0, %v7310_v47  ;;  %v7325_v18 = vshrl.u32 %v6975_v37, 16  ;;  %v13727_v39 = vpop.f32.mrb[102].mxu0  ;;  %v5786_v62 = vld [vmem:[#allocation2 + $0x188] sm:$0x1f] }
 0x20d   :  { %v7322_v29 = vor.u32 %v7321_v27, %v7318_v10  ;;  %v7328_v60 = vshll.u32 %v6975_v37, 16  ;;  %v6154_v35 = vor.u32 %v6153_v40, %v6150_v16  ;;  %v7333_v6 = vshrl.u32 %v6976_v34, 16  ;;  %v13729_v45 = vpop.f32.mrb[103].mxu0  ;;  %v13733_v32 = vpop.f32.mrb[108].mxu1  ;;  %v6977_v10 = vld [vmem:[#allocation2 + $0x180] sm:$0xf8] }
 0x20e   :  { %v6161_v12 = vrot.slane %v6159_v24, 5  ;;  %v7336_v31 = vshll.u32 %v6976_v34, 16  ;;  %v7327_v36 = vrot.slane %v7325_v18, 3  ;;  %v6165_v3 = vshrl.u32 %v5785_v9, 16  ;;  %v3614_v57 = vld [vmem:[#allocation3 + $0x1f0] sm:$0xff]  ;;  %v4745_v34 = vld [vmem:[#allocation3] sm:$0xff] }
 0x20f   :  { %v7323_v21 = vsel %vm543_vm4, %v7314_v25, %v7322_v29  ;;  %v7330_v52 = vrot.slane %v7328_v60, 4  ;;  %v7335_v8 = vrot.slane %v7333_v6, 3  ;;  %v6168_v22 = vshll.u32 %v5785_v9, 16  ;;  %v3612_v17 = vld [vmem:[#allocation3 + $0x1e0] sm:$0xff]  ;;  %v13735_v26 = vpop.f32.mrb[109].mxu1  ;;  %v4748_v9 = vld [vmem:[#allocation3 + $0x18] sm:$0xff] }
 0x210   :  { %11938 = vmatprep.mubr.msk.bf16.mxu0 %vm18_vm1, %v7323_v21  ;;  %v6162_v13 = vor.u32 %v6161_v12, %v6158_v63  ;;  %v7338_v38 = vrot.slane %v7336_v31, 4  ;;  %v6167_v30 = vrot.slane %v6165_v3, 4  ;;  %v6173_v19 = vshrl.u32 %v5786_v62, 16  ;;  %v3615_v2 = vld [vmem:[#allocation3 + $0x1f8] sm:$0xff]  ;;  %v13739_v27 = vpop.f32.mrb[110].mxu1  ;;  %v13744_v29 = vpop.f32.mrb[104].mxu0 }
 0x211   :  { %v7331_v37 = vor.u32 %v7330_v52, %v7327_v36  ;;  %v6176_v49 = vshll.u32 %v5786_v62, 16  ;;  %v6170_v61 = vrot.slane %v6168_v22, 5  ;;  %v3678_v47 = vadd.f32 %v13658_v53, %v3614_v57  ;;  %v3613_v0 = vld [vmem:[#allocation3 + $0x1e8] sm:$0xff]  ;;  %v13746_v18 = vpop.f32.mrb[111].mxu1  ;;  %v5787_v31 = vld [vmem:[#allocation2 + $0x190] sm:$0xf0] }
 0x212   :  { %v6163_v14 = vsel %vm2619_vm6, %v6154_v35, %v6162_v13  ;;  %v7339_v4 = vor.u32 %v7338_v38, %v7335_v8  ;;  %v6175_v16 = vrot.slane %v6173_v19, 4  ;;  %v3676_v63 = vadd.f32 %v3612_v17, %v13664_v7  ;;  %v6978_v25 = vld [vmem:[#allocation2 + $0x188] sm:$0xf]  ;;  %v5788_v62 = vld [vmem:[#allocation2 + $0x198] sm:$0x1f]  ;;  %v13752_v7 = vpop.f32.mrb[105].mxu0 }
 0x213   :  { %11876 = vmatprep.mubr.msk.bf16.mxu1 %vm18_vm1, %v6163_v14  ;;  %v6178_v40 = vrot.slane %v6176_v49, 5  ;;  %v4811_v24 = vadd.f32 %v13639_v41, %v4747_v54  ;;  %v6171_v60 = vor.u32 %v6170_v61, %v6167_v30  ;;  %3742 = vst.msk [vmem:[#allocation3 + $0x1f0] sm:$0xff] %vm1481_vm7, %v3678_v47  ;;  %v3679_v35 = vadd.f32 %v13670_v59, %v3615_v2  ;;  %v4746_v6 = vld [vmem:[#allocation3 + $0x8] sm:$0xff]  ;;  %v6979_v52 = vld [vmem:[#allocation2 + $0x190] sm:$0xf8]  ;;  %v13771_v2 = vpop.f32.mrb[112].mxu1 }
 0x214   :  { %v7340_v53 = vsel %vm543_vm4, %v7331_v37, %v7339_v4  ;;  %v4809_v12 = vadd.f32 %v4745_v34, %v13644_v11  ;;  %3740 = vst.msk [vmem:[#allocation3 + $0x1e0] sm:$0xff] %vm1481_vm7, %v3676_v63  ;;  %v3677_v21 = vadd.f32 %v3613_v0, %v13673_v46  ;;  %v4812_v36 = vadd.f32 %v13650_v28, %v4748_v9  ;;  %v13760_v11 = vpop.f32.mrb[106].mxu0  ;;  %v6980_v38 = vld [vmem:[#allocation2 + $0x198] sm:$0xf]  ;;  %v5789_v54 = vld [vmem:[#allocation2 + $0x1a0] sm:$0xf0] }
 0x215   :  { %11939 = vmatmul.mubr.msk.bf16.gmra.mrb[196].mxu0 %vm18_vm1, %v7340_v53  ;;  %v6179_v41 = vor.u32 %v6178_v40, %v6175_v16  ;;  %4875 = vst.msk [vmem:[#allocation3 + $0x10] sm:$0xff] %vm1481_vm7, %v4811_v24  ;;  %v4810_v59 = vadd.f32 %v4746_v6, %v13660_v51  ;;  %3743 = vst.msk [vmem:[#allocation3 + $0x1f8] sm:$0xff] %vm1481_vm7, %v3679_v35  ;;  %v7342_v3 = vshrl.u32 %v6977_v10, 16  ;;  %v7345_v57 = vshll.u32 %v6977_v10, 16  ;;  %v13764_v22 = vpop.f32.mrb[107].mxu0  ;;  %v13773_v47 = vpop.f32.mrb[113].mxu1 }
 0x216   :  { %4873 = vst.msk [vmem:[#allocation3] sm:$0xff] %vm1481_vm7, %v4809_v12  ;;  %v7350_v13 = vshrl.u32 %v6978_v25, 16  ;;  %v7353_v8 = vshll.u32 %v6978_v25, 16  ;;  %3741 = vst.msk [vmem:[#allocation3 + $0x1e8] sm:$0xff] %vm1481_vm7, %v3677_v21  ;;  %v6182_v28 = vshrl.u32 %v5787_v31, 16  ;;  %v6185_v51 = vshll.u32 %v5787_v31, 16 }
 0x217   :  { %v6180_v46 = vsel %vm2619_vm6, %v6171_v60, %v6179_v41  ;;  %4876 = vst.msk [vmem:[#allocation3 + $0x18] sm:$0xff] %vm1481_vm7, %v4812_v36  ;;  %4874 = vst.msk [vmem:[#allocation3 + $0x8] sm:$0xff] %vm1481_vm7, %v4810_v59  ;;  %v6190_v17 = vshrl.u32 %v5788_v62, 16  ;;  %v7344_v37 = vrot.slane %v7342_v3, 3  ;;  %v7347_v30 = vrot.slane %v7345_v57, 4  ;;  %v13775_v63 = vpop.f32.mrb[114].mxu1 }
 0x218   :  { %11877 = vmatmul.mubr.msk.bf16.gmra.mrb[200].mxu1 %vm18_vm1, %v6180_v46  ;;  %v7352_v19 = vrot.slane %v7350_v13, 3  ;;  %v7355_v49 = vrot.slane %v7353_v8, 4  ;;  %v6184_v34 = vrot.slane %v6182_v28, 4  ;;  %v6187_v14 = vrot.slane %v6185_v51, 5  ;;  %v5790_v40 = vld [vmem:[#allocation2 + $0x1a8] sm:$0x1f] }
 0x219   :  { %v6192_v4 = vrot.slane %v6190_v17, 4  ;;  %v6193_v61 = vshll.u32 %v5788_v62, 16  ;;  %v7348_v0 = vor.u32 %v7347_v30, %v7344_v37  ;;  %v7359_v10 = vshrl.u32 %v6979_v52, 16  ;;  %v13777_v35 = vpop.f32.mrb[108].mxu0  ;;  %v13779_v12 = vpop.f32.mrb[115].mxu1  ;;  %v4751_v17 = vld [vmem:[#allocation3 + $0x30] sm:$0xff] }
 0x21a   :  { %v7356_v9 = vor.u32 %v7355_v49, %v7352_v19  ;;  %v7362_v16 = vshll.u32 %v6979_v52, 16  ;;  %v6188_v24 = vor.u32 %v6187_v14, %v6184_v34  ;;  %v7367_v53 = vshrl.u32 %v6980_v38, 16  ;;  %v13782_v36 = vpop.f32.mrb[109].mxu0 }
 0x21b   :  { %v6195_v25 = vrot.slane %v6193_v61, 5  ;;  %v7370_v60 = vshll.u32 %v6980_v38, 16  ;;  %v7361_v31 = vrot.slane %v7359_v10, 3  ;;  %v6199_v41 = vshrl.u32 %v5789_v54, 16  ;;  %v13785_v8 = vpop.f32.mrb[110].mxu0 }
 0x21c   :  { %v7357_v6 = vsel %vm543_vm4, %v7348_v0, %v7356_v9  ;;  %v7364_v62 = vrot.slane %v7362_v16, 4  ;;  %v5552_v21 = vld [vmem:[#allocation3 + $0x10] sm:$0xff]  ;;  %v7369_v52 = vrot.slane %v7367_v53, 3  ;;  %v6202_v57 = vshll.u32 %v5789_v54, 16  ;;  %v13787_v30 = vpop.f32.mrb[111].mxu0  ;;  %v13794_v53 = vpop.f32.mrb[116].mxu1 }
 0x21d   :  { %11942 = vmatprep.mubr.msk.bf16.mxu0 %vm18_vm1, %v7357_v6  ;;  %v6196_v59 = vor.u32 %v6195_v25, %v6192_v4  ;;  %v7372_v3 = vrot.slane %v7370_v60, 4  ;;  %v5550_v13 = vld [vmem:[#allocation3] sm:$0xff]  ;;  %v6201_v46 = vrot.slane %v6199_v41, 4  ;;  %v6207_v28 = vshrl.u32 %v5790_v40, 16  ;;  %v6982_v25 = vld [vmem:[#allocation2 + $0x1a8] sm:$0xf] }
 0x21e   :  { %v7365_v38 = vor.u32 %v7364_v62, %v7361_v31  ;;  %v6210_v51 = vshll.u32 %v5790_v40, 16  ;;  %v5553_v37 = vld [vmem:[#allocation3 + $0x18] sm:$0xff]  ;;  %v6204_v34 = vrot.slane %v6202_v57, 5  ;;  %v5616_v14 = vadd.f32 %v13683_v42, %v5552_v21  ;;  %v4749_v4 = vld [vmem:[#allocation3 + $0x20] sm:$0xff]  ;;  %v5551_v61 = vld [vmem:[#allocation3 + $0x8] sm:$0xff]  ;;  %v13800_v21 = vpop.f32.mrb[117].mxu1 }
 0x21f   :  { %v6197_v19 = vsel %vm2619_vm6, %v6188_v24, %v6196_v59  ;;  %v7373_v49 = vor.u32 %v7372_v3, %v7369_v52  ;;  %v6981_v54 = vld [vmem:[#allocation2 + $0x1a0] sm:$0xf8]  ;;  %v6209_v0 = vrot.slane %v6207_v28, 4  ;;  %v4815_v10 = vadd.f32 %v13675_v56, %v4751_v17  ;;  %v4752_v40 = vld [vmem:[#allocation3 + $0x38] sm:$0xff]  ;;  %v4750_v31 = vld [vmem:[#allocation3 + $0x28] sm:$0xff]  ;;  %v13812_v28 = vpop.f32.mrb[112].mxu0 }
 0x220   :  { %11880 = vmatprep.mubr.msk.bf16.mxu1 %vm18_vm1, %v6197_v19  ;;  %v6212_v9 = vrot.slane %v6210_v51, 5  ;;  %v5614_v16 = vadd.f32 %v5550_v13, %v13687_v20  ;;  %v6205_v60 = vor.u32 %v6204_v34, %v6201_v46  ;;  %5680 = vst.msk [vmem:[#allocation3 + $0x10] sm:$0xff] %vm1481_vm7, %v5616_v14  ;;  %v4813_v42 = vadd.f32 %v4749_v4, %v13677_v33  ;;  %v5791_v62 = vld [vmem:[#allocation2 + $0x1b0] sm:$0xf0]  ;;  %v5792_v41 = vld [vmem:[#allocation2 + $0x1b8] sm:$0x1f] }
 0x221   :  { %v7374_v24 = vsel %vm543_vm4, %v7365_v38, %v7373_v49  ;;  %v5617_v6 = vadd.f32 %v13691_v48, %v5553_v37  ;;  %4879 = vst.msk [vmem:[#allocation3 + $0x30] sm:$0xff] %vm1481_vm7, %v4815_v10  ;;  %v4816_v20 = vadd.f32 %v13680_v55, %v4752_v40  ;;  %v5615_v59 = vadd.f32 %v5551_v61, %v13696_v15  ;;  %v6983_v52 = vld [vmem:[#allocation2 + $0x1b0] sm:$0xf8]  ;;  %v13808_v48 = vpop.f32.mrb[118].mxu1  ;;  %v6984_v46 = vld [vmem:[#allocation2 + $0x1b8] sm:$0xf] }
 0x222   :  { %11943 = vmatmul.mubr.msk.bf16.gmra.mrb[200].mxu0 %vm18_vm1, %v7374_v24  ;;  %v6213_v56 = vor.u32 %v6212_v9, %v6209_v0  ;;  %5678 = vst.msk [vmem:[#allocation3] sm:$0xff] %vm1481_vm7, %v5614_v16  ;;  %v4814_v33 = vadd.f32 %v4750_v31, %v13685_v50  ;;  %4877 = vst.msk [vmem:[#allocation3 + $0x20] sm:$0xff] %vm1481_vm7, %v4813_v42  ;;  %v7376_v3 = vshrl.u32 %v6981_v54, 16  ;;  %v7379_v57 = vshll.u32 %v6981_v54, 16  ;;  %v13814_v51 = vpop.f32.mrb[119].mxu1  ;;  %v13820_v19 = vpop.f32.mrb[113].mxu0 }
 0x223   :  { %5681 = vst.msk [vmem:[#allocation3 + $0x18] sm:$0xff] %vm1481_vm7, %v5617_v6  ;;  %v7384_v13 = vshrl.u32 %v6982_v25, 16  ;;  %v7387_v38 = vshll.u32 %v6982_v25, 16  ;;  %4880 = vst.msk [vmem:[#allocation3 + $0x38] sm:$0xff] %vm1481_vm7, %v4816_v20  ;;  %v6216_v50 = vshrl.u32 %v5791_v62, 16  ;;  %v6219_v15 = vshll.u32 %v5791_v62, 16 }
 0x224   :  { %v6214_v55 = vsel %vm2619_vm6, %v6205_v60, %v6213_v56  ;;  %5679 = vst.msk [vmem:[#allocation3 + $0x8] sm:$0xff] %vm1481_vm7, %v5615_v59  ;;  %4878 = vst.msk [vmem:[#allocation3 + $0x28] sm:$0xff] %vm1481_vm7, %v4814_v33  ;;  %v6224_v17 = vshrl.u32 %v5792_v41, 16  ;;  %v5793_v37 = vld [vmem:[#allocation2 + $0x1c0] sm:$0xf0]  ;;  %v7378_v49 = vrot.slane %v7376_v3, 3 }
 0x225   :  { %11881 = vmatmul.mubr.msk.bf16.gmra.mrb[204].mxu1 %vm18_vm1, %v6214_v55  ;;  %v7381_v34 = vrot.slane %v7379_v57, 4  ;;  %v7386_v14 = vrot.slane %v7384_v13, 3  ;;  %v7389_v4 = vrot.slane %v7387_v38, 4  ;;  %v13823_v61 = vpop.f32.mrb[114].mxu0  ;;  %v6218_v54 = vrot.slane %v6216_v50, 4  ;;  %v13827_v20 = vpop.f32.mrb[120].mxu1 }
 0x226   :  { %v6221_v0 = vrot.slane %v6219_v15, 5  ;;  %v6226_v9 = vrot.slane %v6224_v17, 4  ;;  %v6227_v10 = vshll.u32 %v5792_v41, 16  ;;  %v13825_v16 = vpop.f32.mrb[115].mxu0  ;;  %v7393_v24 = vshrl.u32 %v6983_v52, 16  ;;  %v13830_v41 = vpop.f32.mrb[121].mxu1 }
 0x227   :  { %v7382_v40 = vor.u32 %v7381_v34, %v7378_v49  ;;  %v7390_v25 = vor.u32 %v7389_v4, %v7386_v14  ;;  %v7396_v60 = vshll.u32 %v6983_v52, 16  ;;  %v7401_v31 = vshrl.u32 %v6984_v46, 16  ;;  %v5794_v56 = vld [vmem:[#allocation2 + $0x1c8] sm:$0x1f]  ;;  %v4755_v15 = vld [vmem:[#allocation3 + $0x50] sm:$0xff] }
 0x228   :  { %v6222_v42 = vor.u32 %v6221_v0, %v6218_v54  ;;  %v6229_v6 = vrot.slane %v6227_v10, 5  ;;  %v7404_v62 = vshll.u32 %v6984_v46, 16  ;;  %v7395_v33 = vrot.slane %v7393_v24, 3  ;;  %v5556_v13 = vld [vmem:[#allocation3 + $0x30] sm:$0xff]  ;;  %v13833_v46 = vpop.f32.mrb[122].mxu1  ;;  %v4753_v54 = vld [vmem:[#allocation3 + $0x40] sm:$0xff] }
 0x229   :  { %v7391_v59 = vsel %vm543_vm4, %v7382_v40, %v7390_v25  ;;  %v7398_v3 = vrot.slane %v7396_v60, 4  ;;  %v6233_v57 = vshrl.u32 %v5793_v37, 16  ;;  %v7403_v55 = vrot.slane %v7401_v31, 3  ;;  %v5554_v17 = vld [vmem:[#allocation3 + $0x20] sm:$0xff]  ;;  %v13835_v10 = vpop.f32.mrb[116].mxu0  ;;  %v13841_v31 = vpop.f32.mrb[123].mxu1 }
 0x22a   :  { %11946 = vmatprep.mubr.msk.bf16.mxu0 %vm18_vm1, %v7391_v59  ;;  %v6230_v38 = vor.u32 %v6229_v6, %v6226_v9  ;;  %v7406_v52 = vrot.slane %v7404_v62, 4  ;;  %v6236_v50 = vshll.u32 %v5793_v37, 16  ;;  %v6241_v14 = vshrl.u32 %v5794_v56, 16  ;;  %v5557_v0 = vld [vmem:[#allocation3 + $0x38] sm:$0xff]  ;;  %v6985_v37 = vld [vmem:[#allocation2 + $0x1c0] sm:$0xf8] }
 0x22b   :  { %v7399_v49 = vor.u32 %v7398_v3, %v7395_v33  ;;  %v6235_v34 = vrot.slane %v6233_v57, 4  ;;  %v6244_v4 = vshll.u32 %v5794_v56, 16  ;;  %v5620_v9 = vadd.f32 %v13721_v23, %v5556_v13  ;;  %v5555_v60 = vld [vmem:[#allocation3 + $0x28] sm:$0xff]  ;;  %v13839_v6 = vpop.f32.mrb[117].mxu0  ;;  %v4756_v3 = vld [vmem:[#allocation3 + $0x58] sm:$0xff] }
 0x22c   :  { %v6231_v40 = vsel %vm2619_vm6, %v6222_v42, %v6230_v38  ;;  %v7407_v25 = vor.u32 %v7406_v52, %v7403_v55  ;;  %v6238_v24 = vrot.slane %v6236_v50, 5  ;;  %v6243_v62 = vrot.slane %v6241_v14, 4  ;;  %v6986_v42 = vld [vmem:[#allocation2 + $0x1c8] sm:$0xf]  ;;  %v13846_v57 = vpop.f32.mrb[118].mxu0 }
 0x22d   :  { %11884 = vmatprep.mubr.msk.bf16.mxu1 %vm18_vm1, %v6231_v40  ;;  %v6246_v56 = vrot.slane %v6244_v4, 5  ;;  %v4819_v59 = vadd.f32 %v13708_v43, %v4755_v15  ;;  %v5618_v33 = vadd.f32 %v5554_v17, %v13725_v44  ;;  %5684 = vst.msk [vmem:[#allocation3 + $0x30] sm:$0xff] %vm1481_vm7, %v5620_v9  ;;  %v4817_v38 = vadd.f32 %v4753_v54, %v13712_v5  ;;  %v4754_v52 = vld [vmem:[#allocation3 + $0x48] sm:$0xff]  ;;  %v5795_v50 = vld [vmem:[#allocation2 + $0x1d0] sm:$0xf0]  ;;  %v13852_v4 = vpop.f32.mrb[119].mxu0 }
 0x22e   :  { %v7408_v23 = vsel %vm543_vm4, %v7399_v49, %v7407_v25  ;;  %v6239_v13 = vor.u32 %v6238_v24, %v6235_v34  ;;  %v5621_v55 = vadd.f32 %v13727_v39, %v5557_v0  ;;  %v5796_v14 = vld [vmem:[#allocation2 + $0x1d8] sm:$0x1f]  ;;  %v4820_v44 = vadd.f32 %v13718_v1, %v4756_v3  ;;  %v6987_v17 = vld [vmem:[#allocation2 + $0x1d0] sm:$0xf8]  ;;  %v13862_v40 = vpop.f32.mrb[124].mxu1 }
 0x22f   :  { %11947 = vmatmul.mubr.msk.bf16.gmra.mrb[204].mxu0 %vm18_vm1, %v7408_v23  ;;  %v6247_v43 = vor.u32 %v6246_v56, %v6243_v62  ;;  %4883 = vst.msk [vmem:[#allocation3 + $0x50] sm:$0xff] %vm1481_vm7, %v4819_v59  ;;  %5682 = vst.msk [vmem:[#allocation3 + $0x20] sm:$0xff] %vm1481_vm7, %v5618_v33  ;;  %v5619_v15 = vadd.f32 %v5555_v60, %v13729_v45  ;;  %v4818_v5 = vadd.f32 %v4754_v52, %v13723_v58  ;;  %v6988_v0 = vld [vmem:[#allocation2 + $0x1d8] sm:$0xf]  ;;  %v5797_v24 = vld [vmem:[#allocation2 + $0x1e0] sm:$0xf0] }
 0x230   :  { %4881 = vst.msk [vmem:[#allocation3 + $0x40] sm:$0xff] %vm1481_vm7, %v4817_v38  ;;  %5685 = vst.msk [vmem:[#allocation3 + $0x38] sm:$0xff] %vm1481_vm7, %v5621_v55  ;;  %v7410_v39 = vshrl.u32 %v6985_v37, 16  ;;  %v7413_v49 = vshll.u32 %v6985_v37, 16  ;;  %v7418_v34 = vshrl.u32 %v6986_v42, 16  ;;  %v7421_v54 = vshll.u32 %v6986_v42, 16 }
 0x231   :  { %v6248_v25 = vsel %vm2619_vm6, %v6239_v13, %v6247_v43  ;;  %4884 = vst.msk [vmem:[#allocation3 + $0x58] sm:$0xff] %vm1481_vm7, %v4820_v44  ;;  %5683 = vst.msk [vmem:[#allocation3 + $0x28] sm:$0xff] %vm1481_vm7, %v5619_v15  ;;  %v6250_v1 = vshrl.u32 %v5795_v50, 16  ;;  %v6253_v58 = vshll.u32 %v5795_v50, 16  ;;  %v6258_v45 = vshrl.u32 %v5796_v14, 16  ;;  %v13868_v9 = vpop.f32.mrb[125].mxu1 }
 0x232   :  { %4882 = vst.msk [vmem:[#allocation3 + $0x48] sm:$0xff] %vm1481_vm7, %v4818_v5  ;;  %11885 = vmatmul.mubr.msk.bf16.gmra.mrb[208].mxu1 %vm18_vm1, %v6248_v25  ;;  %v7412_v60 = vrot.slane %v7410_v39, 3  ;;  %v7415_v37 = vrot.slane %v7413_v49, 4  ;;  %v7420_v62 = vrot.slane %v7418_v34, 3  ;;  %v7423_v56 = vrot.slane %v7421_v54, 4  ;;  %v13871_v59 = vpop.f32.mrb[126].mxu1 }
 0x233   :  { %v6252_v33 = vrot.slane %v6250_v1, 4  ;;  %v6255_v3 = vrot.slane %v6253_v58, 5  ;;  %v6260_v42 = vrot.slane %v6258_v45, 4  ;;  %v6261_v23 = vshll.u32 %v5796_v14, 16  ;;  %v13873_v13 = vpop.f32.mrb[120].mxu0  ;;  %v13875_v38 = vpop.f32.mrb[127].mxu1 }
 0x234   :  { %15296 = vst [vmem:[#allocation4_spill] sm:$0xff] %v13875_v38  ;;  %v7416_v55 = vor.u32 %v7415_v37, %v7412_v60  ;;  %v7424_v52 = vor.u32 %v7423_v56, %v7420_v62  ;;  %v7427_v50 = vshrl.u32 %v6987_v17, 16  ;;  %v7430_v43 = vshll.u32 %v6987_v17, 16  ;;  %v13877_v44 = vpop.f32.mrb[121].mxu0  ;;  %v5798_v34 = vld [vmem:[#allocation2 + $0x1e8] sm:$0x1f] }
 0x235   :  { %15297 = vst [vmem:[#allocation5_spill] sm:$0xff] %v13877_v44  ;;  %v6256_v15 = vor.u32 %v6255_v3, %v6252_v33  ;;  %v6263_v5 = vrot.slane %v6261_v23, 5  ;;  %v7435_v39 = vshrl.u32 %v6988_v0, 16  ;;  %v7438_v49 = vshll.u32 %v6988_v0, 16  ;;  %v13879_v54 = vpop.f32.mrb[122].mxu0  ;;  %v4759_v56 = vld [vmem:[#allocation3 + $0x70] sm:$0xff] }
 0x236   :  { %15298 = vst [vmem:[#allocation6_spill] sm:$0xff] %v13879_v54  ;;  %v7425_v25 = vsel %vm543_vm4, %v7416_v55, %v7424_v52  ;;  %v7429_v14 = vrot.slane %v7427_v50, 3  ;;  %v7432_v1 = vrot.slane %v7430_v43, 4  ;;  %v6267_v58 = vshrl.u32 %v5797_v24, 16  ;;  %v5560_v45 = vld [vmem:[#allocation3 + $0x50] sm:$0xff]  ;;  %v13882_v38 = vpop.f32.mrb[123].mxu0 }
 0x237   :  { %15299 = vst [vmem:[#allocation7_spill] sm:$0xff] %v13882_v38  ;;  %11950 = vmatprep.mubr.msk.bf16.mxu0 %vm18_vm1, %v7425_v25  ;;  %v6264_v17 = vor.u32 %v6263_v5, %v6260_v42  ;;  %v7437_v60 = vrot.slane %v7435_v39, 3  ;;  %v7440_v37 = vrot.slane %v7438_v49, 4  ;;  %v6270_v62 = vshll.u32 %v5797_v24, 16  ;;  %v5558_v33 = vld [vmem:[#allocation3 + $0x40] sm:$0xff]  ;;  %v13885_v52 = vpop.f32.mrb[128].mxu1 }
 0x238   :  { %v7433_v0 = vor.u32 %v7432_v1, %v7429_v14  ;;  %v6269_v3 = vrot.slane %v6267_v58, 4  ;;  %v6275_v23 = vshrl.u32 %v5798_v34, 16  ;;  %v6278_v54 = vshll.u32 %v5798_v34, 16  ;;  %v4757_v44 = vld [vmem:[#allocation3 + $0x60] sm:$0xff]  ;;  %v5561_v55 = vld [vmem:[#allocation3 + $0x58] sm:$0xff]  ;;  %15300 = vst [vmem:[#allocation8_spill] sm:$0xff] %v13885_v52 }
 0x239   :  { %v6265_v50 = vsel %vm2619_vm6, %v6256_v15, %v6264_v17  ;;  %v7441_v43 = vor.u32 %v7440_v37, %v7437_v60  ;;  %v6272_v38 = vrot.slane %v6270_v62, 5  ;;  %v5624_v25 = vadd.f32 %v13744_v29, %v5560_v45  ;;  %v4760_v42 = vld [vmem:[#allocation3 + $0x78] sm:$0xff]  ;;  %v5559_v5 = vld [vmem:[#allocation3 + $0x48] sm:$0xff]  ;;  %v6989_v39 = vld [vmem:[#allocation2 + $0x1e0] sm:$0xf8]  ;;  %v13889_v24 = vpop.f32.mrb[129].mxu1 }
 0x23a   :  { %11888 = vmatprep.mubr.msk.bf16.mxu1 %vm18_vm1, %v6265_v50  ;;  %v6277_v49 = vrot.slane %v6275_v23, 4  ;;  %v6280_v14 = vrot.slane %v6278_v54, 5  ;;  %v4823_v34 = vadd.f32 %v13733_v32, %v4759_v56  ;;  %v5622_v1 = vadd.f32 %v5558_v33, %v13752_v7  ;;  %v4758_v58 = vld [vmem:[#allocation3 + $0x68] sm:$0xff]  ;;  %v13894_v15 = vpop.f32.mrb[130].mxu1  ;;  %v5799_v37 = vld [vmem:[#allocation2 + $0x1f0] sm:$0xf0] }
 0x23b   :  { %v6990_v52 = vld [vmem:[#allocation2 + $0x1e8] sm:$0xf]  ;;  %v7442_v17 = vsel %vm543_vm4, %v7433_v0, %v7441_v43  ;;  %v6273_v29 = vor.u32 %v6272_v38, %v6269_v3  ;;  %5688 = vst.msk [vmem:[#allocation3 + $0x50] sm:$0xff] %vm1481_vm7, %v5624_v25  ;;  %v4821_v45 = vadd.f32 %v4757_v44, %v13735_v26  ;;  %v5625_v60 = vadd.f32 %v13760_v11, %v5561_v55  ;;  %v5800_v62 = vld [vmem:[#allocation2 + $0x1f8] sm:$0x1f]  ;;  %v13900_v54 = vpop.f32.mrb[124].mxu0 }
 0x23c   :  { %v13902_v32 = vpop.f32.mrb[131].mxu1  ;;  %11951 = vmatmul.mubr.msk.bf16.gmra.mrb[208].mxu0 %vm18_vm1, %v7442_v17  ;;  %v6281_v7 = vor.u32 %v6280_v14, %v6277_v49  ;;  %4887 = vst.msk [vmem:[#allocation3 + $0x70] sm:$0xff] %vm1481_vm7, %v4823_v34  ;;  %5686 = vst.msk [vmem:[#allocation3 + $0x40] sm:$0xff] %vm1481_vm7, %v5622_v1  ;;  %v4824_v38 = vadd.f32 %v13739_v27, %v4760_v42  ;;  %v5623_v56 = vadd.f32 %v5559_v5, %v13764_v22  ;;  %v6991_v11 = vld [vmem:[#allocation2 + $0x1f0] sm:$0xf8]  ;;  %v13910_v44 = vpop.f32.mrb[125].mxu0 }
 0x23d   :  { %v4822_v26 = vadd.f32 %v4758_v58, %v13746_v18  ;;  %4885 = vst.msk [vmem:[#allocation3 + $0x60] sm:$0xff] %vm1481_vm7, %v4821_v45  ;;  %5689 = vst.msk [vmem:[#allocation3 + $0x58] sm:$0xff] %vm1481_vm7, %v5625_v60  ;;  %v7444_v33 = vshrl.u32 %v6989_v39, 16  ;;  %v7447_v0 = vshll.u32 %v6989_v39, 16  ;;  %v7452_v3 = vshrl.u32 %v6990_v52, 16  ;;  %v13914_v55 = vpop.f32.mrb[126].mxu0 }
 0x23e   :  { %v7455_v23 = vshll.u32 %v6990_v52, 16  ;;  %v6282_v50 = vsel %vm2619_vm6, %v6273_v29, %v6281_v7  ;;  %4888 = vst.msk [vmem:[#allocation3 + $0x78] sm:$0xff] %vm1481_vm7, %v4824_v38  ;;  %5687 = vst.msk [vmem:[#allocation3 + $0x48] sm:$0xff] %vm1481_vm7, %v5623_v56  ;;  %v6284_v27 = vshrl.u32 %v5799_v37, 16  ;;  %v6287_v18 = vshll.u32 %v5799_v37, 16  ;;  %v13920_v25 = vpop.f32.mrb[127].mxu0 }
 0x23f   :  { %4886 = vst.msk [vmem:[#allocation3 + $0x68] sm:$0xff] %vm1481_vm7, %v4822_v26  ;;  %v6292_v22 = vshrl.u32 %v5800_v62, 16  ;;  %v6992_v43 = vld [vmem:[#allocation2 + $0x1f8] sm:$0xf]  ;;  %11889 = vmatmul.mubr.msk.bf16.gmra.mrb[212].mxu1 %vm18_vm1, %v6282_v50  ;;  %v7446_v42 = vrot.slane %v7444_v33, 3  ;;  %v7449_v52 = vrot.slane %v7447_v0, 4 }
 0x240   :  { %v7454_v5 = vrot.slane %v7452_v3, 3  ;;  %v7457_v39 = vrot.slane %v7455_v23, 4  ;;  %v5801_v49 = vld [vmem:[#allocation2 + $0x200] sm:$0xf0]  ;;  %v6286_v14 = vrot.slane %v6284_v27, 4  ;;  %v6289_v34 = vrot.slane %v6287_v18, 5 }
 0x241   :  { %v6294_v1 = vrot.slane %v6292_v22, 4  ;;  %v6295_v58 = vshll.u32 %v5800_v62, 16  ;;  %v13923_v17 = vpop.f32.mrb[132].mxu1  ;;  %v7450_v29 = vor.u32 %v7449_v52, %v7446_v42  ;;  %v7461_v60 = vshrl.u32 %v6991_v11, 16  ;;  %v5802_v0 = vld [vmem:[#allocation2 + $0x208] sm:$0x1f] }
 0x242   :  { %v7458_v45 = vor.u32 %v7457_v39, %v7454_v5  ;;  %v7464_v37 = vshll.u32 %v6991_v11, 16  ;;  %v13925_v7 = vpop.f32.mrb[133].mxu1  ;;  %v6290_v38 = vor.u32 %v6289_v34, %v6286_v14  ;;  %v7469_v26 = vshrl.u32 %v6992_v43, 16  ;;  %v13930_v22 = vpop.f32.mrb[128].mxu0 }
 0x243   :  { %15301 = vst [vmem:[#allocation9_spill] sm:$0xff] %v13925_v7  ;;  %v6297_v56 = vrot.slane %v6295_v58, 5  ;;  %v7472_v33 = vshll.u32 %v6992_v43, 16  ;;  %v13927_v3 = vpop.f32.mrb[134].mxu1  ;;  %v7463_v50 = vrot.slane %v7461_v60, 3  ;;  %v6301_v62 = vshrl.u32 %v5801_v49, 16 }
 0x244   :  { %15302 = vst [vmem:[#allocation10_spill] sm:$0xff] %v13927_v3  ;;  %v7459_v23 = vsel %vm543_vm4, %v7450_v29, %v7458_v45  ;;  %v7466_v27 = vrot.slane %v7464_v37, 4  ;;  %v5564_v18 = vld [vmem:[#allocation3 + $0x70] sm:$0xff]  ;;  %15303 = vst [vmem:[#allocation11_spill] sm:$0xff] %v13930_v22  ;;  %v13932_v42 = vpop.f32.mrb[135].mxu1  ;;  %v7471_v52 = vrot.slane %v7469_v26, 3 }
 0x245   :  { %15304 = vst [vmem:[#allocation12_spill] sm:$0xff] %v13932_v42  ;;  %11954 = vmatprep.mubr.msk.bf16.mxu0 %vm18_vm1, %v7459_v23  ;;  %v6298_v11 = vor.u32 %v6297_v56, %v6294_v1  ;;  %v7474_v5 = vrot.slane %v7472_v33, 4  ;;  %v6304_v39 = vshll.u32 %v5801_v49, 16  ;;  %v5562_v43 = vld [vmem:[#allocation3 + $0x60] sm:$0xff]  ;;  %v13935_v14 = vpop.f32.mrb[129].mxu0  ;;  %v6303_v58 = vrot.slane %v6301_v62, 4 }
 0x246   :  { %v7467_v34 = vor.u32 %v7466_v27, %v7463_v50  ;;  %v6309_v29 = vshrl.u32 %v5802_v0, 16  ;;  %v6312_v45 = vshll.u32 %v5802_v0, 16  ;;  %v4763_v60 = vld [vmem:[#allocation3 + $0x90] sm:$0xff]  ;;  %v5565_v37 = vld [vmem:[#allocation3 + $0x78] sm:$0xff]  ;;  %v13937_v3 = vpop.f32.mrb[130].mxu0  ;;  %v5628_v1 = vadd.f32 %v13777_v35, %v5564_v18  ;;  %v4761_v56 = vld [vmem:[#allocation3 + $0x80] sm:$0xff] }
 0x247   :  { %15305 = vst [vmem:[#allocation13_spill] sm:$0xff] %v13937_v3  ;;  %v6299_v22 = vsel %vm2619_vm6, %v6290_v38, %v6298_v11  ;;  %v7475_v42 = vor.u32 %v7474_v5, %v7471_v52  ;;  %v6306_v7 = vrot.slane %v6304_v39, 5  ;;  %v4764_v26 = vld [vmem:[#allocation3 + $0x98] sm:$0xff]  ;;  %v5563_v49 = vld [vmem:[#allocation3 + $0x68] sm:$0xff]  ;;  %v13941_v33 = vpop.f32.mrb[131].mxu0  ;;  %v4827_v0 = vadd.f32 %v13771_v2, %v4763_v60  ;;  %v13950_v39 = vpop.f32.mrb[136].mxu1 }
 0x248   :  { %11892 = vmatprep.mubr.msk.bf16.mxu1 %vm18_vm1, %v6299_v22  ;;  %v6311_v23 = vrot.slane %v6309_v29, 4  ;;  %v6314_v50 = vrot.slane %v6312_v45, 5  ;;  %v5626_v27 = vadd.f32 %v5562_v43, %v13782_v36  ;;  %v6993_v62 = vld [vmem:[#allocation2 + $0x200] sm:$0xf8]  ;;  %v6994_v3 = vld [vmem:[#allocation2 + $0x208] sm:$0xf]  ;;  %v4825_v35 = vadd.f32 %v4761_v56, %v13773_v47 }
 0x249   :  { %v7476_v38 = vsel %vm543_vm4, %v7467_v34, %v7475_v42  ;;  %v6307_v11 = vor.u32 %v6306_v7, %v6303_v58  ;;  %5692 = vst.msk [vmem:[#allocation3 + $0x70] sm:$0xff] %vm1481_vm7, %v5628_v1  ;;  %v5629_v18 = vadd.f32 %v13785_v8, %v5565_v37  ;;  %v4762_v52 = vld [vmem:[#allocation3 + $0x88] sm:$0xff]  ;;  %v5803_v5 = vld [vmem:[#allocation2 + $0x210] sm:$0xf0]  ;;  %v5804_v22 = vld [vmem:[#allocation2 + $0x218] sm:$0x1f]  ;;  %v4828_v36 = vadd.f32 %v13775_v63, %v4764_v26 }
 0x24a   :  { %11955 = vmatmul.mubr.msk.bf16.gmra.mrb[212].mxu0 %vm18_vm1, %v7476_v38  ;;  %v6315_v2 = vor.u32 %v6314_v50, %v6311_v23  ;;  %4891 = vst.msk [vmem:[#allocation3 + $0x90] sm:$0xff] %vm1481_vm7, %v4827_v0  ;;  %5690 = vst.msk [vmem:[#allocation3 + $0x60] sm:$0xff] %vm1481_vm7, %v5626_v27  ;;  %v5627_v7 = vadd.f32 %v5563_v49, %v13787_v30  ;;  %v4826_v47 = vadd.f32 %v4762_v52, %v13779_v12  ;;  %v6995_v42 = vld [vmem:[#allocation2 + $0x210] sm:$0xf8]  ;;  %v13958_v8 = vpop.f32.mrb[137].mxu1  ;;  %v13968_v56 = vpop.f32.mrb[132].mxu0 }
 0x24b   :  { %4889 = vst.msk [vmem:[#allocation3 + $0x80] sm:$0xff] %vm1481_vm7, %v4825_v35  ;;  %5693 = vst.msk [vmem:[#allocation3 + $0x78] sm:$0xff] %vm1481_vm7, %v5629_v18  ;;  %v7478_v43 = vshrl.u32 %v6993_v62, 16  ;;  %v7481_v34 = vshll.u32 %v6993_v62, 16  ;;  %v7486_v58 = vshrl.u32 %v6994_v3, 16  ;;  %v7489_v29 = vshll.u32 %v6994_v3, 16 }
 0x24c   :  { %v6996_v45 = vld [vmem:[#allocation2 + $0x218] sm:$0xf]  ;;  %v13962_v60 = vpop.f32.mrb[138].mxu1  ;;  %v6316_v63 = vsel %vm2619_vm6, %v6307_v11, %v6315_v2  ;;  %4892 = vst.msk [vmem:[#allocation3 + $0x98] sm:$0xff] %vm1481_vm7, %v4828_v36  ;;  %5691 = vst.msk [vmem:[#allocation3 + $0x68] sm:$0xff] %vm1481_vm7, %v5627_v7  ;;  %v6318_v12 = vshrl.u32 %v5803_v5, 16 }
 0x24d   :  { %4890 = vst.msk [vmem:[#allocation3 + $0x88] sm:$0xff] %vm1481_vm7, %v4826_v47  ;;  %v6321_v30 = vshll.u32 %v5803_v5, 16  ;;  %v6326_v37 = vshrl.u32 %v5804_v22, 16  ;;  %v5805_v1 = vld [vmem:[#allocation2 + $0x220] sm:$0xf0]  ;;  %v13970_v26 = vpop.f32.mrb[139].mxu1  ;;  %11893 = vmatmul.mubr.msk.bf16.gmra.mrb[216].mxu1 %vm18_vm1, %v6316_v63 }
 0x24e   :  { %15306 = vst [vmem:[#allocation14_spill] sm:$0xff] %v13970_v26  ;;  %v7480_v3 = vrot.slane %v7478_v43, 3  ;;  %v7483_v49 = vrot.slane %v7481_v34, 4  ;;  %v7488_v23 = vrot.slane %v7486_v58, 3  ;;  %v7491_v50 = vrot.slane %v7489_v29, 4  ;;  %v13973_v0 = vpop.f32.mrb[133].mxu0 }
 0x24f   :  { %v6320_v27 = vrot.slane %v6318_v12, 4  ;;  %v6323_v62 = vrot.slane %v6321_v30, 5  ;;  %v6328_v38 = vrot.slane %v6326_v37, 4  ;;  %v6329_v11 = vshll.u32 %v5804_v22, 16  ;;  %v13975_v35 = vpop.f32.mrb[134].mxu0  ;;  %v13980_v22 = vpop.f32.mrb[140].mxu1 }
 0x250   :  { %v7484_v18 = vor.u32 %v7483_v49, %v7480_v3  ;;  %v7492_v52 = vor.u32 %v7491_v50, %v7488_v23  ;;  %v7495_v5 = vshrl.u32 %v6995_v42, 16  ;;  %v7498_v2 = vshll.u32 %v6995_v42, 16  ;;  %v13977_v36 = vpop.f32.mrb[135].mxu0  ;;  %v5806_v58 = vld [vmem:[#allocation2 + $0x228] sm:$0x1f]  ;;  %15308 = vst [vmem:[#allocation16_spill] sm:$0xff] %v13980_v22 }
 0x251   :  { %15307 = vst [vmem:[#allocation15_spill] sm:$0xff] %v13977_v36  ;;  %v6324_v7 = vor.u32 %v6323_v62, %v6320_v27  ;;  %v6331_v47 = vrot.slane %v6329_v11, 5  ;;  %v7503_v43 = vshrl.u32 %v6996_v45, 16  ;;  %v7506_v34 = vshll.u32 %v6996_v45, 16  ;;  %v5568_v37 = vld [vmem:[#allocation3 + $0x90] sm:$0xff]  ;;  %v13983_v62 = vpop.f32.mrb[141].mxu1 }
 0x252   :  { %v7493_v29 = vsel %vm543_vm4, %v7484_v18, %v7492_v52  ;;  %v7497_v63 = vrot.slane %v7495_v5, 3  ;;  %v7500_v12 = vrot.slane %v7498_v2, 4  ;;  %v6335_v30 = vshrl.u32 %v5805_v1, 16  ;;  %v4767_v50 = vld [vmem:[#allocation3 + $0xb0] sm:$0xff]  ;;  %v5566_v27 = vld [vmem:[#allocation3 + $0x80] sm:$0xff]  ;;  %v13985_v2 = vpop.f32.mrb[142].mxu1 }
 0x253   :  { %11958 = vmatprep.mubr.msk.bf16.mxu0 %vm18_vm1, %v7493_v29  ;;  %v6332_v3 = vor.u32 %v6331_v47, %v6328_v38  ;;  %v7505_v49 = vrot.slane %v7503_v43, 3  ;;  %v7508_v42 = vrot.slane %v7506_v34, 4  ;;  %v6338_v23 = vshll.u32 %v5805_v1, 16  ;;  %v4765_v52 = vld [vmem:[#allocation3 + $0xa0] sm:$0xff]  ;;  %v5569_v5 = vld [vmem:[#allocation3 + $0x98] sm:$0xff]  ;;  %15309 = vst [vmem:[#allocation17_spill] sm:$0xff] %v13985_v2 }
 0x254   :  { %v7501_v45 = vor.u32 %v7500_v12, %v7497_v63  ;;  %v6337_v11 = vrot.slane %v6335_v30, 4  ;;  %v6343_v36 = vshrl.u32 %v5806_v58, 16  ;;  %v6346_v18 = vshll.u32 %v5806_v58, 16  ;;  %v5567_v47 = vld [vmem:[#allocation3 + $0x88] sm:$0xff]  ;;  %v6997_v1 = vld [vmem:[#allocation2 + $0x220] sm:$0xf8] }
 0x255   :  { %v6333_v22 = vsel %vm2619_vm6, %v6324_v7, %v6332_v3  ;;  %v7509_v26 = vor.u32 %v7508_v42, %v7505_v49  ;;  %v6340_v29 = vrot.slane %v6338_v23, 5  ;;  %v5632_v38 = vadd.f32 %v13812_v28, %v5568_v37  ;;  %v13989_v43 = vpop.f32.mrb[136].mxu0  ;;  %v13991_v34 = vpop.f32.mrb[143].mxu1  ;;  %v4768_v2 = vld [vmem:[#allocation3 + $0xb8] sm:$0xff]  ;;  %v6998_v7 = vld [vmem:[#allocation2 + $0x228] sm:$0xf] }
 0x256   :  { %11896 = vmatprep.mubr.msk.bf16.mxu1 %vm18_vm1, %v6333_v22  ;;  %v6345_v63 = vrot.slane %v6343_v36, 4  ;;  %v6348_v58 = vrot.slane %v6346_v18, 5  ;;  %v4831_v12 = vadd.f32 %v13794_v53, %v4767_v50  ;;  %v5630_v30 = vadd.f32 %v5566_v27, %v13820_v19  ;;  %v13996_v3 = vpop.f32.mrb[137].mxu0  ;;  %v4766_v22 = vld [vmem:[#allocation3 + $0xa8] sm:$0xff]  ;;  %v6999_v36 = vld [vmem:[#allocation2 + $0x230] sm:$0xf8] }
 0x257   :  { %v7510_v28 = vsel %vm543_vm4, %v7501_v45, %v7509_v26  ;;  %v6341_v37 = vor.u32 %v6340_v29, %v6337_v11  ;;  %5696 = vst.msk [vmem:[#allocation3 + $0x90] sm:$0xff] %vm1481_vm7, %v5632_v38  ;;  %v4829_v49 = vadd.f32 %v4765_v52, %v13800_v21  ;;  %v5633_v42 = vadd.f32 %v13823_v61, %v5569_v5  ;;  %v7000_v23 = vld [vmem:[#allocation2 + $0x238] sm:$0xf]  ;;  %v14002_v18 = vpop.f32.mrb[138].mxu0  ;;  %v8126_v50 = vld [vmem:[#allocation2 + $0x20] sm:$0xf0] }
 0x258   :  { %11959 = vmatmul.mubr.msk.bf16.gmra.mrb[216].mxu0 %vm18_vm1, %v7510_v28  ;;  %v6349_v53 = vor.u32 %v6348_v58, %v6345_v63  ;;  %4895 = vst.msk [vmem:[#allocation3 + $0xb0] sm:$0xff] %vm1481_vm7, %v4831_v12  ;;  %5694 = vst.msk [vmem:[#allocation3 + $0x80] sm:$0xff] %vm1481_vm7, %v5630_v30  ;;  %v4832_v19 = vadd.f32 %v13808_v48, %v4768_v2  ;;  %v5631_v26 = vadd.f32 %v5567_v47, %v13825_v16  ;;  %v8127_v61 = vld [vmem:[#allocation2 + $0x28] sm:$0xf]  ;;  %v14010_v27 = vpop.f32.mrb[139].mxu0  ;;  %v14018_v47 = vpop.f32.mrb[144].mxu1 }
 0x259   :  { %v4830_v21 = vadd.f32 %v4766_v22, %v13814_v51  ;;  %4893 = vst.msk [vmem:[#allocation3 + $0xa0] sm:$0xff] %vm1481_vm7, %v4829_v49  ;;  %5697 = vst.msk [vmem:[#allocation3 + $0x98] sm:$0xff] %vm1481_vm7, %v5633_v42  ;;  %v7512_v45 = vshrl.u32 %v6997_v1, 16  ;;  %v7515_v11 = vshll.u32 %v6997_v1, 16  ;;  %v7520_v52 = vshrl.u32 %v6998_v7, 16  ;;  %v14021_v30 = vpop.f32.mrb[145].mxu1 }
 0x25a   :  { %v7523_v5 = vshll.u32 %v6998_v7, 16  ;;  %v8128_v29 = vld [vmem:[#allocation2 + $0x30] sm:$0xf0]  ;;  %v6350_v38 = vsel %vm2619_vm6, %v6341_v37, %v6349_v53  ;;  %4896 = vst.msk [vmem:[#allocation3 + $0xb8] sm:$0xff] %vm1481_vm7, %v4832_v19  ;;  %5695 = vst.msk [vmem:[#allocation3 + $0x88] sm:$0xff] %vm1481_vm7, %v5631_v26  ;;  %v7529_v48 = vshrl.u32 %v6999_v36, 16 }
 0x25b   :  { %4894 = vst.msk [vmem:[#allocation3 + $0xa8] sm:$0xff] %vm1481_vm7, %v4830_v21  ;;  %v7532_v51 = vshll.u32 %v6999_v36, 16  ;;  %v7537_v16 = vshrl.u32 %v7000_v23, 16  ;;  %v8129_v2 = vld [vmem:[#allocation2 + $0x38] sm:$0xf]  ;;  %15310 = vst [vmem:[#allocation18_spill] sm:$0xff] %v14018_v47  ;;  %11897 = vmatmul.mubr.msk.bf16.gmra.mrb[220].mxu1 %vm18_vm1, %v6350_v38 }
 0x25c   :  { %v7514_v1 = vrot.slane %v7512_v45, 3  ;;  %v7517_v63 = vrot.slane %v7515_v11, 4  ;;  %v7522_v58 = vrot.slane %v7520_v52, 3  ;;  %v7525_v12 = vrot.slane %v7523_v5, 4  ;;  %15311 = vst [vmem:[#allocation19_spill] sm:$0xff] %v14021_v30  ;;  %v4771_v42 = vld [vmem:[#allocation3 + $0xd0] sm:$0xff] }
 0x25d   :  { %v7531_v7 = vrot.slane %v7529_v48, 3  ;;  %v7534_v28 = vrot.slane %v7532_v51, 4  ;;  %v7539_v37 = vrot.slane %v7537_v16, 3  ;;  %v7540_v49 = vshll.u32 %v7000_v23, 16  ;;  %v4769_v22 = vld [vmem:[#allocation3 + $0xc0] sm:$0xff]  ;;  %v14023_v53 = vpop.f32.mrb[146].mxu1 }
 0x25e   :  { %v7518_v36 = vor.u32 %v7517_v63, %v7514_v1  ;;  %v7526_v19 = vor.u32 %v7525_v12, %v7522_v58  ;;  %v8254_v26 = vrot.slane %v8126_v50, 4  ;;  %v8255_v21 = vrot.slane %v8127_v61, 4  ;;  %v8935_v47 = vld [vmem:[#allocation2 + $0x20] sm:$0xf0]  ;;  %v14025_v38 = vpop.f32.mrb[140].mxu0  ;;  %v14027_v45 = vpop.f32.mrb[147].mxu1 }
 0x25f   :  { %15312 = vst [vmem:[#allocation20_spill] sm:$0xff] %v14027_v45  ;;  %v7535_v11 = vor.u32 %v7534_v28, %v7531_v7  ;;  %v7542_v52 = vrot.slane %v7540_v49, 4  ;;  %v8257_v5 = vrot.slane %v8128_v29, 4  ;;  %v8258_v48 = vrot.slane %v8129_v2, 4  ;;  %v4772_v51 = vld [vmem:[#allocation3 + $0xd8] sm:$0xff]  ;;  %v14029_v23 = vpop.f32.mrb[141].mxu0 }
 0x260   :  { %v8936_v16 = vld [vmem:[#allocation2 + $0x28] sm:$0x1f]  ;;  %v7527_v30 = vsel %vm543_vm4, %v7518_v36, %v7526_v19  ;;  %v8256_v1 = vsel %vm1872_vm5, %v8254_v26, %v8255_v21  ;;  %v5572_v63 = vld [vmem:[#allocation3 + $0xb0] sm:$0xff]  ;;  %v4835_v50 = vadd.f32 %v13827_v20, %v4771_v42  ;;  %v4833_v61 = vadd.f32 %v4769_v22, %v13830_v41  ;;  %v8130_v58 = vld [vmem:[#allocation2 + $0x40] sm:$0xf0]  ;;  %v14035_v45 = vpop.f32.mrb[142].mxu0 }
 0x261   :  { %v8131_v12 = vld [vmem:[#allocation2 + $0x48] sm:$0xf]  ;;  %11962 = vmatprep.mubr.msk.bf16.mxu0 %vm18_vm1, %v7527_v30  ;;  %v7543_v29 = vor.u32 %v7542_v52, %v7539_v37  ;;  %11968 = vmatprep.mubr.msk.bf16.mxu1 %vm18_vm1, %v8256_v1  ;;  %v8259_v2 = vsel %vm1872_vm5, %v8257_v5, %v8258_v48  ;;  %v5636_v7 = vadd.f32 %v13835_v10, %v5572_v63  ;;  %v5570_v28 = vld [vmem:[#allocation3 + $0xa0] sm:$0xff]  ;;  %v9000_v36 = vshrl.u32 %v8935_v47, 16  ;;  %v8937_v19 = vld [vmem:[#allocation2 + $0x30] sm:$0xf0] }
 0x262   :  { %v4770_v49 = vld [vmem:[#allocation3 + $0xc8] sm:$0xff]  ;;  %v14041_v20 = vpop.f32.mrb[143].mxu0  ;;  %4899 = vst.msk [vmem:[#allocation3 + $0xd0] sm:$0xff] %vm1481_vm7, %v4835_v50  ;;  %v5634_v41 = vadd.f32 %v5570_v28, %v13839_v6  ;;  %4897 = vst.msk [vmem:[#allocation3 + $0xc0] sm:$0xff] %vm1481_vm7, %v4833_v61  ;;  %v5573_v30 = vld [vmem:[#allocation3 + $0xb8] sm:$0xff]  ;;  %v4836_v37 = vadd.f32 %v13833_v46, %v4772_v51  ;;  %v9003_v26 = vshll.u32 %v8935_v47, 16 }
 0x263   :  { %v5571_v42 = vld [vmem:[#allocation3 + $0xa8] sm:$0xff]  ;;  %v4834_v22 = vadd.f32 %v4770_v49, %v13841_v31  ;;  %v8938_v10 = vld [vmem:[#allocation2 + $0x38] sm:$0x1f]  ;;  %v7544_v21 = vsel %vm543_vm4, %v7535_v11, %v7543_v29  ;;  %5700 = vst.msk [vmem:[#allocation3 + $0xb0] sm:$0xff] %vm1481_vm7, %v5636_v7  ;;  %v5637_v52 = vadd.f32 %v13846_v57, %v5573_v30  ;;  %v9002_v48 = vrot.slane %v9000_v36, 4  ;;  %v14052_v63 = vpop.f32.mrb[148].mxu1  ;;  %11969 = vmatmul.mubr.msk.bf16.vlgmr.msra.gmra.mrb[224].mxu1 %vm18_vm1, %v8259_v2 }
 0x264   :  { %v5635_v5 = vadd.f32 %v5571_v42, %v13852_v4  ;;  %v8132_v6 = vld [vmem:[#allocation2 + $0x50] sm:$0xf0]  ;;  %v8133_v1 = vld [vmem:[#allocation2 + $0x58] sm:$0xf]  ;;  %11963 = vmatmul.mubr.msk.bf16.gmra.mrb[220].mxu0 %vm18_vm1, %v7544_v21  ;;  %5698 = vst.msk [vmem:[#allocation3 + $0xa0] sm:$0xff] %vm1481_vm7, %v5634_v41  ;;  %4900 = vst.msk [vmem:[#allocation3 + $0xd8] sm:$0xff] %vm1481_vm7, %v4836_v37 }
 0x265   :  { %4898 = vst.msk [vmem:[#allocation3 + $0xc8] sm:$0xff] %vm1481_vm7, %v4834_v22  ;;  %v9005_v46 = vrot.slane %v9003_v26, 5  ;;  %v9008_v31 = vshrl.u32 %v8936_v16, 16  ;;  %v9011_v57 = vshll.u32 %v8936_v16, 16  ;;  %v8260_v47 = vrot.slane %v8130_v58, 4  ;;  %v14059_v4 = vpop.f32.mrb[149].mxu1 }
 0x266   :  { %5701 = vst.msk [vmem:[#allocation3 + $0xb8] sm:$0xff] %vm1481_vm7, %v5637_v52  ;;  %5699 = vst.msk [vmem:[#allocation3 + $0xa8] sm:$0xff] %vm1481_vm7, %v5635_v5  ;;  %v8261_v11 = vrot.slane %v8131_v12, 4  ;;  %v9017_v51 = vshrl.u32 %v8937_v19, 16  ;;  %v9020_v50 = vshll.u32 %v8937_v19, 16  ;;  %v9025_v61 = vshrl.u32 %v8938_v10, 16 }
 0x267   :  { %v14063_v29 = vpop.f32.mrb[150].mxu1  ;;  %v9006_v2 = vor.u32 %v9005_v46, %v9002_v48  ;;  %v9010_v7 = vrot.slane %v9008_v31, 4  ;;  %v9013_v28 = vrot.slane %v9011_v57, 5  ;;  %v9028_v49 = vshll.u32 %v8938_v10, 16  ;;  %v4775_v36 = vld [vmem:[#allocation3 + $0xf0] sm:$0xff]  ;;  %v4773_v41 = vld [vmem:[#allocation3 + $0xe0] sm:$0xff] }
 0x268   :  { %v4776_v16 = vld [vmem:[#allocation3 + $0xf8] sm:$0xff]  ;;  %v14065_v58 = vpop.f32.mrb[144].mxu0  ;;  %v14067_v30 = vpop.f32.mrb[151].mxu1  ;;  %v8262_v37 = vsel %vm1872_vm5, %v8260_v47, %v8261_v11  ;;  %v9019_v42 = vrot.slane %v9017_v51, 4  ;;  %v9022_v12 = vrot.slane %v9020_v50, 5  ;;  %v9027_v22 = vrot.slane %v9025_v61, 4 }
 0x269   :  { %15313 = vst [vmem:[#allocation21_spill] sm:$0xff] %v14067_v30  ;;  %v8939_v19 = vld [vmem:[#allocation2 + $0x40] sm:$0xf0]  ;;  %v14070_v26 = vpop.f32.mrb[145].mxu0  ;;  %v9014_v21 = vor.u32 %v9013_v28, %v9010_v7  ;;  %11972 = vmatprep.mubr.msk.bf16.mxu1 %vm18_vm1, %v8262_v37  ;;  %v9030_v52 = vrot.slane %v9028_v49, 5  ;;  %v8263_v10 = vrot.slane %v8132_v6, 4  ;;  %v4839_v47 = vadd.f32 %v13862_v40, %v4775_v36 }
 0x26a   :  { %v8264_v5 = vrot.slane %v8133_v1, 4  ;;  %v4774_v48 = vld [vmem:[#allocation3 + $0xe8] sm:$0xff]  ;;  %v14073_v31 = vpop.f32.mrb[146].mxu0  ;;  %v9023_v57 = vor.u32 %v9022_v12, %v9019_v42  ;;  %v5576_v30 = vld [vmem:[#allocation3 + $0xd0] sm:$0xff]  ;;  %v5574_v11 = vld [vmem:[#allocation3 + $0xc0] sm:$0xff]  ;;  %v4837_v51 = vadd.f32 %v4773_v41, %v13868_v9  ;;  %v4840_v50 = vadd.f32 %v13871_v59, %v4776_v16 }
 0x26b   :  { %v8940_v46 = vld [vmem:[#allocation2 + $0x48] sm:$0x1f]  ;;  %v8134_v61 = vld [vmem:[#allocation2 + $0x60] sm:$0xf0]  ;;  %v14078_v7 = vpop.f32.mrb[147].mxu0  ;;  %v9015_v28 = vsel %vm2619_vm6, %v9006_v2, %v9014_v21  ;;  %v9031_v6 = vor.u32 %v9030_v52, %v9027_v22  ;;  %v5640_v49 = vadd.f32 %v13873_v13, %v5576_v30  ;;  %4903 = vst.msk [vmem:[#allocation3 + $0xf0] sm:$0xff] %vm1481_vm7, %v4839_v47 }
 0x26c   :  { %15314 = vst [vmem:[#allocation22_spill] sm:$0xff] %v14078_v7  ;;  %v8265_v1 = vsel %vm1872_vm5, %v8263_v10, %v8264_v5  ;;  %v8135_v37 = vld [vmem:[#allocation2 + $0x68] sm:$0xf]  ;;  %v8941_v42 = vld [vmem:[#allocation2 + $0x50] sm:$0xf0]  ;;  %12034 = vmatprep.mubr.msk.bf16.mxu0 %vm18_vm1, %v9015_v28  ;;  %4901 = vst.msk [vmem:[#allocation3 + $0xe0] sm:$0xff] %vm1481_vm7, %v4837_v51 }
 0x26d   :  { %v8942_v12 = vld [vmem:[#allocation2 + $0x58] sm:$0x1f]  ;;  %v15315_v40 = vld [vmem:[#allocation5_spill] sm:$0xff]  ;;  %4904 = vst.msk [vmem:[#allocation3 + $0xf8] sm:$0xff] %vm1481_vm7, %v4840_v50  ;;  %v15316_v36 = vld [vmem:[#allocation4_spill] sm:$0xff]  ;;  %v9034_v16 = vshrl.u32 %v8939_v19, 16  ;;  %v9032_v30 = vsel %vm2619_vm6, %v9023_v57, %v9031_v6  ;;  %11973 = vmatmul.mubr.msk.bf16.gmra.mrb[228].mxu1 %vm18_vm1, %v8265_v1 }
 0x26e   :  { %v5638_v9 = vadd.f32 %v5574_v11, %v15315_v40  ;;  %v5577_v59 = vld [vmem:[#allocation3 + $0xd8] sm:$0xff]  ;;  %v5575_v2 = vld [vmem:[#allocation3 + $0xc8] sm:$0xff]  ;;  %v4838_v41 = vadd.f32 %v4774_v48, %v15316_v36  ;;  %v9037_v22 = vshll.u32 %v8939_v19, 16  ;;  %v14089_v13 = vpop.f32.mrb[152].mxu1  ;;  %5704 = vst.msk [vmem:[#allocation3 + $0xd0] sm:$0xff] %vm1481_vm7, %v5640_v49  ;;  %v15318_v21 = vld [vmem:[#allocation6_spill] sm:$0xff]  ;;  %12035 = vmatmul.mubr.msk.bf16.vlgmr.msra.gmra.mrb[224].mxu0 %vm18_vm1, %v9032_v30 }
 0x26f   :  { %15317 = vst [vmem:[#allocation5_spill] sm:$0xff] %v14089_v13  ;;  %v5641_v52 = vadd.f32 %v15318_v21, %v5577_v59  ;;  %v15319_v10 = vld [vmem:[#allocation7_spill] sm:$0xff]  ;;  %v9042_v47 = vshrl.u32 %v8940_v46, 16  ;;  %v8136_v11 = vld [vmem:[#allocation2 + $0x70] sm:$0xf0]  ;;  %v14096_v50 = vpop.f32.mrb[153].mxu1 }
 0x270   :  { %v5639_v5 = vadd.f32 %v5575_v2, %v15319_v10  ;;  %v8137_v51 = vld [vmem:[#allocation2 + $0x78] sm:$0xf]  ;;  %15320 = vst [vmem:[#allocation4_spill] sm:$0xff] %v14096_v50  ;;  %5702 = vst.msk [vmem:[#allocation3 + $0xc0] sm:$0xff] %vm1481_vm7, %v5638_v9  ;;  %v9036_v19 = vrot.slane %v9034_v16, 4  ;;  %v9039_v48 = vrot.slane %v9037_v22, 5 }
 0x271   :  { %4902 = vst.msk [vmem:[#allocation3 + $0xe8] sm:$0xff] %vm1481_vm7, %v4838_v41  ;;  %v9045_v57 = vshll.u32 %v8940_v46, 16  ;;  %v8266_v28 = vrot.slane %v8134_v61, 4  ;;  %v14101_v6 = vpop.f32.mrb[154].mxu1  ;;  %5705 = vst.msk [vmem:[#allocation3 + $0xd8] sm:$0xff] %vm1481_vm7, %v5641_v52  ;;  %v9044_v1 = vrot.slane %v9042_v47, 4 }
 0x272   :  { %15321 = vst [vmem:[#allocation6_spill] sm:$0xff] %v14101_v6  ;;  %5703 = vst.msk [vmem:[#allocation3 + $0xc8] sm:$0xff] %vm1481_vm7, %v5639_v5  ;;  %v8267_v49 = vrot.slane %v8135_v37, 4  ;;  %v9051_v40 = vshrl.u32 %v8941_v42, 16  ;;  %v9054_v59 = vshll.u32 %v8941_v42, 16  ;;  %v14105_v2 = vpop.f32.mrb[148].mxu0  ;;  %v9040_v9 = vor.u32 %v9039_v48, %v9036_v19 }
 0x273   :  { %15322 = vst [vmem:[#allocation7_spill] sm:$0xff] %v14105_v2  ;;  %v14107_v36 = vpop.f32.mrb[155].mxu1  ;;  %v9047_v41 = vrot.slane %v9045_v57, 5  ;;  %v9059_v16 = vshrl.u32 %v8942_v12, 16  ;;  %v9062_v22 = vshll.u32 %v8942_v12, 16  ;;  %v4779_v46 = vld [vmem:[#allocation3 + $0x110] sm:$0xff] }
 0x274   :  { %15323 = vst [vmem:[#allocation23_spill] sm:$0xff] %v14107_v36  ;;  %v4777_v61 = vld [vmem:[#allocation3 + $0x100] sm:$0xff]  ;;  %v4780_v30 = vld [vmem:[#allocation3 + $0x118] sm:$0xff]  ;;  %v14109_v10 = vpop.f32.mrb[149].mxu0  ;;  %v8268_v52 = vsel %vm1872_vm5, %v8266_v28, %v8267_v49  ;;  %v9053_v5 = vrot.slane %v9051_v40, 4  ;;  %v9056_v37 = vrot.slane %v9054_v59, 5 }
 0x275   :  { %v8943_v21 = vld [vmem:[#allocation2 + $0x60] sm:$0xf0]  ;;  %15324 = vst [vmem:[#allocation24_spill] sm:$0xff] %v14109_v10  ;;  %v8269_v47 = vrot.slane %v8136_v11, 4  ;;  %v8944_v42 = vld [vmem:[#allocation2 + $0x68] sm:$0x1f]  ;;  %v9048_v2 = vor.u32 %v9047_v41, %v9044_v1  ;;  %11976 = vmatprep.mubr.msk.bf16.mxu1 %vm18_vm1, %v8268_v52  ;;  %v4841_v11 = vadd.f32 %v4777_v61, %v13889_v24  ;;  %v4844_v59 = vadd.f32 %v13894_v15, %v4780_v30 }
 0x276   :  { %v14112_v6 = vpop.f32.mrb[150].mxu0  ;;  %v9061_v19 = vrot.slane %v9059_v16, 4  ;;  %v9064_v48 = vrot.slane %v9062_v22, 5  ;;  %v8270_v12 = vrot.slane %v8137_v51, 4  ;;  %v8138_v57 = vld [vmem:[#allocation2 + $0x80] sm:$0xf0]  ;;  %v9057_v13 = vor.u32 %v9056_v37, %v9053_v5 }
 0x277   :  { %v8139_v36 = vld [vmem:[#allocation2 + $0x88] sm:$0xf]  ;;  %v14115_v50 = vpop.f32.mrb[151].mxu0  ;;  %v5580_v10 = vld [vmem:[#allocation3 + $0xf0] sm:$0xff]  ;;  %v15326_v7 = vld [vmem:[#allocation8_spill] sm:$0xff]  ;;  %v9049_v1 = vsel %vm2619_vm6, %v9040_v9, %v9048_v2  ;;  %v14123_v5 = vpop.f32.mrb[156].mxu1 }
 0x278   :  { %15325 = vst [vmem:[#allocation25_spill] sm:$0xff] %v14115_v50  ;;  %v4843_v28 = vadd.f32 %v15326_v7, %v4779_v46  ;;  %v5578_v49 = vld [vmem:[#allocation3 + $0xe0] sm:$0xff]  ;;  %v5581_v40 = vld [vmem:[#allocation3 + $0xf8] sm:$0xff]  ;;  %v9065_v41 = vor.u32 %v9064_v48, %v9061_v19  ;;  %v8271_v16 = vsel %vm1872_vm5, %v8269_v47, %v8270_v12  ;;  %v5644_v51 = vadd.f32 %v13900_v54, %v5580_v10  ;;  %v4778_v22 = vld [vmem:[#allocation3 + $0x108] sm:$0xff]  ;;  %v14133_v46 = vpop.f32.mrb[157].mxu1  ;;  %v14144_v48 = vpop.f32.mrb[152].mxu0 }
 0x279   :  { %v8945_v52 = vld [vmem:[#allocation2 + $0x70] sm:$0xf0]  ;;  %v8946_v50 = vld [vmem:[#allocation2 + $0x78] sm:$0x1f]  ;;  %12038 = vmatprep.mubr.msk.bf16.mxu0 %vm18_vm1, %v9049_v1  ;;  %11977 = vmatmul.mubr.msk.bf16.gmra.mrb[232].mxu1 %vm18_vm1, %v8271_v16  ;;  %v5642_v24 = vadd.f32 %v5578_v49, %v13910_v44  ;;  %4905 = vst.msk [vmem:[#allocation3 + $0x100] sm:$0xff] %vm1481_vm7, %v4841_v11  ;;  %v5645_v15 = vadd.f32 %v13914_v55, %v5581_v40  ;;  %4908 = vst.msk [vmem:[#allocation3 + $0x118] sm:$0xff] %vm1481_vm7, %v4844_v59 }
 0x27a   :  { %4907 = vst.msk [vmem:[#allocation3 + $0x110] sm:$0xff] %vm1481_vm7, %v4843_v28  ;;  %v5579_v54 = vld [vmem:[#allocation3 + $0xe8] sm:$0xff]  ;;  %v4842_v7 = vadd.f32 %v4778_v22, %v13902_v32  ;;  %v9068_v2 = vshrl.u32 %v8943_v21, 16  ;;  %v8140_v9 = vld [vmem:[#allocation2 + $0x90] sm:$0xf0]  ;;  %v9066_v61 = vsel %vm2619_vm6, %v9057_v13, %v9065_v41  ;;  %5708 = vst.msk [vmem:[#allocation3 + $0xf0] sm:$0xff] %vm1481_vm7, %v5644_v51 }
 0x27b   :  { %v5643_v30 = vadd.f32 %v5579_v54, %v13920_v25  ;;  %v9071_v44 = vshll.u32 %v8943_v21, 16  ;;  %v9076_v10 = vshrl.u32 %v8944_v42, 16  ;;  %v8141_v37 = vld [vmem:[#allocation2 + $0x98] sm:$0xf]  ;;  %v14138_v47 = vpop.f32.mrb[158].mxu1  ;;  %12039 = vmatmul.mubr.msk.bf16.gmra.mrb[228].mxu0 %vm18_vm1, %v9066_v61  ;;  %5706 = vst.msk [vmem:[#allocation3 + $0xe0] sm:$0xff] %vm1481_vm7, %v5642_v24 }
 0x27c   :  { %5709 = vst.msk [vmem:[#allocation3 + $0xf8] sm:$0xff] %vm1481_vm7, %v5645_v15  ;;  %4906 = vst.msk [vmem:[#allocation3 + $0x108] sm:$0xff] %vm1481_vm7, %v4842_v7  ;;  %v9070_v32 = vrot.slane %v9068_v2, 4  ;;  %v9079_v55 = vshll.u32 %v8944_v42, 16  ;;  %v8272_v13 = vrot.slane %v8138_v57, 4  ;;  %v8273_v19 = vrot.slane %v8139_v36, 4 }
 0x27d   :  { %v14146_v25 = vpop.f32.mrb[159].mxu1  ;;  %5707 = vst.msk [vmem:[#allocation3 + $0xe8] sm:$0xff] %vm1481_vm7, %v5643_v30  ;;  %v9073_v21 = vrot.slane %v9071_v44, 5  ;;  %v9078_v12 = vrot.slane %v9076_v10, 4  ;;  %v9085_v28 = vshrl.u32 %v8945_v52, 16  ;;  %v9088_v49 = vshll.u32 %v8945_v52, 16 }
 0x27e   :  { %15327 = vst [vmem:[#allocation8_spill] sm:$0xff] %v14146_v25  ;;  %v14149_v11 = vpop.f32.mrb[153].mxu0  ;;  %v9081_v40 = vrot.slane %v9079_v55, 5  ;;  %v8274_v59 = vsel %vm1872_vm5, %v8272_v13, %v8273_v19  ;;  %v9093_v1 = vshrl.u32 %v8946_v50, 16  ;;  %v9096_v41 = vshll.u32 %v8946_v50, 16  ;;  %v4783_v42 = vld [vmem:[#allocation3 + $0x130] sm:$0xff] }
 0x27f   :  { %v4781_v57 = vld [vmem:[#allocation3 + $0x120] sm:$0xff]  ;;  %v14152_v16 = vpop.f32.mrb[154].mxu0  ;;  %v9074_v51 = vor.u32 %v9073_v21, %v9070_v32  ;;  %11980 = vmatprep.mubr.msk.bf16.mxu1 %vm18_vm1, %v8274_v59  ;;  %v9087_v22 = vrot.slane %v9085_v28, 4  ;;  %v9090_v24 = vrot.slane %v9088_v49, 5  ;;  %v8275_v15 = vrot.slane %v8140_v9, 4  ;;  %v4784_v44 = vld [vmem:[#allocation3 + $0x138] sm:$0xff] }
 0x280   :  { %v8947_v36 = vld [vmem:[#allocation2 + $0x80] sm:$0xf0]  ;;  %15328 = vst [vmem:[#allocation26_spill] sm:$0xff] %v14152_v16  ;;  %v8948_v54 = vld [vmem:[#allocation2 + $0x88] sm:$0x1f]  ;;  %v14155_v52 = vpop.f32.mrb[155].mxu0  ;;  %v9082_v7 = vor.u32 %v9081_v40, %v9078_v12  ;;  %v4847_v19 = vadd.f32 %v13923_v17, %v4783_v42 }
 0x281   :  { %15329 = vst [vmem:[#allocation27_spill] sm:$0xff] %v14155_v52  ;;  %v9095_v2 = vrot.slane %v9093_v1, 4  ;;  %v9098_v61 = vrot.slane %v9096_v41, 5  ;;  %v8276_v30 = vrot.slane %v8141_v37, 4  ;;  %v8142_v50 = vld [vmem:[#allocation2 + $0xa0] sm:$0xf0]  ;;  %v9091_v55 = vor.u32 %v9090_v24, %v9087_v22 }
 0x282   :  { %v8143_v10 = vld [vmem:[#allocation2 + $0xa8] sm:$0xf]  ;;  %v5584_v13 = vld [vmem:[#allocation3 + $0x110] sm:$0xff]  ;;  %v5582_v32 = vld [vmem:[#allocation3 + $0x100] sm:$0xff]  ;;  %v14160_v25 = vpop.f32.mrb[160].mxu1  ;;  %v9083_v12 = vsel %vm2619_vm6, %v9074_v51, %v9082_v7  ;;  %4911 = vst.msk [vmem:[#allocation3 + $0x130] sm:$0xff] %vm1481_vm7, %v4847_v19 }
 0x283   :  { %v15330_v21 = vld [vmem:[#allocation9_spill] sm:$0xff]  ;;  %v5585_v28 = vld [vmem:[#allocation3 + $0x118] sm:$0xff]  ;;  %v15331_v49 = vld [vmem:[#allocation10_spill] sm:$0xff]  ;;  %v9099_v40 = vor.u32 %v9098_v61, %v9095_v2  ;;  %v8277_v37 = vsel %vm1872_vm5, %v8275_v15, %v8276_v30  ;;  %v14165_v16 = vpop.f32.mrb[161].mxu1  ;;  %12042 = vmatprep.mubr.msk.bf16.mxu0 %vm18_vm1, %v9083_v12  ;;  %v5646_v17 = vadd.f32 %v5582_v32, %v13935_v14  ;;  %v9102_v2 = vshrl.u32 %v8947_v36, 16 }
 0x284   :  { %v4845_v59 = vadd.f32 %v4781_v57, %v15330_v21  ;;  %v4848_v9 = vadd.f32 %v15331_v49, %v4784_v44  ;;  %v15332_v1 = vld [vmem:[#allocation11_spill] sm:$0xff]  ;;  %v4782_v52 = vld [vmem:[#allocation3 + $0x128] sm:$0xff]  ;;  %v8949_v22 = vld [vmem:[#allocation2 + $0x90] sm:$0xf0]  ;;  %11981 = vmatmul.mubr.msk.bf16.gmra.mrb[236].mxu1 %vm18_vm1, %v8277_v37  ;;  %v14175_v30 = vpop.f32.mrb[162].mxu1  ;;  %v9105_v14 = vshll.u32 %v8947_v36, 16 }
 0x285   :  { %v5648_v41 = vadd.f32 %v15332_v1, %v5584_v13  ;;  %v8950_v24 = vld [vmem:[#allocation2 + $0x98] sm:$0x1f]  ;;  %v15333_v42 = vld [vmem:[#allocation13_spill] sm:$0xff]  ;;  %v15334_v15 = vld [vmem:[#allocation12_spill] sm:$0xff]  ;;  %v9100_v44 = vsel %vm2619_vm6, %v9091_v55, %v9099_v40  ;;  %v9110_v19 = vshrl.u32 %v8948_v54, 16  ;;  %v14180_v21 = vpop.f32.mrb[156].mxu0 }
 0x286   :  { %4909 = vst.msk [vmem:[#allocation3 + $0x120] sm:$0xff] %vm1481_vm7, %v4845_v59  ;;  %v5649_v57 = vadd.f32 %v15333_v42, %v5585_v28  ;;  %4912 = vst.msk [vmem:[#allocation3 + $0x138] sm:$0xff] %vm1481_vm7, %v4848_v9  ;;  %v5583_v51 = vld [vmem:[#allocation3 + $0x108] sm:$0xff]  ;;  %v4846_v7 = vadd.f32 %v4782_v52, %v15334_v15  ;;  %v8144_v61 = vld [vmem:[#allocation2 + $0xb0] sm:$0xf0]  ;;  %v14182_v59 = vpop.f32.mrb[163].mxu1  ;;  %12043 = vmatmul.mubr.msk.bf16.gmra.mrb[232].mxu0 %vm18_vm1, %v9100_v44 }
 0x287   :  { %5712 = vst.msk [vmem:[#allocation3 + $0x110] sm:$0xff] %vm1481_vm7, %v5648_v41  ;;  %v5647_v13 = vadd.f32 %v5583_v51, %v13941_v33  ;;  %v8145_v32 = vld [vmem:[#allocation2 + $0xb8] sm:$0xf]  ;;  %15335 = vst [vmem:[#allocation9_spill] sm:$0xff] %v14182_v59  ;;  %v9104_v52 = vrot.slane %v9102_v2, 4  ;;  %v9113_v55 = vshll.u32 %v8948_v54, 16 }
 0x288   :  { %5710 = vst.msk [vmem:[#allocation3 + $0x100] sm:$0xff] %vm1481_vm7, %v5646_v17  ;;  %5713 = vst.msk [vmem:[#allocation3 + $0x118] sm:$0xff] %vm1481_vm7, %v5649_v57  ;;  %v8278_v28 = vrot.slane %v8142_v50, 4  ;;  %v8279_v49 = vrot.slane %v8143_v10, 4  ;;  %v14188_v33 = vpop.f32.mrb[157].mxu0  ;;  %v9107_v36 = vrot.slane %v9105_v14, 5 }
 0x289   :  { %4910 = vst.msk [vmem:[#allocation3 + $0x128] sm:$0xff] %vm1481_vm7, %v4846_v7  ;;  %5711 = vst.msk [vmem:[#allocation3 + $0x108] sm:$0xff] %vm1481_vm7, %v5647_v13  ;;  %v9112_v9 = vrot.slane %v9110_v19, 4  ;;  %v9119_v12 = vshrl.u32 %v8949_v22, 16  ;;  %v9122_v40 = vshll.u32 %v8949_v22, 16  ;;  %v14191_v37 = vpop.f32.mrb[158].mxu0 }
 0x28a   :  { %15336 = vst [vmem:[#allocation10_spill] sm:$0xff] %v14191_v37  ;;  %v9115_v1 = vrot.slane %v9113_v55, 5  ;;  %v8280_v41 = vsel %vm1872_vm5, %v8278_v28, %v8279_v49  ;;  %v9127_v17 = vshrl.u32 %v8950_v24, 16  ;;  %v9130_v42 = vshll.u32 %v8950_v24, 16  ;;  %v4787_v57 = vld [vmem:[#allocation3 + $0x150] sm:$0xff]  ;;  %v4785_v51 = vld [vmem:[#allocation3 + $0x140] sm:$0xff] }
 0x28b   :  { %v8951_v54 = vld [vmem:[#allocation2 + $0xa0] sm:$0xf0]  ;;  %v14194_v50 = vpop.f32.mrb[159].mxu0  ;;  %v9108_v10 = vor.u32 %v9107_v36, %v9104_v52  ;;  %11984 = vmatprep.mubr.msk.bf16.mxu1 %vm18_vm1, %v8280_v41  ;;  %v9121_v15 = vrot.slane %v9119_v12, 4  ;;  %v9124_v7 = vrot.slane %v9122_v40, 5  ;;  %v8281_v2 = vrot.slane %v8144_v61, 4 }
 0x28c   :  { %15337 = vst [vmem:[#allocation11_spill] sm:$0xff] %v14194_v50  ;;  %v4788_v44 = vld [vmem:[#allocation3 + $0x158] sm:$0xff]  ;;  %v8952_v22 = vld [vmem:[#allocation2 + $0xa8] sm:$0x1f]  ;;  %v9116_v13 = vor.u32 %v9115_v1, %v9112_v9  ;;  %v9129_v14 = vrot.slane %v9127_v17, 4  ;;  %v9132_v19 = vrot.slane %v9130_v42, 5  ;;  %v4851_v50 = vadd.f32 %v13950_v39, %v4787_v57 }
 0x28d   :  { %v8282_v55 = vrot.slane %v8145_v32, 4  ;;  %v8146_v28 = vld [vmem:[#allocation2 + $0xc0] sm:$0xf0]  ;;  %v8147_v49 = vld [vmem:[#allocation2 + $0xc8] sm:$0xf]  ;;  %v14197_v24 = vpop.f32.mrb[164].mxu1  ;;  %v9125_v59 = vor.u32 %v9124_v7, %v9121_v15  ;;  %v4849_v36 = vadd.f32 %v4785_v51, %v13958_v8  ;;  %v4852_v61 = vadd.f32 %v13962_v60, %v4788_v44 }
 0x28e   :  { %v5588_v37 = vld [vmem:[#allocation3 + $0x130] sm:$0xff]  ;;  %v5586_v52 = vld [vmem:[#allocation3 + $0x120] sm:$0xff]  ;;  %v5589_v12 = vld [vmem:[#allocation3 + $0x138] sm:$0xff]  ;;  %v14202_v40 = vpop.f32.mrb[165].mxu1  ;;  %v9117_v9 = vsel %vm2619_vm6, %v9108_v10, %v9116_v13  ;;  %v9133_v1 = vor.u32 %v9132_v19, %v9129_v14  ;;  %4915 = vst.msk [vmem:[#allocation3 + $0x150] sm:$0xff] %vm1481_vm7, %v4851_v50  ;;  %v9136_v57 = vshrl.u32 %v8951_v54, 16 }
 0x28f   :  { %v8283_v32 = vsel %vm1872_vm5, %v8281_v2, %v8282_v55  ;;  %v5652_v41 = vadd.f32 %v13968_v56, %v5588_v37  ;;  %v4786_v17 = vld [vmem:[#allocation3 + $0x148] sm:$0xff]  ;;  %v8953_v42 = vld [vmem:[#allocation2 + $0xb0] sm:$0xf0]  ;;  %v8954_v15 = vld [vmem:[#allocation2 + $0xb8] sm:$0x1f]  ;;  %v14207_v7 = vpop.f32.mrb[166].mxu1  ;;  %12046 = vmatprep.mubr.msk.bf16.mxu0 %vm18_vm1, %v9117_v9  ;;  %v5650_v39 = vadd.f32 %v5586_v52, %v13973_v0  ;;  %v5653_v8 = vadd.f32 %v13975_v35, %v5589_v12 }
 0x290   :  { %11985 = vmatmul.mubr.msk.bf16.gmra.mrb[240].mxu1 %vm18_vm1, %v8283_v32  ;;  %4913 = vst.msk [vmem:[#allocation3 + $0x140] sm:$0xff] %vm1481_vm7, %v4849_v36  ;;  %4916 = vst.msk [vmem:[#allocation3 + $0x158] sm:$0xff] %vm1481_vm7, %v4852_v61  ;;  %v5587_v60 = vld [vmem:[#allocation3 + $0x128] sm:$0xff]  ;;  %v15338_v56 = vld [vmem:[#allocation14_spill] sm:$0xff]  ;;  %v14217_v10 = vpop.f32.mrb[160].mxu0  ;;  %v14219_v2 = vpop.f32.mrb[167].mxu1  ;;  %v9134_v44 = vsel %vm2619_vm6, %v9125_v59, %v9133_v1 }
 0x291   :  { %v4850_v37 = vadd.f32 %v4786_v17, %v15338_v56  ;;  %v8148_v51 = vld [vmem:[#allocation2 + $0xd0] sm:$0xf0]  ;;  %15339 = vst [vmem:[#allocation13_spill] sm:$0xff] %v14219_v2  ;;  %5716 = vst.msk [vmem:[#allocation3 + $0x130] sm:$0xff] %vm1481_vm7, %v5652_v41  ;;  %v15340_v0 = vld [vmem:[#allocation15_spill] sm:$0xff]  ;;  %v9139_v13 = vshll.u32 %v8951_v54, 16  ;;  %12047 = vmatmul.mubr.msk.bf16.gmra.mrb[236].mxu0 %vm18_vm1, %v9134_v44 }
 0x292   :  { %v5651_v50 = vadd.f32 %v5587_v60, %v15340_v0  ;;  %v9144_v14 = vshrl.u32 %v8952_v22, 16  ;;  %v8149_v35 = vld [vmem:[#allocation2 + $0xd8] sm:$0xf]  ;;  %v14224_v19 = vpop.f32.mrb[161].mxu0  ;;  %5714 = vst.msk [vmem:[#allocation3 + $0x120] sm:$0xff] %vm1481_vm7, %v5650_v39  ;;  %5717 = vst.msk [vmem:[#allocation3 + $0x138] sm:$0xff] %vm1481_vm7, %v5653_v8 }
 0x293   :  { %15341 = vst [vmem:[#allocation12_spill] sm:$0xff] %v14224_v19  ;;  %4914 = vst.msk [vmem:[#allocation3 + $0x148] sm:$0xff] %vm1481_vm7, %v4850_v37  ;;  %v9138_v55 = vrot.slane %v9136_v57, 4  ;;  %v9147_v52 = vshll.u32 %v8952_v22, 16  ;;  %v8284_v59 = vrot.slane %v8146_v28, 4  ;;  %v8285_v36 = vrot.slane %v8147_v49, 4 }
 0x294   :  { %v14230_v12 = vpop.f32.mrb[162].mxu0  ;;  %5715 = vst.msk [vmem:[#allocation3 + $0x128] sm:$0xff] %vm1481_vm7, %v5651_v50  ;;  %v9141_v54 = vrot.slane %v9139_v13, 5  ;;  %v9146_v61 = vrot.slane %v9144_v14, 4  ;;  %v9153_v9 = vshrl.u32 %v8953_v42, 16  ;;  %v9156_v1 = vshll.u32 %v8953_v42, 16 }
 0x295   :  { %15342 = vst [vmem:[#allocation14_spill] sm:$0xff] %v14230_v12  ;;  %v14233_v32 = vpop.f32.mrb[163].mxu0  ;;  %v9149_v41 = vrot.slane %v9147_v52, 5  ;;  %v8286_v17 = vsel %vm1872_vm5, %v8284_v59, %v8285_v36  ;;  %v9161_v39 = vshrl.u32 %v8954_v15, 16  ;;  %v9164_v8 = vshll.u32 %v8954_v15, 16  ;;  %v4791_v60 = vld [vmem:[#allocation3 + $0x170] sm:$0xff] }
 0x296   :  { %15343 = vst [vmem:[#allocation15_spill] sm:$0xff] %v14233_v32  ;;  %v4789_v56 = vld [vmem:[#allocation3 + $0x160] sm:$0xff]  ;;  %v4792_v22 = vld [vmem:[#allocation3 + $0x178] sm:$0xff]  ;;  %v9142_v49 = vor.u32 %v9141_v54, %v9138_v55  ;;  %11988 = vmatprep.mubr.msk.bf16.mxu1 %vm18_vm1, %v8286_v17  ;;  %v9155_v37 = vrot.slane %v9153_v9, 4  ;;  %v9158_v57 = vrot.slane %v9156_v1, 5  ;;  %v8287_v44 = vrot.slane %v8148_v51, 4 }
 0x297   :  { %v8955_v28 = vld [vmem:[#allocation2 + $0xc0] sm:$0xf0]  ;;  %v8956_v0 = vld [vmem:[#allocation2 + $0xc8] sm:$0x1f]  ;;  %v14237_v50 = vpop.f32.mrb[168].mxu1  ;;  %v9150_v42 = vor.u32 %v9149_v41, %v9146_v61  ;;  %v9163_v13 = vrot.slane %v9161_v39, 4  ;;  %v4853_v9 = vadd.f32 %v4789_v56, %v13983_v62 }
 0x298   :  { %v9166_v14 = vrot.slane %v9164_v8, 5  ;;  %v8288_v52 = vrot.slane %v8149_v35, 4  ;;  %v4790_v59 = vld [vmem:[#allocation3 + $0x168] sm:$0xff]  ;;  %v8150_v36 = vld [vmem:[#allocation2 + $0xe0] sm:$0xf0]  ;;  %v14239_v15 = vpop.f32.mrb[169].mxu1  ;;  %v9159_v32 = vor.u32 %v9158_v57, %v9155_v37 }
 0x299   :  { %v5592_v2 = vld [vmem:[#allocation3 + $0x150] sm:$0xff]  ;;  %v15344_v12 = vld [vmem:[#allocation16_spill] sm:$0xff]  ;;  %v5593_v1 = vld [vmem:[#allocation3 + $0x158] sm:$0xff]  ;;  %v14244_v19 = vpop.f32.mrb[170].mxu1  ;;  %v9151_v61 = vsel %vm2619_vm6, %v9142_v49, %v9150_v42  ;;  %v14249_v57 = vpop.f32.mrb[164].mxu0  ;;  %4917 = vst.msk [vmem:[#allocation3 + $0x160] sm:$0xff] %vm1481_vm7, %v4853_v9 }
 0x29a   :  { %v4855_v55 = vadd.f32 %v15344_v12, %v4791_v60  ;;  %v5590_v54 = vld [vmem:[#allocation3 + $0x140] sm:$0xff]  ;;  %v15345_v51 = vld [vmem:[#allocation17_spill] sm:$0xff]  ;;  %v9167_v41 = vor.u32 %v9166_v14, %v9163_v13  ;;  %v8289_v35 = vsel %vm1872_vm5, %v8287_v44, %v8288_v52  ;;  %v5656_v39 = vadd.f32 %v13989_v43, %v5592_v2  ;;  %v8957_v37 = vld [vmem:[#allocation2 + $0xd0] sm:$0xf0]  ;;  %v14251_v12 = vpop.f32.mrb[171].mxu1  ;;  %12050 = vmatprep.mubr.msk.bf16.mxu0 %vm18_vm1, %v9151_v61  ;;  %v14261_v49 = vpop.f32.mrb[165].mxu0 }
 0x29b   :  { %v4856_v17 = vadd.f32 %v15345_v51, %v4792_v22  ;;  %v8151_v8 = vld [vmem:[#allocation2 + $0xe8] sm:$0xf]  ;;  %11989 = vmatmul.mubr.msk.bf16.gmra.mrb[244].mxu1 %vm18_vm1, %v8289_v35  ;;  %v5654_v62 = vadd.f32 %v5590_v54, %v13996_v3  ;;  %v5657_v60 = vadd.f32 %v14002_v18, %v5593_v1  ;;  %v4854_v2 = vadd.f32 %v4790_v59, %v13991_v34  ;;  %v8958_v22 = vld [vmem:[#allocation2 + $0xd8] sm:$0x1f]  ;;  %v8152_v14 = vld [vmem:[#allocation2 + $0xf0] sm:$0xf0] }
 0x29c   :  { %4919 = vst.msk [vmem:[#allocation3 + $0x170] sm:$0xff] %vm1481_vm7, %v4855_v55  ;;  %v5591_v43 = vld [vmem:[#allocation3 + $0x148] sm:$0xff]  ;;  %v9170_v56 = vshrl.u32 %v8955_v28, 16  ;;  %v9168_v44 = vsel %vm2619_vm6, %v9159_v32, %v9167_v41  ;;  %5720 = vst.msk [vmem:[#allocation3 + $0x150] sm:$0xff] %vm1481_vm7, %v5656_v39  ;;  %v9173_v3 = vshll.u32 %v8955_v28, 16  ;;  %v9178_v13 = vshrl.u32 %v8956_v0, 16 }
 0x29d   :  { %4920 = vst.msk [vmem:[#allocation3 + $0x178] sm:$0xff] %vm1481_vm7, %v4856_v17  ;;  %v5655_v42 = vadd.f32 %v5591_v43, %v14010_v27  ;;  %v14266_v52 = vpop.f32.mrb[166].mxu0  ;;  %12051 = vmatmul.mubr.msk.bf16.gmra.mrb[240].mxu0 %vm18_vm1, %v9168_v44  ;;  %5718 = vst.msk [vmem:[#allocation3 + $0x140] sm:$0xff] %vm1481_vm7, %v5654_v62  ;;  %v9181_v18 = vshll.u32 %v8956_v0, 16  ;;  %v8290_v32 = vrot.slane %v8150_v36, 4  ;;  %v8291_v59 = vrot.slane %v8151_v8, 4 }
 0x29e   :  { %5721 = vst.msk [vmem:[#allocation3 + $0x158] sm:$0xff] %vm1481_vm7, %v5657_v60  ;;  %4918 = vst.msk [vmem:[#allocation3 + $0x168] sm:$0xff] %vm1481_vm7, %v4854_v2  ;;  %v9172_v34 = vrot.slane %v9170_v56, 4  ;;  %v14272_v55 = vpop.f32.mrb[167].mxu0  ;;  %v9175_v27 = vrot.slane %v9173_v3, 5  ;;  %v9180_v28 = vrot.slane %v9178_v13, 4 }
 0x29f   :  { %5719 = vst.msk [vmem:[#allocation3 + $0x148] sm:$0xff] %vm1481_vm7, %v5655_v42  ;;  %v9187_v54 = vshrl.u32 %v8957_v37, 16  ;;  %v9190_v9 = vshll.u32 %v8957_v37, 16  ;;  %v8153_v1 = vld [vmem:[#allocation2 + $0xf8] sm:$0xf]  ;;  %v9183_v51 = vrot.slane %v9181_v18, 5  ;;  %v8292_v17 = vsel %vm1872_vm5, %v8290_v32, %v8291_v59 }
 0x2a0   :  { %v9195_v61 = vshrl.u32 %v8958_v22, 16  ;;  %v9198_v41 = vshll.u32 %v8958_v22, 16  ;;  %v4795_v35 = vld [vmem:[#allocation3 + $0x190] sm:$0xff]  ;;  %v4793_v39 = vld [vmem:[#allocation3 + $0x180] sm:$0xff]  ;;  %v4796_v62 = vld [vmem:[#allocation3 + $0x198] sm:$0xff]  ;;  %v14276_v0 = vpop.f32.mrb[172].mxu1  ;;  %v9176_v36 = vor.u32 %v9175_v27, %v9172_v34  ;;  %11992 = vmatprep.mubr.msk.bf16.mxu1 %vm18_vm1, %v8292_v17 }
 0x2a1   :  { %15346 = vst [vmem:[#allocation16_spill] sm:$0xff] %v14276_v0  ;;  %v9189_v8 = vrot.slane %v9187_v54, 4  ;;  %v9192_v60 = vrot.slane %v9190_v9, 5  ;;  %v8293_v43 = vrot.slane %v8152_v14, 4  ;;  %v8959_v2 = vld [vmem:[#allocation2 + $0xe0] sm:$0xf0]  ;;  %v9184_v37 = vor.u32 %v9183_v51, %v9180_v28 }
 0x2a2   :  { %v14279_v56 = vpop.f32.mrb[173].mxu1  ;;  %v9197_v44 = vrot.slane %v9195_v61, 4  ;;  %v9200_v42 = vrot.slane %v9198_v41, 5  ;;  %v8294_v3 = vrot.slane %v8153_v1, 4  ;;  %v8960_v13 = vld [vmem:[#allocation2 + $0xe8] sm:$0x1f]  ;;  %v4860_v14 = vadd.f32 %v14023_v53, %v4796_v62 }
 0x2a3   :  { %15347 = vst [vmem:[#allocation17_spill] sm:$0xff] %v14279_v56  ;;  %v14281_v22 = vpop.f32.mrb[174].mxu1  ;;  %v9193_v18 = vor.u32 %v9192_v60, %v9189_v8  ;;  %v5596_v32 = vld [vmem:[#allocation3 + $0x170] sm:$0xff]  ;;  %v5594_v34 = vld [vmem:[#allocation3 + $0x160] sm:$0xff]  ;;  %v15349_v27 = vld [vmem:[#allocation19_spill] sm:$0xff]  ;;  %v14286_v9 = vpop.f32.mrb[168].mxu0  ;;  %v9185_v28 = vsel %vm2619_vm6, %v9176_v36, %v9184_v37 }
 0x2a4   :  { %v15348_v59 = vld [vmem:[#allocation18_spill] sm:$0xff]  ;;  %v4857_v17 = vadd.f32 %v4793_v39, %v15349_v27  ;;  %v5597_v54 = vld [vmem:[#allocation3 + $0x178] sm:$0xff]  ;;  %v14288_v56 = vpop.f32.mrb[175].mxu1  ;;  %v9201_v1 = vor.u32 %v9200_v42, %v9197_v44  ;;  %v8295_v51 = vsel %vm1872_vm5, %v8293_v43, %v8294_v3  ;;  %v5660_v61 = vadd.f32 %v14025_v38, %v5596_v32  ;;  %v4794_v41 = vld [vmem:[#allocation3 + $0x188] sm:$0xff]  ;;  %v14293_v60 = vpop.f32.mrb[169].mxu0  ;;  %12054 = vmatprep.mubr.msk.bf16.mxu0 %vm18_vm1, %v9185_v28 }
 0x2a5   :  { %v4859_v0 = vadd.f32 %v15348_v59, %v4795_v35  ;;  %v8154_v8 = vld [vmem:[#allocation2 + $0x100] sm:$0xf0]  ;;  %v8155_v35 = vld [vmem:[#allocation2 + $0x108] sm:$0xf]  ;;  %11993 = vmatmul.mubr.msk.bf16.gmra.mrb[248].mxu1 %vm18_vm1, %v8295_v51  ;;  %v5658_v53 = vadd.f32 %v5594_v34, %v14029_v23  ;;  %v5661_v39 = vadd.f32 %v14035_v45, %v5597_v54  ;;  %4924 = vst.msk [vmem:[#allocation3 + $0x198] sm:$0xff] %vm1481_vm7, %v4860_v14  ;;  %v9204_v43 = vshrl.u32 %v8959_v2, 16 }
 0x2a6   :  { %4921 = vst.msk [vmem:[#allocation3 + $0x180] sm:$0xff] %vm1481_vm7, %v4857_v17  ;;  %v5595_v38 = vld [vmem:[#allocation3 + $0x168] sm:$0xff]  ;;  %v15350_v62 = vld [vmem:[#allocation20_spill] sm:$0xff]  ;;  %v8961_v37 = vld [vmem:[#allocation2 + $0xf0] sm:$0xf0]  ;;  %v14303_v44 = vpop.f32.mrb[170].mxu0  ;;  %v9202_v42 = vsel %vm2619_vm6, %v9193_v18, %v9201_v1 }
 0x2a7   :  { %4923 = vst.msk [vmem:[#allocation3 + $0x190] sm:$0xff] %vm1481_vm7, %v4859_v0  ;;  %v4858_v36 = vadd.f32 %v4794_v41, %v15350_v62  ;;  %5724 = vst.msk [vmem:[#allocation3 + $0x170] sm:$0xff] %vm1481_vm7, %v5660_v61  ;;  %v5659_v0 = vadd.f32 %v5595_v38, %v14041_v20  ;;  %v9207_v23 = vshll.u32 %v8959_v2, 16  ;;  %v9212_v3 = vshrl.u32 %v8960_v13, 16  ;;  %v8962_v32 = vld [vmem:[#allocation2 + $0xf8] sm:$0x1f]  ;;  %12055 = vmatmul.mubr.msk.bf16.gmra.mrb[244].mxu0 %vm18_vm1, %v9202_v42 }
 0x2a8   :  { %v14308_v59 = vpop.f32.mrb[171].mxu0  ;;  %5722 = vst.msk [vmem:[#allocation3 + $0x160] sm:$0xff] %vm1481_vm7, %v5658_v53  ;;  %5725 = vst.msk [vmem:[#allocation3 + $0x178] sm:$0xff] %vm1481_vm7, %v5661_v39  ;;  %v9206_v45 = vrot.slane %v9204_v43, 4  ;;  %v9215_v34 = vshll.u32 %v8960_v13, 16  ;;  %v8296_v18 = vrot.slane %v8154_v8, 4 }
 0x2a9   :  { %15351 = vst [vmem:[#allocation18_spill] sm:$0xff] %v14308_v59  ;;  %4922 = vst.msk [vmem:[#allocation3 + $0x188] sm:$0xff] %vm1481_vm7, %v4858_v36  ;;  %v8297_v27 = vrot.slane %v8155_v35, 4  ;;  %v8156_v17 = vld [vmem:[#allocation2 + $0x110] sm:$0xf0]  ;;  %v9209_v20 = vrot.slane %v9207_v23, 5 }
 0x2aa   :  { %5723 = vst.msk [vmem:[#allocation3 + $0x168] sm:$0xff] %vm1481_vm7, %v5659_v0  ;;  %v9214_v2 = vrot.slane %v9212_v3, 4  ;;  %v9221_v54 = vshrl.u32 %v8961_v37, 16  ;;  %v9224_v14 = vshll.u32 %v8961_v37, 16  ;;  %v8157_v28 = vld [vmem:[#allocation2 + $0x118] sm:$0xf] }
 0x2ab   :  { %v9217_v1 = vrot.slane %v9215_v34, 5  ;;  %v8298_v51 = vsel %vm1872_vm5, %v8296_v18, %v8297_v27  ;;  %v9229_v61 = vshrl.u32 %v8962_v32, 16  ;;  %v9232_v41 = vshll.u32 %v8962_v32, 16  ;;  %v4799_v53 = vld [vmem:[#allocation3 + $0x1b0] sm:$0xff]  ;;  %v4797_v39 = vld [vmem:[#allocation3 + $0x1a0] sm:$0xff]  ;;  %v4800_v36 = vld [vmem:[#allocation3 + $0x1b8] sm:$0xff] }
 0x2ac   :  { %v8963_v38 = vld [vmem:[#allocation2 + $0x100] sm:$0xf0]  ;;  %v9210_v62 = vor.u32 %v9209_v20, %v9206_v45  ;;  %11996 = vmatprep.mubr.msk.bf16.mxu1 %vm18_vm1, %v8298_v51  ;;  %v9223_v13 = vrot.slane %v9221_v54, 4  ;;  %v9226_v8 = vrot.slane %v9224_v14, 5  ;;  %v8299_v35 = vrot.slane %v8156_v17, 4  ;;  %v4798_v3 = vld [vmem:[#allocation3 + $0x1a8] sm:$0xff] }
 0x2ad   :  { %v8964_v43 = vld [vmem:[#allocation2 + $0x108] sm:$0x1f]  ;;  %v9218_v42 = vor.u32 %v9217_v1, %v9214_v2  ;;  %v9231_v0 = vrot.slane %v9229_v61, 4  ;;  %v9234_v37 = vrot.slane %v9232_v41, 5  ;;  %v8300_v23 = vrot.slane %v8157_v28, 4  ;;  %v14317_v18 = vpop.f32.mrb[172].mxu0 }
 0x2ae   :  { %v8158_v34 = vld [vmem:[#allocation2 + $0x140] sm:$0xf0]  ;;  %v9227_v32 = vor.u32 %v9226_v8, %v9223_v13  ;;  %v5600_v27 = vld [vmem:[#allocation3 + $0x190] sm:$0xff]  ;;  %v4863_v59 = vadd.f32 %v14052_v63, %v4799_v53  ;;  %v4861_v20 = vadd.f32 %v4797_v39, %v14059_v4  ;;  %v5601_v54 = vld [vmem:[#allocation3 + $0x198] sm:$0xff]  ;;  %v4864_v17 = vadd.f32 %v14063_v29, %v4800_v36  ;;  %v14322_v14 = vpop.f32.mrb[173].mxu0  ;;  %v14327_v13 = vpop.f32.mrb[176].mxu1 }
 0x2af   :  { %v5598_v45 = vld [vmem:[#allocation3 + $0x180] sm:$0xff]  ;;  %15352 = vst [vmem:[#allocation19_spill] sm:$0xff] %v14322_v14  ;;  %v9219_v2 = vsel %vm2619_vm6, %v9210_v62, %v9218_v42  ;;  %v9235_v1 = vor.u32 %v9234_v37, %v9231_v0  ;;  %v8301_v28 = vsel %vm1872_vm5, %v8299_v35, %v8300_v23  ;;  %v5664_v51 = vadd.f32 %v14065_v58, %v5600_v27  ;;  %v8159_v61 = vld [vmem:[#allocation2 + $0x148] sm:$0xf]  ;;  %v8965_v41 = vld [vmem:[#allocation2 + $0x110] sm:$0xf0] }
 0x2b0   :  { %v14329_v63 = vpop.f32.mrb[174].mxu0  ;;  %12058 = vmatprep.mubr.msk.bf16.mxu0 %vm18_vm1, %v9219_v2  ;;  %11997 = vmatmul.mubr.msk.bf16.gmra.mrb[252].mxu1 %vm18_vm1, %v8301_v28  ;;  %4927 = vst.msk [vmem:[#allocation3 + $0x1b0] sm:$0xff] %vm1481_vm7, %v4863_v59  ;;  %v5662_v4 = vadd.f32 %v5598_v45, %v14070_v26  ;;  %4925 = vst.msk [vmem:[#allocation3 + $0x1a0] sm:$0xff] %vm1481_vm7, %v4861_v20  ;;  %v5665_v29 = vadd.f32 %v14073_v31, %v5601_v54  ;;  %v5599_v58 = vld [vmem:[#allocation3 + $0x188] sm:$0xff]  ;;  %v9238_v62 = vshrl.u32 %v8963_v38, 16  ;;  %v14339_v35 = vpop.f32.mrb[177].mxu1 }
 0x2b1   :  { %15353 = vst [vmem:[#allocation20_spill] sm:$0xff] %v14329_v63  ;;  %4928 = vst.msk [vmem:[#allocation3 + $0x1b8] sm:$0xff] %vm1481_vm7, %v4864_v17  ;;  %v15354_v53 = vld [vmem:[#allocation21_spill] sm:$0xff]  ;;  %v8966_v8 = vld [vmem:[#allocation2 + $0x118] sm:$0x1f]  ;;  %v14341_v36 = vpop.f32.mrb[175].mxu0  ;;  %v9236_v42 = vsel %vm2619_vm6, %v9227_v32, %v9235_v1 }
 0x2b2   :  { %v4862_v39 = vadd.f32 %v4798_v3, %v15354_v53  ;;  %15355 = vst [vmem:[#allocation21_spill] sm:$0xff] %v14341_v36  ;;  %5728 = vst.msk [vmem:[#allocation3 + $0x190] sm:$0xff] %vm1481_vm7, %v5664_v51  ;;  %v15356_v26 = vld [vmem:[#allocation22_spill] sm:$0xff]  ;;  %v9241_v0 = vshll.u32 %v8963_v38, 16  ;;  %v9246_v37 = vshrl.u32 %v8964_v43, 16  ;;  %v14346_v23 = vpop.f32.mrb[178].mxu1  ;;  %12059 = vmatmul.mubr.msk.bf16.gmra.mrb[248].mxu0 %vm18_vm1, %v9236_v42 }
 0x2b3   :  { %v5663_v59 = vadd.f32 %v5599_v58, %v15356_v26  ;;  %v8160_v31 = vld [vmem:[#allocation2 + $0x150] sm:$0xf0]  ;;  %5726 = vst.msk [vmem:[#allocation3 + $0x180] sm:$0xff] %vm1481_vm7, %v5662_v4  ;;  %5729 = vst.msk [vmem:[#allocation3 + $0x198] sm:$0xff] %vm1481_vm7, %v5665_v29  ;;  %v9240_v3 = vrot.slane %v9238_v62, 4  ;;  %v9249_v27 = vshll.u32 %v8964_v43, 16 }
 0x2b4   :  { %4926 = vst.msk [vmem:[#allocation3 + $0x1a8] sm:$0xff] %vm1481_vm7, %v4862_v39  ;;  %v8302_v32 = vrot.slane %v8158_v34, 4  ;;  %v8303_v45 = vrot.slane %v8159_v61, 4  ;;  %v14352_v20 = vpop.f32.mrb[179].mxu1  ;;  %v9243_v38 = vrot.slane %v9241_v0, 5  ;;  %v9248_v54 = vrot.slane %v9246_v37, 4 }
 0x2b5   :  { %15357 = vst [vmem:[#allocation22_spill] sm:$0xff] %v14352_v20  ;;  %5727 = vst.msk [vmem:[#allocation3 + $0x188] sm:$0xff] %vm1481_vm7, %v5663_v59  ;;  %v9255_v17 = vshrl.u32 %v8965_v41, 16  ;;  %v9258_v2 = vshll.u32 %v8965_v41, 16  ;;  %v8161_v1 = vld [vmem:[#allocation2 + $0x158] sm:$0xf] }
 0x2b6   :  { %v9251_v28 = vrot.slane %v9249_v27, 5  ;;  %v8304_v51 = vsel %vm1872_vm5, %v8302_v32, %v8303_v45  ;;  %v9263_v4 = vshrl.u32 %v8966_v8, 16  ;;  %v9266_v29 = vshll.u32 %v8966_v8, 16  ;;  %v4803_v58 = vld [vmem:[#allocation3 + $0x1d0] sm:$0xff]  ;;  %v4801_v53 = vld [vmem:[#allocation3 + $0x1c0] sm:$0xff]  ;;  %v4804_v62 = vld [vmem:[#allocation3 + $0x1d8] sm:$0xff] }
 0x2b7   :  { %v9244_v39 = vor.u32 %v9243_v38, %v9240_v3  ;;  %12000 = vmatprep.mubr.msk.bf16.mxu1 %vm18_vm1, %v8304_v51  ;;  %v9257_v43 = vrot.slane %v9255_v17, 4  ;;  %v9260_v34 = vrot.slane %v9258_v2, 5  ;;  %v8305_v61 = vrot.slane %v8160_v31, 4  ;;  %v8967_v42 = vld [vmem:[#allocation2 + $0x140] sm:$0xf0]  ;;  %v4802_v37 = vld [vmem:[#allocation3 + $0x1c8] sm:$0xff] }
 0x2b8   :  { %v9252_v26 = vor.u32 %v9251_v28, %v9248_v54  ;;  %v9265_v59 = vrot.slane %v9263_v4, 4  ;;  %v9268_v0 = vrot.slane %v9266_v29, 5  ;;  %v8306_v41 = vrot.slane %v8161_v1, 4  ;;  %v8968_v27 = vld [vmem:[#allocation2 + $0x148] sm:$0x1f]  ;;  %v5604_v32 = vld [vmem:[#allocation3 + $0x1b0] sm:$0xff] }
 0x2b9   :  { %v9261_v36 = vor.u32 %v9260_v34, %v9257_v43  ;;  %v15358_v45 = vld [vmem:[#allocation5_spill] sm:$0xff]  ;;  %v5602_v20 = vld [vmem:[#allocation3 + $0x1a0] sm:$0xff]  ;;  %v5605_v38 = vld [vmem:[#allocation3 + $0x1b8] sm:$0xff] }
 0x2ba   :  { %v4867_v8 = vadd.f32 %v15358_v45, %v4803_v58  ;;  %v15359_v63 = vld [vmem:[#allocation4_spill] sm:$0xff]  ;;  %v15360_v51 = vld [vmem:[#allocation6_spill] sm:$0xff]  ;;  %v9253_v31 = vsel %vm2619_vm6, %v9244_v39, %v9252_v26  ;;  %v9269_v2 = vor.u32 %v9268_v0, %v9265_v59  ;;  %v8307_v54 = vsel %vm1872_vm5, %v8305_v61, %v8306_v41  ;;  %v15361_v28 = vld [vmem:[#allocation7_spill] sm:$0xff] }
 0x2bb   :  { %v4865_v3 = vadd.f32 %v4801_v53, %v15359_v63  ;;  %v4868_v17 = vadd.f32 %v15360_v51, %v4804_v62  ;;  %v5668_v4 = vadd.f32 %v15361_v28, %v5604_v32  ;;  %v8162_v1 = vld [vmem:[#allocation2 + $0x160] sm:$0xf0]  ;;  %v8163_v29 = vld [vmem:[#allocation2 + $0x168] sm:$0xf]  ;;  %v8969_v14 = vld [vmem:[#allocation2 + $0x150] sm:$0xf0]  ;;  %12062 = vmatprep.mubr.msk.bf16.mxu0 %vm18_vm1, %v9253_v31  ;;  %12001 = vmatmul.mubr.msk.bf16.gmra.mrb[0].mxu1 %vm18_vm1, %v8307_v54 }
 0x2bc   :  { %4931 = vst.msk [vmem:[#allocation3 + $0x1d0] sm:$0xff] %vm1481_vm7, %v4867_v8  ;;  %v15362_v63 = vld [vmem:[#allocation24_spill] sm:$0xff]  ;;  %v5669_v53 = vadd.f32 %v14112_v6, %v5605_v38  ;;  %v5603_v39 = vld [vmem:[#allocation3 + $0x1a8] sm:$0xff]  ;;  %v15363_v43 = vld [vmem:[#allocation23_spill] sm:$0xff]  ;;  %v9272_v61 = vshrl.u32 %v8967_v42, 16  ;;  %v9270_v59 = vsel %vm2619_vm6, %v9261_v36, %v9269_v2  ;;  %v9275_v32 = vshll.u32 %v8967_v42, 16 }
 0x2bd   :  { %v5666_v58 = vadd.f32 %v5602_v20, %v15362_v63  ;;  %4929 = vst.msk [vmem:[#allocation3 + $0x1c0] sm:$0xff] %vm1481_vm7, %v4865_v3  ;;  %4932 = vst.msk [vmem:[#allocation3 + $0x1d8] sm:$0xff] %vm1481_vm7, %v4868_v17  ;;  %v4866_v34 = vadd.f32 %v4802_v37, %v15363_v43  ;;  %v8970_v62 = vld [vmem:[#allocation2 + $0x158] sm:$0x1f]  ;;  %v8164_v26 = vld [vmem:[#allocation2 + $0x170] sm:$0xf0]  ;;  %12063 = vmatmul.mubr.msk.bf16.gmra.mrb[252].mxu0 %vm18_vm1, %v9270_v59 }
 0x2be   :  { %5732 = vst.msk [vmem:[#allocation3 + $0x1b0] sm:$0xff] %vm1481_vm7, %v5668_v4  ;;  %v15364_v0 = vld [vmem:[#allocation25_spill] sm:$0xff]  ;;  %v9280_v20 = vshrl.u32 %v8968_v27, 16  ;;  %v8165_v45 = vld [vmem:[#allocation2 + $0x178] sm:$0xf]  ;;  %v14374_v8 = vpop.f32.mrb[176].mxu0 }
 0x2bf   :  { %v5667_v41 = vadd.f32 %v5603_v39, %v15364_v0  ;;  %5730 = vst.msk [vmem:[#allocation3 + $0x1a0] sm:$0xff] %vm1481_vm7, %v5666_v58  ;;  %5733 = vst.msk [vmem:[#allocation3 + $0x1b8] sm:$0xff] %vm1481_vm7, %v5669_v53  ;;  %v9274_v6 = vrot.slane %v9272_v61, 4  ;;  %v9283_v37 = vshll.u32 %v8968_v27, 16  ;;  %v8308_v36 = vrot.slane %v8162_v1, 4  ;;  %v14380_v38 = vpop.f32.mrb[177].mxu0 }
 0x2c0   :  { %4930 = vst.msk [vmem:[#allocation3 + $0x1c8] sm:$0xff] %vm1481_vm7, %v4866_v34  ;;  %v8309_v3 = vrot.slane %v8163_v29, 4  ;;  %v9277_v42 = vrot.slane %v9275_v32, 5  ;;  %v9282_v51 = vrot.slane %v9280_v20, 4  ;;  %v9289_v17 = vshrl.u32 %v8969_v14, 16  ;;  %v14383_v2 = vpop.f32.mrb[178].mxu0 }
 0x2c1   :  { %5731 = vst.msk [vmem:[#allocation3 + $0x1a8] sm:$0xff] %vm1481_vm7, %v5667_v41  ;;  %v9292_v31 = vshll.u32 %v8969_v14, 16  ;;  %v9285_v54 = vrot.slane %v9283_v37, 5  ;;  %v9297_v4 = vshrl.u32 %v8970_v62, 16  ;;  %v9300_v63 = vshll.u32 %v8970_v62, 16  ;;  %v4807_v58 = vld [vmem:[#allocation3 + $0x1f0] sm:$0xff] }
 0x2c2   :  { %v8310_v28 = vsel %vm1872_vm5, %v8308_v36, %v8309_v3  ;;  %v4805_v53 = vld [vmem:[#allocation3 + $0x1e0] sm:$0xff]  ;;  %v4808_v27 = vld [vmem:[#allocation3 + $0x1f8] sm:$0xff]  ;;  %v14386_v1 = vpop.f32.mrb[180].mxu1  ;;  %v14388_v29 = vpop.f32.mrb[179].mxu0  ;;  %v9278_v39 = vor.u32 %v9277_v42, %v9274_v6  ;;  %v9291_v43 = vrot.slane %v9289_v17, 4  ;;  %v8311_v14 = vrot.slane %v8164_v26, 4 }
 0x2c3   :  { %15365 = vst [vmem:[#allocation5_spill] sm:$0xff] %v14388_v29  ;;  %12004 = vmatprep.mubr.msk.bf16.mxu1 %vm18_vm1, %v8310_v28  ;;  %v9294_v34 = vrot.slane %v9292_v31, 5  ;;  %v8971_v61 = vld [vmem:[#allocation2 + $0x160] sm:$0xf0]  ;;  %v14391_v59 = vpop.f32.mrb[181].mxu1  ;;  %v9286_v0 = vor.u32 %v9285_v54, %v9282_v51  ;;  %v9299_v41 = vrot.slane %v9297_v4, 4  ;;  %v4871_v29 = vadd.f32 %v14123_v5, %v4807_v58 }
 0x2c4   :  { %v9302_v32 = vrot.slane %v9300_v63, 5  ;;  %v8312_v62 = vrot.slane %v8165_v45, 4  ;;  %v8972_v20 = vld [vmem:[#allocation2 + $0x168] sm:$0x1f]  ;;  %v14393_v37 = vpop.f32.mrb[182].mxu1  ;;  %v5608_v3 = vld [vmem:[#allocation3 + $0x1d0] sm:$0xff]  ;;  %v4869_v42 = vadd.f32 %v4805_v53, %v14133_v46  ;;  %v4872_v26 = vadd.f32 %v14138_v47, %v4808_v27 }
 0x2c5   :  { %v9295_v36 = vor.u32 %v9294_v34, %v9291_v43  ;;  %v5606_v6 = vld [vmem:[#allocation3 + $0x1c0] sm:$0xff]  ;;  %v5609_v17 = vld [vmem:[#allocation3 + $0x1d8] sm:$0xff]  ;;  %v14398_v31 = vpop.f32.mrb[183].mxu1  ;;  %v9287_v51 = vsel %vm2619_vm6, %v9278_v39, %v9286_v0  ;;  %v5672_v28 = vadd.f32 %v14144_v48, %v5608_v3  ;;  %v4806_v4 = vld [vmem:[#allocation3 + $0x1e8] sm:$0xff]  ;;  %4935 = vst.msk [vmem:[#allocation3 + $0x1f0] sm:$0xff] %vm1481_vm7, %v4871_v29  ;;  %v9306_v27 = vshrl.u32 %v8971_v61, 16 }
 0x2c6   :  { %v9303_v54 = vor.u32 %v9302_v32, %v9299_v41  ;;  %v8313_v45 = vsel %vm1872_vm5, %v8311_v14, %v8312_v62  ;;  %v8166_v63 = vld [vmem:[#allocation2 + $0x180] sm:$0xf0]  ;;  %v8167_v43 = vld [vmem:[#allocation2 + $0x188] sm:$0xf]  ;;  %12066 = vmatprep.mubr.msk.bf16.mxu0 %vm18_vm1, %v9287_v51  ;;  %v5670_v5 = vadd.f32 %v5606_v6, %v14149_v11  ;;  %4933 = vst.msk [vmem:[#allocation3 + $0x1e0] sm:$0xff] %vm1481_vm7, %v4869_v42  ;;  %v15366_v46 = vld [vmem:[#allocation26_spill] sm:$0xff] }
 0x2c7   :  { %12005 = vmatmul.mubr.msk.bf16.gmra.mrb[4].mxu1 %vm18_vm1, %v8313_v45  ;;  %v5673_v47 = vadd.f32 %v15366_v46, %v5609_v17  ;;  %4936 = vst.msk [vmem:[#allocation3 + $0x1f8] sm:$0xff] %vm1481_vm7, %v4872_v26  ;;  %v5607_v58 = vld [vmem:[#allocation3 + $0x1c8] sm:$0xff]  ;;  %v15367_v53 = vld [vmem:[#allocation8_spill] sm:$0xff]  ;;  %v8973_v39 = vld [vmem:[#allocation2 + $0x170] sm:$0xf0]  ;;  %v9309_v29 = vshll.u32 %v8971_v61, 16 }
 0x2c8   :  { %v4870_v48 = vadd.f32 %v4806_v4, %v15367_v53  ;;  %v9304_v34 = vsel %vm2619_vm6, %v9295_v36, %v9303_v54  ;;  %5736 = vst.msk [vmem:[#allocation3 + $0x1d0] sm:$0xff] %vm1481_vm7, %v5672_v28  ;;  %v15368_v14 = vld [vmem:[#allocation27_spill] sm:$0xff]  ;;  %v9314_v41 = vshrl.u32 %v8972_v20, 16  ;;  %5734 = vst.msk [vmem:[#allocation3 + $0x1c0] sm:$0xff] %vm1481_vm7, %v5670_v5  ;;  %v9308_v32 = vrot.slane %v9306_v27, 4  ;;  %v6745_v5 = vld [vmem:[#allocation3 + $0x10] sm:$0xff] }
 0x2c9   :  { %v5671_v0 = vadd.f32 %v5607_v58, %v15368_v14  ;;  %v8974_v11 = vld [vmem:[#allocation2 + $0x178] sm:$0x1f]  ;;  %12067 = vmatmul.mubr.msk.bf16.gmra.mrb[0].mxu0 %vm18_vm1, %v9304_v34  ;;  %5737 = vst.msk [vmem:[#allocation3 + $0x1d8] sm:$0xff] %vm1481_vm7, %v5673_v47  ;;  %v9317_v62 = vshll.u32 %v8972_v20, 16  ;;  %v8314_v3 = vrot.slane %v8166_v63, 4  ;;  %v8315_v6 = vrot.slane %v8167_v43, 4 }
 0x2ca   :  { %4934 = vst.msk [vmem:[#allocation3 + $0x1e8] sm:$0xff] %vm1481_vm7, %v4870_v48  ;;  %v8168_v36 = vld [vmem:[#allocation2 + $0x190] sm:$0xf0]  ;;  %v9311_v42 = vrot.slane %v9309_v29, 5  ;;  %v9316_v17 = vrot.slane %v9314_v41, 4  ;;  %v9323_v61 = vshrl.u32 %v8973_v39, 16 }
 0x2cb   :  { %5735 = vst.msk [vmem:[#allocation3 + $0x1c8] sm:$0xff] %vm1481_vm7, %v5671_v0  ;;  %v9326_v26 = vshll.u32 %v8973_v39, 16  ;;  %v8169_v51 = vld [vmem:[#allocation2 + $0x198] sm:$0xf]  ;;  %v9319_v54 = vrot.slane %v9317_v62, 5  ;;  %v8316_v45 = vsel %vm1872_vm5, %v8314_v3, %v8315_v6  ;;  %v9331_v28 = vshrl.u32 %v8974_v11, 16 }
 0x2cc   :  { %v9334_v4 = vshll.u32 %v8974_v11, 16  ;;  %v6743_v46 = vld [vmem:[#allocation3] sm:$0xff]  ;;  %v6746_v47 = vld [vmem:[#allocation3 + $0x18] sm:$0xff]  ;;  %v14420_v58 = vpop.f32.mrb[180].mxu0  ;;  %v9312_v20 = vor.u32 %v9311_v42, %v9308_v32  ;;  %12008 = vmatprep.mubr.msk.bf16.mxu1 %vm18_vm1, %v8316_v45  ;;  %v9325_v63 = vrot.slane %v9323_v61, 4  ;;  %v8317_v53 = vrot.slane %v8168_v36, 4 }
 0x2cd   :  { %v9328_v43 = vrot.slane %v9326_v26, 5  ;;  %v8975_v48 = vld [vmem:[#allocation2 + $0x180] sm:$0xf0]  ;;  %v14423_v27 = vpop.f32.mrb[181].mxu0  ;;  %v9320_v39 = vor.u32 %v9319_v54, %v9316_v17  ;;  %v9333_v34 = vrot.slane %v9331_v28, 4  ;;  %v8318_v0 = vrot.slane %v8169_v51, 4 }
 0x2ce   :  { %v9336_v14 = vrot.slane %v9334_v4, 5  ;;  %v8976_v29 = vld [vmem:[#allocation2 + $0x188] sm:$0x1f]  ;;  %v14425_v41 = vpop.f32.mrb[182].mxu0  ;;  %v5612_v62 = vld [vmem:[#allocation3 + $0x1f0] sm:$0xff]  ;;  %v5610_v3 = vld [vmem:[#allocation3 + $0x1e0] sm:$0xff]  ;;  %v6809_v32 = vadd.f32 %v14160_v25, %v6745_v5  ;;  %v6807_v42 = vadd.f32 %v6743_v46, %v14165_v16  ;;  %v6810_v36 = vadd.f32 %v14175_v30, %v6746_v47 }
 0x2cf   :  { %15369 = vst [vmem:[#allocation4_spill] sm:$0xff] %v14425_v41  ;;  %v9329_v11 = vor.u32 %v9328_v43, %v9325_v63  ;;  %v5613_v6 = vld [vmem:[#allocation3 + $0x1f8] sm:$0xff]  ;;  %v14430_v61 = vpop.f32.mrb[184].mxu1  ;;  %v14432_v26 = vpop.f32.mrb[183].mxu0  ;;  %v9321_v17 = vsel %vm2619_vm6, %v9312_v20, %v9320_v39  ;;  %v8319_v54 = vsel %vm1872_vm5, %v8317_v53, %v8318_v0  ;;  %v5676_v45 = vadd.f32 %v14180_v21, %v5612_v62  ;;  %v6744_v28 = vld [vmem:[#allocation3 + $0x8] sm:$0xff]  ;;  %v15371_v30 = vld [vmem:[#allocation10_spill] sm:$0xff] }
 0x2d0   :  { %15370 = vst [vmem:[#allocation6_spill] sm:$0xff] %v14432_v26  ;;  %v9337_v51 = vor.u32 %v9336_v14, %v9333_v34  ;;  %v8170_v4 = vld [vmem:[#allocation2 + $0x1a0] sm:$0xf0]  ;;  %v8171_v63 = vld [vmem:[#allocation2 + $0x1a8] sm:$0xf]  ;;  %v14437_v25 = vpop.f32.mrb[185].mxu1  ;;  %12070 = vmatprep.mubr.msk.bf16.mxu0 %vm18_vm1, %v9321_v17  ;;  %12009 = vmatmul.mubr.msk.bf16.gmra.mrb[8].mxu1 %vm18_vm1, %v8319_v54  ;;  %v5674_v16 = vadd.f32 %v5610_v3, %v14188_v33 }
 0x2d1   :  { %6873 = vst.msk [vmem:[#allocation3 + $0x10] sm:$0xff] %vm1481_vm7, %v6809_v32  ;;  %v5677_v5 = vadd.f32 %v15371_v30, %v5613_v6  ;;  %6871 = vst.msk [vmem:[#allocation3] sm:$0xff] %vm1481_vm7, %v6807_v42  ;;  %v5611_v46 = vld [vmem:[#allocation3 + $0x1e8] sm:$0xff]  ;;  %v9340_v20 = vshrl.u32 %v8975_v48, 16  ;;  %v8977_v43 = vld [vmem:[#allocation2 + $0x190] sm:$0xf0] }
 0x2d2   :  { %6874 = vst.msk [vmem:[#allocation3 + $0x18] sm:$0xff] %vm1481_vm7, %v6810_v36  ;;  %v15372_v21 = vld [vmem:[#allocation9_spill] sm:$0xff]  ;;  %v14447_v53 = vpop.f32.mrb[186].mxu1  ;;  %v9338_v39 = vsel %vm2619_vm6, %v9329_v11, %v9337_v51  ;;  %5740 = vst.msk [vmem:[#allocation3 + $0x1f0] sm:$0xff] %vm1481_vm7, %v5676_v45  ;;  %v15373_v33 = vld [vmem:[#allocation11_spill] sm:$0xff]  ;;  %v9343_v14 = vshll.u32 %v8975_v48, 16 }
 0x2d3   :  { %v6808_v47 = vadd.f32 %v6744_v28, %v15372_v21  ;;  %v5675_v34 = vadd.f32 %v5611_v46, %v15373_v33  ;;  %v9348_v0 = vshrl.u32 %v8976_v29, 16  ;;  %v8978_v62 = vld [vmem:[#allocation2 + $0x198] sm:$0x1f]  ;;  %v14452_v3 = vpop.f32.mrb[187].mxu1  ;;  %12071 = vmatmul.mubr.msk.bf16.gmra.mrb[4].mxu0 %vm18_vm1, %v9338_v39  ;;  %5738 = vst.msk [vmem:[#allocation3 + $0x1e0] sm:$0xff] %vm1481_vm7, %v5674_v16  ;;  %5741 = vst.msk [vmem:[#allocation3 + $0x1f8] sm:$0xff] %vm1481_vm7, %v5677_v5 }
 0x2d4   :  { %v9342_v32 = vrot.slane %v9340_v20, 4  ;;  %v9351_v6 = vshll.u32 %v8976_v29, 16  ;;  %v8320_v11 = vrot.slane %v8170_v4, 4  ;;  %v8321_v42 = vrot.slane %v8171_v63, 4  ;;  %v8172_v36 = vld [vmem:[#allocation2 + $0x1b0] sm:$0xf0] }
 0x2d5   :  { %6872 = vst.msk [vmem:[#allocation3 + $0x8] sm:$0xff] %vm1481_vm7, %v6808_v47  ;;  %5739 = vst.msk [vmem:[#allocation3 + $0x1e8] sm:$0xff] %vm1481_vm7, %v5675_v34  ;;  %v9345_v48 = vrot.slane %v9343_v14, 5  ;;  %v9350_v17 = vrot.slane %v9348_v0, 4  ;;  %v9357_v51 = vshrl.u32 %v8977_v43, 16  ;;  %v9360_v54 = vshll.u32 %v8977_v43, 16 }
 0x2d6   :  { %v8173_v45 = vld [vmem:[#allocation2 + $0x1b8] sm:$0xf]  ;;  %v9353_v28 = vrot.slane %v9351_v6, 5  ;;  %v8322_v30 = vsel %vm1872_vm5, %v8320_v11, %v8321_v42  ;;  %v9365_v16 = vshrl.u32 %v8978_v62, 16  ;;  %v9368_v46 = vshll.u32 %v8978_v62, 16  ;;  %v6749_v5 = vld [vmem:[#allocation3 + $0x30] sm:$0xff] }
 0x2d7   :  { %v8979_v21 = vld [vmem:[#allocation2 + $0x1a0] sm:$0xf0]  ;;  %v9346_v47 = vor.u32 %v9345_v48, %v9342_v32  ;;  %12012 = vmatprep.mubr.msk.bf16.mxu1 %vm18_vm1, %v8322_v30  ;;  %v9359_v29 = vrot.slane %v9357_v51, 4  ;;  %v9362_v4 = vrot.slane %v9360_v54, 5  ;;  %v8323_v63 = vrot.slane %v8172_v36, 4  ;;  %v6750_v0 = vld [vmem:[#allocation3 + $0x38] sm:$0xff] }
 0x2d8   :  { %v6747_v20 = vld [vmem:[#allocation3 + $0x20] sm:$0xff]  ;;  %v8980_v39 = vld [vmem:[#allocation2 + $0x1a8] sm:$0x1f]  ;;  %v9354_v33 = vor.u32 %v9353_v28, %v9350_v17  ;;  %v9367_v34 = vrot.slane %v9365_v16, 4  ;;  %v9370_v14 = vrot.slane %v9368_v46, 5  ;;  %v8324_v43 = vrot.slane %v8173_v45, 4 }
 0x2d9   :  { %v8174_v6 = vld [vmem:[#allocation2 + $0x1c0] sm:$0xf0]  ;;  %v8175_v26 = vld [vmem:[#allocation2 + $0x1c8] sm:$0xf]  ;;  %v9363_v11 = vor.u32 %v9362_v4, %v9359_v29  ;;  %v7935_v42 = vld [vmem:[#allocation3 + $0x10] sm:$0xff]  ;;  %v6813_v62 = vadd.f32 %v14197_v24, %v6749_v5  ;;  %v6811_v32 = vadd.f32 %v6747_v20, %v14202_v40  ;;  %v6814_v51 = vadd.f32 %v14207_v7, %v6750_v0  ;;  %v14467_v46 = vpop.f32.mrb[184].mxu0 }
 0x2da   :  { %v7933_v41 = vld [vmem:[#allocation3] sm:$0xff]  ;;  %v7936_v48 = vld [vmem:[#allocation3 + $0x18] sm:$0xff]  ;;  %v9355_v36 = vsel %vm2619_vm6, %v9346_v47, %v9354_v33  ;;  %v9371_v54 = vor.u32 %v9370_v14, %v9367_v34  ;;  %v8325_v17 = vsel %vm1872_vm5, %v8323_v63, %v8324_v43  ;;  %v7999_v45 = vadd.f32 %v14217_v10, %v7935_v42  ;;  %v6748_v28 = vld [vmem:[#allocation3 + $0x28] sm:$0xff]  ;;  %v14477_v20 = vpop.f32.mrb[185].mxu0 }
 0x2db   :  { %v8981_v30 = vld [vmem:[#allocation2 + $0x1b0] sm:$0xf0]  ;;  %v8982_v16 = vld [vmem:[#allocation2 + $0x1b8] sm:$0x1f]  ;;  %12074 = vmatprep.mubr.msk.bf16.mxu0 %vm18_vm1, %v9355_v36  ;;  %12013 = vmatmul.mubr.msk.bf16.gmra.mrb[12].mxu1 %vm18_vm1, %v8325_v17  ;;  %6877 = vst.msk [vmem:[#allocation3 + $0x30] sm:$0xff] %vm1481_vm7, %v6813_v62  ;;  %v15374_v24 = vld [vmem:[#allocation12_spill] sm:$0xff] }
 0x2dc   :  { %v7997_v40 = vadd.f32 %v7933_v41, %v15374_v24  ;;  %6875 = vst.msk [vmem:[#allocation3 + $0x20] sm:$0xff] %vm1481_vm7, %v6811_v32  ;;  %v15375_v7 = vld [vmem:[#allocation14_spill] sm:$0xff]  ;;  %6878 = vst.msk [vmem:[#allocation3 + $0x38] sm:$0xff] %vm1481_vm7, %v6814_v51  ;;  %v7934_v10 = vld [vmem:[#allocation3 + $0x8] sm:$0xff]  ;;  %v9374_v4 = vshrl.u32 %v8979_v21, 16  ;;  %v9372_v33 = vsel %vm2619_vm6, %v9363_v11, %v9371_v54  ;;  %v9377_v41 = vshll.u32 %v8979_v21, 16 }
 0x2dd   :  { %v8000_v5 = vadd.f32 %v15375_v7, %v7936_v48  ;;  %v15376_v47 = vld [vmem:[#allocation13_spill] sm:$0xff]  ;;  %v8176_v63 = vld [vmem:[#allocation2 + $0x1d0] sm:$0xf0]  ;;  %8063 = vst.msk [vmem:[#allocation3 + $0x10] sm:$0xff] %vm1481_vm7, %v7999_v45  ;;  %v15377_v34 = vld [vmem:[#allocation15_spill] sm:$0xff]  ;;  %v9382_v43 = vshrl.u32 %v8980_v39, 16  ;;  %12075 = vmatmul.mubr.msk.bf16.gmra.mrb[8].mxu0 %vm18_vm1, %v9372_v33 }
 0x2de   :  { %v6812_v29 = vadd.f32 %v6748_v28, %v15376_v47  ;;  %v7998_v14 = vadd.f32 %v7934_v10, %v15377_v34  ;;  %v8177_v0 = vld [vmem:[#allocation2 + $0x1d8] sm:$0xf]  ;;  %v14482_v42 = vpop.f32.mrb[186].mxu0  ;;  %8061 = vst.msk [vmem:[#allocation3] sm:$0xff] %vm1481_vm7, %v7997_v40  ;;  %v9376_v62 = vrot.slane %v9374_v4, 4  ;;  %v9385_v32 = vshll.u32 %v8980_v39, 16 }
 0x2df   :  { %15378 = vst [vmem:[#allocation7_spill] sm:$0xff] %v14482_v42  ;;  %8064 = vst.msk [vmem:[#allocation3 + $0x18] sm:$0xff] %vm1481_vm7, %v8000_v5  ;;  %v8326_v11 = vrot.slane %v8174_v6, 4  ;;  %v8327_v48 = vrot.slane %v8175_v26, 4  ;;  %v14488_v51 = vpop.f32.mrb[188].mxu1  ;;  %v14490_v36 = vpop.f32.mrb[187].mxu0 }
 0x2e0   :  { %6876 = vst.msk [vmem:[#allocation3 + $0x28] sm:$0xff] %vm1481_vm7, %v6812_v29  ;;  %15379 = vst [vmem:[#allocation24_spill] sm:$0xff] %v14490_v36  ;;  %v9379_v21 = vrot.slane %v9377_v41, 5  ;;  %v9384_v54 = vrot.slane %v9382_v43, 4  ;;  %v9391_v17 = vshrl.u32 %v8981_v30, 16  ;;  %v9394_v45 = vshll.u32 %v8981_v30, 16 }
 0x2e1   :  { %8062 = vst.msk [vmem:[#allocation3 + $0x8] sm:$0xff] %vm1481_vm7, %v7998_v14  ;;  %v14493_v28 = vpop.f32.mrb[189].mxu1  ;;  %v9387_v24 = vrot.slane %v9385_v32, 5  ;;  %v8328_v40 = vsel %vm1872_vm5, %v8326_v11, %v8327_v48  ;;  %v9399_v7 = vshrl.u32 %v8982_v16, 16  ;;  %v9402_v5 = vshll.u32 %v8982_v16, 16  ;;  %v6753_v39 = vld [vmem:[#allocation3 + $0x50] sm:$0xff] }
 0x2e2   :  { %v6751_v6 = vld [vmem:[#allocation3 + $0x40] sm:$0xff]  ;;  %v14496_v26 = vpop.f32.mrb[190].mxu1  ;;  %v9380_v10 = vor.u32 %v9379_v21, %v9376_v62  ;;  %12016 = vmatprep.mubr.msk.bf16.mxu1 %vm18_vm1, %v8328_v40  ;;  %v9393_v47 = vrot.slane %v9391_v17, 4  ;;  %v9396_v29 = vrot.slane %v9394_v45, 5  ;;  %v8329_v4 = vrot.slane %v8176_v63, 4  ;;  %v6754_v32 = vld [vmem:[#allocation3 + $0x58] sm:$0xff] }
 0x2e3   :  { %v8983_v33 = vld [vmem:[#allocation2 + $0x1c0] sm:$0xf0]  ;;  %v14499_v34 = vpop.f32.mrb[191].mxu1  ;;  %v9388_v30 = vor.u32 %v9387_v24, %v9384_v54  ;;  %v9401_v14 = vrot.slane %v9399_v7, 4  ;;  %v9404_v41 = vrot.slane %v9402_v5, 5  ;;  %v8330_v43 = vrot.slane %v8177_v0, 4 }
 0x2e4   :  { %v8984_v11 = vld [vmem:[#allocation2 + $0x1c8] sm:$0x1f]  ;;  %v9397_v16 = vor.u32 %v9396_v29, %v9393_v47  ;;  %v7939_v48 = vld [vmem:[#allocation3 + $0x30] sm:$0xff]  ;;  %v6817_v36 = vadd.f32 %v14237_v50, %v6753_v39  ;;  %v7937_v42 = vld [vmem:[#allocation3 + $0x20] sm:$0xff]  ;;  %v6815_v62 = vadd.f32 %v6751_v6, %v14239_v15  ;;  %v6818_v17 = vadd.f32 %v14244_v19, %v6754_v32 }
 0x2e5   :  { %v7940_v21 = vld [vmem:[#allocation3 + $0x38] sm:$0xff]  ;;  %v9389_v63 = vsel %vm2619_vm6, %v9380_v10, %v9388_v30  ;;  %v9405_v45 = vor.u32 %v9404_v41, %v9401_v14  ;;  %v8331_v54 = vsel %vm1872_vm5, %v8329_v4, %v8330_v43  ;;  %v8003_v24 = vadd.f32 %v14249_v57, %v7939_v48  ;;  %v6752_v0 = vld [vmem:[#allocation3 + $0x48] sm:$0xff]  ;;  %v8178_v40 = vld [vmem:[#allocation2 + $0x1e0] sm:$0xf0]  ;;  %v14523_v43 = vpop.f32.mrb[188].mxu0 }
 0x2e6   :  { %v8179_v7 = vld [vmem:[#allocation2 + $0x1e8] sm:$0xf]  ;;  %12078 = vmatprep.mubr.msk.bf16.mxu0 %vm18_vm1, %v9389_v63  ;;  %12017 = vmatmul.mubr.msk.bf16.gmra.mrb[16].mxu1 %vm18_vm1, %v8331_v54  ;;  %6881 = vst.msk [vmem:[#allocation3 + $0x50] sm:$0xff] %vm1481_vm7, %v6817_v36  ;;  %v8001_v50 = vadd.f32 %v7937_v42, %v14261_v49  ;;  %6879 = vst.msk [vmem:[#allocation3 + $0x40] sm:$0xff] %vm1481_vm7, %v6815_v62  ;;  %v8004_v19 = vadd.f32 %v14266_v52, %v7940_v21  ;;  %v9408_v5 = vshrl.u32 %v8983_v33, 16  ;;  %v6757_v21 = vld [vmem:[#allocation3 + $0x70] sm:$0xff] }
 0x2e7   :  { %6882 = vst.msk [vmem:[#allocation3 + $0x58] sm:$0xff] %vm1481_vm7, %v6818_v17  ;;  %v7938_v15 = vld [vmem:[#allocation3 + $0x28] sm:$0xff]  ;;  %v6816_v57 = vadd.f32 %v6752_v0, %v14251_v12  ;;  %v8985_v39 = vld [vmem:[#allocation2 + $0x1d0] sm:$0xf0]  ;;  %v9406_v6 = vsel %vm2619_vm6, %v9397_v16, %v9405_v45  ;;  %8067 = vst.msk [vmem:[#allocation3 + $0x30] sm:$0xff] %vm1481_vm7, %v8003_v24  ;;  %v9411_v36 = vshll.u32 %v8983_v33, 16 }
 0x2e8   :  { %v8002_v10 = vadd.f32 %v7938_v15, %v14272_v55  ;;  %v9416_v47 = vshrl.u32 %v8984_v11, 16  ;;  %v8986_v49 = vld [vmem:[#allocation2 + $0x1d8] sm:$0x1f]  ;;  %v8180_v42 = vld [vmem:[#allocation2 + $0x1f0] sm:$0xf0]  ;;  %12079 = vmatmul.mubr.msk.bf16.gmra.mrb[12].mxu0 %vm18_vm1, %v9406_v6  ;;  %8065 = vst.msk [vmem:[#allocation3 + $0x20] sm:$0xff] %vm1481_vm7, %v8001_v50 }
 0x2e9   :  { %8068 = vst.msk [vmem:[#allocation3 + $0x38] sm:$0xff] %vm1481_vm7, %v8004_v19  ;;  %6880 = vst.msk [vmem:[#allocation3 + $0x48] sm:$0xff] %vm1481_vm7, %v6816_v57  ;;  %v9410_v12 = vrot.slane %v9408_v5, 4  ;;  %v9419_v52 = vshll.u32 %v8984_v11, 16  ;;  %v8332_v29 = vrot.slane %v8178_v40, 4  ;;  %v8333_v4 = vrot.slane %v8179_v7, 4 }
 0x2ea   :  { %v8181_v30 = vld [vmem:[#allocation2 + $0x1f8] sm:$0xf]  ;;  %8066 = vst.msk [vmem:[#allocation3 + $0x28] sm:$0xff] %vm1481_vm7, %v8002_v10  ;;  %v9413_v55 = vrot.slane %v9411_v36, 5  ;;  %v9418_v33 = vrot.slane %v9416_v47, 4  ;;  %v9425_v14 = vshrl.u32 %v8985_v39, 16 }
 0x2eb   :  { %v9428_v41 = vshll.u32 %v8985_v39, 16  ;;  %v9421_v32 = vrot.slane %v9419_v52, 5  ;;  %v8334_v16 = vsel %vm1872_vm5, %v8332_v29, %v8333_v4  ;;  %v9433_v48 = vshrl.u32 %v8986_v49, 16  ;;  %v6755_v17 = vld [vmem:[#allocation3 + $0x60] sm:$0xff]  ;;  %v14526_v11 = vpop.f32.mrb[189].mxu0  ;;  %v6758_v5 = vld [vmem:[#allocation3 + $0x78] sm:$0xff] }
 0x2ec   :  { %v9436_v62 = vshll.u32 %v8986_v49, 16  ;;  %v8987_v63 = vld [vmem:[#allocation2 + $0x1e0] sm:$0xf0]  ;;  %v9414_v45 = vor.u32 %v9413_v55, %v9410_v12  ;;  %12020 = vmatprep.mubr.msk.bf16.mxu1 %vm18_vm1, %v8334_v16  ;;  %v9427_v54 = vrot.slane %v9425_v14, 4  ;;  %v8335_v0 = vrot.slane %v8180_v42, 4  ;;  %v14529_v7 = vpop.f32.mrb[190].mxu0 }
 0x2ed   :  { %v9430_v24 = vrot.slane %v9428_v41, 5  ;;  %v8988_v40 = vld [vmem:[#allocation2 + $0x1e8] sm:$0x1f]  ;;  %v9422_v50 = vor.u32 %v9421_v32, %v9418_v33  ;;  %v9435_v19 = vrot.slane %v9433_v48, 4  ;;  %v8336_v57 = vrot.slane %v8181_v30, 4  ;;  %v14531_v39 = vpop.f32.mrb[192].mxu1 }
 0x2ee   :  { %v9438_v15 = vrot.slane %v9436_v62, 5  ;;  %v14533_v6 = vpop.f32.mrb[191].mxu0  ;;  %v7943_v36 = vld [vmem:[#allocation3 + $0x50] sm:$0xff]  ;;  %v15380_v47 = vld [vmem:[#allocation16_spill] sm:$0xff]  ;;  %v15381_v52 = vld [vmem:[#allocation17_spill] sm:$0xff]  ;;  %v6822_v4 = vadd.f32 %v14281_v22, %v6758_v5  ;;  %v14538_v55 = vpop.f32.mrb[193].mxu1 }
 0x2ef   :  { %v9431_v10 = vor.u32 %v9430_v24, %v9427_v54  ;;  %v6821_v49 = vadd.f32 %v15380_v47, %v6757_v21  ;;  %v7941_v12 = vld [vmem:[#allocation3 + $0x40] sm:$0xff]  ;;  %v6819_v29 = vadd.f32 %v6755_v17, %v15381_v52  ;;  %v7944_v42 = vld [vmem:[#allocation3 + $0x58] sm:$0xff]  ;;  %v9423_v33 = vsel %vm2619_vm6, %v9414_v45, %v9422_v50  ;;  %v6756_v32 = vld [vmem:[#allocation3 + $0x68] sm:$0xff]  ;;  %v14543_v62 = vpop.f32.mrb[194].mxu1 }
 0x2f0   :  { %v9439_v30 = vor.u32 %v9438_v15, %v9435_v19  ;;  %v8337_v14 = vsel %vm1872_vm5, %v8335_v0, %v8336_v57  ;;  %v8007_v41 = vadd.f32 %v14286_v9, %v7943_v36  ;;  %v8182_v16 = vld [vmem:[#allocation2 + $0x200] sm:$0xf0]  ;;  %v8183_v48 = vld [vmem:[#allocation2 + $0x208] sm:$0xf]  ;;  %12082 = vmatprep.mubr.msk.bf16.mxu0 %vm18_vm1, %v9423_v33  ;;  %v8005_v22 = vadd.f32 %v7941_v12, %v14293_v60  ;;  %v8989_v54 = vld [vmem:[#allocation2 + $0x1f0] sm:$0xf0] }
 0x2f1   :  { %12021 = vmatmul.mubr.msk.bf16.gmra.mrb[20].mxu1 %vm18_vm1, %v8337_v14  ;;  %6885 = vst.msk [vmem:[#allocation3 + $0x70] sm:$0xff] %vm1481_vm7, %v6821_v49  ;;  %6883 = vst.msk [vmem:[#allocation3 + $0x60] sm:$0xff] %vm1481_vm7, %v6819_v29  ;;  %v8008_v21 = vadd.f32 %v14303_v44, %v7944_v42  ;;  %v7942_v9 = vld [vmem:[#allocation3 + $0x48] sm:$0xff]  ;;  %v6820_v17 = vadd.f32 %v6756_v32, %v14288_v56  ;;  %v9442_v45 = vshrl.u32 %v8987_v63, 16  ;;  %v14553_v24 = vpop.f32.mrb[195].mxu1  ;;  %v15382_v50 = vld [vmem:[#allocation18_spill] sm:$0xff] }
 0x2f2   :  { %6886 = vst.msk [vmem:[#allocation3 + $0x78] sm:$0xff] %vm1481_vm7, %v6822_v4  ;;  %v9440_v0 = vsel %vm2619_vm6, %v9431_v10, %v9439_v30  ;;  %8071 = vst.msk [vmem:[#allocation3 + $0x50] sm:$0xff] %vm1481_vm7, %v8007_v41  ;;  %v8006_v19 = vadd.f32 %v7942_v9, %v15382_v50  ;;  %v9445_v60 = vshll.u32 %v8987_v63, 16  ;;  %v9450_v15 = vshrl.u32 %v8988_v40, 16  ;;  %v8990_v57 = vld [vmem:[#allocation2 + $0x1f8] sm:$0x1f] }
 0x2f3   :  { %12083 = vmatmul.mubr.msk.bf16.gmra.mrb[16].mxu0 %vm18_vm1, %v9440_v0  ;;  %8069 = vst.msk [vmem:[#allocation3 + $0x40] sm:$0xff] %vm1481_vm7, %v8005_v22  ;;  %8072 = vst.msk [vmem:[#allocation3 + $0x58] sm:$0xff] %vm1481_vm7, %v8008_v21  ;;  %v9444_v56 = vrot.slane %v9442_v45, 4  ;;  %v9453_v44 = vshll.u32 %v8988_v40, 16  ;;  %v8338_v5 = vrot.slane %v8182_v16, 4  ;;  %v8339_v36 = vrot.slane %v8183_v48, 4 }
 0x2f4   :  { %6884 = vst.msk [vmem:[#allocation3 + $0x68] sm:$0xff] %vm1481_vm7, %v6820_v17  ;;  %v8184_v10 = vld [vmem:[#allocation2 + $0x210] sm:$0xf0]  ;;  %8070 = vst.msk [vmem:[#allocation3 + $0x48] sm:$0xff] %vm1481_vm7, %v8006_v19  ;;  %v9447_v47 = vrot.slane %v9445_v60, 5  ;;  %v9452_v49 = vrot.slane %v9450_v15, 4 }
 0x2f5   :  { %v9459_v63 = vshrl.u32 %v8989_v54, 16  ;;  %v9462_v12 = vshll.u32 %v8989_v54, 16  ;;  %v8185_v52 = vld [vmem:[#allocation2 + $0x218] sm:$0xf]  ;;  %v9455_v29 = vrot.slane %v9453_v44, 5  ;;  %v8340_v42 = vsel %vm1872_vm5, %v8338_v5, %v8339_v36  ;;  %v6761_v30 = vld [vmem:[#allocation3 + $0x90] sm:$0xff] }
 0x2f6   :  { %v9467_v4 = vshrl.u32 %v8990_v57, 16  ;;  %v9470_v33 = vshll.u32 %v8990_v57, 16  ;;  %v8991_v14 = vld [vmem:[#allocation2 + $0x200] sm:$0xf0]  ;;  %v9448_v41 = vor.u32 %v9447_v47, %v9444_v56  ;;  %12024 = vmatprep.mubr.msk.bf16.mxu1 %vm18_vm1, %v8340_v42  ;;  %v8341_v16 = vrot.slane %v8184_v10, 4  ;;  %v6762_v54 = vld [vmem:[#allocation3 + $0x98] sm:$0xff] }
 0x2f7   :  { %v9461_v40 = vrot.slane %v9459_v63, 4  ;;  %v9464_v32 = vrot.slane %v9462_v12, 5  ;;  %v6759_v48 = vld [vmem:[#allocation3 + $0x80] sm:$0xff]  ;;  %v8992_v22 = vld [vmem:[#allocation2 + $0x208] sm:$0x1f]  ;;  %v9456_v21 = vor.u32 %v9455_v29, %v9452_v49  ;;  %v8342_v45 = vrot.slane %v8185_v52, 4 }
 0x2f8   :  { %v9469_v9 = vrot.slane %v9467_v4, 4  ;;  %v9472_v17 = vrot.slane %v9470_v33, 5  ;;  %v8186_v0 = vld [vmem:[#allocation2 + $0x220] sm:$0xf0]  ;;  %v8187_v50 = vld [vmem:[#allocation2 + $0x228] sm:$0xf]  ;;  %v6825_v15 = vadd.f32 %v14327_v13, %v6761_v30  ;;  %v6823_v56 = vadd.f32 %v6759_v48, %v14339_v35 }
 0x2f9   :  { %v9465_v19 = vor.u32 %v9464_v32, %v9461_v40  ;;  %v7947_v60 = vld [vmem:[#allocation3 + $0x70] sm:$0xff]  ;;  %v7945_v57 = vld [vmem:[#allocation3 + $0x60] sm:$0xff]  ;;  %v7948_v44 = vld [vmem:[#allocation3 + $0x78] sm:$0xff]  ;;  %v6826_v5 = vadd.f32 %v14346_v23, %v6762_v54  ;;  %v14568_v36 = vpop.f32.mrb[192].mxu0  ;;  %v9457_v10 = vsel %vm2619_vm6, %v9448_v41, %v9456_v21  ;;  %v8343_v49 = vsel %vm1872_vm5, %v8341_v16, %v8342_v45  ;;  %v14588_v54 = vpop.f32.mrb[196].mxu1 }
 0x2fa   :  { %v9473_v47 = vor.u32 %v9472_v17, %v9469_v9  ;;  %v8011_v63 = vadd.f32 %v14317_v18, %v7947_v60  ;;  %v6760_v12 = vld [vmem:[#allocation3 + $0x88] sm:$0xff]  ;;  %v8993_v52 = vld [vmem:[#allocation2 + $0x210] sm:$0xf0]  ;;  %v8994_v29 = vld [vmem:[#allocation2 + $0x218] sm:$0x1f]  ;;  %v14573_v42 = vpop.f32.mrb[193].mxu0  ;;  %12086 = vmatprep.mubr.msk.bf16.mxu0 %vm18_vm1, %v9457_v10  ;;  %12025 = vmatmul.mubr.msk.bf16.gmra.mrb[24].mxu1 %vm18_vm1, %v8343_v49 }
 0x2fb   :  { %6889 = vst.msk [vmem:[#allocation3 + $0x90] sm:$0xff] %vm1481_vm7, %v6825_v15  ;;  %v15383_v13 = vld [vmem:[#allocation19_spill] sm:$0xff]  ;;  %6887 = vst.msk [vmem:[#allocation3 + $0x80] sm:$0xff] %vm1481_vm7, %v6823_v56  ;;  %v15384_v23 = vld [vmem:[#allocation20_spill] sm:$0xff]  ;;  %v9476_v41 = vshrl.u32 %v8991_v14, 16  ;;  %v14583_v32 = vpop.f32.mrb[194].mxu0 }
 0x2fc   :  { %v8009_v35 = vadd.f32 %v7945_v57, %v15383_v13  ;;  %v8012_v4 = vadd.f32 %v15384_v23, %v7948_v44  ;;  %6890 = vst.msk [vmem:[#allocation3 + $0x98] sm:$0xff] %vm1481_vm7, %v6826_v5  ;;  %v7946_v18 = vld [vmem:[#allocation3 + $0x68] sm:$0xff]  ;;  %v15385_v33 = vld [vmem:[#allocation22_spill] sm:$0xff]  ;;  %v9474_v16 = vsel %vm2619_vm6, %v9465_v19, %v9473_v47  ;;  %8075 = vst.msk [vmem:[#allocation3 + $0x70] sm:$0xff] %vm1481_vm7, %v8011_v63  ;;  %v9479_v9 = vshll.u32 %v8991_v14, 16  ;;  %v14590_v60 = vpop.f32.mrb[195].mxu0 }
 0x2fd   :  { %v6824_v30 = vadd.f32 %v6760_v12, %v15385_v33  ;;  %v8188_v40 = vld [vmem:[#allocation2 + $0x230] sm:$0xf0]  ;;  %v15386_v48 = vld [vmem:[#allocation21_spill] sm:$0xff]  ;;  %v9484_v17 = vshrl.u32 %v8992_v22, 16  ;;  %v8189_v45 = vld [vmem:[#allocation2 + $0x238] sm:$0xf]  ;;  %12087 = vmatmul.mubr.msk.bf16.gmra.mrb[20].mxu0 %vm18_vm1, %v9474_v16 }
 0x2fe   :  { %v8010_v21 = vadd.f32 %v7946_v18, %v15386_v48  ;;  %8073 = vst.msk [vmem:[#allocation3 + $0x60] sm:$0xff] %vm1481_vm7, %v8009_v35  ;;  %8076 = vst.msk [vmem:[#allocation3 + $0x78] sm:$0xff] %vm1481_vm7, %v8012_v4  ;;  %v9478_v19 = vrot.slane %v9476_v41, 4  ;;  %v9487_v15 = vshll.u32 %v8992_v22, 16  ;;  %v8344_v57 = vrot.slane %v8186_v0, 4  ;;  %v14596_v44 = vpop.f32.mrb[197].mxu1 }
 0x2ff   :  { %6888 = vst.msk [vmem:[#allocation3 + $0x88] sm:$0xff] %vm1481_vm7, %v6824_v30  ;;  %v8345_v56 = vrot.slane %v8187_v50, 4  ;;  %v9481_v14 = vrot.slane %v9479_v9, 5  ;;  %v9486_v5 = vrot.slane %v9484_v17, 4  ;;  %v9493_v10 = vshrl.u32 %v8993_v52, 16  ;;  %v14599_v49 = vpop.f32.mrb[198].mxu1 }
 0x300   :  { %8074 = vst.msk [vmem:[#allocation3 + $0x68] sm:$0xff] %vm1481_vm7, %v8010_v21  ;;  %v9496_v47 = vshll.u32 %v8993_v52, 16  ;;  %v9489_v63 = vrot.slane %v9487_v15, 5  ;;  %v9501_v13 = vshrl.u32 %v8994_v29, 16  ;;  %v9504_v35 = vshll.u32 %v8994_v29, 16  ;;  %v6765_v23 = vld [vmem:[#allocation3 + $0xb0] sm:$0xff] }
 0x301   :  { %v8346_v12 = vsel %vm1872_vm5, %v8344_v57, %v8345_v56  ;;  %v14602_v4 = vpop.f32.mrb[199].mxu1  ;;  %v9482_v22 = vor.u32 %v9481_v14, %v9478_v19  ;;  %v9495_v0 = vrot.slane %v9493_v10, 4  ;;  %v8347_v18 = vrot.slane %v8188_v40, 4  ;;  %v6763_v33 = vld [vmem:[#allocation3 + $0xa0] sm:$0xff]  ;;  %v6766_v21 = vld [vmem:[#allocation3 + $0xb8] sm:$0xff] }
 0x302   :  { %12028 = vmatprep.mubr.msk.bf16.mxu1 %vm18_vm1, %v8346_v12  ;;  %v9498_v50 = vrot.slane %v9496_v47, 5  ;;  %v8995_v30 = vld [vmem:[#allocation2 + $0x220] sm:$0xf0]  ;;  %v9490_v41 = vor.u32 %v9489_v63, %v9486_v5  ;;  %v9503_v52 = vrot.slane %v9501_v13, 4  ;;  %v9506_v16 = vrot.slane %v9504_v35, 5  ;;  %v7951_v15 = vld [vmem:[#allocation3 + $0x90] sm:$0xff] }
 0x303   :  { %v8348_v48 = vrot.slane %v8189_v45, 4  ;;  %v8996_v9 = vld [vmem:[#allocation2 + $0x228] sm:$0x1f]  ;;  %v6829_v29 = vadd.f32 %v14386_v1, %v6765_v23  ;;  %v7949_v57 = vld [vmem:[#allocation3 + $0x80] sm:$0xff]  ;;  %v6827_v19 = vadd.f32 %v6763_v33, %v14391_v59  ;;  %v7952_v56 = vld [vmem:[#allocation3 + $0x98] sm:$0xff]  ;;  %v6830_v14 = vadd.f32 %v14393_v37, %v6766_v21 }
 0x304   :  { %v9499_v17 = vor.u32 %v9498_v50, %v9495_v0  ;;  %v9491_v40 = vsel %vm2619_vm6, %v9482_v22, %v9490_v41  ;;  %v9507_v10 = vor.u32 %v9506_v16, %v9503_v52  ;;  %v8015_v47 = vadd.f32 %v14374_v8, %v7951_v15  ;;  %v6764_v45 = vld [vmem:[#allocation3 + $0xa8] sm:$0xff]  ;;  %v8997_v63 = vld [vmem:[#allocation2 + $0x230] sm:$0xf0]  ;;  %v8998_v13 = vld [vmem:[#allocation2 + $0x238] sm:$0x1f]  ;;  %v14626_v41 = vpop.f32.mrb[196].mxu0 }
 0x305   :  { %v8349_v5 = vsel %vm1872_vm5, %v8347_v18, %v8348_v48  ;;  %12090 = vmatprep.mubr.msk.bf16.mxu0 %vm18_vm1, %v9491_v40  ;;  %6893 = vst.msk [vmem:[#allocation3 + $0xb0] sm:$0xff] %vm1481_vm7, %v6829_v29  ;;  %v8013_v1 = vadd.f32 %v7949_v57, %v14380_v38  ;;  %6891 = vst.msk [vmem:[#allocation3 + $0xa0] sm:$0xff] %vm1481_vm7, %v6827_v19  ;;  %v8016_v59 = vadd.f32 %v14383_v2, %v7952_v56  ;;  %v15387_v23 = vld [vmem:[#allocation5_spill] sm:$0xff]  ;;  %v6769_v33 = vld [vmem:[#allocation3 + $0xd0] sm:$0xff] }
 0x306   :  { %12029 = vmatmul.mubr.msk.bf16.gmra.mrb[28].mxu1 %vm18_vm1, %v8349_v5  ;;  %6894 = vst.msk [vmem:[#allocation3 + $0xb8] sm:$0xff] %vm1481_vm7, %v6830_v14  ;;  %v7950_v37 = vld [vmem:[#allocation3 + $0x88] sm:$0xff]  ;;  %v6828_v12 = vadd.f32 %v6764_v45, %v14398_v31  ;;  %v9510_v8 = vshrl.u32 %v8995_v30, 16  ;;  %v9508_v35 = vsel %vm2619_vm6, %v9499_v17, %v9507_v10  ;;  %8079 = vst.msk [vmem:[#allocation3 + $0x90] sm:$0xff] %vm1481_vm7, %v8015_v47  ;;  %v9513_v0 = vshll.u32 %v8995_v30, 16  ;;  %v6767_v21 = vld [vmem:[#allocation3 + $0xc0] sm:$0xff] }
 0x307   :  { %v8014_v22 = vadd.f32 %v7950_v37, %v15387_v23  ;;  %v9518_v50 = vshrl.u32 %v8996_v9, 16  ;;  %12091 = vmatmul.mubr.msk.bf16.gmra.mrb[24].mxu0 %vm18_vm1, %v9508_v35  ;;  %8077 = vst.msk [vmem:[#allocation3 + $0x80] sm:$0xff] %vm1481_vm7, %v8013_v1  ;;  %8080 = vst.msk [vmem:[#allocation3 + $0x98] sm:$0xff] %vm1481_vm7, %v8016_v59  ;;  %v9521_v2 = vshll.u32 %v8996_v9, 16  ;;  %v9527_v31 = vshrl.u32 %v8997_v63, 16  ;;  %v14629_v17 = vpop.f32.mrb[197].mxu0 }
 0x308   :  { %6892 = vst.msk [vmem:[#allocation3 + $0xa8] sm:$0xff] %vm1481_vm7, %v6828_v12  ;;  %v9512_v38 = vrot.slane %v9510_v8, 4  ;;  %v9530_v18 = vshll.u32 %v8997_v63, 16  ;;  %v9515_v52 = vrot.slane %v9513_v0, 5  ;;  %v9535_v16 = vshrl.u32 %v8998_v13, 16  ;;  %v6770_v9 = vld [vmem:[#allocation3 + $0xd8] sm:$0xff] }
 0x309   :  { %8078 = vst.msk [vmem:[#allocation3 + $0x88] sm:$0xff] %vm1481_vm7, %v8014_v22  ;;  %v9520_v30 = vrot.slane %v9518_v50, 4  ;;  %v9538_v48 = vshll.u32 %v8998_v13, 16  ;;  %v9523_v15 = vrot.slane %v9521_v2, 5  ;;  %v9529_v29 = vrot.slane %v9527_v31, 4  ;;  %v6768_v56 = vld [vmem:[#allocation3 + $0xc8] sm:$0xff] }
 0x30a   :  { %v9532_v57 = vrot.slane %v9530_v18, 5  ;;  %v6833_v19 = vadd.f32 %v14430_v61, %v6769_v33  ;;  %v14632_v14 = vpop.f32.mrb[198].mxu0  ;;  %v9516_v40 = vor.u32 %v9515_v52, %v9512_v38  ;;  %v9537_v10 = vrot.slane %v9535_v16, 4  ;;  %v6773_v45 = vld [vmem:[#allocation3 + $0xf0] sm:$0xff]  ;;  %v6771_v63 = vld [vmem:[#allocation3 + $0xe0] sm:$0xff]  ;;  %v11878_v1 = vpop.f32.mrb[200].mxu1 }
 0x30b   :  { %v9540_v5 = vrot.slane %v9538_v48, 5  ;;  %v6831_v47 = vadd.f32 %v6767_v21, %v14437_v25  ;;  %v14635_v59 = vpop.f32.mrb[199].mxu0  ;;  %v9524_v37 = vor.u32 %v9523_v15, %v9520_v30  ;;  %v6834_v61 = vadd.f32 %v14447_v53, %v6770_v9  ;;  %v6774_v13 = vld [vmem:[#allocation3 + $0xf8] sm:$0xff]  ;;  %v6772_v35 = vld [vmem:[#allocation3 + $0xe8] sm:$0xff]  ;;  %v6777_v23 = vld [vmem:[#allocation3 + $0x110] sm:$0xff]  ;;  %v6648_v22 = vpop.f32.mrb[201].mxu1 }
 0x30c   :  { %v9533_v12 = vor.u32 %v9532_v57, %v9529_v29  ;;  %6897 = vst.msk [vmem:[#allocation3 + $0xd0] sm:$0xff] %vm1481_vm7, %v6833_v19  ;;  %v6832_v8 = vadd.f32 %v6768_v56, %v14452_v3  ;;  %v7955_v50 = vld [vmem:[#allocation3 + $0xb0] sm:$0xff]  ;;  %v7953_v25 = vld [vmem:[#allocation3 + $0xa0] sm:$0xff]  ;;  %v6837_v2 = vadd.f32 %v14488_v51, %v6773_v45  ;;  %v6835_v31 = vadd.f32 %v6771_v63, %v14493_v28  ;;  %v11879_v33 = vpop.f32.mrb[202].mxu1  ;;  %v6778_v21 = vld [vmem:[#allocation3 + $0x118] sm:$0xff] }
 0x30d   :  { %v9541_v0 = vor.u32 %v9540_v5, %v9537_v10  ;;  %6895 = vst.msk [vmem:[#allocation3 + $0xc0] sm:$0xff] %vm1481_vm7, %v6831_v47  ;;  %v7956_v38 = vld [vmem:[#allocation3 + $0xb8] sm:$0xff]  ;;  %v6838_v18 = vadd.f32 %v14496_v26, %v6774_v13  ;;  %v9525_v53 = vsel %vm2619_vm6, %v9516_v40, %v9524_v37  ;;  %v8019_v3 = vadd.f32 %v14420_v58, %v7955_v50  ;;  %v15388_v30 = vld [vmem:[#allocation4_spill] sm:$0xff]  ;;  %v6776_v51 = vld [vmem:[#allocation3 + $0x108] sm:$0xff]  ;;  %v6651_v15 = vpop.f32.mrb[203].mxu1 }
 0x30e   :  { %v8017_v52 = vadd.f32 %v7953_v25, %v14423_v27  ;;  %v8020_v16 = vadd.f32 %v15388_v30, %v7956_v38  ;;  %6898 = vst.msk [vmem:[#allocation3 + $0xd8] sm:$0xff] %vm1481_vm7, %v6834_v61  ;;  %6896 = vst.msk [vmem:[#allocation3 + $0xc8] sm:$0xff] %vm1481_vm7, %v6832_v8  ;;  %v6775_v48 = vld [vmem:[#allocation3 + $0x100] sm:$0xff]  ;;  %12094 = vmatprep.mubr.msk.bf16.mxu0 %vm18_vm1, %v9525_v53  ;;  %v6836_v58 = vadd.f32 %v6772_v35, %v14499_v34  ;;  %v6781_v57 = vld [vmem:[#allocation3 + $0x130] sm:$0xff] }
 0x30f   :  { %v9542_v28 = vsel %vm2619_vm6, %v9533_v12, %v9541_v0  ;;  %v7954_v26 = vld [vmem:[#allocation3 + $0xa8] sm:$0xff]  ;;  %6901 = vst.msk [vmem:[#allocation3 + $0xf0] sm:$0xff] %vm1481_vm7, %v6837_v2  ;;  %6899 = vst.msk [vmem:[#allocation3 + $0xe0] sm:$0xff] %vm1481_vm7, %v6835_v31  ;;  %v6841_v27 = vadd.f32 %v14531_v39, %v6777_v23  ;;  %v6839_v29 = vadd.f32 %v6775_v48, %v14538_v55  ;;  %v6779_v19 = vld [vmem:[#allocation3 + $0x120] sm:$0xff]  ;;  %v11944_v23 = vpop.f32.mrb[200].mxu0 }
 0x310   :  { %6902 = vst.msk [vmem:[#allocation3 + $0xf8] sm:$0xff] %vm1481_vm7, %v6838_v18  ;;  %12095 = vmatmul.mubr.msk.bf16.gmra.mrb[28].mxu0 %vm18_vm1, %v9542_v28  ;;  %8083 = vst.msk [vmem:[#allocation3 + $0xb0] sm:$0xff] %vm1481_vm7, %v8019_v3  ;;  %v15389_v9 = vld [vmem:[#allocation6_spill] sm:$0xff]  ;;  %v6842_v40 = vadd.f32 %v14543_v62, %v6778_v21  ;;  %v6840_v34 = vadd.f32 %v6776_v51, %v14553_v24  ;;  %v6845_v39 = vadd.f32 %v14588_v54, %v6781_v57  ;;  %v6782_v10 = vld [vmem:[#allocation3 + $0x138] sm:$0xff]  ;;  %v7838_v31 = vpop.f32.mrb[201].mxu0  ;;  %v11882_v21 = vpop.f32.mrb[204].mxu1 }
 0x311   :  { %8081 = vst.msk [vmem:[#allocation3 + $0xa0] sm:$0xff] %vm1481_vm7, %v8017_v52  ;;  %8084 = vst.msk [vmem:[#allocation3 + $0xb8] sm:$0xff] %vm1481_vm7, %v8020_v16  ;;  %v8018_v56 = vadd.f32 %v7954_v26, %v15389_v9  ;;  %v6780_v55 = vld [vmem:[#allocation3 + $0x128] sm:$0xff]  ;;  %v6785_v5 = vld [vmem:[#allocation3 + $0x150] sm:$0xff]  ;;  %v6843_v47 = vadd.f32 %v6779_v19, %v14596_v44  ;;  %v6846_v45 = vadd.f32 %v14599_v49, %v6782_v10  ;;  %v11945_v52 = vpop.f32.mrb[202].mxu0 }
 0x312   :  { %6900 = vst.msk [vmem:[#allocation3 + $0xe8] sm:$0xff] %vm1481_vm7, %v6836_v58  ;;  %6905 = vst.msk [vmem:[#allocation3 + $0x110] sm:$0xff] %vm1481_vm7, %v6841_v27  ;;  %v6844_v63 = vadd.f32 %v6780_v55, %v14602_v4  ;;  %v6849_v62 = vadd.f32 %v11878_v1, %v6785_v5  ;;  %v6783_v37 = vld [vmem:[#allocation3 + $0x140] sm:$0xff]  ;;  %v6786_v24 = vld [vmem:[#allocation3 + $0x158] sm:$0xff] }
 0x313   :  { %6903 = vst.msk [vmem:[#allocation3 + $0x100] sm:$0xff] %vm1481_vm7, %v6839_v29  ;;  %v6784_v12 = vld [vmem:[#allocation3 + $0x148] sm:$0xff]  ;;  %8082 = vst.msk [vmem:[#allocation3 + $0xa8] sm:$0xff] %vm1481_vm7, %v8018_v56  ;;  %v6847_v54 = vadd.f32 %v6783_v37, %v6648_v22  ;;  %v6850_v61 = vadd.f32 %v11879_v33, %v6786_v24  ;;  %v7959_v44 = vld [vmem:[#allocation3 + $0xd0] sm:$0xff]  ;;  %v6664_v29 = vpop.f32.mrb[205].mxu1 }
 0x314   :  { %6906 = vst.msk [vmem:[#allocation3 + $0x118] sm:$0xff] %vm1481_vm7, %v6842_v40  ;;  %6904 = vst.msk [vmem:[#allocation3 + $0x108] sm:$0xff] %vm1481_vm7, %v6840_v34  ;;  %v6848_v8 = vadd.f32 %v6784_v12, %v6651_v15  ;;  %v8023_v49 = vadd.f32 %v14467_v46, %v7959_v44  ;;  %v7957_v4 = vld [vmem:[#allocation3 + $0xc0] sm:$0xff]  ;;  %v15390_v22 = vld [vmem:[#allocation7_spill] sm:$0xff]  ;;  %v7841_v15 = vpop.f32.mrb[203].mxu0  ;;  %v11883_v10 = vpop.f32.mrb[206].mxu1 }
 0x315   :  { %6909 = vst.msk [vmem:[#allocation3 + $0x130] sm:$0xff] %vm1481_vm7, %v6845_v39  ;;  %6907 = vst.msk [vmem:[#allocation3 + $0x120] sm:$0xff] %vm1481_vm7, %v6843_v47  ;;  %v8021_v1 = vadd.f32 %v7957_v4, %v14477_v20  ;;  %v7960_v13 = vld [vmem:[#allocation3 + $0xd8] sm:$0xff]  ;;  %v7958_v35 = vld [vmem:[#allocation3 + $0xc8] sm:$0xff]  ;;  %v6667_v47 = vpop.f32.mrb[207].mxu1  ;;  %v11948_v37 = vpop.f32.mrb[204].mxu0 }
 0x316   :  { %6910 = vst.msk [vmem:[#allocation3 + $0x138] sm:$0xff] %vm1481_vm7, %v6846_v45  ;;  %6908 = vst.msk [vmem:[#allocation3 + $0x128] sm:$0xff] %vm1481_vm7, %v6844_v63  ;;  %v8024_v0 = vadd.f32 %v15390_v22, %v7960_v13  ;;  %v15391_v50 = vld [vmem:[#allocation24_spill] sm:$0xff]  ;;  %v7963_v38 = vld [vmem:[#allocation3 + $0xf0] sm:$0xff]  ;;  %v11886_v4 = vpop.f32.mrb[208].mxu1 }
 0x317   :  { %6913 = vst.msk [vmem:[#allocation3 + $0x150] sm:$0xff] %vm1481_vm7, %v6849_v62  ;;  %6911 = vst.msk [vmem:[#allocation3 + $0x140] sm:$0xff] %vm1481_vm7, %v6847_v54  ;;  %v8022_v25 = vadd.f32 %v7958_v35, %v15391_v50  ;;  %v7961_v46 = vld [vmem:[#allocation3 + $0xe0] sm:$0xff]  ;;  %v7964_v2 = vld [vmem:[#allocation3 + $0xf8] sm:$0xff]  ;;  %v8027_v18 = vadd.f32 %v14523_v43, %v7963_v38  ;;  %v7854_v54 = vpop.f32.mrb[205].mxu0 }
 0x318   :  { %6914 = vst.msk [vmem:[#allocation3 + $0x158] sm:$0xff] %vm1481_vm7, %v6850_v61  ;;  %6912 = vst.msk [vmem:[#allocation3 + $0x148] sm:$0xff] %vm1481_vm7, %v6848_v8  ;;  %v8025_v33 = vadd.f32 %v7961_v46, %v14526_v11  ;;  %v8028_v20 = vadd.f32 %v14529_v7, %v7964_v2  ;;  %v6789_v53 = vld [vmem:[#allocation3 + $0x170] sm:$0xff]  ;;  %v6787_v3 = vld [vmem:[#allocation3 + $0x160] sm:$0xff]  ;;  %v11949_v44 = vpop.f32.mrb[206].mxu0 }
 0x319   :  { %8087 = vst.msk [vmem:[#allocation3 + $0xd0] sm:$0xff] %vm1481_vm7, %v8023_v49  ;;  %8085 = vst.msk [vmem:[#allocation3 + $0xc0] sm:$0xff] %vm1481_vm7, %v8021_v1  ;;  %v7962_v30 = vld [vmem:[#allocation3 + $0xe8] sm:$0xff]  ;;  %v7967_v16 = vld [vmem:[#allocation3 + $0x110] sm:$0xff]  ;;  %v6853_v27 = vadd.f32 %v11882_v21, %v6789_v53  ;;  %v7857_v35 = vpop.f32.mrb[207].mxu0 }
 0x31a   :  { %8088 = vst.msk [vmem:[#allocation3 + $0xd8] sm:$0xff] %vm1481_vm7, %v8024_v0  ;;  %8086 = vst.msk [vmem:[#allocation3 + $0xc8] sm:$0xff] %vm1481_vm7, %v8022_v25  ;;  %v7965_v48 = vld [vmem:[#allocation3 + $0x100] sm:$0xff]  ;;  %v6790_v51 = vld [vmem:[#allocation3 + $0x178] sm:$0xff]  ;;  %v8026_v43 = vadd.f32 %v7962_v30, %v14533_v6  ;;  %v8031_v11 = vadd.f32 %v14568_v36, %v7967_v16  ;;  %v6851_v6 = vadd.f32 %v6787_v3, %v6664_v29  ;;  %v6680_v0 = vpop.f32.mrb[209].mxu1  ;;  %v11952_v53 = vpop.f32.mrb[208].mxu0 }
 0x31b   :  { %8091 = vst.msk [vmem:[#allocation3 + $0xf0] sm:$0xff] %vm1481_vm7, %v8027_v18  ;;  %8089 = vst.msk [vmem:[#allocation3 + $0xe0] sm:$0xff] %vm1481_vm7, %v8025_v33  ;;  %v8029_v7 = vadd.f32 %v7965_v48, %v14573_v42  ;;  %v7968_v28 = vld [vmem:[#allocation3 + $0x118] sm:$0xff]  ;;  %v7966_v26 = vld [vmem:[#allocation3 + $0x108] sm:$0xff]  ;;  %v6854_v5 = vadd.f32 %v11883_v10, %v6790_v51  ;;  %v11887_v46 = vpop.f32.mrb[210].mxu1  ;;  %v7870_v30 = vpop.f32.mrb[209].mxu0 }
 0x31c   :  { %8092 = vst.msk [vmem:[#allocation3 + $0xf8] sm:$0xff] %vm1481_vm7, %v8028_v20  ;;  %v7971_v58 = vld [vmem:[#allocation3 + $0x130] sm:$0xff]  ;;  %v6788_v57 = vld [vmem:[#allocation3 + $0x168] sm:$0xff]  ;;  %v8032_v19 = vadd.f32 %v14583_v32, %v7968_v28  ;;  %v8030_v9 = vadd.f32 %v7966_v26, %v14590_v60  ;;  %v7969_v40 = vld [vmem:[#allocation3 + $0x120] sm:$0xff]  ;;  %v6683_v18 = vpop.f32.mrb[211].mxu1  ;;  %v11953_v21 = vpop.f32.mrb[210].mxu0 }
 0x31d   :  { %v8035_v56 = vadd.f32 %v14626_v41, %v7971_v58  ;;  %v7972_v34 = vld [vmem:[#allocation3 + $0x138] sm:$0xff]  ;;  %v7970_v39 = vld [vmem:[#allocation3 + $0x128] sm:$0xff]  ;;  %8090 = vst.msk [vmem:[#allocation3 + $0xe8] sm:$0xff] %vm1481_vm7, %v8026_v43  ;;  %8095 = vst.msk [vmem:[#allocation3 + $0x110] sm:$0xff] %vm1481_vm7, %v8031_v11  ;;  %v8033_v36 = vadd.f32 %v7969_v40, %v14629_v17 }
 0x31e   :  { %8093 = vst.msk [vmem:[#allocation3 + $0x100] sm:$0xff] %vm1481_vm7, %v8029_v7  ;;  %v8036_v42 = vadd.f32 %v14632_v14, %v7972_v34  ;;  %v8034_v32 = vadd.f32 %v7970_v39, %v14635_v59  ;;  %v7975_v60 = vld [vmem:[#allocation3 + $0x150] sm:$0xff]  ;;  %6917 = vst.msk [vmem:[#allocation3 + $0x170] sm:$0xff] %vm1481_vm7, %v6853_v27  ;;  %v7973_v41 = vld [vmem:[#allocation3 + $0x140] sm:$0xff]  ;;  %v6852_v59 = vadd.f32 %v6788_v57, %v6667_v47  ;;  %v7873_v7 = vpop.f32.mrb[211].mxu0 }
 0x31f   :  { %v7976_v55 = vld [vmem:[#allocation3 + $0x158] sm:$0xff]  ;;  %8096 = vst.msk [vmem:[#allocation3 + $0x118] sm:$0xff] %vm1481_vm7, %v8032_v19  ;;  %8094 = vst.msk [vmem:[#allocation3 + $0x108] sm:$0xff] %vm1481_vm7, %v8030_v9  ;;  %v8039_v45 = vadd.f32 %v11944_v23, %v7975_v60  ;;  %v8037_v63 = vadd.f32 %v7973_v41, %v7838_v31  ;;  %v7974_v14 = vld [vmem:[#allocation3 + $0x148] sm:$0xff] }
 0x320   :  { %8099 = vst.msk [vmem:[#allocation3 + $0x130] sm:$0xff] %vm1481_vm7, %v8035_v56  ;;  %6915 = vst.msk [vmem:[#allocation3 + $0x160] sm:$0xff] %vm1481_vm7, %v6851_v6  ;;  %v8040_v17 = vadd.f32 %v11945_v52, %v7976_v55  ;;  %v8038_v62 = vadd.f32 %v7974_v14, %v7841_v15  ;;  %v6793_v1 = vld [vmem:[#allocation3 + $0x190] sm:$0xff]  ;;  %v6791_v50 = vld [vmem:[#allocation3 + $0x180] sm:$0xff]  ;;  %v11890_v15 = vpop.f32.mrb[212].mxu1  ;;  %v11956_v6 = vpop.f32.mrb[212].mxu0 }
 0x321   :  { %8097 = vst.msk [vmem:[#allocation3 + $0x120] sm:$0xff] %vm1481_vm7, %v8033_v36  ;;  %8100 = vst.msk [vmem:[#allocation3 + $0x138] sm:$0xff] %vm1481_vm7, %v8036_v42  ;;  %v6857_v22 = vadd.f32 %v11886_v4, %v6793_v1  ;;  %v6855_v38 = vadd.f32 %v6791_v50, %v6680_v0  ;;  %v6794_v2 = vld [vmem:[#allocation3 + $0x198] sm:$0xff]  ;;  %v6792_v33 = vld [vmem:[#allocation3 + $0x188] sm:$0xff]  ;;  %v6696_v58 = vpop.f32.mrb[213].mxu1  ;;  %v7886_v42 = vpop.f32.mrb[213].mxu0 }
 0x322   :  { %8098 = vst.msk [vmem:[#allocation3 + $0x128] sm:$0xff] %vm1481_vm7, %v8034_v32  ;;  %6918 = vst.msk [vmem:[#allocation3 + $0x178] sm:$0xff] %vm1481_vm7, %v6854_v5  ;;  %v6858_v31 = vadd.f32 %v11887_v46, %v6794_v2  ;;  %v6856_v20 = vadd.f32 %v6792_v33, %v6683_v18  ;;  %v6797_v43 = vld [vmem:[#allocation3 + $0x1b0] sm:$0xff]  ;;  %v6795_v27 = vld [vmem:[#allocation3 + $0x1a0] sm:$0xff]  ;;  %v11891_v19 = vpop.f32.mrb[214].mxu1  ;;  %v11957_v41 = vpop.f32.mrb[214].mxu0 }
 0x323   :  { %8103 = vst.msk [vmem:[#allocation3 + $0x150] sm:$0xff] %vm1481_vm7, %v8039_v45  ;;  %8101 = vst.msk [vmem:[#allocation3 + $0x140] sm:$0xff] %vm1481_vm7, %v8037_v63  ;;  %v6861_v26 = vadd.f32 %v11890_v15, %v6797_v43  ;;  %v6859_v57 = vadd.f32 %v6795_v27, %v6696_v58  ;;  %v6798_v9 = vld [vmem:[#allocation3 + $0x1b8] sm:$0xff]  ;;  %v6699_v40 = vpop.f32.mrb[215].mxu1  ;;  %v6796_v34 = vld [vmem:[#allocation3 + $0x1a8] sm:$0xff]  ;;  %v7889_v63 = vpop.f32.mrb[215].mxu0 }
 0x324   :  { %8104 = vst.msk [vmem:[#allocation3 + $0x158] sm:$0xff] %vm1481_vm7, %v8040_v17  ;;  %6916 = vst.msk [vmem:[#allocation3 + $0x168] sm:$0xff] %vm1481_vm7, %v6852_v59  ;;  %v6862_v56 = vadd.f32 %v11891_v19, %v6798_v9  ;;  %v6860_v39 = vadd.f32 %v6796_v34, %v6699_v40  ;;  %v11894_v5 = vpop.f32.mrb[216].mxu1  ;;  %v6801_v47 = vld [vmem:[#allocation3 + $0x1d0] sm:$0xff]  ;;  %v8742_v58 = vld [vmem:[#allocation3] sm:$0xff] }
 0x325   :  { %8102 = vst.msk [vmem:[#allocation3 + $0x148] sm:$0xff] %vm1481_vm7, %v8038_v62  ;;  %v7979_v24 = vld [vmem:[#allocation3 + $0x170] sm:$0xff]  ;;  %6921 = vst.msk [vmem:[#allocation3 + $0x190] sm:$0xff] %vm1481_vm7, %v6857_v22  ;;  %v6865_v14 = vadd.f32 %v11894_v5, %v6801_v47  ;;  %v6712_v59 = vpop.f32.mrb[217].mxu1  ;;  %v6799_v62 = vld [vmem:[#allocation3 + $0x1c0] sm:$0xff] }
 0x326   :  { %v8043_v12 = vadd.f32 %v11948_v37, %v7979_v24  ;;  %6919 = vst.msk [vmem:[#allocation3 + $0x180] sm:$0xff] %vm1481_vm7, %v6855_v38  ;;  %6922 = vst.msk [vmem:[#allocation3 + $0x198] sm:$0xff] %vm1481_vm7, %v6858_v31  ;;  %v6863_v24 = vadd.f32 %v6799_v62, %v6712_v59  ;;  %v6805_v38 = vld [vmem:[#allocation3 + $0x1f0] sm:$0xff]  ;;  %v8745_v9 = vld [vmem:[#allocation3 + $0x18] sm:$0xff] }
 0x327   :  { %v7977_v61 = vld [vmem:[#allocation3 + $0x160] sm:$0xff]  ;;  %6920 = vst.msk [vmem:[#allocation3 + $0x188] sm:$0xff] %vm1481_vm7, %v6856_v20  ;;  %6925 = vst.msk [vmem:[#allocation3 + $0x1b0] sm:$0xff] %vm1481_vm7, %v6861_v26  ;;  %v8748_v47 = vld [vmem:[#allocation3 + $0x30] sm:$0xff] }
 0x328   :  { %v8041_v8 = vadd.f32 %v7977_v61, %v7854_v54  ;;  %8107 = vst.msk [vmem:[#allocation3 + $0x170] sm:$0xff] %vm1481_vm7, %v8043_v12  ;;  %6923 = vst.msk [vmem:[#allocation3 + $0x1a0] sm:$0xff] %vm1481_vm7, %v6859_v57  ;;  %v11895_v12 = vpop.f32.mrb[218].mxu1  ;;  %v6802_v54 = vld [vmem:[#allocation3 + $0x1d8] sm:$0xff]  ;;  %v6803_v20 = vld [vmem:[#allocation3 + $0x1e0] sm:$0xff] }
 0x329   :  { %v7980_v49 = vld [vmem:[#allocation3 + $0x178] sm:$0xff]  ;;  %6926 = vst.msk [vmem:[#allocation3 + $0x1b8] sm:$0xff] %vm1481_vm7, %v6862_v56  ;;  %6924 = vst.msk [vmem:[#allocation3 + $0x1a8] sm:$0xff] %vm1481_vm7, %v6860_v39  ;;  %v6866_v61 = vadd.f32 %v11895_v12, %v6802_v54 }
 0x32a   :  { %v8044_v13 = vadd.f32 %v11949_v44, %v7980_v49  ;;  %8105 = vst.msk [vmem:[#allocation3 + $0x160] sm:$0xff] %vm1481_vm7, %v8041_v8  ;;  %6929 = vst.msk [vmem:[#allocation3 + $0x1d0] sm:$0xff] %vm1481_vm7, %v6865_v14  ;;  %v6715_v8 = vpop.f32.mrb[219].mxu1  ;;  %v6800_v44 = vld [vmem:[#allocation3 + $0x1c8] sm:$0xff]  ;;  %v8746_v14 = vld [vmem:[#allocation3 + $0x20] sm:$0xff] }
 0x32b   :  { %v7978_v23 = vld [vmem:[#allocation3 + $0x168] sm:$0xff]  ;;  %6927 = vst.msk [vmem:[#allocation3 + $0x1c0] sm:$0xff] %vm1481_vm7, %v6863_v24  ;;  %v6864_v49 = vadd.f32 %v6800_v44, %v6715_v8  ;;  %6930 = vst.msk [vmem:[#allocation3 + $0x1d8] sm:$0xff] %vm1481_vm7, %v6866_v61  ;;  %v11960_v4 = vpop.f32.mrb[216].mxu0  ;;  %v8749_v12 = vld [vmem:[#allocation3 + $0x38] sm:$0xff] }
 0x32c   :  { %v8042_v25 = vadd.f32 %v7978_v23, %v7857_v35  ;;  %8108 = vst.msk [vmem:[#allocation3 + $0x178] sm:$0xff] %vm1481_vm7, %v8044_v13  ;;  %v7983_v3 = vld [vmem:[#allocation3 + $0x190] sm:$0xff]  ;;  %v7902_v35 = vpop.f32.mrb[217].mxu0 }
 0x32d   :  { %v8047_v52 = vadd.f32 %v11952_v53, %v7983_v3  ;;  %v7981_v16 = vld [vmem:[#allocation3 + $0x180] sm:$0xff]  ;;  %v7984_v51 = vld [vmem:[#allocation3 + $0x198] sm:$0xff]  ;;  %6928 = vst.msk [vmem:[#allocation3 + $0x1c8] sm:$0xff] %vm1481_vm7, %v6864_v49  ;;  %v11961_v0 = vpop.f32.mrb[218].mxu0 }
 0x32e   :  { %8106 = vst.msk [vmem:[#allocation3 + $0x168] sm:$0xff] %vm1481_vm7, %v8042_v25  ;;  %v8045_v48 = vadd.f32 %v7981_v16, %v7870_v30  ;;  %v8048_v11 = vadd.f32 %v11953_v21, %v7984_v51  ;;  %v7982_v28 = vld [vmem:[#allocation3 + $0x188] sm:$0xff]  ;;  %v7987_v10 = vld [vmem:[#allocation3 + $0x1b0] sm:$0xff]  ;;  %v11898_v25 = vpop.f32.mrb[220].mxu1  ;;  %v7905_v2 = vpop.f32.mrb[219].mxu0  ;;  %v6806_v30 = vld [vmem:[#allocation3 + $0x1f8] sm:$0xff] }
 0x32f   :  { %8111 = vst.msk [vmem:[#allocation3 + $0x190] sm:$0xff] %vm1481_vm7, %v8047_v52  ;;  %v8046_v29 = vadd.f32 %v7982_v28, %v7873_v7  ;;  %v8051_v36 = vadd.f32 %v11956_v6, %v7987_v10  ;;  %v7985_v32 = vld [vmem:[#allocation3 + $0x1a0] sm:$0xff]  ;;  %v6869_v18 = vadd.f32 %v11898_v25, %v6805_v38  ;;  %v6728_v33 = vpop.f32.mrb[221].mxu1  ;;  %v6804_v21 = vld [vmem:[#allocation3 + $0x1e8] sm:$0xff]  ;;  %v8752_v38 = vld [vmem:[#allocation3 + $0x50] sm:$0xff] }
 0x330   :  { %8109 = vst.msk [vmem:[#allocation3 + $0x180] sm:$0xff] %vm1481_vm7, %v8045_v48  ;;  %8112 = vst.msk [vmem:[#allocation3 + $0x198] sm:$0xff] %vm1481_vm7, %v8048_v11  ;;  %v8049_v60 = vadd.f32 %v7985_v32, %v7886_v42  ;;  %v7988_v55 = vld [vmem:[#allocation3 + $0x1b8] sm:$0xff]  ;;  %v7986_v17 = vld [vmem:[#allocation3 + $0x1a8] sm:$0xff]  ;;  %v6867_v3 = vadd.f32 %v6803_v20, %v6728_v33  ;;  %v11899_v52 = vpop.f32.mrb[222].mxu1 }
 0x331   :  { %8110 = vst.msk [vmem:[#allocation3 + $0x188] sm:$0xff] %vm1481_vm7, %v8046_v29  ;;  %8115 = vst.msk [vmem:[#allocation3 + $0x1b0] sm:$0xff] %vm1481_vm7, %v8051_v36  ;;  %v8052_v45 = vadd.f32 %v11957_v41, %v7988_v55  ;;  %v8050_v37 = vadd.f32 %v7986_v17, %v7889_v63  ;;  %v7991_v1 = vld [vmem:[#allocation3 + $0x1d0] sm:$0xff]  ;;  %v6870_v16 = vadd.f32 %v11899_v52, %v6806_v30  ;;  %v6731_v48 = vpop.f32.mrb[223].mxu1  ;;  %v8743_v10 = vld [vmem:[#allocation3 + $0x8] sm:$0xff] }
 0x332   :  { %8113 = vst.msk [vmem:[#allocation3 + $0x1a0] sm:$0xff] %vm1481_vm7, %v8049_v60  ;;  %v8055_v13 = vadd.f32 %v11960_v4, %v7991_v1  ;;  %v7989_v23 = vld [vmem:[#allocation3 + $0x1c0] sm:$0xff]  ;;  %v7992_v50 = vld [vmem:[#allocation3 + $0x1d8] sm:$0xff]  ;;  %6933 = vst.msk [vmem:[#allocation3 + $0x1f0] sm:$0xff] %vm1481_vm7, %v6869_v18  ;;  %v6868_v51 = vadd.f32 %v6804_v21, %v6731_v48 }
 0x333   :  { %8116 = vst.msk [vmem:[#allocation3 + $0x1b8] sm:$0xff] %vm1481_vm7, %v8052_v45  ;;  %8114 = vst.msk [vmem:[#allocation3 + $0x1a8] sm:$0xff] %vm1481_vm7, %v8050_v37  ;;  %v8053_v22 = vadd.f32 %v7989_v23, %v7902_v35  ;;  %v8056_v46 = vadd.f32 %v11961_v0, %v7992_v50  ;;  %v8744_v11 = vld [vmem:[#allocation3 + $0x10] sm:$0xff]  ;;  %v8747_v4 = vld [vmem:[#allocation3 + $0x28] sm:$0xff] }
 0x334   :  { %8119 = vst.msk [vmem:[#allocation3 + $0x1d0] sm:$0xff] %vm1481_vm7, %v8055_v13  ;;  %v7990_v31 = vld [vmem:[#allocation3 + $0x1c8] sm:$0xff]  ;;  %6931 = vst.msk [vmem:[#allocation3 + $0x1e0] sm:$0xff] %vm1481_vm7, %v6867_v3  ;;  %v14774_v18 = vld [vmem:[%s15293_s2] ss:$0 sm:$0xff] }
 0x335   :  { %8117 = vst.msk [vmem:[#allocation3 + $0x1c0] sm:$0xff] %vm1481_vm7, %v8053_v22  ;;  %v8054_v53 = vadd.f32 %v7990_v31, %v7905_v2  ;;  %8120 = vst.msk [vmem:[#allocation3 + $0x1d8] sm:$0xff] %vm1481_vm7, %v8056_v46  ;;  %v8750_v31 = vld [vmem:[#allocation3 + $0x40] sm:$0xff]  ;;  %v8753_v52 = vld [vmem:[#allocation3 + $0x58] sm:$0xff] }
 0x336   :  { %6934 = vst.msk [vmem:[#allocation3 + $0x1f8] sm:$0xff] %vm1481_vm7, %v6870_v16  ;;  %6932 = vst.msk [vmem:[#allocation3 + $0x1e8] sm:$0xff] %vm1481_vm7, %v6868_v51  ;;  %v11970_v43 = vpop.f32.mrb[224].mxu1 }
 0x337   :  { %8118 = vst.msk [vmem:[#allocation3 + $0x1c8] sm:$0xff] %vm1481_vm7, %v8054_v53  ;;  %v11964_v15 = vpop.f32.mrb[220].mxu0  ;;  %v8808_v28 = vadd.f32 %v11970_v43, %v8744_v11  ;;  %v8487_v26 = vpop.f32.mrb[225].mxu1  ;;  %v14780_v11 = vld [vmem:[%s15294_s3] ss:$0 sm:$0xff] }
 0x338   :  { %v7918_v7 = vpop.f32.mrb[221].mxu0  ;;  %v8806_v57 = vadd.f32 %v8742_v58, %v8487_v26  ;;  %v11971_v19 = vpop.f32.mrb[226].mxu1 }
 0x339   :  { %v7995_v27 = vld [vmem:[#allocation3 + $0x1f0] sm:$0xff]  ;;  %v11965_v29 = vpop.f32.mrb[222].mxu0  ;;  %8872 = vst.msk [vmem:[#allocation3 + $0x10] sm:$0xff] %vm1481_vm7, %v8808_v28  ;;  %v8809_v39 = vadd.f32 %v11971_v19, %v8745_v9  ;;  %v8490_v6 = vpop.f32.mrb[227].mxu1 }
 0x33a   :  { %v8059_v56 = vadd.f32 %v11964_v15, %v7995_v27  ;;  %v7921_v34 = vpop.f32.mrb[223].mxu0  ;;  %8870 = vst.msk [vmem:[#allocation3] sm:$0xff] %vm1481_vm7, %v8806_v57  ;;  %v8807_v32 = vadd.f32 %v8743_v10, %v8490_v6  ;;  %v8751_v15 = vld [vmem:[#allocation3 + $0x48] sm:$0xff] }
 0x33b   :  { %v7993_v40 = vld [vmem:[#allocation3 + $0x1e0] sm:$0xff]  ;;  %8873 = vst.msk [vmem:[#allocation3 + $0x18] sm:$0xff] %vm1481_vm7, %v8809_v39 }
 0x33c   :  { %v8057_v36 = vadd.f32 %v7993_v40, %v7918_v7  ;;  %8123 = vst.msk [vmem:[#allocation3 + $0x1f0] sm:$0xff] %vm1481_vm7, %v8059_v56  ;;  %8871 = vst.msk [vmem:[#allocation3 + $0x8] sm:$0xff] %vm1481_vm7, %v8807_v32 }
 0x33d   :  { %v7996_v42 = vld [vmem:[#allocation3 + $0x1f8] sm:$0xff]  ;;  %v7994_v41 = vld [vmem:[#allocation3 + $0x1e8] sm:$0xff] }
 0x33e   :  { %v8060_v60 = vadd.f32 %v11965_v29, %v7996_v42  ;;  %8121 = vst.msk [vmem:[#allocation3 + $0x1e0] sm:$0xff] %vm1481_vm7, %v8057_v36  ;;  %v8058_v55 = vadd.f32 %v7994_v41, %v7921_v34 }
 0x340   :  { %8124 = vst.msk [vmem:[#allocation3 + $0x1f8] sm:$0xff] %vm1481_vm7, %v8060_v60  ;;  %8122 = vst.msk [vmem:[#allocation3 + $0x1e8] sm:$0xff] %vm1481_vm7, %v8058_v55  ;;  %v11974_v5 = vpop.f32.mrb[228].mxu1  ;;  %v9933_v59 = vld [vmem:[#allocation3 + $0x10] sm:$0xff] }
 0x341   :  { %v12036_v45 = vpop.f32.mrb[224].mxu0  ;;  %v8812_v63 = vadd.f32 %v11974_v5, %v8748_v47  ;;  %v8503_v17 = vpop.f32.mrb[229].mxu1  ;;  %v9931_v61 = vld [vmem:[#allocation3] sm:$0xff]  ;;  %v8756_v55 = vld [vmem:[#allocation3 + $0x70] sm:$0xff] }
 0x342   :  { %v9676_v62 = vpop.f32.mrb[225].mxu0  ;;  %v8810_v37 = vadd.f32 %v8746_v14, %v8503_v17  ;;  %v11975_v24 = vpop.f32.mrb[230].mxu1  ;;  %v9997_v54 = vadd.f32 %v12036_v45, %v9933_v59  ;;  %v9934_v13 = vld [vmem:[#allocation3 + $0x18] sm:$0xff]  ;;  %v8754_v14 = vld [vmem:[#allocation3 + $0x60] sm:$0xff] }
 0x343   :  { %8876 = vst.msk [vmem:[#allocation3 + $0x30] sm:$0xff] %vm1481_vm7, %v8812_v63  ;;  %v12037_v8 = vpop.f32.mrb[226].mxu0  ;;  %v8813_v44 = vadd.f32 %v11975_v24, %v8749_v12  ;;  %v8506_v49 = vpop.f32.mrb[231].mxu1  ;;  %v9995_v1 = vadd.f32 %v9931_v61, %v9676_v62  ;;  %v9932_v0 = vld [vmem:[#allocation3 + $0x8] sm:$0xff]  ;;  %v8757_v61 = vld [vmem:[#allocation3 + $0x78] sm:$0xff] }
 0x344   :  { %8874 = vst.msk [vmem:[#allocation3 + $0x20] sm:$0xff] %vm1481_vm7, %v8810_v37  ;;  %v9679_v35 = vpop.f32.mrb[227].mxu0  ;;  %v8811_v23 = vadd.f32 %v8747_v4, %v8506_v49  ;;  %10061 = vst.msk [vmem:[#allocation3 + $0x10] sm:$0xff] %vm1481_vm7, %v9997_v54  ;;  %v9998_v22 = vadd.f32 %v12037_v8, %v9934_v13 }
 0x345   :  { %8877 = vst.msk [vmem:[#allocation3 + $0x38] sm:$0xff] %vm1481_vm7, %v8813_v44  ;;  %10059 = vst.msk [vmem:[#allocation3] sm:$0xff] %vm1481_vm7, %v9995_v1  ;;  %v9996_v50 = vadd.f32 %v9932_v0, %v9679_v35 }
 0x346   :  { %8875 = vst.msk [vmem:[#allocation3 + $0x28] sm:$0xff] %vm1481_vm7, %v8811_v23  ;;  %10062 = vst.msk [vmem:[#allocation3 + $0x18] sm:$0xff] %vm1481_vm7, %v9998_v22  ;;  %v8755_v22 = vld [vmem:[#allocation3 + $0x68] sm:$0xff] }
 0x347   :  { %10060 = vst.msk [vmem:[#allocation3 + $0x8] sm:$0xff] %vm1481_vm7, %v9996_v50 }
 0x34a   :  { %v9937_v20 = vld [vmem:[#allocation3 + $0x30] sm:$0xff] }
 0x34b   :  { %v9935_v48 = vld [vmem:[#allocation3 + $0x20] sm:$0xff]  ;;  %v10128_v43 = vld [vmem:[#allocation3 + $0x10] sm:$0xff] }
 0x34c   :  { %v11978_v25 = vpop.f32.mrb[232].mxu1  ;;  %v9938_v26 = vld [vmem:[#allocation3 + $0x38] sm:$0xff]  ;;  %v10199_v27 = vmul.f32 %v14774_v18, %v10128_v43  ;;  %v10126_v29 = vld [vmem:[#allocation3] sm:$0xff] }
 0x34d   :  { %v8816_v46 = vadd.f32 %v11978_v25, %v8752_v38  ;;  %v8519_v2 = vpop.f32.mrb[233].mxu1  ;;  %v9936_v9 = vld [vmem:[#allocation3 + $0x28] sm:$0xff]  ;;  %v10197_v56 = vmul.f32 %v14774_v18, %v10126_v29  ;;  %v10129_v40 = vld [vmem:[#allocation3 + $0x18] sm:$0xff] }
 0x34e   :  { %v12040_v33 = vpop.f32.mrb[228].mxu0  ;;  %v8814_v53 = vadd.f32 %v8750_v31, %v8519_v2  ;;  %v11979_v3 = vpop.f32.mrb[234].mxu1  ;;  %v10270_v39 = vadd.f32 %v14780_v11, %v10199_v27  ;;  %v10200_v6 = vmul.f32 %v14774_v18, %v10129_v40  ;;  %v10127_v10 = vld [vmem:[#allocation3 + $0x8] sm:$0xff]  ;;  %v8760_v27 = vld [vmem:[#allocation3 + $0x90] sm:$0xff]  ;;  %v8758_v40 = vld [vmem:[#allocation3 + $0x80] sm:$0xff] }
 0x34f   :  { %v10001_v30 = vadd.f32 %v12040_v33, %v9937_v20  ;;  %8880 = vst.msk [vmem:[#allocation3 + $0x50] sm:$0xff] %vm1481_vm7, %v8816_v46  ;;  %v9692_v16 = vpop.f32.mrb[229].mxu0  ;;  %v8817_v21 = vadd.f32 %v11979_v3, %v8753_v52  ;;  %v8522_v51 = vpop.f32.mrb[235].mxu1  ;;  %v10268_v36 = vadd.f32 %v14780_v11, %v10197_v56  ;;  %v10198_v42 = vmul.f32 %v14774_v18, %v10127_v10 }
 0x350   :  { %v9999_v7 = vadd.f32 %v9935_v48, %v9692_v16  ;;  %8878 = vst.msk [vmem:[#allocation3 + $0x40] sm:$0xff] %vm1481_vm7, %v8814_v53  ;;  %v12041_v28 = vpop.f32.mrb[230].mxu0  ;;  %v8815_v58 = vadd.f32 %v8751_v15, %v8522_v51  ;;  %v10334_v32 = vmax.f32 %v10270_v39, 0.0  ;;  %v10271_v60 = vadd.f32 %v14780_v11, %v10200_v6 }
 0x351   :  { %10065 = vst.msk [vmem:[#allocation3 + $0x30] sm:$0xff] %vm1481_vm7, %v10001_v30  ;;  %v10002_v57 = vadd.f32 %v12041_v28, %v9938_v26  ;;  %8881 = vst.msk [vmem:[#allocation3 + $0x58] sm:$0xff] %vm1481_vm7, %v8817_v21  ;;  %v9695_v19 = vpop.f32.mrb[231].mxu0  ;;  %v10332_v5 = vmax.f32 %v10268_v36, 0.0  ;;  %v10269_v47 = vadd.f32 %v14780_v11, %v10198_v42 }
 0x352   :  { %10063 = vst.msk [vmem:[#allocation3 + $0x20] sm:$0xff] %vm1481_vm7, %v9999_v7  ;;  %v10000_v34 = vadd.f32 %v9936_v9, %v9695_v19  ;;  %8879 = vst.msk [vmem:[#allocation3 + $0x48] sm:$0xff] %vm1481_vm7, %v8815_v58  ;;  %v11145_v59 = vpack.c.bf16 %v10334_v32, %v10334_v32  ;;  %v10335_v62 = vmax.f32 %v10271_v60, 0.0  ;;  %v8761_v32 = vld [vmem:[#allocation3 + $0x98] sm:$0xff] }
 0x353   :  { %10066 = vst.msk [vmem:[#allocation3 + $0x38] sm:$0xff] %vm1481_vm7, %v10002_v57  ;;  %v11143_v8 = vpack.c.bf16 %v10332_v5, %v10332_v5  ;;  %v10333_v44 = vmax.f32 %v10269_v47, 0.0 }
 0x354   :  { %10064 = vst.msk [vmem:[#allocation3 + $0x28] sm:$0xff] %vm1481_vm7, %v10000_v34  ;;  %v11146_v0 = vpack.c.bf16 %v10335_v62, %v10335_v62 }
 0x355   :  { %10655 = vst.msk [vmem:[%s15295_s4 + $0x8] sm:$0xf] %vm10652_vm8, %v11145_v59  ;;  %10653 = vst.msk [vmem:[%s15295_s4] sm:$0xf] %vm10652_vm8, %v11143_v8  ;;  %v11144_v33 = vpack.c.bf16 %v10333_v44, %v10333_v44 }
 0x356   :  { %v9941_v45 = vld [vmem:[#allocation3 + $0x50] sm:$0xff]  ;;  %10656 = vst.msk [vmem:[%s15295_s4 + $0xc] sm:$0xf] %vm10652_vm8, %v11146_v0 }
 0x357   :  { %v11982_v41 = vpop.f32.mrb[236].mxu1  ;;  %v9939_v24 = vld [vmem:[#allocation3 + $0x40] sm:$0xff]  ;;  %10654 = vst.msk [vmem:[%s15295_s4 + $0x4] sm:$0xf] %vm10652_vm8, %v11144_v33 }
 0x358   :  { %v8820_v63 = vadd.f32 %v11982_v41, %v8756_v55  ;;  %v8535_v17 = vpop.f32.mrb[237].mxu1  ;;  %v10132_v49 = vld [vmem:[#allocation3 + $0x30] sm:$0xff]  ;;  %v9942_v13 = vld [vmem:[#allocation3 + $0x58] sm:$0xff] }
 0x359   :  { %v12044_v37 = vpop.f32.mrb[232].mxu0  ;;  %v8818_v12 = vadd.f32 %v8754_v14, %v8535_v17  ;;  %v11983_v54 = vpop.f32.mrb[238].mxu1  ;;  %v10203_v50 = vmul.f32 %v14774_v18, %v10132_v49  ;;  %v10130_v25 = vld [vmem:[#allocation3 + $0x20] sm:$0xff]  ;;  %v9940_v2 = vld [vmem:[#allocation3 + $0x48] sm:$0xff] }
 0x35a   :  { %v10005_v4 = vadd.f32 %v12044_v37, %v9941_v45  ;;  %8884 = vst.msk [vmem:[#allocation3 + $0x70] sm:$0xff] %vm1481_vm7, %v8820_v63  ;;  %v9708_v1 = vpop.f32.mrb[233].mxu0  ;;  %v8821_v35 = vadd.f32 %v11983_v54, %v8757_v61  ;;  %v8538_v23 = vpop.f32.mrb[239].mxu1  ;;  %v10201_v20 = vmul.f32 %v14774_v18, %v10130_v25  ;;  %v10133_v53 = vld [vmem:[#allocation3 + $0x38] sm:$0xff]  ;;  %v8759_v17 = vld [vmem:[#allocation3 + $0x88] sm:$0xff] }
 0x35b   :  { %v10003_v38 = vadd.f32 %v9939_v24, %v9708_v1  ;;  %8882 = vst.msk [vmem:[#allocation3 + $0x60] sm:$0xff] %vm1481_vm7, %v8818_v12  ;;  %v12045_v46 = vpop.f32.mrb[234].mxu0  ;;  %v8819_v31 = vadd.f32 %v8755_v22, %v8538_v23  ;;  %v10274_v30 = vadd.f32 %v14780_v11, %v10203_v50  ;;  %v10204_v16 = vmul.f32 %v14774_v18, %v10133_v53  ;;  %v10131_v48 = vld [vmem:[#allocation3 + $0x28] sm:$0xff] }
 0x35c   :  { %10069 = vst.msk [vmem:[#allocation3 + $0x50] sm:$0xff] %vm1481_vm7, %v10005_v4  ;;  %v10006_v3 = vadd.f32 %v12045_v46, %v9942_v13  ;;  %8885 = vst.msk [vmem:[#allocation3 + $0x78] sm:$0xff] %vm1481_vm7, %v8821_v35  ;;  %v9711_v52 = vpop.f32.mrb[235].mxu0  ;;  %v10272_v51 = vadd.f32 %v14780_v11, %v10201_v20  ;;  %v10202_v15 = vmul.f32 %v14774_v18, %v10131_v48 }
 0x35d   :  { %10067 = vst.msk [vmem:[#allocation3 + $0x40] sm:$0xff] %vm1481_vm7, %v10003_v38  ;;  %v10004_v21 = vadd.f32 %v9940_v2, %v9711_v52  ;;  %8883 = vst.msk [vmem:[#allocation3 + $0x68] sm:$0xff] %vm1481_vm7, %v8819_v31  ;;  %v10338_v43 = vmax.f32 %v10274_v30, 0.0  ;;  %v10275_v7 = vadd.f32 %v14780_v11, %v10204_v16  ;;  %v8764_v2 = vld [vmem:[#allocation3 + $0xb0] sm:$0xff]  ;;  %v8762_v52 = vld [vmem:[#allocation3 + $0xa0] sm:$0xff] }
 0x35e   :  { %10070 = vst.msk [vmem:[#allocation3 + $0x58] sm:$0xff] %vm1481_vm7, %v10006_v3  ;;  %v10336_v28 = vmax.f32 %v10272_v51, 0.0  ;;  %v10273_v26 = vadd.f32 %v14780_v11, %v10202_v15 }
 0x35f   :  { %10068 = vst.msk [vmem:[#allocation3 + $0x48] sm:$0xff] %vm1481_vm7, %v10004_v21  ;;  %v11149_v29 = vpack.c.bf16 %v10338_v43, %v10338_v43  ;;  %v10339_v57 = vmax.f32 %v10275_v7, 0.0  ;;  %v8765_v43 = vld [vmem:[#allocation3 + $0xb8] sm:$0xff] }
 0x360   :  { %v11147_v34 = vpack.c.bf16 %v10336_v28, %v10336_v28  ;;  %v10337_v39 = vmax.f32 %v10273_v26, 0.0 }
 0x361   :  { %v9945_v19 = vld [vmem:[#allocation3 + $0x70] sm:$0xff]  ;;  %10659 = vst.msk [vmem:[%s15295_s4 + $0x18] sm:$0xf] %vm10652_vm8, %v11149_v29  ;;  %v11150_v60 = vpack.c.bf16 %v10339_v57, %v10339_v57 }
 0x362   :  { %v9943_v10 = vld [vmem:[#allocation3 + $0x60] sm:$0xff]  ;;  %10657 = vst.msk [vmem:[%s15295_s4 + $0x10] sm:$0xf] %vm10652_vm8, %v11147_v34  ;;  %v11148_v14 = vpack.c.bf16 %v10337_v39, %v10337_v39 }
 0x363   :  { %v11986_v58 = vpop.f32.mrb[240].mxu1  ;;  %v10136_v41 = vld [vmem:[#allocation3 + $0x50] sm:$0xff]  ;;  %v9946_v47 = vld [vmem:[#allocation3 + $0x78] sm:$0xff]  ;;  %10660 = vst.msk [vmem:[%s15295_s4 + $0x1c] sm:$0xf] %vm10652_vm8, %v11150_v60 }
 0x364   :  { %v8824_v9 = vadd.f32 %v11986_v58, %v8760_v27  ;;  %v8551_v56 = vpop.f32.mrb[241].mxu1  ;;  %v12048_v6 = vpop.f32.mrb[236].mxu0  ;;  %v10207_v59 = vmul.f32 %v14774_v18, %v10136_v41  ;;  %v10134_v62 = vld [vmem:[#allocation3 + $0x40] sm:$0xff]  ;;  %v9944_v12 = vld [vmem:[#allocation3 + $0x68] sm:$0xff]  ;;  %10658 = vst.msk [vmem:[%s15295_s4 + $0x14] sm:$0xf] %vm10652_vm8, %v11148_v14 }
 0x365   :  { %v8822_v36 = vadd.f32 %v8758_v40, %v8551_v56  ;;  %v11987_v42 = vpop.f32.mrb[242].mxu1  ;;  %v10009_v55 = vadd.f32 %v12048_v6, %v9945_v19  ;;  %v9724_v5 = vpop.f32.mrb[237].mxu0  ;;  %v10205_v61 = vmul.f32 %v14774_v18, %v10134_v62  ;;  %v10137_v8 = vld [vmem:[#allocation3 + $0x58] sm:$0xff]  ;;  %v8763_v19 = vld [vmem:[#allocation3 + $0xa8] sm:$0xff] }
 0x366   :  { %8888 = vst.msk [vmem:[#allocation3 + $0x90] sm:$0xff] %vm1481_vm7, %v8824_v9  ;;  %v8825_v45 = vadd.f32 %v11987_v42, %v8761_v32  ;;  %v8554_v63 = vpop.f32.mrb[243].mxu1  ;;  %v10007_v37 = vadd.f32 %v9943_v10, %v9724_v5  ;;  %v12049_v24 = vpop.f32.mrb[238].mxu0  ;;  %v10278_v4 = vadd.f32 %v14780_v11, %v10207_v59  ;;  %v10208_v1 = vmul.f32 %v14774_v18, %v10137_v8  ;;  %v10135_v13 = vld [vmem:[#allocation3 + $0x48] sm:$0xff] }
 0x367   :  { %8886 = vst.msk [vmem:[#allocation3 + $0x80] sm:$0xff] %vm1481_vm7, %v8822_v36  ;;  %v8823_v54 = vadd.f32 %v8759_v17, %v8554_v63  ;;  %10073 = vst.msk [vmem:[#allocation3 + $0x70] sm:$0xff] %vm1481_vm7, %v10009_v55  ;;  %v10010_v44 = vadd.f32 %v12049_v24, %v9946_v47  ;;  %v9727_v49 = vpop.f32.mrb[239].mxu0  ;;  %v10276_v23 = vadd.f32 %v14780_v11, %v10205_v61  ;;  %v8768_v24 = vld [vmem:[#allocation3 + $0xd0] sm:$0xff] }
 0x368   :  { %8889 = vst.msk [vmem:[#allocation3 + $0x98] sm:$0xff] %vm1481_vm7, %v8825_v45  ;;  %10071 = vst.msk [vmem:[#allocation3 + $0x60] sm:$0xff] %vm1481_vm7, %v10007_v37  ;;  %v10008_v35 = vadd.f32 %v9944_v12, %v9727_v49  ;;  %v10206_v22 = vmul.f32 %v14774_v18, %v10135_v13  ;;  %v10342_v0 = vmax.f32 %v10278_v4, 0.0  ;;  %v10279_v50 = vadd.f32 %v14780_v11, %v10208_v1  ;;  %v8766_v49 = vld [vmem:[#allocation3 + $0xc0] sm:$0xff] }
 0x369   :  { %8887 = vst.msk [vmem:[#allocation3 + $0x88] sm:$0xff] %vm1481_vm7, %v8823_v54  ;;  %10074 = vst.msk [vmem:[#allocation3 + $0x78] sm:$0xff] %vm1481_vm7, %v10010_v44  ;;  %v10340_v25 = vmax.f32 %v10276_v23, 0.0 }
 0x36a   :  { %10072 = vst.msk [vmem:[#allocation3 + $0x68] sm:$0xff] %vm1481_vm7, %v10008_v35  ;;  %v10277_v38 = vadd.f32 %v14780_v11, %v10206_v22  ;;  %v11153_v31 = vpack.c.bf16 %v10342_v0, %v10342_v0  ;;  %v10343_v33 = vmax.f32 %v10279_v50, 0.0  ;;  %v8769_v0 = vld [vmem:[#allocation3 + $0xd8] sm:$0xff] }
 0x36b   :  { %v11151_v30 = vpack.c.bf16 %v10340_v25, %v10340_v25 }
 0x36c   :  { %v10341_v16 = vmax.f32 %v10277_v38, 0.0  ;;  %10663 = vst.msk [vmem:[%s15295_s4 + $0x28] sm:$0xf] %vm10652_vm8, %v11153_v31  ;;  %v11154_v7 = vpack.c.bf16 %v10343_v33, %v10343_v33 }
 0x36d   :  { %v9949_v20 = vld [vmem:[#allocation3 + $0x90] sm:$0xff]  ;;  %10661 = vst.msk [vmem:[%s15295_s4 + $0x20] sm:$0xf] %vm10652_vm8, %v11151_v30 }
 0x36e   :  { %v11990_v46 = vpop.f32.mrb[244].mxu1  ;;  %v9947_v21 = vld [vmem:[#allocation3 + $0x80] sm:$0xff]  ;;  %v10140_v28 = vld [vmem:[#allocation3 + $0x70] sm:$0xff]  ;;  %v11152_v9 = vpack.c.bf16 %v10341_v16, %v10341_v16  ;;  %10664 = vst.msk [vmem:[%s15295_s4 + $0x2c] sm:$0xf] %vm10652_vm8, %v11154_v7 }
 0x36f   :  { %v8828_v53 = vadd.f32 %v11990_v46, %v8764_v2  ;;  %v8567_v3 = vpop.f32.mrb[245].mxu1  ;;  %v9950_v27 = vld [vmem:[#allocation3 + $0x98] sm:$0xff]  ;;  %v10211_v56 = vmul.f32 %v14774_v18, %v10140_v28  ;;  %v10138_v40 = vld [vmem:[#allocation3 + $0x60] sm:$0xff] }
 0x370   :  { %v12052_v48 = vpop.f32.mrb[240].mxu0  ;;  %v8826_v51 = vadd.f32 %v8762_v52, %v8567_v3  ;;  %v11991_v15 = vpop.f32.mrb[246].mxu1  ;;  %v9948_v6 = vld [vmem:[#allocation3 + $0x88] sm:$0xff]  ;;  %v10209_v36 = vmul.f32 %v14774_v18, %v10138_v40  ;;  %v10141_v42 = vld [vmem:[#allocation3 + $0x78] sm:$0xff]  ;;  %10662 = vst.msk [vmem:[%s15295_s4 + $0x24] sm:$0xf] %vm10652_vm8, %v11152_v9 }
 0x371   :  { %v10013_v26 = vadd.f32 %v12052_v48, %v9949_v20  ;;  %8892 = vst.msk [vmem:[#allocation3 + $0xb0] sm:$0xff] %vm1481_vm7, %v8828_v53  ;;  %v9740_v58 = vpop.f32.mrb[241].mxu0  ;;  %v8829_v29 = vadd.f32 %v11991_v15, %v8765_v43  ;;  %v8570_v57 = vpop.f32.mrb[247].mxu1  ;;  %v10282_v41 = vadd.f32 %v14780_v11, %v10211_v56  ;;  %v10212_v55 = vmul.f32 %v14774_v18, %v10141_v42  ;;  %v10139_v5 = vld [vmem:[#allocation3 + $0x68] sm:$0xff] }
 0x372   :  { %v10011_v34 = vadd.f32 %v9947_v21, %v9740_v58  ;;  %8890 = vst.msk [vmem:[#allocation3 + $0xa0] sm:$0xff] %vm1481_vm7, %v8826_v51  ;;  %v12053_v39 = vpop.f32.mrb[242].mxu0  ;;  %v8827_v10 = vadd.f32 %v8763_v19, %v8570_v57  ;;  %v10280_v45 = vadd.f32 %v14780_v11, %v10209_v36  ;;  %v10210_v63 = vmul.f32 %v14774_v18, %v10139_v5  ;;  %v8767_v20 = vld [vmem:[#allocation3 + $0xc8] sm:$0xff] }
 0x373   :  { %10077 = vst.msk [vmem:[#allocation3 + $0x90] sm:$0xff] %vm1481_vm7, %v10013_v26  ;;  %v10014_v32 = vadd.f32 %v12053_v39, %v9950_v27  ;;  %8893 = vst.msk [vmem:[#allocation3 + $0xb8] sm:$0xff] %vm1481_vm7, %v8829_v29  ;;  %v9743_v60 = vpop.f32.mrb[243].mxu0  ;;  %v10346_v17 = vmax.f32 %v10282_v41, 0.0  ;;  %v10283_v14 = vadd.f32 %v14780_v11, %v10212_v55  ;;  %v8772_v39 = vld [vmem:[#allocation3 + $0xf0] sm:$0xff] }
 0x374   :  { %10075 = vst.msk [vmem:[#allocation3 + $0x80] sm:$0xff] %vm1481_vm7, %v10011_v34  ;;  %v10012_v47 = vadd.f32 %v9948_v6, %v9743_v60  ;;  %8891 = vst.msk [vmem:[#allocation3 + $0xa8] sm:$0xff] %vm1481_vm7, %v8827_v10  ;;  %v10344_v59 = vmax.f32 %v10280_v45, 0.0  ;;  %v10281_v62 = vadd.f32 %v14780_v11, %v10210_v63  ;;  %v8770_v60 = vld [vmem:[#allocation3 + $0xe0] sm:$0xff] }
 0x375   :  { %10078 = vst.msk [vmem:[#allocation3 + $0x98] sm:$0xff] %vm1481_vm7, %v10014_v32  ;;  %v11157_v12 = vpack.c.bf16 %v10346_v17, %v10346_v17  ;;  %v10347_v54 = vmax.f32 %v10283_v14, 0.0  ;;  %v8773_v17 = vld [vmem:[#allocation3 + $0xf8] sm:$0xff] }
 0x376   :  { %10076 = vst.msk [vmem:[#allocation3 + $0x88] sm:$0xff] %vm1481_vm7, %v10012_v47  ;;  %v11155_v4 = vpack.c.bf16 %v10344_v59, %v10344_v59  ;;  %v10345_v1 = vmax.f32 %v10281_v62, 0.0 }
 0x377   :  { %10667 = vst.msk [vmem:[%s15295_s4 + $0x38] sm:$0xf] %vm10652_vm8, %v11157_v12  ;;  %v11158_v50 = vpack.c.bf16 %v10347_v54, %v10347_v54 }
 0x378   :  { %v11994_v37 = vpop.f32.mrb[248].mxu1  ;;  %v9953_v61 = vld [vmem:[#allocation3 + $0xb0] sm:$0xff]  ;;  %10665 = vst.msk [vmem:[%s15295_s4 + $0x30] sm:$0xf] %vm10652_vm8, %v11155_v4  ;;  %v11156_v53 = vpack.c.bf16 %v10345_v1, %v10345_v1 }
 0x379   :  { %v8832_v8 = vadd.f32 %v11994_v37, %v8768_v24  ;;  %v8583_v44 = vpop.f32.mrb[249].mxu1  ;;  %v9951_v35 = vld [vmem:[#allocation3 + $0xa0] sm:$0xff]  ;;  %10668 = vst.msk [vmem:[%s15295_s4 + $0x3c] sm:$0xf] %vm10652_vm8, %v11158_v50 }
 0x37a   :  { %v12056_v13 = vpop.f32.mrb[244].mxu0  ;;  %v8830_v23 = vadd.f32 %v8766_v49, %v8583_v44  ;;  %v11995_v22 = vpop.f32.mrb[250].mxu1  ;;  %v10144_v25 = vld [vmem:[#allocation3 + $0x90] sm:$0xff]  ;;  %v9954_v2 = vld [vmem:[#allocation3 + $0xb8] sm:$0xff]  ;;  %10666 = vst.msk [vmem:[%s15295_s4 + $0x34] sm:$0xf] %vm10652_vm8, %v11156_v53 }
 0x37b   :  { %v10017_v38 = vadd.f32 %v12056_v13, %v9953_v61  ;;  %8896 = vst.msk [vmem:[#allocation3 + $0xd0] sm:$0xff] %vm1481_vm7, %v8832_v8  ;;  %v9756_v46 = vpop.f32.mrb[245].mxu0  ;;  %v8833_v31 = vadd.f32 %v11995_v22, %v8769_v0  ;;  %v8586_v33 = vpop.f32.mrb[251].mxu1  ;;  %v10215_v3 = vmul.f32 %v14774_v18, %v10144_v25  ;;  %v10142_v52 = vld [vmem:[#allocation3 + $0x80] sm:$0xff]  ;;  %v9952_v48 = vld [vmem:[#allocation3 + $0xa8] sm:$0xff] }
 0x37c   :  { %v10015_v30 = vadd.f32 %v9951_v35, %v9756_v46  ;;  %8894 = vst.msk [vmem:[#allocation3 + $0xc0] sm:$0xff] %vm1481_vm7, %v8830_v23  ;;  %v12057_v16 = vpop.f32.mrb[246].mxu0  ;;  %v8831_v21 = vadd.f32 %v8767_v20, %v8586_v33  ;;  %v10213_v51 = vmul.f32 %v14774_v18, %v10142_v52  ;;  %v10145_v15 = vld [vmem:[#allocation3 + $0x98] sm:$0xff]  ;;  %v8771_v61 = vld [vmem:[#allocation3 + $0xe8] sm:$0xff] }
 0x37d   :  { %10081 = vst.msk [vmem:[#allocation3 + $0xb0] sm:$0xff] %vm1481_vm7, %v10017_v38  ;;  %v10018_v43 = vadd.f32 %v12057_v16, %v9954_v2  ;;  %8897 = vst.msk [vmem:[#allocation3 + $0xd8] sm:$0xff] %vm1481_vm7, %v8833_v31  ;;  %v9759_v7 = vpop.f32.mrb[247].mxu0  ;;  %v10286_v28 = vadd.f32 %v14780_v11, %v10215_v3  ;;  %v10216_v26 = vmul.f32 %v14774_v18, %v10145_v15  ;;  %v10143_v58 = vld [vmem:[#allocation3 + $0x88] sm:$0xff]  ;;  %v8776_v16 = vld [vmem:[#allocation3 + $0x110] sm:$0xff] }
 0x37e   :  { %10079 = vst.msk [vmem:[#allocation3 + $0xa0] sm:$0xff] %vm1481_vm7, %v10015_v30  ;;  %v10016_v27 = vadd.f32 %v9952_v48, %v9759_v7  ;;  %8895 = vst.msk [vmem:[#allocation3 + $0xc8] sm:$0xff] %vm1481_vm7, %v8831_v21  ;;  %v10284_v29 = vadd.f32 %v14780_v11, %v10213_v51  ;;  %v10214_v57 = vmul.f32 %v14774_v18, %v10143_v58  ;;  %v8774_v7 = vld [vmem:[#allocation3 + $0x100] sm:$0xff] }
 0x37f   :  { %10082 = vst.msk [vmem:[#allocation3 + $0xb8] sm:$0xff] %vm1481_vm7, %v10018_v43  ;;  %v10350_v19 = vmax.f32 %v10286_v28, 0.0  ;;  %v10287_v9 = vadd.f32 %v14780_v11, %v10216_v26 }
 0x380   :  { %10080 = vst.msk [vmem:[#allocation3 + $0xa8] sm:$0xff] %vm1481_vm7, %v10016_v27  ;;  %v10348_v56 = vmax.f32 %v10284_v29, 0.0  ;;  %v10285_v40 = vadd.f32 %v14780_v11, %v10214_v57 }
 0x381   :  { %v11161_v6 = vpack.c.bf16 %v10350_v19, %v10350_v19  ;;  %v10351_v10 = vmax.f32 %v10287_v9, 0.0  ;;  %v8777_v19 = vld [vmem:[#allocation3 + $0x118] sm:$0xff] }
 0x382   :  { %v9957_v36 = vld [vmem:[#allocation3 + $0xd0] sm:$0xff]  ;;  %v11159_v41 = vpack.c.bf16 %v10348_v56, %v10348_v56  ;;  %v10349_v55 = vmax.f32 %v10285_v40, 0.0 }
 0x383   :  { %v11998_v34 = vpop.f32.mrb[252].mxu1  ;;  %v9955_v47 = vld [vmem:[#allocation3 + $0xc0] sm:$0xff]  ;;  %10671 = vst.msk [vmem:[%s15295_s4 + $0x48] sm:$0xf] %vm10652_vm8, %v11161_v6  ;;  %v11162_v14 = vpack.c.bf16 %v10351_v10, %v10351_v10 }
 0x384   :  { %v8836_v42 = vadd.f32 %v11998_v34, %v8772_v39  ;;  %v8599_v32 = vpop.f32.mrb[253].mxu1  ;;  %v10148_v59 = vld [vmem:[#allocation3 + $0xb0] sm:$0xff]  ;;  %v9958_v24 = vld [vmem:[#allocation3 + $0xd8] sm:$0xff]  ;;  %10669 = vst.msk [vmem:[%s15295_s4 + $0x40] sm:$0xf] %vm10652_vm8, %v11159_v41  ;;  %v11160_v8 = vpack.c.bf16 %v10349_v55, %v10349_v55 }
 0x385   :  { %v12060_v5 = vpop.f32.mrb[248].mxu0  ;;  %v8834_v45 = vadd.f32 %v8770_v60, %v8599_v32  ;;  %v11999_v63 = vpop.f32.mrb[254].mxu1  ;;  %v10219_v44 = vmul.f32 %v14774_v18, %v10148_v59  ;;  %v10146_v49 = vld [vmem:[#allocation3 + $0xa0] sm:$0xff]  ;;  %v9956_v13 = vld [vmem:[#allocation3 + $0xc8] sm:$0xff]  ;;  %10672 = vst.msk [vmem:[%s15295_s4 + $0x4c] sm:$0xf] %vm10652_vm8, %v11162_v14 }
 0x386   :  { %v10021_v62 = vadd.f32 %v12060_v5, %v9957_v36  ;;  %8900 = vst.msk [vmem:[#allocation3 + $0xf0] sm:$0xff] %vm1481_vm7, %v8836_v42  ;;  %v9772_v37 = vpop.f32.mrb[249].mxu0  ;;  %v8837_v12 = vadd.f32 %v11999_v63, %v8773_v17  ;;  %v8602_v54 = vpop.f32.mrb[255].mxu1  ;;  %v10217_v23 = vmul.f32 %v14774_v18, %v10146_v49  ;;  %v10149_v22 = vld [vmem:[#allocation3 + $0xb8] sm:$0xff]  ;;  %v8775_v36 = vld [vmem:[#allocation3 + $0x108] sm:$0xff] }
 0x387   :  { %v10019_v4 = vadd.f32 %v9955_v47, %v9772_v37  ;;  %8898 = vst.msk [vmem:[#allocation3 + $0xe0] sm:$0xff] %vm1481_vm7, %v8834_v45  ;;  %v12061_v1 = vpop.f32.mrb[250].mxu0  ;;  %v8835_v35 = vadd.f32 %v8771_v61, %v8602_v54  ;;  %v10290_v25 = vadd.f32 %v14780_v11, %v10219_v44  ;;  %v10220_v38 = vmul.f32 %v14774_v18, %v10149_v22  ;;  %v10147_v46 = vld [vmem:[#allocation3 + $0xa8] sm:$0xff] }
 0x388   :  { %10085 = vst.msk [vmem:[#allocation3 + $0xd0] sm:$0xff] %vm1481_vm7, %v10021_v62  ;;  %v10022_v0 = vadd.f32 %v12061_v1, %v9958_v24  ;;  %8901 = vst.msk [vmem:[#allocation3 + $0xf8] sm:$0xff] %vm1481_vm7, %v8837_v12  ;;  %v9775_v50 = vpop.f32.mrb[251].mxu0  ;;  %v10288_v31 = vadd.f32 %v14780_v11, %v10217_v23  ;;  %v10218_v33 = vmul.f32 %v14774_v18, %v10147_v46  ;;  %v8780_v1 = vld [vmem:[#allocation3 + $0x130] sm:$0xff] }
 0x389   :  { %10670 = vst.msk [vmem:[%s15295_s4 + $0x44] sm:$0xf] %vm10652_vm8, %v11160_v8  ;;  %v10020_v2 = vadd.f32 %v9956_v13, %v9775_v50  ;;  %v10354_v20 = vmax.f32 %v10290_v25, 0.0  ;;  %v10291_v53 = vadd.f32 %v14780_v11, %v10220_v38  ;;  %v8778_v50 = vld [vmem:[#allocation3 + $0x120] sm:$0xff] }
 0x38a   :  { %10083 = vst.msk [vmem:[#allocation3 + $0xc0] sm:$0xff] %vm1481_vm7, %v10019_v4  ;;  %8899 = vst.msk [vmem:[#allocation3 + $0xe8] sm:$0xff] %vm1481_vm7, %v8835_v35  ;;  %v10352_v3 = vmax.f32 %v10288_v31, 0.0  ;;  %v10289_v52 = vadd.f32 %v14780_v11, %v10218_v33 }
 0x38b   :  { %10086 = vst.msk [vmem:[#allocation3 + $0xd8] sm:$0xff] %vm1481_vm7, %v10022_v0  ;;  %10084 = vst.msk [vmem:[#allocation3 + $0xc8] sm:$0xff] %vm1481_vm7, %v10020_v2  ;;  %v11165_v48 = vpack.c.bf16 %v10354_v20, %v10354_v20  ;;  %v10355_v21 = vmax.f32 %v10291_v53, 0.0  ;;  %v8781_v20 = vld [vmem:[#allocation3 + $0x138] sm:$0xff] }
 0x38c   :  { %v11163_v28 = vpack.c.bf16 %v10352_v3, %v10352_v3  ;;  %v10353_v26 = vmax.f32 %v10289_v52, 0.0 }
 0x38d   :  { %v9961_v51 = vld [vmem:[#allocation3 + $0xf0] sm:$0xff]  ;;  %10675 = vst.msk [vmem:[%s15295_s4 + $0x58] sm:$0xf] %vm10652_vm8, %v11165_v48  ;;  %v11166_v9 = vpack.c.bf16 %v10355_v21, %v10355_v21 }
 0x38e   :  { %v12002_v30 = vpop.f32.mrb[0].mxu1  ;;  %v9959_v27 = vld [vmem:[#allocation3 + $0xe0] sm:$0xff]  ;;  %10673 = vst.msk [vmem:[%s15295_s4 + $0x50] sm:$0xf] %vm10652_vm8, %v11163_v28  ;;  %v11164_v42 = vpack.c.bf16 %v10353_v26, %v10353_v26 }
 0x38f   :  { %v8840_v15 = vadd.f32 %v12002_v30, %v8776_v16  ;;  %v8615_v43 = vpop.f32.mrb[1].mxu1  ;;  %v10152_v56 = vld [vmem:[#allocation3 + $0xd0] sm:$0xff]  ;;  %v9962_v39 = vld [vmem:[#allocation3 + $0xf8] sm:$0xff]  ;;  %10676 = vst.msk [vmem:[%s15295_s4 + $0x5c] sm:$0xf] %vm10652_vm8, %v11166_v9 }
 0x390   :  { %v12064_v58 = vpop.f32.mrb[252].mxu0  ;;  %v8838_v29 = vadd.f32 %v8774_v7, %v8615_v43  ;;  %v12003_v57 = vpop.f32.mrb[2].mxu1  ;;  %v10223_v32 = vmul.f32 %v14774_v18, %v10152_v56  ;;  %10674 = vst.msk [vmem:[%s15295_s4 + $0x54] sm:$0xf] %vm10652_vm8, %v11164_v42 }
 0x391   :  { %v10025_v40 = vadd.f32 %v12064_v58, %v9961_v51  ;;  %8904 = vst.msk [vmem:[#allocation3 + $0x110] sm:$0xff] %vm1481_vm7, %v8840_v15  ;;  %v9788_v34 = vpop.f32.mrb[253].mxu0  ;;  %v8841_v6 = vadd.f32 %v12003_v57, %v8777_v19  ;;  %v8618_v10 = vpop.f32.mrb[3].mxu1  ;;  %v10150_v60 = vld [vmem:[#allocation3 + $0xc0] sm:$0xff]  ;;  %v9960_v5 = vld [vmem:[#allocation3 + $0xe8] sm:$0xff] }
 0x392   :  { %v10023_v41 = vadd.f32 %v9959_v27, %v9788_v34  ;;  %8902 = vst.msk [vmem:[#allocation3 + $0x100] sm:$0xff] %vm1481_vm7, %v8838_v29  ;;  %v12065_v55 = vpop.f32.mrb[254].mxu0  ;;  %v8839_v47 = vadd.f32 %v8775_v36, %v8618_v10  ;;  %v10221_v45 = vmul.f32 %v14774_v18, %v10150_v60  ;;  %v10153_v63 = vld [vmem:[#allocation3 + $0xd8] sm:$0xff]  ;;  %v10294_v59 = vadd.f32 %v14780_v11, %v10223_v32  ;;  %v10151_v37 = vld [vmem:[#allocation3 + $0xc8] sm:$0xff] }
 0x393   :  { %10089 = vst.msk [vmem:[#allocation3 + $0xf0] sm:$0xff] %vm1481_vm7, %v10025_v40  ;;  %v10026_v17 = vadd.f32 %v12065_v55, %v9962_v39  ;;  %8905 = vst.msk [vmem:[#allocation3 + $0x118] sm:$0xff] %vm1481_vm7, %v8841_v6  ;;  %v9791_v14 = vpop.f32.mrb[255].mxu0  ;;  %v10224_v62 = vmul.f32 %v14774_v18, %v10153_v63  ;;  %v10222_v54 = vmul.f32 %v14774_v18, %v10151_v37  ;;  %v8779_v51 = vld [vmem:[#allocation3 + $0x128] sm:$0xff]  ;;  %v8784_v55 = vld [vmem:[#allocation3 + $0x150] sm:$0xff] }
 0x394   :  { %10087 = vst.msk [vmem:[#allocation3 + $0xe0] sm:$0xff] %vm1481_vm7, %v10023_v41  ;;  %v10024_v24 = vadd.f32 %v9960_v5, %v9791_v14  ;;  %8903 = vst.msk [vmem:[#allocation3 + $0x108] sm:$0xff] %vm1481_vm7, %v8839_v47  ;;  %v10292_v12 = vadd.f32 %v14780_v11, %v10221_v45  ;;  %v10358_v61 = vmax.f32 %v10294_v59, 0.0  ;;  %v8782_v14 = vld [vmem:[#allocation3 + $0x140] sm:$0xff] }
 0x395   :  { %10090 = vst.msk [vmem:[#allocation3 + $0xf8] sm:$0xff] %vm1481_vm7, %v10026_v17  ;;  %v10295_v8 = vadd.f32 %v14780_v11, %v10224_v62  ;;  %v10293_v49 = vadd.f32 %v14780_v11, %v10222_v54 }
 0x396   :  { %10088 = vst.msk [vmem:[#allocation3 + $0xe8] sm:$0xff] %vm1481_vm7, %v10024_v24  ;;  %v10356_v44 = vmax.f32 %v10292_v12, 0.0  ;;  %v11169_v13 = vpack.c.bf16 %v10358_v61, %v10358_v61  ;;  %v8785_v61 = vld [vmem:[#allocation3 + $0x158] sm:$0xff] }
 0x397   :  { %v10359_v35 = vmax.f32 %v10295_v8, 0.0  ;;  %v10357_v38 = vmax.f32 %v10293_v49, 0.0 }
 0x398   :  { %v9965_v23 = vld [vmem:[#allocation3 + $0x110] sm:$0xff]  ;;  %v11167_v25 = vpack.c.bf16 %v10356_v44, %v10356_v44  ;;  %10679 = vst.msk [vmem:[%s15295_s4 + $0x68] sm:$0xf] %vm10652_vm8, %v11169_v13 }
 0x399   :  { %v9963_v2 = vld [vmem:[#allocation3 + $0x100] sm:$0xff]  ;;  %v11170_v53 = vpack.c.bf16 %v10359_v35, %v10359_v35  ;;  %v11168_v15 = vpack.c.bf16 %v10357_v38, %v10357_v38 }
 0x39a   :  { %v12006_v4 = vpop.f32.mrb[4].mxu1  ;;  %v10156_v3 = vld [vmem:[#allocation3 + $0xf0] sm:$0xff]  ;;  %v9966_v16 = vld [vmem:[#allocation3 + $0x118] sm:$0xff]  ;;  %10677 = vst.msk [vmem:[%s15295_s4 + $0x60] sm:$0xf] %vm10652_vm8, %v11167_v25 }
 0x39b   :  { %v8844_v22 = vadd.f32 %v12006_v4, %v8780_v1  ;;  %v8631_v0 = vpop.f32.mrb[5].mxu1  ;;  %v10227_v43 = vmul.f32 %v14774_v18, %v10156_v3  ;;  %v10154_v7 = vld [vmem:[#allocation3 + $0xe0] sm:$0xff]  ;;  %v9964_v58 = vld [vmem:[#allocation3 + $0x108] sm:$0xff]  ;;  %10680 = vst.msk [vmem:[%s15295_s4 + $0x6c] sm:$0xf] %vm10652_vm8, %v11170_v53 }
 0x39c   :  { %v12068_v46 = vpop.f32.mrb[0].mxu0  ;;  %v8842_v31 = vadd.f32 %v8778_v50, %v8631_v0  ;;  %v12007_v33 = vpop.f32.mrb[6].mxu1  ;;  %v10225_v29 = vmul.f32 %v14774_v18, %v10154_v7  ;;  %v10157_v57 = vld [vmem:[#allocation3 + $0xf8] sm:$0xff]  ;;  %10678 = vst.msk [vmem:[%s15295_s4 + $0x64] sm:$0xf] %vm10652_vm8, %v11168_v15 }
 0x39d   :  { %v10029_v52 = vadd.f32 %v12068_v46, %v9965_v23  ;;  %8908 = vst.msk [vmem:[#allocation3 + $0x130] sm:$0xff] %vm1481_vm7, %v8844_v22  ;;  %v9804_v30 = vpop.f32.mrb[1].mxu0  ;;  %v8845_v48 = vadd.f32 %v12007_v33, %v8781_v20  ;;  %v8634_v21 = vpop.f32.mrb[7].mxu1  ;;  %v10298_v56 = vadd.f32 %v14780_v11, %v10227_v43  ;;  %v10228_v40 = vmul.f32 %v14774_v18, %v10157_v57  ;;  %v10155_v34 = vld [vmem:[#allocation3 + $0xe8] sm:$0xff] }
 0x39e   :  { %v10027_v28 = vadd.f32 %v9963_v2, %v9804_v30  ;;  %8906 = vst.msk [vmem:[#allocation3 + $0x120] sm:$0xff] %vm1481_vm7, %v8842_v31  ;;  %v12069_v26 = vpop.f32.mrb[2].mxu0  ;;  %v8843_v27 = vadd.f32 %v8779_v51, %v8634_v21  ;;  %v10296_v6 = vadd.f32 %v14780_v11, %v10225_v29  ;;  %v10226_v10 = vmul.f32 %v14774_v18, %v10155_v34  ;;  %v8783_v23 = vld [vmem:[#allocation3 + $0x148] sm:$0xff] }
 0x39f   :  { %10093 = vst.msk [vmem:[#allocation3 + $0x110] sm:$0xff] %vm1481_vm7, %v10029_v52  ;;  %v10030_v19 = vadd.f32 %v12069_v26, %v9966_v16  ;;  %8909 = vst.msk [vmem:[#allocation3 + $0x138] sm:$0xff] %vm1481_vm7, %v8845_v48  ;;  %v9807_v9 = vpop.f32.mrb[3].mxu0  ;;  %v10362_v36 = vmax.f32 %v10298_v56, 0.0  ;;  %v10299_v42 = vadd.f32 %v14780_v11, %v10228_v40  ;;  %v8788_v26 = vld [vmem:[#allocation3 + $0x170] sm:$0xff] }
 0x3a0   :  { %10091 = vst.msk [vmem:[#allocation3 + $0x100] sm:$0xff] %vm1481_vm7, %v10027_v28  ;;  %v10028_v39 = vadd.f32 %v9964_v58, %v9807_v9  ;;  %8907 = vst.msk [vmem:[#allocation3 + $0x128] sm:$0xff] %vm1481_vm7, %v8843_v27  ;;  %v10360_v32 = vmax.f32 %v10296_v6, 0.0  ;;  %v10297_v60 = vadd.f32 %v14780_v11, %v10226_v10  ;;  %v8786_v9 = vld [vmem:[#allocation3 + $0x160] sm:$0xff]  ;;  %v8789_v10 = vld [vmem:[#allocation3 + $0x178] sm:$0xff] }
 0x3a1   :  { %10094 = vst.msk [vmem:[#allocation3 + $0x118] sm:$0xff] %vm1481_vm7, %v10030_v19  ;;  %v11173_v5 = vpack.c.bf16 %v10362_v36, %v10362_v36  ;;  %v10363_v47 = vmax.f32 %v10299_v42, 0.0 }
 0x3a2   :  { %10092 = vst.msk [vmem:[#allocation3 + $0x108] sm:$0xff] %vm1481_vm7, %v10028_v39  ;;  %v11171_v59 = vpack.c.bf16 %v10360_v32, %v10360_v32  ;;  %v10361_v62 = vmax.f32 %v10297_v60, 0.0 }
 0x3a3   :  { %v12010_v41 = vpop.f32.mrb[8].mxu1  ;;  %10683 = vst.msk [vmem:[%s15295_s4 + $0x78] sm:$0xf] %vm10652_vm8, %v11173_v5  ;;  %v11174_v8 = vpack.c.bf16 %v10363_v47, %v10363_v47  ;;  %v8787_v5 = vld [vmem:[#allocation3 + $0x168] sm:$0xff] }
 0x3a4   :  { %v9969_v45 = vld [vmem:[#allocation3 + $0x130] sm:$0xff]  ;;  %v8848_v63 = vadd.f32 %v12010_v41, %v8784_v55  ;;  %v8647_v17 = vpop.f32.mrb[9].mxu1  ;;  %10681 = vst.msk [vmem:[%s15295_s4 + $0x70] sm:$0xf] %vm10652_vm8, %v11171_v59  ;;  %v11172_v22 = vpack.c.bf16 %v10361_v62, %v10361_v62 }
 0x3a5   :  { %v9967_v24 = vld [vmem:[#allocation3 + $0x120] sm:$0xff]  ;;  %v8846_v12 = vadd.f32 %v8782_v14, %v8647_v17  ;;  %v12011_v54 = vpop.f32.mrb[10].mxu1  ;;  %10684 = vst.msk [vmem:[%s15295_s4 + $0x7c] sm:$0xf] %vm10652_vm8, %v11174_v8 }
 0x3a6   :  { %v12072_v37 = vpop.f32.mrb[4].mxu0  ;;  %v10160_v44 = vld [vmem:[#allocation3 + $0x110] sm:$0xff]  ;;  %8912 = vst.msk [vmem:[#allocation3 + $0x150] sm:$0xff] %vm1481_vm7, %v8848_v63  ;;  %v9970_v1 = vld [vmem:[#allocation3 + $0x138] sm:$0xff]  ;;  %v8849_v13 = vadd.f32 %v12011_v54, %v8785_v61  ;;  %v8650_v35 = vpop.f32.mrb[11].mxu1 }
 0x3a7   :  { %v10033_v49 = vadd.f32 %v12072_v37, %v9969_v45  ;;  %v9820_v4 = vpop.f32.mrb[5].mxu0  ;;  %v10231_v0 = vmul.f32 %v14774_v18, %v10160_v44  ;;  %v10158_v50 = vld [vmem:[#allocation3 + $0x100] sm:$0xff]  ;;  %8910 = vst.msk [vmem:[#allocation3 + $0x140] sm:$0xff] %vm1481_vm7, %v8846_v12  ;;  %v9968_v46 = vld [vmem:[#allocation3 + $0x128] sm:$0xff]  ;;  %v8847_v2 = vadd.f32 %v8783_v23, %v8650_v35 }
 0x3a8   :  { %v10031_v25 = vadd.f32 %v9967_v24, %v9820_v4  ;;  %v12073_v38 = vpop.f32.mrb[6].mxu0  ;;  %v10229_v31 = vmul.f32 %v14774_v18, %v10158_v50  ;;  %v10161_v33 = vld [vmem:[#allocation3 + $0x118] sm:$0xff]  ;;  %8913 = vst.msk [vmem:[#allocation3 + $0x158] sm:$0xff] %vm1481_vm7, %v8849_v13  ;;  %v15065_v45 = vld [vmem:[%s15293_s2] ss:$0 sm:$0xff] }
 0x3a9   :  { %10097 = vst.msk [vmem:[#allocation3 + $0x130] sm:$0xff] %vm1481_vm7, %v10033_v49  ;;  %v10034_v20 = vadd.f32 %v12073_v38, %v9970_v1  ;;  %v9823_v53 = vpop.f32.mrb[7].mxu0  ;;  %v10302_v3 = vadd.f32 %v14780_v11, %v10231_v0  ;;  %v10232_v52 = vmul.f32 %v14774_v18, %v10161_v33  ;;  %v10159_v30 = vld [vmem:[#allocation3 + $0x108] sm:$0xff]  ;;  %8911 = vst.msk [vmem:[#allocation3 + $0x148] sm:$0xff] %vm1481_vm7, %v8847_v2  ;;  %v15083_v8 = vld [vmem:[%s15294_s3] ss:$0 sm:$0xff] }
 0x3aa   :  { %10682 = vst.msk [vmem:[%s15295_s4 + $0x74] sm:$0xf] %vm10652_vm8, %v11172_v22  ;;  %v10032_v16 = vadd.f32 %v9968_v46, %v9823_v53  ;;  %v10300_v48 = vadd.f32 %v14780_v11, %v10229_v31  ;;  %v10230_v21 = vmul.f32 %v14774_v18, %v10159_v30  ;;  %v8792_v38 = vld [vmem:[#allocation3 + $0x190] sm:$0xff]  ;;  %v8790_v53 = vld [vmem:[#allocation3 + $0x180] sm:$0xff] }
 0x3ab   :  { %10095 = vst.msk [vmem:[#allocation3 + $0x120] sm:$0xff] %vm1481_vm7, %v10031_v25  ;;  %10098 = vst.msk [vmem:[#allocation3 + $0x138] sm:$0xff] %vm1481_vm7, %v10034_v20  ;;  %v10366_v51 = vmax.f32 %v10302_v3, 0.0  ;;  %v10303_v15 = vadd.f32 %v14780_v11, %v10232_v52 }
 0x3ac   :  { %10096 = vst.msk [vmem:[#allocation3 + $0x128] sm:$0xff] %vm1481_vm7, %v10032_v16  ;;  %v10364_v43 = vmax.f32 %v10300_v48, 0.0  ;;  %v10301_v7 = vadd.f32 %v14780_v11, %v10230_v21 }
 0x3ad   :  { %v11177_v58 = vpack.c.bf16 %v10366_v51, %v10366_v51  ;;  %v10367_v27 = vmax.f32 %v10303_v15, 0.0  ;;  %v9973_v29 = vld [vmem:[#allocation3 + $0x150] sm:$0xff]  ;;  %v8793_v51 = vld [vmem:[#allocation3 + $0x198] sm:$0xff] }
 0x3ae   :  { %v12014_v28 = vpop.f32.mrb[12].mxu1  ;;  %v11175_v56 = vpack.c.bf16 %v10364_v43, %v10364_v43  ;;  %v10365_v18 = vmax.f32 %v10301_v7, 0.0  ;;  %v9971_v34 = vld [vmem:[#allocation3 + $0x140] sm:$0xff] }
 0x3af   :  { %v8852_v57 = vadd.f32 %v12014_v28, %v8788_v26  ;;  %v8663_v19 = vpop.f32.mrb[13].mxu1  ;;  %10687 = vst.msk [vmem:[%s15295_s4 + $0x88] sm:$0xf] %vm10652_vm8, %v11177_v58  ;;  %v11178_v11 = vpack.c.bf16 %v10367_v27, %v10367_v27  ;;  %v9974_v60 = vld [vmem:[#allocation3 + $0x158] sm:$0xff] }
 0x3b0   :  { %v12076_v40 = vpop.f32.mrb[8].mxu0  ;;  %v8850_v39 = vadd.f32 %v8786_v9, %v8663_v19  ;;  %v12015_v6 = vpop.f32.mrb[14].mxu1  ;;  %v10164_v36 = vld [vmem:[#allocation3 + $0x130] sm:$0xff]  ;;  %10685 = vst.msk [vmem:[%s15295_s4 + $0x80] sm:$0xf] %vm10652_vm8, %v11175_v56  ;;  %v11176_v47 = vpack.c.bf16 %v10365_v18, %v10365_v18  ;;  %v9972_v62 = vld [vmem:[#allocation3 + $0x148] sm:$0xff] }
 0x3b1   :  { %v10037_v42 = vadd.f32 %v12076_v40, %v9973_v29  ;;  %8916 = vst.msk [vmem:[#allocation3 + $0x170] sm:$0xff] %vm1481_vm7, %v8852_v57  ;;  %v9836_v32 = vpop.f32.mrb[9].mxu0  ;;  %v8853_v41 = vadd.f32 %v12015_v6, %v8789_v10  ;;  %v8666_v55 = vpop.f32.mrb[15].mxu1  ;;  %v10235_v63 = vmul.f32 %v15065_v45, %v10164_v36  ;;  %v8791_v29 = vld [vmem:[#allocation3 + $0x188] sm:$0xff] }
 0x3b2   :  { %v10162_v17 = vld [vmem:[#allocation3 + $0x120] sm:$0xff]  ;;  %v10035_v14 = vadd.f32 %v9971_v34, %v9836_v32  ;;  %8914 = vst.msk [vmem:[#allocation3 + $0x160] sm:$0xff] %vm1481_vm7, %v8850_v39  ;;  %v12077_v59 = vpop.f32.mrb[10].mxu0  ;;  %v8851_v37 = vadd.f32 %v8787_v5, %v8666_v55  ;;  %v10165_v12 = vld [vmem:[#allocation3 + $0x138] sm:$0xff] }
 0x3b3   :  { %10688 = vst.msk [vmem:[%s15295_s4 + $0x8c] sm:$0xf] %vm10652_vm8, %v11178_v11  ;;  %v10233_v24 = vmul.f32 %v15065_v45, %v10162_v17  ;;  %v10038_v54 = vadd.f32 %v12077_v59, %v9974_v60  ;;  %v9839_v61 = vpop.f32.mrb[11].mxu0  ;;  %10686 = vst.msk [vmem:[%s15295_s4 + $0x84] sm:$0xf] %vm10652_vm8, %v11176_v47  ;;  %v10306_v44 = vadd.f32 %v15083_v8, %v10235_v63  ;;  %v10163_v4 = vld [vmem:[#allocation3 + $0x128] sm:$0xff] }
 0x3b4   :  { %10101 = vst.msk [vmem:[#allocation3 + $0x150] sm:$0xff] %vm1481_vm7, %v10037_v42  ;;  %8917 = vst.msk [vmem:[#allocation3 + $0x178] sm:$0xff] %vm1481_vm7, %v8853_v41  ;;  %v10236_v49 = vmul.f32 %v15065_v45, %v10165_v12  ;;  %v10036_v1 = vadd.f32 %v9972_v62, %v9839_v61  ;;  %v10234_v35 = vmul.f32 %v15065_v45, %v10163_v4  ;;  %v8796_v59 = vld [vmem:[#allocation3 + $0x1b0] sm:$0xff]  ;;  %v8794_v61 = vld [vmem:[#allocation3 + $0x1a0] sm:$0xff] }
 0x3b5   :  { %10099 = vst.msk [vmem:[#allocation3 + $0x140] sm:$0xff] %vm1481_vm7, %v10035_v14  ;;  %8915 = vst.msk [vmem:[#allocation3 + $0x168] sm:$0xff] %vm1481_vm7, %v8851_v37  ;;  %v10304_v13 = vadd.f32 %v15083_v8, %v10233_v24  ;;  %v10370_v23 = vmax.f32 %v10306_v44, 0.0 }
 0x3b6   :  { %10102 = vst.msk [vmem:[#allocation3 + $0x158] sm:$0xff] %vm1481_vm7, %v10038_v54  ;;  %v10307_v22 = vadd.f32 %v15083_v8, %v10236_v49  ;;  %10100 = vst.msk [vmem:[#allocation3 + $0x148] sm:$0xff] %vm1481_vm7, %v10036_v1  ;;  %v10305_v50 = vadd.f32 %v15083_v8, %v10234_v35 }
 0x3b7   :  { %v10368_v0 = vmax.f32 %v10304_v13, 0.0  ;;  %v11181_v46 = vpack.c.bf16 %v10370_v23, %v10370_v23  ;;  %v8797_v23 = vld [vmem:[#allocation3 + $0x1b8] sm:$0xff] }
 0x3b8   :  { %v10371_v2 = vmax.f32 %v10307_v22, 0.0  ;;  %v9977_v31 = vld [vmem:[#allocation3 + $0x170] sm:$0xff]  ;;  %v10369_v52 = vmax.f32 %v10305_v50, 0.0 }
 0x3b9   :  { %v12018_v25 = vpop.f32.mrb[16].mxu1  ;;  %v11179_v3 = vpack.c.bf16 %v10368_v0, %v10368_v0  ;;  %v9975_v16 = vld [vmem:[#allocation3 + $0x160] sm:$0xff]  ;;  %10691 = vst.msk [vmem:[%s15295_s4 + $0x98] sm:$0xf] %vm10652_vm8, %v11181_v46 }
 0x3ba   :  { %v8856_v33 = vadd.f32 %v12018_v25, %v8792_v38  ;;  %v8679_v20 = vpop.f32.mrb[17].mxu1  ;;  %v11182_v15 = vpack.c.bf16 %v10371_v2, %v10371_v2  ;;  %v11180_v57 = vpack.c.bf16 %v10369_v52, %v10369_v52 }
 0x3bb   :  { %v12080_v30 = vpop.f32.mrb[12].mxu0  ;;  %v8854_v48 = vadd.f32 %v8790_v53, %v8679_v20  ;;  %v12019_v21 = vpop.f32.mrb[18].mxu1  ;;  %v10168_v43 = vld [vmem:[#allocation3 + $0x150] sm:$0xff]  ;;  %v9978_v26 = vld [vmem:[#allocation3 + $0x178] sm:$0xff]  ;;  %10689 = vst.msk [vmem:[%s15295_s4 + $0x90] sm:$0xf] %vm10652_vm8, %v11179_v3 }
 0x3bc   :  { %v10041_v7 = vadd.f32 %v12080_v30, %v9977_v31  ;;  %8920 = vst.msk [vmem:[#allocation3 + $0x190] sm:$0xff] %vm1481_vm7, %v8856_v33  ;;  %v9852_v28 = vpop.f32.mrb[13].mxu0  ;;  %v8857_v58 = vadd.f32 %v12019_v21, %v8793_v51  ;;  %v8682_v27 = vpop.f32.mrb[19].mxu1  ;;  %v10239_v19 = vmul.f32 %v15065_v45, %v10168_v43  ;;  %v10166_v9 = vld [vmem:[#allocation3 + $0x140] sm:$0xff]  ;;  %v9976_v40 = vld [vmem:[#allocation3 + $0x168] sm:$0xff] }
 0x3bd   :  { %v10039_v56 = vadd.f32 %v9975_v16, %v9852_v28  ;;  %8918 = vst.msk [vmem:[#allocation3 + $0x180] sm:$0xff] %vm1481_vm7, %v8854_v48  ;;  %v12081_v18 = vpop.f32.mrb[14].mxu0  ;;  %v8855_v34 = vadd.f32 %v8791_v29, %v8682_v27  ;;  %v10237_v39 = vmul.f32 %v15065_v45, %v10166_v9  ;;  %v10169_v6 = vld [vmem:[#allocation3 + $0x158] sm:$0xff]  ;;  %v10167_v32 = vld [vmem:[#allocation3 + $0x148] sm:$0xff] }
 0x3be   :  { %10692 = vst.msk [vmem:[%s15295_s4 + $0x9c] sm:$0xf] %vm10652_vm8, %v11182_v15  ;;  %v10042_v10 = vadd.f32 %v12081_v18, %v9978_v26  ;;  %v9855_v11 = vpop.f32.mrb[15].mxu0  ;;  %10690 = vst.msk [vmem:[%s15295_s4 + $0x94] sm:$0xf] %vm10652_vm8, %v11180_v57  ;;  %v10310_v36 = vadd.f32 %v15083_v8, %v10239_v19  ;;  %v10240_v42 = vmul.f32 %v15065_v45, %v10169_v6  ;;  %v8795_v31 = vld [vmem:[#allocation3 + $0x1a8] sm:$0xff] }
 0x3bf   :  { %10105 = vst.msk [vmem:[#allocation3 + $0x170] sm:$0xff] %vm1481_vm7, %v10041_v7  ;;  %8921 = vst.msk [vmem:[#allocation3 + $0x198] sm:$0xff] %vm1481_vm7, %v8857_v58  ;;  %v10040_v60 = vadd.f32 %v9976_v40, %v9855_v11  ;;  %v10308_v41 = vadd.f32 %v15083_v8, %v10237_v39  ;;  %v10238_v55 = vmul.f32 %v15065_v45, %v10167_v32  ;;  %v8800_v18 = vld [vmem:[#allocation3 + $0x1d0] sm:$0xff]  ;;  %v8798_v11 = vld [vmem:[#allocation3 + $0x1c0] sm:$0xff] }
 0x3c0   :  { %10103 = vst.msk [vmem:[#allocation3 + $0x160] sm:$0xff] %vm1481_vm7, %v10039_v56  ;;  %8919 = vst.msk [vmem:[#allocation3 + $0x188] sm:$0xff] %vm1481_vm7, %v8855_v34  ;;  %v10374_v5 = vmax.f32 %v10310_v36, 0.0  ;;  %v10311_v47 = vadd.f32 %v15083_v8, %v10240_v42 }
 0x3c1   :  { %10106 = vst.msk [vmem:[#allocation3 + $0x178] sm:$0xff] %vm1481_vm7, %v10042_v10  ;;  %10104 = vst.msk [vmem:[#allocation3 + $0x168] sm:$0xff] %vm1481_vm7, %v10040_v60  ;;  %v10372_v63 = vmax.f32 %v10308_v41, 0.0  ;;  %v10309_v17 = vadd.f32 %v15083_v8, %v10238_v55 }
 0x3c2   :  { %v11185_v62 = vpack.c.bf16 %v10374_v5, %v10374_v5  ;;  %v10375_v37 = vmax.f32 %v10311_v47, 0.0  ;;  %v8801_v5 = vld [vmem:[#allocation3 + $0x1d8] sm:$0xff] }
 0x3c3   :  { %v9981_v24 = vld [vmem:[#allocation3 + $0x190] sm:$0xff]  ;;  %v11183_v44 = vpack.c.bf16 %v10372_v63, %v10372_v63  ;;  %v10373_v49 = vmax.f32 %v10309_v17, 0.0 }
 0x3c4   :  { %v12022_v14 = vpop.f32.mrb[20].mxu1  ;;  %v9979_v1 = vld [vmem:[#allocation3 + $0x180] sm:$0xff]  ;;  %10695 = vst.msk [vmem:[%s15295_s4 + $0xa8] sm:$0xf] %vm10652_vm8, %v11185_v62  ;;  %v11186_v22 = vpack.c.bf16 %v10375_v37, %v10375_v37 }
 0x3c5   :  { %v8860_v12 = vadd.f32 %v12022_v14, %v8796_v59  ;;  %v8695_v54 = vpop.f32.mrb[21].mxu1  ;;  %10693 = vst.msk [vmem:[%s15295_s4 + $0xa0] sm:$0xf] %vm10652_vm8, %v11183_v44  ;;  %v11184_v33 = vpack.c.bf16 %v10373_v49, %v10373_v49 }
 0x3c6   :  { %v12084_v4 = vpop.f32.mrb[16].mxu0  ;;  %v8858_v13 = vadd.f32 %v8794_v61, %v8695_v54  ;;  %v12023_v35 = vpop.f32.mrb[22].mxu1  ;;  %v10172_v0 = vld [vmem:[#allocation3 + $0x170] sm:$0xff]  ;;  %v9982_v38 = vld [vmem:[#allocation3 + $0x198] sm:$0xff]  ;;  %10696 = vst.msk [vmem:[%s15295_s4 + $0xac] sm:$0xf] %vm10652_vm8, %v11186_v22 }
 0x3c7   :  { %v10045_v50 = vadd.f32 %v12084_v4, %v9981_v24  ;;  %8924 = vst.msk [vmem:[#allocation3 + $0x1b0] sm:$0xff] %vm1481_vm7, %v8860_v12  ;;  %v9868_v25 = vpop.f32.mrb[17].mxu0  ;;  %v8861_v46 = vadd.f32 %v12023_v35, %v8797_v23  ;;  %v8698_v2 = vpop.f32.mrb[23].mxu1  ;;  %v10243_v20 = vmul.f32 %v15065_v45, %v10172_v0  ;;  %v10170_v53 = vld [vmem:[#allocation3 + $0x160] sm:$0xff]  ;;  %v9980_v30 = vld [vmem:[#allocation3 + $0x188] sm:$0xff] }
 0x3c8   :  { %v10043_v3 = vadd.f32 %v9979_v1, %v9868_v25  ;;  %8922 = vst.msk [vmem:[#allocation3 + $0x1a0] sm:$0xff] %vm1481_vm7, %v8858_v13  ;;  %v12085_v52 = vpop.f32.mrb[18].mxu0  ;;  %v8859_v16 = vadd.f32 %v8795_v31, %v8698_v2  ;;  %v10241_v48 = vmul.f32 %v15065_v45, %v10170_v53  ;;  %v10173_v21 = vld [vmem:[#allocation3 + $0x178] sm:$0xff]  ;;  %v10171_v28 = vld [vmem:[#allocation3 + $0x168] sm:$0xff] }
 0x3c9   :  { %10109 = vst.msk [vmem:[#allocation3 + $0x190] sm:$0xff] %vm1481_vm7, %v10045_v50  ;;  %v10046_v51 = vadd.f32 %v12085_v52, %v9982_v38  ;;  %8925 = vst.msk [vmem:[#allocation3 + $0x1b8] sm:$0xff] %vm1481_vm7, %v8861_v46  ;;  %v9871_v15 = vpop.f32.mrb[19].mxu0  ;;  %v10314_v43 = vadd.f32 %v15083_v8, %v10243_v20  ;;  %v10244_v7 = vmul.f32 %v15065_v45, %v10173_v21  ;;  %v8799_v24 = vld [vmem:[#allocation3 + $0x1c8] sm:$0xff]  ;;  %v8804_v52 = vld [vmem:[#allocation3 + $0x1f0] sm:$0xff] }
 0x3ca   :  { %10694 = vst.msk [vmem:[%s15295_s4 + $0xa4] sm:$0xf] %vm10652_vm8, %v11184_v33  ;;  %v10044_v26 = vadd.f32 %v9980_v30, %v9871_v15  ;;  %v10312_v58 = vadd.f32 %v15083_v8, %v10241_v48  ;;  %v10242_v27 = vmul.f32 %v15065_v45, %v10171_v28  ;;  %v8802_v15 = vld [vmem:[#allocation3 + $0x1e0] sm:$0xff] }
 0x3cb   :  { %10107 = vst.msk [vmem:[#allocation3 + $0x180] sm:$0xff] %vm1481_vm7, %v10043_v3  ;;  %8923 = vst.msk [vmem:[#allocation3 + $0x1a8] sm:$0xff] %vm1481_vm7, %v8859_v16  ;;  %v10378_v29 = vmax.f32 %v10314_v43, 0.0  ;;  %v10315_v57 = vadd.f32 %v15083_v8, %v10244_v7 }
 0x3cc   :  { %10110 = vst.msk [vmem:[#allocation3 + $0x198] sm:$0xff] %vm1481_vm7, %v10046_v51  ;;  %10108 = vst.msk [vmem:[#allocation3 + $0x188] sm:$0xff] %vm1481_vm7, %v10044_v26  ;;  %v10376_v19 = vmax.f32 %v10312_v58, 0.0  ;;  %v10313_v9 = vadd.f32 %v15083_v8, %v10242_v27 }
 0x3cd   :  { %v12026_v56 = vpop.f32.mrb[24].mxu1  ;;  %v11189_v40 = vpack.c.bf16 %v10378_v29, %v10378_v29  ;;  %v10379_v34 = vmax.f32 %v10315_v57, 0.0  ;;  %v8805_v29 = vld [vmem:[#allocation3 + $0x1f8] sm:$0xff] }
 0x3ce   :  { %v9985_v39 = vld [vmem:[#allocation3 + $0x1b0] sm:$0xff]  ;;  %v8864_v6 = vadd.f32 %v12026_v56, %v8800_v18  ;;  %v8711_v10 = vpop.f32.mrb[25].mxu1  ;;  %v11187_v36 = vpack.c.bf16 %v10376_v19, %v10376_v19  ;;  %v10377_v42 = vmax.f32 %v10313_v9, 0.0 }
 0x3cf   :  { %v9983_v60 = vld [vmem:[#allocation3 + $0x1a0] sm:$0xff]  ;;  %v8862_v41 = vadd.f32 %v8798_v11, %v8711_v10  ;;  %v12027_v55 = vpop.f32.mrb[26].mxu1  ;;  %10699 = vst.msk [vmem:[%s15295_s4 + $0xb8] sm:$0xf] %vm10652_vm8, %v11189_v40  ;;  %v11190_v47 = vpack.c.bf16 %v10379_v34, %v10379_v34 }
 0x3d0   :  { %v12088_v32 = vpop.f32.mrb[20].mxu0  ;;  %v10176_v63 = vld [vmem:[#allocation3 + $0x190] sm:$0xff]  ;;  %8928 = vst.msk [vmem:[#allocation3 + $0x1d0] sm:$0xff] %vm1481_vm7, %v8864_v6  ;;  %v9986_v59 = vld [vmem:[#allocation3 + $0x1b8] sm:$0xff]  ;;  %v8865_v62 = vadd.f32 %v12027_v55, %v8801_v5  ;;  %v8714_v37 = vpop.f32.mrb[27].mxu1  ;;  %v11188_v12 = vpack.c.bf16 %v10377_v42, %v10377_v42 }
 0x3d1   :  { %v10049_v17 = vadd.f32 %v12088_v32, %v9985_v39  ;;  %v9884_v14 = vpop.f32.mrb[21].mxu0  ;;  %10697 = vst.msk [vmem:[%s15295_s4 + $0xb0] sm:$0xf] %vm10652_vm8, %v11187_v36  ;;  %v10247_v54 = vmul.f32 %v15065_v45, %v10176_v63  ;;  %v8863_v1 = vadd.f32 %v8799_v24, %v8714_v37  ;;  %10700 = vst.msk [vmem:[%s15295_s4 + $0xbc] sm:$0xf] %vm10652_vm8, %v11190_v47  ;;  %v8803_v39 = vld [vmem:[#allocation3 + $0x1e8] sm:$0xff] }
 0x3d2   :  { %v10174_v61 = vld [vmem:[#allocation3 + $0x180] sm:$0xff]  ;;  %v10047_v44 = vadd.f32 %v9983_v60, %v9884_v14  ;;  %8926 = vst.msk [vmem:[#allocation3 + $0x1c0] sm:$0xff] %vm1481_vm7, %v8862_v41  ;;  %v12089_v49 = vpop.f32.mrb[22].mxu0  ;;  %v9984_v4 = vld [vmem:[#allocation3 + $0x1a8] sm:$0xff]  ;;  %8929 = vst.msk [vmem:[#allocation3 + $0x1d8] sm:$0xff] %vm1481_vm7, %v8865_v62 }
 0x3d3   :  { %v10245_v13 = vmul.f32 %v15065_v45, %v10174_v61  ;;  %v10177_v35 = vld [vmem:[#allocation3 + $0x198] sm:$0xff]  ;;  %10113 = vst.msk [vmem:[#allocation3 + $0x1b0] sm:$0xff] %vm1481_vm7, %v10049_v17  ;;  %v10050_v23 = vadd.f32 %v12089_v49, %v9986_v59  ;;  %v9887_v22 = vpop.f32.mrb[23].mxu0  ;;  %v10318_v0 = vadd.f32 %v15083_v8, %v10247_v54  ;;  %v10175_v25 = vld [vmem:[#allocation3 + $0x188] sm:$0xff]  ;;  %8927 = vst.msk [vmem:[#allocation3 + $0x1c8] sm:$0xff] %vm1481_vm7, %v8863_v1 }
 0x3d4   :  { %10698 = vst.msk [vmem:[%s15295_s4 + $0xb4] sm:$0xf] %vm10652_vm8, %v11188_v12  ;;  %v10248_v50 = vmul.f32 %v15065_v45, %v10177_v35  ;;  %v10048_v38 = vadd.f32 %v9984_v4, %v9887_v22  ;;  %v10246_v2 = vmul.f32 %v15065_v45, %v10175_v25 }
 0x3d5   :  { %10111 = vst.msk [vmem:[#allocation3 + $0x1a0] sm:$0xff] %vm1481_vm7, %v10047_v44  ;;  %v10316_v46 = vadd.f32 %v15083_v8, %v10245_v13  ;;  %10114 = vst.msk [vmem:[#allocation3 + $0x1b8] sm:$0xff] %vm1481_vm7, %v10050_v23  ;;  %v10382_v31 = vmax.f32 %v10318_v0, 0.0 }
 0x3d6   :  { %v10319_v33 = vadd.f32 %v15083_v8, %v10248_v50  ;;  %10112 = vst.msk [vmem:[#allocation3 + $0x1a8] sm:$0xff] %vm1481_vm7, %v10048_v38  ;;  %v10317_v53 = vadd.f32 %v15083_v8, %v10246_v2 }
 0x3d7   :  { %v10380_v20 = vmax.f32 %v10316_v46, 0.0  ;;  %v11193_v30 = vpack.c.bf16 %v10382_v31, %v10382_v31  ;;  %v9989_v48 = vld [vmem:[#allocation3 + $0x1d0] sm:$0xff] }
 0x3d8   :  { %v10383_v16 = vmax.f32 %v10319_v33, 0.0  ;;  %v10381_v7 = vmax.f32 %v10317_v53, 0.0 }
 0x3d9   :  { %v12030_v3 = vpop.f32.mrb[28].mxu1  ;;  %v11191_v43 = vpack.c.bf16 %v10380_v20, %v10380_v20  ;;  %v9987_v26 = vld [vmem:[#allocation3 + $0x1c0] sm:$0xff]  ;;  %10703 = vst.msk [vmem:[%s15295_s4 + $0xc8] sm:$0xf] %vm10652_vm8, %v11193_v30  ;;  %v9990_v18 = vld [vmem:[#allocation3 + $0x1d8] sm:$0xff] }
 0x3da   :  { %v8868_v21 = vadd.f32 %v12030_v3, %v8804_v52  ;;  %v8727_v51 = vpop.f32.mrb[29].mxu1  ;;  %v12092_v28 = vpop.f32.mrb[24].mxu0  ;;  %v11194_v57 = vpack.c.bf16 %v10383_v16, %v10383_v16  ;;  %v10180_v19 = vld [vmem:[#allocation3 + $0x1b0] sm:$0xff]  ;;  %v11192_v6 = vpack.c.bf16 %v10381_v7, %v10381_v7  ;;  %v9988_v32 = vld [vmem:[#allocation3 + $0x1c8] sm:$0xff] }
 0x3db   :  { %v8866_v58 = vadd.f32 %v8802_v15, %v8727_v51  ;;  %v12031_v27 = vpop.f32.mrb[30].mxu1  ;;  %v10053_v9 = vadd.f32 %v12092_v28, %v9989_v48  ;;  %v9900_v56 = vpop.f32.mrb[25].mxu0  ;;  %10701 = vst.msk [vmem:[%s15295_s4 + $0xc0] sm:$0xf] %vm10652_vm8, %v11191_v43  ;;  %v10251_v10 = vmul.f32 %v15065_v45, %v10180_v19 }
 0x3dc   :  { %8932 = vst.msk [vmem:[#allocation3 + $0x1f0] sm:$0xff] %vm1481_vm7, %v8868_v21  ;;  %v8869_v40 = vadd.f32 %v12031_v27, %v8805_v29  ;;  %v8730_v34 = vpop.f32.mrb[31].mxu1  ;;  %v10178_v11 = vld [vmem:[#allocation3 + $0x1a0] sm:$0xff]  ;;  %v10051_v36 = vadd.f32 %v9987_v26, %v9900_v56  ;;  %v12093_v42 = vpop.f32.mrb[26].mxu0  ;;  %v10181_v55 = vld [vmem:[#allocation3 + $0x1b8] sm:$0xff] }
 0x3dd   :  { %8930 = vst.msk [vmem:[#allocation3 + $0x1e0] sm:$0xff] %vm1481_vm7, %v8866_v58  ;;  %v8867_v60 = vadd.f32 %v8803_v39, %v8730_v34  ;;  %v10249_v41 = vmul.f32 %v15065_v45, %v10178_v11  ;;  %10117 = vst.msk [vmem:[#allocation3 + $0x1d0] sm:$0xff] %vm1481_vm7, %v10053_v9  ;;  %v10054_v5 = vadd.f32 %v12093_v42, %v9990_v18  ;;  %v9903_v47 = vpop.f32.mrb[27].mxu0  ;;  %v10179_v14 = vld [vmem:[#allocation3 + $0x1a8] sm:$0xff] }
 0x3de   :  { %10704 = vst.msk [vmem:[%s15295_s4 + $0xcc] sm:$0xf] %vm10652_vm8, %v11194_v57  ;;  %10702 = vst.msk [vmem:[%s15295_s4 + $0xc4] sm:$0xf] %vm10652_vm8, %v11192_v6  ;;  %v10322_v63 = vadd.f32 %v15083_v8, %v10251_v10  ;;  %v10252_v17 = vmul.f32 %v15065_v45, %v10181_v55  ;;  %v10052_v59 = vadd.f32 %v9988_v32, %v9903_v47 }
 0x3df   :  { %8933 = vst.msk [vmem:[#allocation3 + $0x1f8] sm:$0xff] %vm1481_vm7, %v8869_v40  ;;  %10115 = vst.msk [vmem:[#allocation3 + $0x1c0] sm:$0xff] %vm1481_vm7, %v10051_v36  ;;  %v10320_v62 = vadd.f32 %v15083_v8, %v10249_v41  ;;  %v10250_v37 = vmul.f32 %v15065_v45, %v10179_v14 }
 0x3e0   :  { %8931 = vst.msk [vmem:[#allocation3 + $0x1e8] sm:$0xff] %vm1481_vm7, %v8867_v60  ;;  %10118 = vst.msk [vmem:[#allocation3 + $0x1d8] sm:$0xff] %vm1481_vm7, %v10054_v5  ;;  %v10386_v24 = vmax.f32 %v10322_v63, 0.0  ;;  %v10323_v12 = vadd.f32 %v15083_v8, %v10252_v17 }
 0x3e1   :  { %10116 = vst.msk [vmem:[#allocation3 + $0x1c8] sm:$0xff] %vm1481_vm7, %v10052_v59  ;;  %v10384_v54 = vmax.f32 %v10320_v62, 0.0  ;;  %v10321_v61 = vadd.f32 %v15083_v8, %v10250_v37 }
 0x3e2   :  { %v11197_v44 = vpack.c.bf16 %v10386_v24, %v10386_v24  ;;  %v10387_v49 = vmax.f32 %v10323_v12, 0.0 }
 0x3e3   :  { %v12096_v4 = vpop.f32.mrb[28].mxu0  ;;  %v9993_v1 = vld [vmem:[#allocation3 + $0x1f0] sm:$0xff]  ;;  %v11195_v13 = vpack.c.bf16 %v10384_v54, %v10384_v54  ;;  %v10385_v35 = vmax.f32 %v10321_v61, 0.0 }
 0x3e4   :  { %v10057_v23 = vadd.f32 %v12096_v4, %v9993_v1  ;;  %v9916_v22 = vpop.f32.mrb[29].mxu0  ;;  %v9991_v0 = vld [vmem:[#allocation3 + $0x1e0] sm:$0xff]  ;;  %10707 = vst.msk [vmem:[%s15295_s4 + $0xd8] sm:$0xf] %vm10652_vm8, %v11197_v44  ;;  %v11198_v50 = vpack.c.bf16 %v10387_v49, %v10387_v49  ;;  %v10184_v25 = vld [vmem:[#allocation3 + $0x1d0] sm:$0xff] }
 0x3e5   :  { %v10055_v38 = vadd.f32 %v9991_v0, %v9916_v22  ;;  %v12097_v46 = vpop.f32.mrb[30].mxu0  ;;  %10705 = vst.msk [vmem:[%s15295_s4 + $0xd0] sm:$0xf] %vm10652_vm8, %v11195_v13  ;;  %v11196_v31 = vpack.c.bf16 %v10385_v35, %v10385_v35  ;;  %v10255_v33 = vmul.f32 %v15065_v45, %v10184_v25 }
 0x3e6   :  { %v9994_v2 = vld [vmem:[#allocation3 + $0x1f8] sm:$0xff]  ;;  %v10182_v20 = vld [vmem:[#allocation3 + $0x1c0] sm:$0xff]  ;;  %10121 = vst.msk [vmem:[#allocation3 + $0x1f0] sm:$0xff] %vm1481_vm7, %v10057_v23  ;;  %v9919_v3 = vpop.f32.mrb[31].mxu0 }
 0x3e7   :  { %v10058_v53 = vadd.f32 %v12097_v46, %v9994_v2  ;;  %v9992_v52 = vld [vmem:[#allocation3 + $0x1e8] sm:$0xff]  ;;  %10708 = vst.msk [vmem:[%s15295_s4 + $0xdc] sm:$0xf] %vm10652_vm8, %v11198_v50  ;;  %v10253_v30 = vmul.f32 %v15065_v45, %v10182_v20  ;;  %v10185_v16 = vld [vmem:[#allocation3 + $0x1d8] sm:$0xff]  ;;  %10706 = vst.msk [vmem:[%s15295_s4 + $0xd4] sm:$0xf] %vm10652_vm8, %v11196_v31  ;;  %v10326_v21 = vadd.f32 %v15083_v8, %v10255_v33 }
 0x3e8   :  { %10119 = vst.msk [vmem:[#allocation3 + $0x1e0] sm:$0xff] %vm1481_vm7, %v10055_v38  ;;  %v10056_v48 = vadd.f32 %v9992_v52, %v9919_v3  ;;  %v10256_v51 = vmul.f32 %v15065_v45, %v10185_v16  ;;  %v10183_v15 = vld [vmem:[#allocation3 + $0x1c8] sm:$0xff] }
 0x3e9   :  { %10122 = vst.msk [vmem:[#allocation3 + $0x1f8] sm:$0xff] %vm1481_vm7, %v10058_v53  ;;  %v10324_v43 = vadd.f32 %v15083_v8, %v10253_v30  ;;  %v10254_v7 = vmul.f32 %v15065_v45, %v10183_v15  ;;  %v10390_v28 = vmax.f32 %v10326_v21, 0.0 }
 0x3ea   :  { %10120 = vst.msk [vmem:[#allocation3 + $0x1e8] sm:$0xff] %vm1481_vm7, %v10056_v48  ;;  %v10327_v26 = vadd.f32 %v15083_v8, %v10256_v51 }
 0x3eb   :  { %v10388_v58 = vmax.f32 %v10324_v43, 0.0  ;;  %v10325_v27 = vadd.f32 %v15083_v8, %v10254_v7  ;;  %v11201_v29 = vpack.c.bf16 %v10390_v28, %v10390_v28 }
 0x3ec   :  { %v10391_v57 = vmax.f32 %v10327_v26, 0.0 }
 0x3ed   :  { %v11199_v19 = vpack.c.bf16 %v10388_v58, %v10388_v58  ;;  %v10389_v9 = vmax.f32 %v10325_v27, 0.0  ;;  %v10188_v56 = vld [vmem:[#allocation3 + $0x1f0] sm:$0xff]  ;;  %10711 = vst.msk [vmem:[%s15295_s4 + $0xe8] sm:$0xf] %vm10652_vm8, %v11201_v29 }
 0x3ee   :  { %v11202_v18 = vpack.c.bf16 %v10391_v57, %v10391_v57  ;;  %v10259_v40 = vmul.f32 %v15065_v45, %v10188_v56 }
 0x3ef   :  { %v10186_v34 = vld [vmem:[#allocation3 + $0x1e0] sm:$0xff]  ;;  %10709 = vst.msk [vmem:[%s15295_s4 + $0xe0] sm:$0xf] %vm10652_vm8, %v11199_v19  ;;  %v11200_v39 = vpack.c.bf16 %v10389_v9, %v10389_v9 }
 0x3f0   :  { %v10257_v6 = vmul.f32 %v15065_v45, %v10186_v34  ;;  %v10189_v10 = vld [vmem:[#allocation3 + $0x1f8] sm:$0xff]  ;;  %10712 = vst.msk [vmem:[%s15295_s4 + $0xec] sm:$0xf] %vm10652_vm8, %v11202_v18  ;;  %v10330_v11 = vadd.f32 %v15083_v8, %v10259_v40 }
 0x3f1   :  { %v10260_v36 = vmul.f32 %v15065_v45, %v10189_v10  ;;  %v10187_v42 = vld [vmem:[#allocation3 + $0x1e8] sm:$0xff]  ;;  %10710 = vst.msk [vmem:[%s15295_s4 + $0xe4] sm:$0xf] %vm10652_vm8, %v11200_v39 }
 0x3f2   :  { %v10328_v32 = vadd.f32 %v15083_v8, %v10257_v6  ;;  %v10258_v60 = vmul.f32 %v15065_v45, %v10187_v42  ;;  %v10394_v41 = vmax.f32 %v10330_v11, 0.0 }
 0x3f3   :  { %v10331_v55 = vadd.f32 %v15083_v8, %v10260_v36 }
 0x3f4   :  { %v10392_v5 = vmax.f32 %v10328_v32, 0.0  ;;  %v10329_v47 = vadd.f32 %v15083_v8, %v10258_v60  ;;  %v11205_v63 = vpack.c.bf16 %v10394_v41, %v10394_v41 }
 0x3f5   :  { %v10395_v17 = vmax.f32 %v10331_v55, 0.0 }
 0x3f6   :  { %v11203_v14 = vpack.c.bf16 %v10392_v5, %v10392_v5  ;;  %v10393_v59 = vmax.f32 %v10329_v47, 0.0  ;;  %10715 = vst.msk [vmem:[%s15295_s4 + $0xf8] sm:$0xf] %vm10652_vm8, %v11205_v63 }
 0x3f7   :  { %v11206_v62 = vpack.c.bf16 %v10395_v17, %v10395_v17 }
 0x3f8   :  { %10713 = vst.msk [vmem:[%s15295_s4 + $0xf0] sm:$0xf] %vm10652_vm8, %v11203_v14  ;;  %v11204_v45 = vpack.c.bf16 %v10393_v59, %v10393_v59 }
 0x3f9   :  { %10716 = vst.msk [vmem:[%s15295_s4 + $0xfc] sm:$0xf] %vm10652_vm8, %v11206_v62 }
 0x3fa   :  { %10714 = vst.msk [vmem:[%s15295_s4 + $0xf4] sm:$0xf] %vm10652_vm8, %v11204_v45 }

</bundles_post_ra>
